<compile_context>
chip_gen: v7x
topology: tpu7x:2x2x1
jax: 0.10.0
libtpu: 0.0.40
codegen_flags: <defaults>
</compile_context>

<pallas_src>
import jax
import jax.numpy as jnp
from jax.experimental import pallas as pl
from jax.experimental.pallas import tpu as pltpu


def _round_up(x, m):
    return (x + m - 1) // m * m


# ---------------------------------------------------------------------------
# Kernel 1: fused conv1+pool -> conv2+pool (one batch tile per grid step)
# ---------------------------------------------------------------------------
def _convs_kernel(x4_ref, g1_ref, b1_ref, g2_ref, b2_ref, o_ref, h1p_ref):
    # x4_ref : [BT, 4, 9, 32]  bf16, x4[b, m, t, j] = zero-h-padded input row 4t+m
    # g1_ref : [3, 32, 1024]   bf16 banded conv1 weight, cols = p*512 + wo1*32 + c
    # b1_ref : [1, 512]        f32  conv1 bias tiled over wo1
    # g2_ref : [3, 512, 1024]  bf16 banded conv2 weight, rows = wo1*32 + c,
    #                               cols = p2*512 + wo2*64 + c2
    # b2_ref : [1, 512]        f32  conv2 bias tiled over wo2
    # o_ref  : [BT, 8, 512]    bf16 pooled conv2 output, lanes = wo2*64 + c2
    # h1p_ref: [BT, 2, 9, 512] bf16 scratch; h1p[b, a, i, :] = pooled conv1 row
    #                               (2*i + a - 1); rows -1 / 16 stay zero (halo).
    bt = x4_ref.shape[0]

    # ---- conv1: 3 accumulating matmuls (one per h-tap dh), K=32, N=1024 ----
    # LHS rows stacked over the 4 (output-row-parity g, pool-parity q) combos so
    # the banded weight is loaded once per dh.
    acc1 = jnp.zeros((4 * bt * 8, 1024), jnp.float32)
    for dh in range(3):
        parts = []
        for g in (0, 1):
            for q in (0, 1):
                m = 2 * g + q + dh                      # padded-input row = 4t + m
                sl = x4_ref[:, m % 4:m % 4 + 1, m // 4:m // 4 + 8, :]
                parts.append(sl.reshape(bt * 8, 32))
        lhs = jnp.concatenate(parts, axis=0)            # [4*bt*8, 32]
        acc1 = acc1 + jnp.dot(lhs, g1_ref[dh],
                              preferred_element_type=jnp.float32)
    acc1 = acc1.reshape(4, bt, 8, 1024)

    b1 = b1_ref[...]

    def _finish1(a):          # max over w-parity lane halves, bias, ReLU -> bf16
        a = jnp.maximum(a[:, :, :512], a[:, :, 512:])
        a = jnp.maximum(a + b1, 0.0)
        return a.astype(jnp.bfloat16).reshape(bt, 1, 8, 512)

    h_even = _finish1(jnp.maximum(acc1[0], acc1[1]))    # pooled rows ho1 = 2t
    h_odd = _finish1(jnp.maximum(acc1[2], acc1[3]))     # pooled rows ho1 = 2t+1

    # Write pooled conv1 into the h-parity-split, h-padded VMEM scratch.
    zrow = jnp.zeros((bt, 1, 1, 512), jnp.bfloat16)
    h1p_ref[:, 0:1, 0:1, :] = zrow                      # halo row -1
    h1p_ref[:, 1:2, 8:9, :] = zrow                      # halo row 16
    h1p_ref[:, 1:2, 0:8, :] = h_even                    # rows 2t   -> (a=1, i=t)
    h1p_ref[:, 0:1, 1:9, :] = h_odd                     # rows 2t+1 -> (a=0, i=t+1)

    # ---- conv2: 6 accumulating matmuls (dh2 x q2), K=512, N=1024 ----
    acc2 = [jnp.zeros((bt * 8, 1024), jnp.float32) for _ in range(2)]
    for dh2 in range(3):
        g2w = g2_ref[dh2]                               # [512, 1024]
        for q2 in (0, 1):
            e = q2 + dh2                                # h1 row = 2*ho2 + e - 1
            lhs = h1p_ref[:, e % 2:e % 2 + 1, e // 2:e // 2 + 8, :]
            lhs = lhs.reshape(bt * 8, 512)
            acc2[q2] = acc2[q2] + jnp.dot(lhs, g2w,
                                          preferred_element_type=jnp.float32)

    p2 = jnp.maximum(acc2[0], acc2[1])                  # max over h-parity q2
    p2 = jnp.maximum(p2[:, :512], p2[:, 512:])          # max over w-parity p2
    p2 = jnp.maximum(p2 + b2_ref[...], 0.0)
    o_ref[...] = p2.reshape(bt, 8, 512).astype(o_ref.dtype)


def conv_stack(x_nchw, g1, b1t, g2, b2t, *, block_b=8):
    """[B, 1, 32, 32] -> pooled conv2 activations [B, 8, 512] (bf16, NHWC-flat rows)."""
    B = x_nchw.shape[0]
    bt = min(block_b, B)
    Bp = _round_up(B, bt)
    x = x_nchw.reshape(B, 32, 32)
    if Bp != B:
        x = jnp.pad(x, ((0, Bp - B), (0, 0), (0, 0)))
    # 1 zero row on top (h = -1), 3 on the bottom (h = 32 pad + 2 filler rows
    # so the h axis splits into groups of 4 for the parity layout).
    xp = jnp.pad(x, ((0, 0), (1, 3), (0, 0)))
    x4 = xp.reshape(Bp, 9, 4, 32).transpose(0, 2, 1, 3).astype(jnp.bfloat16)

    out = pl.pallas_call(
        _convs_kernel,
        out_shape=jax.ShapeDtypeStruct((Bp, 8, 512), jnp.bfloat16),
        grid=(Bp // bt,),
        in_specs=[
            pl.BlockSpec((bt, 4, 9, 32), lambda i: (i, 0, 0, 0)),
            pl.BlockSpec((3, 32, 1024), lambda i: (0, 0, 0)),
            pl.BlockSpec((1, 512), lambda i: (0, 0)),
            pl.BlockSpec((3, 512, 1024), lambda i: (0, 0, 0)),
            pl.BlockSpec((1, 512), lambda i: (0, 0)),
        ],
        out_specs=pl.BlockSpec((bt, 8, 512), lambda i: (i, 0, 0)),
        scratch_shapes=[pltpu.VMEM((bt, 2, 9, 512), jnp.bfloat16)],
        compiler_params=pltpu.CompilerParams(
            dimension_semantics=("parallel",),
            vmem_limit_bytes=32 * 1024 * 1024),
    )(x4, g1, b1t, g2, b2t)
    return out[:B]


# ---------------------------------------------------------------------------
# Kernel 2: fc1 + bias + ReLU + fc2 + bias (batch-tiled, weights VMEM-resident)
# ---------------------------------------------------------------------------
def _fc_kernel(x_ref, w1_ref, b1_ref, w2_ref, b2_ref, o_ref):
    h = jnp.dot(x_ref[...], w1_ref[...], preferred_element_type=jnp.float32)
    h = jnp.maximum(h + b1_ref[...], 0.0).astype(jnp.bfloat16)
    o = jnp.dot(h, w2_ref[...], preferred_element_type=jnp.float32)
    o_ref[...] = (o + b2_ref[...]).astype(o_ref.dtype)


def fc_fused(flat, w1, b1, w2, b2):
    B, K = flat.shape
    bfc = B if B <= 512 else 256
    Bp = _round_up(B, bfc)
    if Bp != B:
        flat = jnp.pad(flat, ((0, Bp - B), (0, 0)))
    n1, n2 = w1.shape[1], w2.shape[1]
    out = pl.pallas_call(
        _fc_kernel,
        out_shape=jax.ShapeDtypeStruct((Bp, n2), jnp.float32),
        grid=(Bp // bfc,),
        in_specs=[
            pl.BlockSpec((bfc, K), lambda i: (i, 0)),
            pl.BlockSpec((K, n1), lambda i: (0, 0)),
            pl.BlockSpec((1, n1), lambda i: (0, 0)),
            pl.BlockSpec((n1, n2), lambda i: (0, 0)),
            pl.BlockSpec((1, n2), lambda i: (0, 0)),
        ],
        out_specs=pl.BlockSpec((bfc, n2), lambda i: (i, 0)),
        compiler_params=pltpu.CompilerParams(
            dimension_semantics=("parallel",),
            vmem_limit_bytes=32 * 1024 * 1024),
    )(flat, w1, b1, w2, b2)
    return out[:B]


# ---------------------------------------------------------------------------
# Parameters (torch layout) and one-time host-side re-layout.
# ---------------------------------------------------------------------------
def init_torch_params(key):
    ks = jax.random.split(key, 8)
    s = 0.05
    return {
        "conv1_w": s * jax.random.normal(ks[0], (32, 1, 3, 3), jnp.float32),
        "conv1_b": s * jax.random.normal(ks[1], (32,), jnp.float32),
        "conv2_w": s * jax.random.normal(ks[2], (64, 32, 3, 3), jnp.float32),
        "conv2_b": s * jax.random.normal(ks[3], (64,), jnp.float32),
        "fc1_w": s * jax.random.normal(ks[4], (128, 64 * 8 * 8), jnp.float32),
        "fc1_b": s * jax.random.normal(ks[5], (128,), jnp.float32),
        "fc2_w": s * jax.random.normal(ks[6], (10, 128), jnp.float32),
        "fc2_b": s * jax.random.normal(ks[7], (10,), jnp.float32),
    }


def _banded_conv1_weight(w):
    """[32,1,3,3] -> G1[dh, j, p*512 + wo*32 + c] = w1[c,0,dh,dw], dw = j-2wo-p+1."""
    wt = jnp.transpose(w[:, 0], (1, 2, 0))              # [dh, dw, c]
    g = jnp.zeros((3, 32, 2, 16, 32), jnp.float32)
    for p in range(2):
        for wo in range(16):
            for dw in range(3):
                j = 2 * wo + p - 1 + dw
                if 0 <= j < 32:
                    g = g.at[:, j, p, wo, :].set(wt[:, dw, :])
    return g.reshape(3, 32, 1024).astype(jnp.bfloat16)


def _banded_conv2_weight(w):
    """[64,32,3,3] -> G2[dh, wo1*32+c, p*512 + wo2*64 + c2] = w2[c2,c,dh,dw]."""
    wt = jnp.transpose(w, (2, 3, 1, 0))                 # [dh, dw, cin, cout]
    g = jnp.zeros((3, 16, 32, 2, 8, 64), jnp.float32)
    for p in range(2):
        for wo2 in range(8):
            for dw in range(3):
                wo1 = 2 * wo2 + p - 1 + dw
                if 0 <= wo1 < 16:
                    g = g.at[:, wo1, :, p, wo2, :].set(wt[:, dw, :, :])
    return g.reshape(3, 512, 1024).astype(jnp.bfloat16)


def prepare_params(p):
    """One-time weight re-layout so the jitted forward has no transposes."""
    # fc1: torch flattens NCHW (c*64 + h*8 + w); our activations flatten NHWC
    # (h*512 + w*64 + c), so permute the K rows accordingly.
    fc1_wk = jnp.transpose(p["fc1_w"].reshape(128, 64, 8, 8),
                           (2, 3, 1, 0)).reshape(64 * 8 * 8, 128)
    w2p = jnp.zeros((128, 128), jnp.float32).at[:, :10].set(jnp.transpose(p["fc2_w"]))
    b2p = jnp.zeros((1, 128), jnp.float32).at[:, :10].set(p["fc2_b"].reshape(1, 10))
    return {
        "conv1_g": _banded_conv1_weight(p["conv1_w"]),
        "conv1_b": jnp.tile(p["conv1_b"].reshape(1, 32), (1, 16)),   # [1, 512]
        "conv2_g": _banded_conv2_weight(p["conv2_w"]),
        "conv2_b": jnp.tile(p["conv2_b"].reshape(1, 64), (1, 8)),    # [1, 512]
        "fc1_wk": fc1_wk.astype(jnp.bfloat16),
        "fc1_b": p["fc1_b"].reshape(1, 128),
        "fc2_wk": w2p.astype(jnp.bfloat16),
        "fc2_b": b2p,
    }


# ---------------------------------------------------------------------------
# Forward pass (matches torch SimpleCNN.forward for NCHW input [B, 1, 32, 32]).
# ---------------------------------------------------------------------------
def simple_cnn_forward(params, x_nchw):
    B = x_nchw.shape[0]
    h2 = conv_stack(x_nchw, params["conv1_g"], params["conv1_b"],
                    params["conv2_g"], params["conv2_b"])   # [B, 8, 512] bf16
    flat = h2.reshape(B, 64 * 8 * 8)                        # free view, NHWC flatten
    logits = fc_fused(flat, params["fc1_wk"], params["fc1_b"],
                      params["fc2_wk"], params["fc2_b"])    # [B, 128] f32
    return logits[:, :10]


# ---------------------------------------------------------------------------
# Pure-JAX f32 reference (torch layout / semantics) for a tolerance check.
# ---------------------------------------------------------------------------
def _reference_forward(p, x):
    y = jax.lax.conv_general_dilated(x, p["conv1_w"], (1, 1), ((1, 1), (1, 1)),
                                     dimension_numbers=("NCHW", "OIHW", "NCHW"))
    y = jax.nn.relu(y + p["conv1_b"].reshape(1, 32, 1, 1))
    y = jax.lax.reduce_window(y, -jnp.inf, jax.lax.max,
                              (1, 1, 2, 2), (1, 1, 2, 2), "VALID")
    y = jax.lax.conv_general_dilated(y, p["conv2_w"], (1, 1), ((1, 1), (1, 1)),
                                     dimension_numbers=("NCHW", "OIHW", "NCHW"))
    y = jax.nn.relu(y + p["conv2_b"].reshape(1, 64, 1, 1))
    y = jax.lax.reduce_window(y, -jnp.inf, jax.lax.max,
                              (1, 1, 2, 2), (1, 1, 2, 2), "VALID")
    y = y.reshape(x.shape[0], 64 * 8 * 8)
    y = jax.nn.relu(y @ p["fc1_w"].T + p["fc1_b"])
    return y @ p["fc2_w"].T + p["fc2_b"]


if __name__ == "__main__":
    key = jax.random.PRNGKey(0)
    pkey, xkey = jax.random.split(key)
    raw = init_torch_params(pkey)
    params = prepare_params(raw)
    # batch=2, 1 channel, 32x32 spatial (implied by fc1's 64*8*8 input size)
    x = jax.random.normal(xkey, (2, 1, 32, 32), jnp.float32)

    fwd = jax.jit(simple_cnn_forward)
    logits = fwd(params, x)
    jax.block_until_ready(logits)
    assert logits.shape == (2, 10) and logits.dtype == jnp.float32

    ref = _reference_forward(raw, x)
    err = float(jnp.max(jnp.abs(logits - ref)))
    assert err < 5e-2, f"mismatch vs reference: max abs err {err}"
    print("KERNEL_OK")
</pallas_src>

<mosaic_0001>
module attributes {stable_mosaic.version = 11 : i64} {
  func.func @_convs_kernel(%arg0: i32, %arg1: memref<2x4x9x32xbf16, #tpu.memory_space<vmem>>, %arg2: memref<3x32x1024xbf16, #tpu.memory_space<vmem>>, %arg3: memref<1x512xf32, #tpu.memory_space<vmem>>, %arg4: memref<3x512x1024xbf16, #tpu.memory_space<vmem>>, %arg5: memref<1x512xf32, #tpu.memory_space<vmem>>, %arg6: memref<2x8x512xbf16, #tpu.memory_space<vmem>>, %arg7: memref<2x2x9x512xbf16, #tpu.memory_space<vmem>>) attributes {dimension_semantics = [#tpu.dimension_semantics<parallel>], iteration_bounds = array<i64: 1>, scalar_prefetch = 0 : i64, scratch_operands = 1 : i64, tpu.core_type = #tpu.core_type<tc>, window_params = [{transform_indices = @transform_0, window_bounds = array<i64: 2, 4, 9, 32>}, {pipeline_mode = #tpu.pipeline_mode<synchronous>, transform_indices = @transform_1, window_bounds = array<i64: 3, 32, 1024>}, {pipeline_mode = #tpu.pipeline_mode<synchronous>, transform_indices = @transform_2, window_bounds = array<i64: 1, 512>}, {pipeline_mode = #tpu.pipeline_mode<synchronous>, transform_indices = @transform_3, window_bounds = array<i64: 3, 512, 1024>}, {pipeline_mode = #tpu.pipeline_mode<synchronous>, transform_indices = @transform_4, window_bounds = array<i64: 1, 512>}, {transform_indices = @transform_5, window_bounds = array<i64: 2, 8, 512>}]} {
    %cst = arith.constant 0.000000e+00 : f32
    %0 = vector.broadcast %cst : f32 to vector<64x1024xf32>
    %c0 = arith.constant 0 : index
    %c0_0 = arith.constant 0 : index
    %c0_1 = arith.constant 0 : index
    %c0_2 = arith.constant 0 : index
    %1 = vector.load %arg1[%c0, %c0_0, %c0_1, %c0_2] : memref<2x4x9x32xbf16, #tpu.memory_space<vmem>>, vector<2x1x8x32xbf16>
    %2 = vector.shape_cast %1 : vector<2x1x8x32xbf16> to vector<16x32xbf16>
    %c0_3 = arith.constant 0 : index
    %c1 = arith.constant 1 : index
    %c0_4 = arith.constant 0 : index
    %c0_5 = arith.constant 0 : index
    %3 = vector.load %arg1[%c0_3, %c1, %c0_4, %c0_5] : memref<2x4x9x32xbf16, #tpu.memory_space<vmem>>, vector<2x1x8x32xbf16>
    %4 = vector.shape_cast %3 : vector<2x1x8x32xbf16> to vector<16x32xbf16>
    %c0_6 = arith.constant 0 : index
    %c2 = arith.constant 2 : index
    %c0_7 = arith.constant 0 : index
    %c0_8 = arith.constant 0 : index
    %5 = vector.load %arg1[%c0_6, %c2, %c0_7, %c0_8] : memref<2x4x9x32xbf16, #tpu.memory_space<vmem>>, vector<2x1x8x32xbf16>
    %6 = vector.shape_cast %5 : vector<2x1x8x32xbf16> to vector<16x32xbf16>
    %c0_9 = arith.constant 0 : index
    %c3 = arith.constant 3 : index
    %c0_10 = arith.constant 0 : index
    %c0_11 = arith.constant 0 : index
    %7 = vector.load %arg1[%c0_9, %c3, %c0_10, %c0_11] : memref<2x4x9x32xbf16, #tpu.memory_space<vmem>>, vector<2x1x8x32xbf16>
    %8 = vector.shape_cast %7 : vector<2x1x8x32xbf16> to vector<16x32xbf16>
    %9 = tpu.concatenate %2, %4, %6, %8 in 0 : vector<16x32xbf16>, vector<16x32xbf16>, vector<16x32xbf16>, vector<16x32xbf16> -> vector<64x32xbf16>
    %c0_12 = arith.constant 0 : index
    %c0_13 = arith.constant 0 : index
    %c0_14 = arith.constant 0 : index
    %10 = vector.load %arg2[%c0_12, %c0_13, %c0_14] : memref<3x32x1024xbf16, #tpu.memory_space<vmem>>, vector<1x32x1024xbf16>
    %11 = vector.shape_cast %10 : vector<1x32x1024xbf16> to vector<32x1024xbf16>
    %cst_15 = arith.constant dense<0.000000e+00> : vector<64x1024xf32>
    %12 = tpu.matmul %9, %11, %cst_15 {dimension_numbers = #tpu.dot_dimension_numbers<[1], [0], [0], [1], [0, 0, 1, 1], [], []>} : vector<64x32xbf16>, vector<32x1024xbf16>, vector<64x1024xf32> -> vector<64x1024xf32>
    %13 = arith.addf %0, %12 : vector<64x1024xf32>
    %c0_16 = arith.constant 0 : index
    %c1_17 = arith.constant 1 : index
    %c0_18 = arith.constant 0 : index
    %c0_19 = arith.constant 0 : index
    %14 = vector.load %arg1[%c0_16, %c1_17, %c0_18, %c0_19] : memref<2x4x9x32xbf16, #tpu.memory_space<vmem>>, vector<2x1x8x32xbf16>
    %15 = vector.shape_cast %14 : vector<2x1x8x32xbf16> to vector<16x32xbf16>
    %c0_20 = arith.constant 0 : index
    %c2_21 = arith.constant 2 : index
    %c0_22 = arith.constant 0 : index
    %c0_23 = arith.constant 0 : index
    %16 = vector.load %arg1[%c0_20, %c2_21, %c0_22, %c0_23] : memref<2x4x9x32xbf16, #tpu.memory_space<vmem>>, vector<2x1x8x32xbf16>
    %17 = vector.shape_cast %16 : vector<2x1x8x32xbf16> to vector<16x32xbf16>
    %c0_24 = arith.constant 0 : index
    %c3_25 = arith.constant 3 : index
    %c0_26 = arith.constant 0 : index
    %c0_27 = arith.constant 0 : index
    %18 = vector.load %arg1[%c0_24, %c3_25, %c0_26, %c0_27] : memref<2x4x9x32xbf16, #tpu.memory_space<vmem>>, vector<2x1x8x32xbf16>
    %19 = vector.shape_cast %18 : vector<2x1x8x32xbf16> to vector<16x32xbf16>
    %c0_28 = arith.constant 0 : index
    %c0_29 = arith.constant 0 : index
    %c1_30 = arith.constant 1 : index
    %c0_31 = arith.constant 0 : index
    %20 = vector.load %arg1[%c0_28, %c0_29, %c1_30, %c0_31] : memref<2x4x9x32xbf16, #tpu.memory_space<vmem>>, vector<2x1x8x32xbf16>
    %21 = vector.shape_cast %20 : vector<2x1x8x32xbf16> to vector<16x32xbf16>
    %22 = tpu.concatenate %15, %17, %19, %21 in 0 : vector<16x32xbf16>, vector<16x32xbf16>, vector<16x32xbf16>, vector<16x32xbf16> -> vector<64x32xbf16>
    %c1_32 = arith.constant 1 : index
    %c0_33 = arith.constant 0 : index
    %c0_34 = arith.constant 0 : index
    %23 = vector.load %arg2[%c1_32, %c0_33, %c0_34] : memref<3x32x1024xbf16, #tpu.memory_space<vmem>>, vector<1x32x1024xbf16>
    %24 = vector.shape_cast %23 : vector<1x32x1024xbf16> to vector<32x1024xbf16>
    %cst_35 = arith.constant dense<0.000000e+00> : vector<64x1024xf32>
    %25 = tpu.matmul %22, %24, %cst_35 {dimension_numbers = #tpu.dot_dimension_numbers<[1], [0], [0], [1], [0, 0, 1, 1], [], []>} : vector<64x32xbf16>, vector<32x1024xbf16>, vector<64x1024xf32> -> vector<64x1024xf32>
    %26 = arith.addf %13, %25 : vector<64x1024xf32>
    %c0_36 = arith.constant 0 : index
    %c2_37 = arith.constant 2 : index
    %c0_38 = arith.constant 0 : index
    %c0_39 = arith.constant 0 : index
    %27 = vector.load %arg1[%c0_36, %c2_37, %c0_38, %c0_39] : memref<2x4x9x32xbf16, #tpu.memory_space<vmem>>, vector<2x1x8x32xbf16>
    %28 = vector.shape_cast %27 : vector<2x1x8x32xbf16> to vector<16x32xbf16>
    %c0_40 = arith.constant 0 : index
    %c3_41 = arith.constant 3 : index
    %c0_42 = arith.constant 0 : index
    %c0_43 = arith.constant 0 : index
    %29 = vector.load %arg1[%c0_40, %c3_41, %c0_42, %c0_43] : memref<2x4x9x32xbf16, #tpu.memory_space<vmem>>, vector<2x1x8x32xbf16>
    %30 = vector.shape_cast %29 : vector<2x1x8x32xbf16> to vector<16x32xbf16>
    %c0_44 = arith.constant 0 : index
    %c0_45 = arith.constant 0 : index
    %c1_46 = arith.constant 1 : index
    %c0_47 = arith.constant 0 : index
    %31 = vector.load %arg1[%c0_44, %c0_45, %c1_46, %c0_47] : memref<2x4x9x32xbf16, #tpu.memory_space<vmem>>, vector<2x1x8x32xbf16>
    %32 = vector.shape_cast %31 : vector<2x1x8x32xbf16> to vector<16x32xbf16>
    %c0_48 = arith.constant 0 : index
    %c1_49 = arith.constant 1 : index
    %c1_50 = arith.constant 1 : index
    %c0_51 = arith.constant 0 : index
    %33 = vector.load %arg1[%c0_48, %c1_49, %c1_50, %c0_51] : memref<2x4x9x32xbf16, #tpu.memory_space<vmem>>, vector<2x1x8x32xbf16>
    %34 = vector.shape_cast %33 : vector<2x1x8x32xbf16> to vector<16x32xbf16>
    %35 = tpu.concatenate %28, %30, %32, %34 in 0 : vector<16x32xbf16>, vector<16x32xbf16>, vector<16x32xbf16>, vector<16x32xbf16> -> vector<64x32xbf16>
    %c2_52 = arith.constant 2 : index
    %c0_53 = arith.constant 0 : index
    %c0_54 = arith.constant 0 : index
    %36 = vector.load %arg2[%c2_52, %c0_53, %c0_54] : memref<3x32x1024xbf16, #tpu.memory_space<vmem>>, vector<1x32x1024xbf16>
    %37 = vector.shape_cast %36 : vector<1x32x1024xbf16> to vector<32x1024xbf16>
    %cst_55 = arith.constant dense<0.000000e+00> : vector<64x1024xf32>
    %38 = tpu.matmul %35, %37, %cst_55 {dimension_numbers = #tpu.dot_dimension_numbers<[1], [0], [0], [1], [0, 0, 1, 1], [], []>} : vector<64x32xbf16>, vector<32x1024xbf16>, vector<64x1024xf32> -> vector<64x1024xf32>
    %39 = arith.addf %26, %38 : vector<64x1024xf32>
    %40 = vector.shape_cast %39 : vector<64x1024xf32> to vector<4x2x8x1024xf32>
    %c0_56 = arith.constant 0 : index
    %c0_57 = arith.constant 0 : index
    %41 = vector.load %arg3[%c0_56, %c0_57] : memref<1x512xf32, #tpu.memory_space<vmem>>, vector<1x512xf32>
    %42 = vector.extract_strided_slice %40 {offsets = [0, 0, 0, 0], sizes = [1, 2, 8, 1024], strides = [1, 1, 1, 1]} : vector<4x2x8x1024xf32> to vector<1x2x8x1024xf32>
    %43 = vector.shape_cast %42 : vector<1x2x8x1024xf32> to vector<2x8x1024xf32>
    %44 = vector.extract_strided_slice %40 {offsets = [1, 0, 0, 0], sizes = [1, 2, 8, 1024], strides = [1, 1, 1, 1]} : vector<4x2x8x1024xf32> to vector<1x2x8x1024xf32>
    %45 = vector.shape_cast %44 : vector<1x2x8x1024xf32> to vector<2x8x1024xf32>
    %46 = arith.maximumf %43, %45 : vector<2x8x1024xf32>
    %47 = vector.extract_strided_slice %46 {offsets = [0, 0, 0], sizes = [2, 8, 512], strides = [1, 1, 1]} : vector<2x8x1024xf32> to vector<2x8x512xf32>
    %48 = vector.extract_strided_slice %46 {offsets = [0, 0, 512], sizes = [2, 8, 512], strides = [1, 1, 1]} : vector<2x8x1024xf32> to vector<2x8x512xf32>
    %49 = arith.maximumf %47, %48 : vector<2x8x512xf32>
    %50 = vector.shape_cast %41 : vector<1x512xf32> to vector<1x1x512xf32>
    %51 = vector.broadcast %50 : vector<1x1x512xf32> to vector<2x8x512xf32>
    %52 = arith.addf %49, %51 : vector<2x8x512xf32>
    %cst_58 = arith.constant 0.000000e+00 : f32
    %53 = vector.broadcast %cst_58 : f32 to vector<2x8x512xf32>
    %54 = arith.maximumf %52, %53 : vector<2x8x512xf32>
    %55 = arith.truncf %54 : vector<2x8x512xf32> to vector<2x8x512xbf16>
    %56 = vector.shape_cast %55 : vector<2x8x512xbf16> to vector<2x1x8x512xbf16>
    %57 = vector.extract_strided_slice %40 {offsets = [2, 0, 0, 0], sizes = [1, 2, 8, 1024], strides = [1, 1, 1, 1]} : vector<4x2x8x1024xf32> to vector<1x2x8x1024xf32>
    %58 = vector.shape_cast %57 : vector<1x2x8x1024xf32> to vector<2x8x1024xf32>
    %59 = vector.extract_strided_slice %40 {offsets = [3, 0, 0, 0], sizes = [1, 2, 8, 1024], strides = [1, 1, 1, 1]} : vector<4x2x8x1024xf32> to vector<1x2x8x1024xf32>
    %60 = vector.shape_cast %59 : vector<1x2x8x1024xf32> to vector<2x8x1024xf32>
    %61 = arith.maximumf %58, %60 : vector<2x8x1024xf32>
    %62 = vector.extract_strided_slice %61 {offsets = [0, 0, 0], sizes = [2, 8, 512], strides = [1, 1, 1]} : vector<2x8x1024xf32> to vector<2x8x512xf32>
    %63 = vector.extract_strided_slice %61 {offsets = [0, 0, 512], sizes = [2, 8, 512], strides = [1, 1, 1]} : vector<2x8x1024xf32> to vector<2x8x512xf32>
    %64 = arith.maximumf %62, %63 : vector<2x8x512xf32>
    %65 = vector.shape_cast %41 : vector<1x512xf32> to vector<1x1x512xf32>
    %66 = vector.broadcast %65 : vector<1x1x512xf32> to vector<2x8x512xf32>
    %67 = arith.addf %64, %66 : vector<2x8x512xf32>
    %cst_59 = arith.constant 0.000000e+00 : f32
    %68 = vector.broadcast %cst_59 : f32 to vector<2x8x512xf32>
    %69 = arith.maximumf %67, %68 : vector<2x8x512xf32>
    %70 = arith.truncf %69 : vector<2x8x512xf32> to vector<2x8x512xbf16>
    %71 = vector.shape_cast %70 : vector<2x8x512xbf16> to vector<2x1x8x512xbf16>
    %cst_60 = arith.constant 0.000000e+00 : bf16
    %72 = vector.broadcast %cst_60 : bf16 to vector<2x1x1x512xbf16>
    %c0_61 = arith.constant 0 : index
    %c0_62 = arith.constant 0 : index
    %c0_63 = arith.constant 0 : index
    %c0_64 = arith.constant 0 : index
    %73 = vector.load %arg7[%c0_61, %c0_62, %c0_63, %c0_64] : memref<2x2x9x512xbf16, #tpu.memory_space<vmem>>, vector<2x1x1x512xbf16>
    tpu.vector_store %arg7[%c0_61, %c0_62, %c0_63, %c0_64], %72 {strides = array<i32>} : memref<2x2x9x512xbf16, #tpu.memory_space<vmem>>, vector<2x1x1x512xbf16>,
    %c0_65 = arith.constant 0 : index
    %c1_66 = arith.constant 1 : index
    %c8 = arith.constant 8 : index
    %c0_67 = arith.constant 0 : index
    %74 = vector.load %arg7[%c0_65, %c1_66, %c8, %c0_67] : memref<2x2x9x512xbf16, #tpu.memory_space<vmem>>, vector<2x1x1x512xbf16>
    tpu.vector_store %arg7[%c0_65, %c1_66, %c8, %c0_67], %72 {strides = array<i32>} : memref<2x2x9x512xbf16, #tpu.memory_space<vmem>>, vector<2x1x1x512xbf16>,
    %c0_68 = arith.constant 0 : index
    %c1_69 = arith.constant 1 : index
    %c0_70 = arith.constant 0 : index
    %c0_71 = arith.constant 0 : index
    %75 = vector.load %arg7[%c0_68, %c1_69, %c0_70, %c0_71] : memref<2x2x9x512xbf16, #tpu.memory_space<vmem>>, vector<2x1x8x512xbf16>
    tpu.vector_store %arg7[%c0_68, %c1_69, %c0_70, %c0_71], %56 {strides = array<i32>} : memref<2x2x9x512xbf16, #tpu.memory_space<vmem>>, vector<2x1x8x512xbf16>,
    %c0_72 = arith.constant 0 : index
    %c0_73 = arith.constant 0 : index
    %c1_74 = arith.constant 1 : index
    %c0_75 = arith.constant 0 : index
    %76 = vector.load %arg7[%c0_72, %c0_73, %c1_74, %c0_75] : memref<2x2x9x512xbf16, #tpu.memory_space<vmem>>, vector<2x1x8x512xbf16>
    tpu.vector_store %arg7[%c0_72, %c0_73, %c1_74, %c0_75], %71 {strides = array<i32>} : memref<2x2x9x512xbf16, #tpu.memory_space<vmem>>, vector<2x1x8x512xbf16>,
    %cst_76 = arith.constant 0.000000e+00 : f32
    %77 = vector.broadcast %cst_76 : f32 to vector<16x1024xf32>
    %cst_77 = arith.constant 0.000000e+00 : f32
    %78 = vector.broadcast %cst_77 : f32 to vector<16x1024xf32>
    %c0_78 = arith.constant 0 : index
    %c0_79 = arith.constant 0 : index
    %c0_80 = arith.constant 0 : index
    %79 = vector.load %arg4[%c0_78, %c0_79, %c0_80] : memref<3x512x1024xbf16, #tpu.memory_space<vmem>>, vector<1x512x1024xbf16>
    %80 = vector.shape_cast %79 : vector<1x512x1024xbf16> to vector<512x1024xbf16>
    %c0_81 = arith.constant 0 : index
    %c0_82 = arith.constant 0 : index
    %c0_83 = arith.constant 0 : index
    %c0_84 = arith.constant 0 : index
    %81 = vector.load %arg7[%c0_81, %c0_82, %c0_83, %c0_84] : memref<2x2x9x512xbf16, #tpu.memory_space<vmem>>, vector<2x1x8x512xbf16>
    %82 = vector.shape_cast %81 : vector<2x1x8x512xbf16> to vector<16x512xbf16>
    %cst_85 = arith.constant dense<0.000000e+00> : vector<16x1024xf32>
    %83 = tpu.matmul %82, %80, %cst_85 {dimension_numbers = #tpu.dot_dimension_numbers<[1], [0], [0], [1], [0, 0, 1, 1], [], []>} : vector<16x512xbf16>, vector<512x1024xbf16>, vector<16x1024xf32> -> vector<16x1024xf32>
    %84 = arith.addf %77, %83 : vector<16x1024xf32>
    %c0_86 = arith.constant 0 : index
    %c1_87 = arith.constant 1 : index
    %c0_88 = arith.constant 0 : index
    %c0_89 = arith.constant 0 : index
    %85 = vector.load %arg7[%c0_86, %c1_87, %c0_88, %c0_89] : memref<2x2x9x512xbf16, #tpu.memory_space<vmem>>, vector<2x1x8x512xbf16>
    %86 = vector.shape_cast %85 : vector<2x1x8x512xbf16> to vector<16x512xbf16>
    %cst_90 = arith.constant dense<0.000000e+00> : vector<16x1024xf32>
    %87 = tpu.matmul %86, %80, %cst_90 {dimension_numbers = #tpu.dot_dimension_numbers<[1], [0], [0], [1], [0, 0, 1, 1], [], []>} : vector<16x512xbf16>, vector<512x1024xbf16>, vector<16x1024xf32> -> vector<16x1024xf32>
    %88 = arith.addf %78, %87 : vector<16x1024xf32>
    %c1_91 = arith.constant 1 : index
    %c0_92 = arith.constant 0 : index
    %c0_93 = arith.constant 0 : index
    %89 = vector.load %arg4[%c1_91, %c0_92, %c0_93] : memref<3x512x1024xbf16, #tpu.memory_space<vmem>>, vector<1x512x1024xbf16>
    %90 = vector.shape_cast %89 : vector<1x512x1024xbf16> to vector<512x1024xbf16>
    %c0_94 = arith.constant 0 : index
    %c1_95 = arith.constant 1 : index
    %c0_96 = arith.constant 0 : index
    %c0_97 = arith.constant 0 : index
    %91 = vector.load %arg7[%c0_94, %c1_95, %c0_96, %c0_97] : memref<2x2x9x512xbf16, #tpu.memory_space<vmem>>, vector<2x1x8x512xbf16>
    %92 = vector.shape_cast %91 : vector<2x1x8x512xbf16> to vector<16x512xbf16>
    %cst_98 = arith.constant dense<0.000000e+00> : vector<16x1024xf32>
    %93 = tpu.matmul %92, %90, %cst_98 {dimension_numbers = #tpu.dot_dimension_numbers<[1], [0], [0], [1], [0, 0, 1, 1], [], []>} : vector<16x512xbf16>, vector<512x1024xbf16>, vector<16x1024xf32> -> vector<16x1024xf32>
    %94 = arith.addf %84, %93 : vector<16x1024xf32>
    %c0_99 = arith.constant 0 : index
    %c0_100 = arith.constant 0 : index
    %c1_101 = arith.constant 1 : index
    %c0_102 = arith.constant 0 : index
    %95 = vector.load %arg7[%c0_99, %c0_100, %c1_101, %c0_102] : memref<2x2x9x512xbf16, #tpu.memory_space<vmem>>, vector<2x1x8x512xbf16>
    %96 = vector.shape_cast %95 : vector<2x1x8x512xbf16> to vector<16x512xbf16>
    %cst_103 = arith.constant dense<0.000000e+00> : vector<16x1024xf32>
    %97 = tpu.matmul %96, %90, %cst_103 {dimension_numbers = #tpu.dot_dimension_numbers<[1], [0], [0], [1], [0, 0, 1, 1], [], []>} : vector<16x512xbf16>, vector<512x1024xbf16>, vector<16x1024xf32> -> vector<16x1024xf32>
    %98 = arith.addf %88, %97 : vector<16x1024xf32>
    %c2_104 = arith.constant 2 : index
    %c0_105 = arith.constant 0 : index
    %c0_106 = arith.constant 0 : index
    %99 = vector.load %arg4[%c2_104, %c0_105, %c0_106] : memref<3x512x1024xbf16, #tpu.memory_space<vmem>>, vector<1x512x1024xbf16>
    %100 = vector.shape_cast %99 : vector<1x512x1024xbf16> to vector<512x1024xbf16>
    %c0_107 = arith.constant 0 : index
    %c0_108 = arith.constant 0 : index
    %c1_109 = arith.constant 1 : index
    %c0_110 = arith.constant 0 : index
    %101 = vector.load %arg7[%c0_107, %c0_108, %c1_109, %c0_110] : memref<2x2x9x512xbf16, #tpu.memory_space<vmem>>, vector<2x1x8x512xbf16>
    %102 = vector.shape_cast %101 : vector<2x1x8x512xbf16> to vector<16x512xbf16>
    %cst_111 = arith.constant dense<0.000000e+00> : vector<16x1024xf32>
    %103 = tpu.matmul %102, %100, %cst_111 {dimension_numbers = #tpu.dot_dimension_numbers<[1], [0], [0], [1], [0, 0, 1, 1], [], []>} : vector<16x512xbf16>, vector<512x1024xbf16>, vector<16x1024xf32> -> vector<16x1024xf32>
    %104 = arith.addf %94, %103 : vector<16x1024xf32>
    %c0_112 = arith.constant 0 : index
    %c1_113 = arith.constant 1 : index
    %c1_114 = arith.constant 1 : index
    %c0_115 = arith.constant 0 : index
    %105 = vector.load %arg7[%c0_112, %c1_113, %c1_114, %c0_115] : memref<2x2x9x512xbf16, #tpu.memory_space<vmem>>, vector<2x1x8x512xbf16>
    %106 = vector.shape_cast %105 : vector<2x1x8x512xbf16> to vector<16x512xbf16>
    %cst_116 = arith.constant dense<0.000000e+00> : vector<16x1024xf32>
    %107 = tpu.matmul %106, %100, %cst_116 {dimension_numbers = #tpu.dot_dimension_numbers<[1], [0], [0], [1], [0, 0, 1, 1], [], []>} : vector<16x512xbf16>, vector<512x1024xbf16>, vector<16x1024xf32> -> vector<16x1024xf32>
    %108 = arith.addf %98, %107 : vector<16x1024xf32>
    %109 = arith.maximumf %104, %108 : vector<16x1024xf32>
    %110 = vector.extract_strided_slice %109 {offsets = [0, 0], sizes = [16, 512], strides = [1, 1]} : vector<16x1024xf32> to vector<16x512xf32>
    %111 = vector.extract_strided_slice %109 {offsets = [0, 512], sizes = [16, 512], strides = [1, 1]} : vector<16x1024xf32> to vector<16x512xf32>
    %112 = arith.maximumf %110, %111 : vector<16x512xf32>
    %c0_117 = arith.constant 0 : index
    %c0_118 = arith.constant 0 : index
    %113 = vector.load %arg5[%c0_117, %c0_118] : memref<1x512xf32, #tpu.memory_space<vmem>>, vector<1x512xf32>
    %114 = vector.broadcast %113 : vector<1x512xf32> to vector<16x512xf32>
    %115 = arith.addf %112, %114 : vector<16x512xf32>
    %cst_119 = arith.constant 0.000000e+00 : f32
    %116 = vector.broadcast %cst_119 : f32 to vector<16x512xf32>
    %117 = arith.maximumf %115, %116 : vector<16x512xf32>
    %118 = vector.shape_cast %117 : vector<16x512xf32> to vector<2x8x512xf32>
    %119 = arith.truncf %118 : vector<2x8x512xf32> to vector<2x8x512xbf16>
    %c0_120 = arith.constant 0 : index
    %c0_121 = arith.constant 0 : index
    %c0_122 = arith.constant 0 : index
    %120 = vector.load %arg6[%c0_120, %c0_121, %c0_122] : memref<2x8x512xbf16, #tpu.memory_space<vmem>>, vector<2x8x512xbf16>
    tpu.vector_store %arg6[%c0_120, %c0_121, %c0_122], %119 {strides = array<i32>} : memref<2x8x512xbf16, #tpu.memory_space<vmem>>, vector<2x8x512xbf16>,
    return
  }
  func.func @transform_0(%arg0: i32) -> (i32, i32, i32, i32) {
    %c0_i32 = arith.constant 0 : i32
    %c0_i32_0 = arith.constant 0 : i32
    %c0_i32_1 = arith.constant 0 : i32
    %c0_i32_2 = arith.constant 0 : i32
    return %arg0, %c0_i32, %c0_i32_0, %c0_i32_1 : i32, i32, i32, i32
  }
  func.func @transform_1(%arg0: i32) -> (i32, i32, i32) {
    %c0_i32 = arith.constant 0 : i32
    %c0_i32_0 = arith.constant 0 : i32
    %c0_i32_1 = arith.constant 0 : i32
    %c0_i32_2 = arith.constant 0 : i32
    return %c0_i32, %c0_i32_0, %c0_i32_1 : i32, i32, i32
  }
  func.func @transform_2(%arg0: i32) -> (i32, i32) {
    %c0_i32 = arith.constant 0 : i32
    %c0_i32_0 = arith.constant 0 : i32
    %c0_i32_1 = arith.constant 0 : i32
    return %c0_i32, %c0_i32_0 : i32, i32
  }
  func.func @transform_3(%arg0: i32) -> (i32, i32, i32) {
    %c0_i32 = arith.constant 0 : i32
    %c0_i32_0 = arith.constant 0 : i32
    %c0_i32_1 = arith.constant 0 : i32
    %c0_i32_2 = arith.constant 0 : i32
    return %c0_i32, %c0_i32_0, %c0_i32_1 : i32, i32, i32
  }
  func.func @transform_4(%arg0: i32) -> (i32, i32) {
    %c0_i32 = arith.constant 0 : i32
    %c0_i32_0 = arith.constant 0 : i32
    %c0_i32_1 = arith.constant 0 : i32
    return %c0_i32, %c0_i32_0 : i32, i32
  }
  func.func @transform_5(%arg0: i32) -> (i32, i32, i32) {
    %c0_i32 = arith.constant 0 : i32
    %c0_i32_0 = arith.constant 0 : i32
    %c0_i32_1 = arith.constant 0 : i32
    return %arg0, %c0_i32, %c0_i32_0 : i32, i32, i32
  }
}

module attributes {stable_mosaic.version = 11 : i64} {
  func.func @_fc_kernel(%arg0: i32, %arg1: memref<2x4096xbf16, #tpu.memory_space<vmem>>, %arg2: memref<4096x128xbf16, #tpu.memory_space<vmem>>, %arg3: memref<1x128xf32, #tpu.memory_space<vmem>>, %arg4: memref<128x128xbf16, #tpu.memory_space<vmem>>, %arg5: memref<1x128xf32, #tpu.memory_space<vmem>>, %arg6: memref<2x128xf32, #tpu.memory_space<vmem>>) attributes {dimension_semantics = [#tpu.dimension_semantics<parallel>], iteration_bounds = array<i64: 1>, scalar_prefetch = 0 : i64, scratch_operands = 0 : i64, tpu.core_type = #tpu.core_type<tc>, window_params = [{transform_indices = @transform_0, window_bounds = array<i64: 2, 4096>}, {pipeline_mode = #tpu.pipeline_mode<synchronous>, transform_indices = @transform_1, window_bounds = array<i64: 4096, 128>}, {pipeline_mode = #tpu.pipeline_mode<synchronous>, transform_indices = @transform_2, window_bounds = array<i64: 1, 128>}, {pipeline_mode = #tpu.pipeline_mode<synchronous>, transform_indices = @transform_3, window_bounds = array<i64: 128, 128>}, {pipeline_mode = #tpu.pipeline_mode<synchronous>, transform_indices = @transform_4, window_bounds = array<i64: 1, 128>}, {transform_indices = @transform_5, window_bounds = array<i64: 2, 128>}]} {
    %c0 = arith.constant 0 : index
    %c0_0 = arith.constant 0 : index
    %0 = vector.load %arg1[%c0, %c0_0] : memref<2x4096xbf16, #tpu.memory_space<vmem>>, vector<2x4096xbf16>
    %c0_1 = arith.constant 0 : index
    %c0_2 = arith.constant 0 : index
    %1 = vector.load %arg2[%c0_1, %c0_2] : memref<4096x128xbf16, #tpu.memory_space<vmem>>, vector<4096x128xbf16>
    %cst = arith.constant dense<0.000000e+00> : vector<2x128xf32>
    %2 = tpu.matmul %0, %1, %cst {dimension_numbers = #tpu.dot_dimension_numbers<[1], [0], [0], [1], [0, 0, 1, 1], [], []>} : vector<2x4096xbf16>, vector<4096x128xbf16>, vector<2x128xf32> -> vector<2x128xf32>
    %c0_3 = arith.constant 0 : index
    %c0_4 = arith.constant 0 : index
    %3 = vector.load %arg3[%c0_3, %c0_4] : memref<1x128xf32, #tpu.memory_space<vmem>>, vector<1x128xf32>
    %4 = vector.broadcast %3 : vector<1x128xf32> to vector<2x128xf32>
    %5 = arith.addf %2, %4 : vector<2x128xf32>
    %cst_5 = arith.constant 0.000000e+00 : f32
    %6 = vector.broadcast %cst_5 : f32 to vector<2x128xf32>
    %7 = arith.maximumf %5, %6 : vector<2x128xf32>
    %8 = arith.truncf %7 : vector<2x128xf32> to vector<2x128xbf16>
    %c0_6 = arith.constant 0 : index
    %c0_7 = arith.constant 0 : index
    %9 = vector.load %arg4[%c0_6, %c0_7] : memref<128x128xbf16, #tpu.memory_space<vmem>>, vector<128x128xbf16>
    %cst_8 = arith.constant dense<0.000000e+00> : vector<2x128xf32>
    %10 = tpu.matmul %8, %9, %cst_8 {dimension_numbers = #tpu.dot_dimension_numbers<[1], [0], [0], [1], [0, 0, 1, 1], [], []>} : vector<2x128xbf16>, vector<128x128xbf16>, vector<2x128xf32> -> vector<2x128xf32>
    %c0_9 = arith.constant 0 : index
    %c0_10 = arith.constant 0 : index
    %11 = vector.load %arg5[%c0_9, %c0_10] : memref<1x128xf32, #tpu.memory_space<vmem>>, vector<1x128xf32>
    %12 = vector.broadcast %11 : vector<1x128xf32> to vector<2x128xf32>
    %13 = arith.addf %10, %12 : vector<2x128xf32>
    %c0_11 = arith.constant 0 : index
    %c0_12 = arith.constant 0 : index
    %14 = vector.load %arg6[%c0_11, %c0_12] : memref<2x128xf32, #tpu.memory_space<vmem>>, vector<2x128xf32>
    tpu.vector_store %arg6[%c0_11, %c0_12], %13 {strides = array<i32>} : memref<2x128xf32, #tpu.memory_space<vmem>>, vector<2x128xf32>,
    return
  }
  func.func @transform_0(%arg0: i32) -> (i32, i32) {
    %c0_i32 = arith.constant 0 : i32
    %c0_i32_0 = arith.constant 0 : i32
    return %arg0, %c0_i32 : i32, i32
  }
  func.func @transform_1(%arg0: i32) -> (i32, i32) {
    %c0_i32 = arith.constant 0 : i32
    %c0_i32_0 = arith.constant 0 : i32
    %c0_i32_1 = arith.constant 0 : i32
    return %c0_i32, %c0_i32_0 : i32, i32
  }
  func.func @transform_2(%arg0: i32) -> (i32, i32) {
    %c0_i32 = arith.constant 0 : i32
    %c0_i32_0 = arith.constant 0 : i32
    %c0_i32_1 = arith.constant 0 : i32
    return %c0_i32, %c0_i32_0 : i32, i32
  }
  func.func @transform_3(%arg0: i32) -> (i32, i32) {
    %c0_i32 = arith.constant 0 : i32
    %c0_i32_0 = arith.constant 0 : i32
    %c0_i32_1 = arith.constant 0 : i32
    return %c0_i32, %c0_i32_0 : i32, i32
  }
  func.func @transform_4(%arg0: i32) -> (i32, i32) {
    %c0_i32 = arith.constant 0 : i32
    %c0_i32_0 = arith.constant 0 : i32
    %c0_i32_1 = arith.constant 0 : i32
    return %c0_i32, %c0_i32_0 : i32, i32
  }
  func.func @transform_5(%arg0: i32) -> (i32, i32) {
    %c0_i32 = arith.constant 0 : i32
    %c0_i32_0 = arith.constant 0 : i32
    return %arg0, %c0_i32 : i32, i32
  }
}

</mosaic_0001>

<bundles_post_ra>
// kernel: simple_cnn_forward.3
= control target key start
LH: loop header
LB: loop body
LE: loop exit
PB: predicated region body
PF: predicated region fallthrough
CT: control target
= control target key end

     0   :  { %v553_v28 = vlaneseq  ;;  %v4024_v36 = vmov 1966171168   ;;  %s4926_s0 = inlined_call_operand.vmem [shape: bf16[2,4096], index: 0, kind: input, shape index: {}]   ;;  %s4927_s1 = inlined_call_operand.vmem [shape: bf16[4096,128], index: 1, kind: input, shape index: {}]   ;;  %s4928_s2 = inlined_call_operand.vmem [shape: f32[1,128], index: 2, kind: input, shape index: {}]   ;;  %s4929_s3 = inlined_call_operand.vmem [shape: bf16[128,128], index: 3, kind: input, shape index: {}]   ;;  %s4930_s4 = inlined_call_operand.vmem [shape: f32[1,128], index: 4, kind: input, shape index: {}]   ;;  %s4931_s5 = inlined_call_operand.hbm [shape: f32[2,128], index: 5, kind: output, shape index: {}]  }
   0x1   :  { %v3732_v0 = vld [vmem:[%s4927_s1 + $0x40] sm:$0xff]   ;;  %v3736_v4 = vld [vmem:[%s4927_s1 + $0x48] sm:$0xff]   ;;  %v3740_v8 = vld [vmem:[%s4927_s1 + $0x50] sm:$0xff]   ;;  %v551_v37 = vunpack.c.l.s4 %v4024_v36 }
   0x2   :  { %v3733_v1 = vld [vmem:[%s4927_s1 + $0xc0] sm:$0xff]   ;;  %3347 = vmatprep.subr.bf16.mxu0 %v3732_v0  ;;  %v3737_v5 = vld [vmem:[%s4927_s1 + $0xc8] sm:$0xff]   ;;  %v3741_v9 = vld [vmem:[%s4927_s1 + $0xd0] sm:$0xff]   ;;  %v554_v33 = vshrl.u32 %v553_v28, 7 }
   0x3   :  { %v3734_v2 = vld [vmem:[%s4927_s1] sm:$0xff]   ;;  %3369 = vmatprep.subr.bf16.mxu1 %v3733_v1  ;;  %v3738_v6 = vld [vmem:[%s4927_s1 + $0x8] sm:$0xff]   ;;  %v3742_v10 = vld [vmem:[%s4927_s1 + $0x10] sm:$0xff]   ;;  %v552_v40 = vunpack.c.0.s8 %v551_v37 }
   0x4   :  { %v3735_v3 = vld [vmem:[%s4927_s1 + $0x80] sm:$0xff]   ;;  %3348 = vmatpush3.bf16.msra.mxu0 %v3734_v2  ;;  %v3739_v7 = vld [vmem:[%s4927_s1 + $0x88] sm:$0xff]   ;;  %v3743_v11 = vld [vmem:[%s4927_s1 + $0x90] sm:$0xff]  }
   0x5   :  { %3370 = vmatpush3.bf16.msra.mxu1 %v3735_v3  ;;  %3349 = vmatprep.subr.bf16.mxu0 %v3736_v4  ;;  %v3744_v12 = vld [vmem:[%s4927_s1 + $0x58] sm:$0xff]   ;;  %v3748_v16 = vld [vmem:[%s4927_s1 + $0x60] sm:$0xff]   ;;  %v3752_v20 = vld [vmem:[%s4927_s1 + $0x68] sm:$0xff]   ;;  %v4163_v41 = vsub.s32 %v552_v40, %v554_v33 }
   0x6   :  { %3371 = vmatprep.subr.bf16.mxu1 %v3737_v5  ;;  %v3745_v13 = vld [vmem:[%s4927_s1 + $0xd8] sm:$0xff]   ;;  %v3749_v17 = vld [vmem:[%s4927_s1 + $0xe0] sm:$0xff]   ;;  %v3753_v21 = vld [vmem:[%s4927_s1 + $0xe8] sm:$0xff]  }
   0x7   :  { %v3746_v14 = vld [vmem:[%s4927_s1 + $0x18] sm:$0xff]   ;;  %v3750_v18 = vld [vmem:[%s4927_s1 + $0x20] sm:$0xff]   ;;  %v3754_v22 = vld [vmem:[%s4927_s1 + $0x28] sm:$0xff]  }
   0x8   :  { %3350 = vmatpush3.bf16.msra.mxu0 %v3738_v6  ;;  %v3747_v15 = vld [vmem:[%s4927_s1 + $0x98] sm:$0xff]   ;;  %v3751_v19 = vld [vmem:[%s4927_s1 + $0xa0] sm:$0xff]   ;;  %v3755_v23 = vld [vmem:[%s4927_s1 + $0xa8] sm:$0xff]  }
   0x9   :  { %3372 = vmatpush3.bf16.msra.mxu1 %v3739_v7  ;;  %3351 = vmatprep.subr.bf16.mxu0 %v3740_v8  ;;  %v3756_v24 = vld [vmem:[%s4927_s1 + $0x70] sm:$0xff]   ;;  %v3760_v29 = vld [vmem:[%s4927_s1 + $0x78] sm:$0xff]   ;;  %v22_v34 = vld [vmem:[%s4926_s0] sm:$0xff] }
   0xa   :  { %3373 = vmatprep.subr.bf16.mxu1 %v3741_v9  ;;  %v3757_v25 = vld [vmem:[%s4927_s1 + $0xf0] sm:$0xff]   ;;  %v3761_v30 = vld [vmem:[%s4927_s1 + $0xf8] sm:$0xff]   ;;  %v3765_v35 = vld [vmem:[%s4927_s1 + $0x140] sm:$0xff]   ;;  %v549_v39 = vcombine.high %v22_v34, %v22_v34  ;;  %v556_v42 = vrot.slane %v22_v34, %v4163_v41 }
   0xb   :  { %v3758_v26 = vld [vmem:[%s4927_s1 + $0x30] sm:$0xff]   ;;  %v3762_v31 = vld [vmem:[%s4927_s1 + $0x38] sm:$0xff]   ;;  %v3766_v38 = vld [vmem:[%s4927_s1 + $0x1c0] sm:$0xff]  }
   0xc   :  { %3352 = vmatpush3.bf16.msra.mxu0 %v3742_v10  ;;  %v3759_v27 = vld [vmem:[%s4927_s1 + $0xb0] sm:$0xff]   ;;  %v3763_v32 = vld [vmem:[%s4927_s1 + $0xb8] sm:$0xff]   ;;  %v4167_v43 = vrot.slane %v549_v39, %v4163_v41  ;;  %v564_v44 = vcombine.high %v556_v42, %v556_v42  ;;  %v572_v45 = vrot.slane %v556_v42, %v4163_v41  ;;  %v3767_v47 = vld [vmem:[%s4927_s1 + $0x100] sm:$0xff]  }
   0xd   :  { %3374 = vmatpush3.bf16.msra.mxu1 %v3743_v11  ;;  %3353 = vmatprep.subr.bf16.mxu0 %v3744_v12  ;;  %v3768_v49 = vld [vmem:[%s4927_s1 + $0x180] sm:$0xff]   ;;  %v3769_v52 = vld [vmem:[%s4927_s1 + $0x148] sm:$0xff]   ;;  %v3773_v58 = vld [vmem:[%s4927_s1 + $0x150] sm:$0xff]  }
   0xe   :  { %3375 = vmatprep.subr.bf16.mxu1 %v3745_v13  ;;  %v565_v46 = vcombine.high %v4167_v43, %v4167_v43  ;;  %v586_v48 = vrot.slane %v564_v44, %v4163_v41  ;;  %v594_v51 = vcombine.high %v572_v45, %v572_v45  ;;  %v3770_v54 = vld [vmem:[%s4927_s1 + $0x1c8] sm:$0xff]   ;;  %v3774_v59 = vld [vmem:[%s4927_s1 + $0x1d0] sm:$0xff]   ;;  %v3777_v62 = vld [vmem:[%s4927_s1 + $0x158] sm:$0xff]  }
   0xf   :  { %v3771_v55 = vld [vmem:[%s4927_s1 + $0x108] sm:$0xff]   ;;  %v3775_v60 = vld [vmem:[%s4927_s1 + $0x110] sm:$0xff]   ;;  %v3778_v63 = vld [vmem:[%s4927_s1 + $0x1d8] sm:$0xff]  }
  0x10   :  { %3354 = vmatpush3.bf16.msra.mxu0 %v3746_v14  ;;  %v593_v50 = vrot.slane %v565_v46, %v4163_v41  ;;  %2345 = vmatprep.mubr.bf16.mxu0 %v586_v48  ;;  %v596_v53 = vcombine.high %v586_v48, %v586_v48  ;;  %v3772_v57 = vld [vmem:[%s4927_s1 + $0x188] sm:$0xff]   ;;  %v3776_v61 = vld [vmem:[%s4927_s1 + $0x190] sm:$0xff]   ;;  %v3779_v0 = vld [vmem:[%s4927_s1 + $0x118] sm:$0xff]  }
  0x11   :  { %3376 = vmatpush3.bf16.msra.mxu1 %v3747_v15  ;;  %3355 = vmatprep.subr.bf16.mxu0 %v3748_v16  ;;  %v3780_v1 = vld [vmem:[%s4927_s1 + $0x198] sm:$0xff]   ;;  %v3781_v2 = vld [vmem:[%s4927_s1 + $0x160] sm:$0xff]   ;;  %v3785_v6 = vld [vmem:[%s4927_s1 + $0x168] sm:$0xff]  }
  0x12   :  { %3377 = vmatprep.subr.bf16.mxu1 %v3749_v17  ;;  %v597_v56 = vcombine.high %v593_v50, %v593_v50  ;;  %2385 = vmatprep.mubr.bf16.mxu1 %v596_v53  ;;  %v3782_v3 = vld [vmem:[%s4927_s1 + $0x1e0] sm:$0xff]   ;;  %v3786_v7 = vld [vmem:[%s4927_s1 + $0x1e8] sm:$0xff]   ;;  %v3789_v10 = vld [vmem:[%s4927_s1 + $0x170] sm:$0xff]  }
  0x13   :  { %v3783_v4 = vld [vmem:[%s4927_s1 + $0x120] sm:$0xff]   ;;  %v3787_v8 = vld [vmem:[%s4927_s1 + $0x128] sm:$0xff]   ;;  %v3790_v11 = vld [vmem:[%s4927_s1 + $0x1f0] sm:$0xff]  }
  0x14   :  { %3356 = vmatpush3.bf16.msra.mxu0 %v3750_v18  ;;  %v3784_v5 = vld [vmem:[%s4927_s1 + $0x1a0] sm:$0xff]   ;;  %v3788_v9 = vld [vmem:[%s4927_s1 + $0x1a8] sm:$0xff]   ;;  %v3791_v12 = vld [vmem:[%s4927_s1 + $0x130] sm:$0xff]   ;;  %v579_v18 = vrot.slane %v4167_v43, %v4163_v41 }
  0x15   :  { %3378 = vmatpush3.bf16.msra.mxu1 %v3751_v19  ;;  %3357 = vmatprep.subr.bf16.mxu0 %v3752_v20  ;;  %v3792_v13 = vld [vmem:[%s4927_s1 + $0x1b0] sm:$0xff]   ;;  %v3793_v14 = vld [vmem:[%s4927_s1 + $0x178] sm:$0xff]   ;;  %v3797_v19 = vld [vmem:[%s4927_s1 + $0x240] sm:$0xff]  }
  0x16   :  { %3379 = vmatprep.subr.bf16.mxu1 %v3753_v21  ;;  %v3794_v15 = vld [vmem:[%s4927_s1 + $0x1f8] sm:$0xff]   ;;  %v3798_v20 = vld [vmem:[%s4927_s1 + $0x2c0] sm:$0xff]   ;;  %v3805_v28 = vld [vmem:[%s4927_s1 + $0x250] sm:$0xff]  }
  0x17   :  { %v3795_v16 = vld [vmem:[%s4927_s1 + $0x138] sm:$0xff]   ;;  %v3799_v21 = vld [vmem:[%s4927_s1 + $0x200] sm:$0xff]   ;;  %v3817_v40 = vld [vmem:[%s4927_s1 + $0x268] sm:$0xff]  }
  0x18   :  { %3358 = vmatpush3.bf16.msra.mxu0 %v3754_v22  ;;  %v3796_v17 = vld [vmem:[%s4927_s1 + $0x1b8] sm:$0xff]   ;;  %v3800_v22 = vld [vmem:[%s4927_s1 + $0x280] sm:$0xff]   ;;  %v3818_v42 = vld [vmem:[%s4927_s1 + $0x2e8] sm:$0xff]  }
  0x19   :  { %3380 = vmatpush3.bf16.msra.mxu1 %v3755_v23  ;;  %3359 = vmatprep.subr.bf16.mxu0 %v3756_v24  ;;  %v595_v23 = vcombine.high %v579_v18, %v579_v18  ;;  %v3801_v24 = vld [vmem:[%s4927_s1 + $0x248] sm:$0xff]   ;;  %v3810_v33 = vld [vmem:[%s4927_s1 + $0x2d8] sm:$0xff]   ;;  %v3813_v36 = vld [vmem:[%s4927_s1 + $0x260] sm:$0xff]  }
  0x1a   :  { %3381 = vmatprep.subr.bf16.mxu1 %v3757_v25  ;;  %v3802_v25 = vld [vmem:[%s4927_s1 + $0x2c8] sm:$0xff]   ;;  %v3811_v34 = vld [vmem:[%s4927_s1 + $0x218] sm:$0xff]   ;;  %v3814_v37 = vld [vmem:[%s4927_s1 + $0x2e0] sm:$0xff]  }
  0x1b   :  { %v3816_v39 = vld [vmem:[%s4927_s1 + $0x2a0] sm:$0xff]   ;;  %v3819_v43 = vld [vmem:[%s4927_s1 + $0x228] sm:$0xff]  }
  0x1c   :  { %3360 = vmatpush3.bf16.msra.mxu0 %v3758_v26  ;;  %v3803_v26 = vld [vmem:[%s4927_s1 + $0x208] sm:$0xff]  }
  0x1d   :  { %3382 = vmatpush3.bf16.msra.mxu1 %v3759_v27  ;;  %3361 = vmatprep.subr.bf16.mxu0 %v3760_v29  ;;  %v3804_v27 = vld [vmem:[%s4927_s1 + $0x288] sm:$0xff]   ;;  %v3806_v29 = vld [vmem:[%s4927_s1 + $0x2d0] sm:$0xff]  }
  0x1e   :  { %3383 = vmatprep.subr.bf16.mxu1 %v3761_v30  ;;  %v3807_v30 = vld [vmem:[%s4927_s1 + $0x210] sm:$0xff]   ;;  %v3820_v44 = vld [vmem:[%s4927_s1 + $0x2a8] sm:$0xff]  }
  0x1f   :  { %v23_v46 = vld [vmem:[%s4926_s0 + $0x8] sm:$0xff] }
  0x20   :  { %3362 = vmatpush3.bf16.msra.mxu0 %v3762_v31  ;;  %v3808_v31 = vld [vmem:[%s4927_s1 + $0x290] sm:$0xff]   ;;  %v605_v48 = vrot.slane %v23_v46, %v4163_v41 }
  0x21   :  { %3384 = vmatpush3.bf16.msra.mxu1 %v3763_v32  ;;  %3391 = vmatprep.subr.bf16.mxu0 %v3765_v35  ;;  %v3809_v32 = vld [vmem:[%s4927_s1 + $0x258] sm:$0xff]  }
  0x22   :  { %3413 = vmatprep.subr.bf16.mxu1 %v3766_v38  ;;  %v3812_v35 = vld [vmem:[%s4927_s1 + $0x298] sm:$0xff]   ;;  %v3815_v38 = vld [vmem:[%s4927_s1 + $0x220] sm:$0xff]  }
  0x23   :  { %2346 = vmatmul.mubr.bf16.vlgmr.msra.gmra.mrb[0].mxu0 %v572_v45  ;;  %v3821_v45 = vld [vmem:[%s4927_s1 + $0x270] sm:$0xff]  }
  0x24   :  { %3392 = vmatpush3.bf16.msra.mxu0 %v3767_v47  ;;  %2386 = vmatmul.mubr.bf16.vlgmr.msra.gmra.mrb[0].mxu1 %v594_v51  ;;  %v3822_v47 = vld [vmem:[%s4927_s1 + $0x2f0] sm:$0xff]  }
  0x25   :  { %3393 = vmatprep.subr.bf16.mxu0 %v3769_v52  ;;  %3414 = vmatpush3.bf16.msra.mxu1 %v3768_v49  ;;  %v598_v49 = vcombine.high %v23_v46, %v23_v46  ;;  %v3824_v51 = vld [vmem:[%s4927_s1 + $0x2b0] sm:$0xff]   ;;  %v613_v52 = vcombine.high %v605_v48, %v605_v48 }
  0x26   :  { %2425 = vmatprep.mubr.bf16.mxu0 %v593_v50  ;;  %3415 = vmatprep.subr.bf16.mxu1 %v3770_v54  ;;  %v3823_v50 = vld [vmem:[%s4927_s1 + $0x230] sm:$0xff]   ;;  %v3825_v54 = vld [vmem:[%s4927_s1 + $0x278] sm:$0xff]  }
  0x27   :  { %2465 = vmatprep.mubr.bf16.mxu1 %v597_v56  ;;  %v4355_v53 = vrot.slane %v598_v49, %v4163_v41  ;;  %v635_v56 = vrot.slane %v613_v52, %v4163_v41  ;;  %v3872_v46 = vld [vmem:[%s4927_s1 + $0x410] sm:$0xff]   ;;  %v3875_v49 = vld [vmem:[%s4927_s1 + $0x4d8] sm:$0xff]   ;;  %v3878_v52 = vld [vmem:[%s4927_s1 + $0x460] sm:$0xff]  }
  0x28   :  { %3394 = vmatpush3.bf16.msra.mxu0 %v3771_v55  ;;  %v3826_v55 = vld [vmem:[%s4927_s1 + $0x2f8] sm:$0xff]  }
  0x29   :  { %3395 = vmatprep.subr.bf16.mxu0 %v3773_v58  ;;  %3416 = vmatpush3.bf16.msra.mxu1 %v3772_v57  ;;  %v614_v57 = vcombine.high %v4355_v53, %v4355_v53  ;;  %v3827_v58 = vld [vmem:[%s4927_s1 + $0x238] sm:$0xff]  }
  0x2a   :  { %3417 = vmatprep.subr.bf16.mxu1 %v3774_v59  ;;  %v3828_v59 = vld [vmem:[%s4927_s1 + $0x2b8] sm:$0xff]  }
  0x2c   :  { %3396 = vmatpush3.bf16.msra.mxu0 %v3775_v60  ;;  %v645_v60 = vcombine.high %v635_v56, %v635_v56 }
  0x2d   :  { %3397 = vmatprep.subr.bf16.mxu0 %v3777_v62  ;;  %3418 = vmatpush3.bf16.msra.mxu1 %v3776_v61  ;;  %v621_v61 = vrot.slane %v605_v48, %v4163_v41  ;;  %v3829_v62 = vld [vmem:[%s4927_s1 + $0x340] sm:$0xff]   ;;  %v3874_v48 = vld [vmem:[%s4927_s1 + $0x458] sm:$0xff]  }
  0x2e   :  { %3419 = vmatprep.subr.bf16.mxu1 %v3778_v63  ;;  %v3830_v63 = vld [vmem:[%s4927_s1 + $0x3c0] sm:$0xff]  }
  0x30   :  { %3398 = vmatpush3.bf16.msra.mxu0 %v3779_v0  ;;  %v642_v0 = vrot.slane %v614_v57, %v4163_v41  ;;  %v3883_v57 = vld [vmem:[%s4927_s1 + $0x4e8] sm:$0xff]  }
  0x31   :  { %3399 = vmatprep.subr.bf16.mxu0 %v3781_v2  ;;  %3420 = vmatpush3.bf16.msra.mxu1 %v3780_v1  ;;  %v3831_v1 = vld [vmem:[%s4927_s1 + $0x300] sm:$0xff]  }
  0x32   :  { %3421 = vmatprep.subr.bf16.mxu1 %v3782_v3  ;;  %v3832_v2 = vld [vmem:[%s4927_s1 + $0x380] sm:$0xff]   ;;  %v643_v3 = vcombine.high %v621_v61, %v621_v61 }
  0x34   :  { %3400 = vmatpush3.bf16.msra.mxu0 %v3783_v4  ;;  %v3833_v4 = vld [vmem:[%s4927_s1 + $0x348] sm:$0xff]  }
  0x35   :  { %3401 = vmatprep.subr.bf16.mxu0 %v3785_v6  ;;  %3422 = vmatpush3.bf16.msra.mxu1 %v3784_v5  ;;  %v3834_v5 = vld [vmem:[%s4927_s1 + $0x3c8] sm:$0xff]   ;;  %v646_v6 = vcombine.high %v642_v0, %v642_v0 }
  0x36   :  { %3423 = vmatprep.subr.bf16.mxu1 %v3786_v7  ;;  %v3835_v7 = vld [vmem:[%s4927_s1 + $0x308] sm:$0xff]  }
  0x38   :  { %3402 = vmatpush3.bf16.msra.mxu0 %v3787_v8  ;;  %v3836_v8 = vld [vmem:[%s4927_s1 + $0x388] sm:$0xff]  }
  0x39   :  { %3403 = vmatprep.subr.bf16.mxu0 %v3789_v10  ;;  %3424 = vmatpush3.bf16.msra.mxu1 %v3788_v9  ;;  %v3837_v9 = vld [vmem:[%s4927_s1 + $0x350] sm:$0xff]  }
  0x3a   :  { %3425 = vmatprep.subr.bf16.mxu1 %v3790_v11  ;;  %v3838_v10 = vld [vmem:[%s4927_s1 + $0x3d0] sm:$0xff]  }
  0x3b   :  { %v3839_v11 = vld [vmem:[%s4927_s1 + $0x310] sm:$0xff]  }
  0x3c   :  { %3404 = vmatpush3.bf16.msra.mxu0 %v3791_v12  ;;  %v3840_v12 = vld [vmem:[%s4927_s1 + $0x390] sm:$0xff]  }
  0x3d   :  { %3405 = vmatprep.subr.bf16.mxu0 %v3793_v14  ;;  %3426 = vmatpush3.bf16.msra.mxu1 %v3792_v13  ;;  %v3841_v13 = vld [vmem:[%s4927_s1 + $0x358] sm:$0xff]  }
  0x3e   :  { %3427 = vmatprep.subr.bf16.mxu1 %v3794_v15  ;;  %v3842_v14 = vld [vmem:[%s4927_s1 + $0x3d8] sm:$0xff]  }
  0x3f   :  { %v3843_v15 = vld [vmem:[%s4927_s1 + $0x318] sm:$0xff]  }
  0x40   :  { %3406 = vmatpush3.bf16.msra.mxu0 %v3795_v16  ;;  %v3844_v16 = vld [vmem:[%s4927_s1 + $0x398] sm:$0xff]  }
  0x41   :  { %3435 = vmatprep.subr.bf16.mxu0 %v3797_v19  ;;  %3428 = vmatpush3.bf16.msra.mxu1 %v3796_v17  ;;  %v3845_v17 = vld [vmem:[%s4927_s1 + $0x360] sm:$0xff]  }
  0x42   :  { %3457 = vmatprep.subr.bf16.mxu1 %v3798_v20  ;;  %v3847_v19 = vld [vmem:[%s4927_s1 + $0x320] sm:$0xff]  }
  0x43   :  { %2426 = vmatmul.mubr.bf16.vlgmr.msra.gmra.mrb[4].mxu0 %v579_v18  ;;  %v3846_v18 = vld [vmem:[%s4927_s1 + $0x3e0] sm:$0xff]  }
  0x44   :  { %3436 = vmatpush3.bf16.msra.mxu0 %v3799_v21  ;;  %2466 = vmatmul.mubr.bf16.vlgmr.msra.gmra.mrb[4].mxu1 %v595_v23  ;;  %v3848_v20 = vld [vmem:[%s4927_s1 + $0x3a0] sm:$0xff]   ;;  %v3849_v21 = vld [vmem:[%s4927_s1 + $0x368] sm:$0xff]  }
  0x45   :  { %3437 = vmatprep.subr.bf16.mxu0 %v3801_v24  ;;  %3458 = vmatpush3.bf16.msra.mxu1 %v3800_v22  ;;  %v3850_v22 = vld [vmem:[%s4927_s1 + $0x3e8] sm:$0xff]  }
  0x46   :  { %3459 = vmatprep.subr.bf16.mxu1 %v3802_v25  ;;  %2505 = vmatprep.mubr.bf16.mxu0 %v635_v56  ;;  %v3851_v23 = vld [vmem:[%s4927_s1 + $0x328] sm:$0xff]   ;;  %v3853_v25 = vld [vmem:[%s4927_s1 + $0x370] sm:$0xff]  }
  0x47   :  { %2545 = vmatprep.mubr.bf16.mxu1 %v645_v60  ;;  %v3852_v24 = vld [vmem:[%s4927_s1 + $0x3a8] sm:$0xff]   ;;  %v3886_v60 = vld [vmem:[%s4927_s1 + $0x470] sm:$0xff]  }
  0x48   :  { %3438 = vmatpush3.bf16.msra.mxu0 %v3803_v26  ;;  %v3854_v26 = vld [vmem:[%s4927_s1 + $0x3f0] sm:$0xff]   ;;  %v3882_v56 = vld [vmem:[%s4927_s1 + $0x468] sm:$0xff]  }
  0x49   :  { %3439 = vmatprep.subr.bf16.mxu0 %v3805_v28  ;;  %3460 = vmatpush3.bf16.msra.mxu1 %v3804_v27  ;;  %v3855_v27 = vld [vmem:[%s4927_s1 + $0x330] sm:$0xff]  }
  0x4a   :  { %3461 = vmatprep.subr.bf16.mxu1 %v3806_v29  ;;  %v3856_v28 = vld [vmem:[%s4927_s1 + $0x3b0] sm:$0xff]   ;;  %v3857_v29 = vld [vmem:[%s4927_s1 + $0x378] sm:$0xff]  }
  0x4c   :  { %3440 = vmatpush3.bf16.msra.mxu0 %v3807_v30  ;;  %v3858_v30 = vld [vmem:[%s4927_s1 + $0x3f8] sm:$0xff]  }
  0x4d   :  { %3441 = vmatprep.subr.bf16.mxu0 %v3809_v32  ;;  %3462 = vmatpush3.bf16.msra.mxu1 %v3808_v31  ;;  %v3859_v31 = vld [vmem:[%s4927_s1 + $0x338] sm:$0xff]  }
  0x4e   :  { %3463 = vmatprep.subr.bf16.mxu1 %v3810_v33  ;;  %v3860_v32 = vld [vmem:[%s4927_s1 + $0x3b8] sm:$0xff]   ;;  %v628_v33 = vrot.slane %v4355_v53, %v4163_v41  ;;  %v3879_v53 = vld [vmem:[%s4927_s1 + $0x4e0] sm:$0xff]  }
  0x50   :  { %3442 = vmatpush3.bf16.msra.mxu0 %v3811_v34  ;;  %v3862_v34 = vld [vmem:[%s4927_s1 + $0x440] sm:$0xff]  }
  0x51   :  { %3443 = vmatprep.subr.bf16.mxu0 %v3813_v36  ;;  %3464 = vmatpush3.bf16.msra.mxu1 %v3812_v35  ;;  %v3863_v35 = vld [vmem:[%s4927_s1 + $0x4c0] sm:$0xff]  }
  0x52   :  { %3465 = vmatprep.subr.bf16.mxu1 %v3814_v37  ;;  %v3864_v36 = vld [vmem:[%s4927_s1 + $0x400] sm:$0xff]  }
  0x53   :  { %v3865_v37 = vld [vmem:[%s4927_s1 + $0x480] sm:$0xff]  }
  0x54   :  { %3444 = vmatpush3.bf16.msra.mxu0 %v3815_v38  ;;  %v644_v38 = vcombine.high %v628_v33, %v628_v33 }
  0x55   :  { %3445 = vmatprep.subr.bf16.mxu0 %v3817_v40  ;;  %3466 = vmatpush3.bf16.msra.mxu1 %v3816_v39  ;;  %v3866_v39 = vld [vmem:[%s4927_s1 + $0x448] sm:$0xff]  }
  0x56   :  { %3467 = vmatprep.subr.bf16.mxu1 %v3818_v42  ;;  %v3867_v40 = vld [vmem:[%s4927_s1 + $0x4c8] sm:$0xff]  }
  0x57   :  { %v3868_v42 = vld [vmem:[%s4927_s1 + $0x408] sm:$0xff]  }
  0x58   :  { %3446 = vmatpush3.bf16.msra.mxu0 %v3819_v43  ;;  %v3869_v43 = vld [vmem:[%s4927_s1 + $0x488] sm:$0xff]  }
  0x59   :  { %3447 = vmatprep.subr.bf16.mxu0 %v3821_v45  ;;  %3468 = vmatpush3.bf16.msra.mxu1 %v3820_v44  ;;  %v3870_v44 = vld [vmem:[%s4927_s1 + $0x450] sm:$0xff]  }
  0x5a   :  { %3469 = vmatprep.subr.bf16.mxu1 %v3822_v47  ;;  %v3871_v45 = vld [vmem:[%s4927_s1 + $0x4d0] sm:$0xff]  }
  0x5b   :  { %v3873_v47 = vld [vmem:[%s4927_s1 + $0x490] sm:$0xff]  }
  0x5c   :  { %3448 = vmatpush3.bf16.msra.mxu0 %v3823_v50  ;;  %v3876_v50 = vld [vmem:[%s4927_s1 + $0x418] sm:$0xff]  }
  0x5d   :  { %3449 = vmatprep.subr.bf16.mxu0 %v3825_v54  ;;  %3470 = vmatpush3.bf16.msra.mxu1 %v3824_v51  ;;  %v3877_v51 = vld [vmem:[%s4927_s1 + $0x498] sm:$0xff]   ;;  %v3880_v54 = vld [vmem:[%s4927_s1 + $0x420] sm:$0xff]  }
  0x5e   :  { %3471 = vmatprep.subr.bf16.mxu1 %v3826_v55  ;;  %v3881_v55 = vld [vmem:[%s4927_s1 + $0x4a0] sm:$0xff]  }
  0x60   :  { %3450 = vmatpush3.bf16.msra.mxu0 %v3827_v58  ;;  %v3884_v58 = vld [vmem:[%s4927_s1 + $0x428] sm:$0xff]  }
  0x61   :  { %3479 = vmatprep.subr.bf16.mxu0 %v3829_v62  ;;  %3472 = vmatpush3.bf16.msra.mxu1 %v3828_v59  ;;  %v3885_v59 = vld [vmem:[%s4927_s1 + $0x4a8] sm:$0xff]   ;;  %v3887_v62 = vld [vmem:[%s4927_s1 + $0x4f0] sm:$0xff]  }
  0x62   :  { %3501 = vmatprep.subr.bf16.mxu1 %v3830_v63 }
  0x63   :  { %2506 = vmatmul.mubr.bf16.vlgmr.msra.gmra.mrb[8].mxu0 %v621_v61  ;;  %v24_v61 = vld [vmem:[%s4926_s0 + $0x10] sm:$0xff] }
  0x64   :  { %3480 = vmatpush3.bf16.msra.mxu0 %v3831_v1  ;;  %2585 = vmatprep.mubr.bf16.mxu0 %v642_v0  ;;  %v654_v63 = vrot.slane %v24_v61, %v4163_v41  ;;  %v647_v0 = vcombine.high %v24_v61, %v24_v61  ;;  %v3888_v1 = vld [vmem:[%s4927_s1 + $0x430] sm:$0xff]  }
  0x65   :  { %2546 = vmatmul.mubr.bf16.vlgmr.msra.gmra.mrb[8].mxu1 %v643_v3  ;;  %3481 = vmatprep.subr.bf16.mxu0 %v3833_v4  ;;  %v3937_v61 = vld [vmem:[%s4927_s1 + $0x610] sm:$0xff]  }
  0x66   :  { %3502 = vmatpush3.bf16.msra.mxu1 %v3832_v2  ;;  %2625 = vmatprep.mubr.bf16.mxu1 %v646_v6  ;;  %v3889_v2 = vld [vmem:[%s4927_s1 + $0x4b0] sm:$0xff]   ;;  %v662_v3 = vcombine.high %v654_v63, %v654_v63  ;;  %v4561_v4 = vrot.slane %v647_v0, %v4163_v41  ;;  %v3891_v6 = vld [vmem:[%s4927_s1 + $0x4f8] sm:$0xff]  }
  0x67   :  { %3503 = vmatprep.subr.bf16.mxu1 %v3834_v5  ;;  %v3890_v5 = vld [vmem:[%s4927_s1 + $0x478] sm:$0xff]  }
  0x68   :  { %3482 = vmatpush3.bf16.msra.mxu0 %v3835_v7  ;;  %v684_v7 = vrot.slane %v662_v3, %v4163_v41  ;;  %v3940_v0 = vld [vmem:[%s4927_s1 + $0x6d8] sm:$0xff]   ;;  %v3943_v3 = vld [vmem:[%s4927_s1 + $0x660] sm:$0xff]  }
  0x69   :  { %3483 = vmatprep.subr.bf16.mxu0 %v3837_v9  ;;  %v3892_v9 = vld [vmem:[%s4927_s1 + $0x438] sm:$0xff]  }
  0x6a   :  { %3504 = vmatpush3.bf16.msra.mxu1 %v3836_v8  ;;  %v663_v8 = vcombine.high %v4561_v4, %v4561_v4 }
  0x6b   :  { %3505 = vmatprep.subr.bf16.mxu1 %v3838_v10  ;;  %v3893_v10 = vld [vmem:[%s4927_s1 + $0x4b8] sm:$0xff]  }
  0x6c   :  { %3484 = vmatpush3.bf16.msra.mxu0 %v3839_v11  ;;  %v694_v11 = vcombine.high %v684_v7, %v684_v7 }
  0x6d   :  { %3485 = vmatprep.subr.bf16.mxu0 %v3841_v13  ;;  %v3894_v13 = vld [vmem:[%s4927_s1 + $0x540] sm:$0xff]  }
  0x6e   :  { %3506 = vmatpush3.bf16.msra.mxu1 %v3840_v12  ;;  %v670_v12 = vrot.slane %v654_v63, %v4163_v41  ;;  %v3939_v63 = vld [vmem:[%s4927_s1 + $0x658] sm:$0xff]  }
  0x6f   :  { %3507 = vmatprep.subr.bf16.mxu1 %v3842_v14  ;;  %v3895_v14 = vld [vmem:[%s4927_s1 + $0x5c0] sm:$0xff]  }
  0x70   :  { %3486 = vmatpush3.bf16.msra.mxu0 %v3843_v15  ;;  %v691_v15 = vrot.slane %v663_v8, %v4163_v41  ;;  %v3948_v8 = vld [vmem:[%s4927_s1 + $0x6e8] sm:$0xff]  }
  0x71   :  { %3487 = vmatprep.subr.bf16.mxu0 %v3845_v17  ;;  %v3897_v17 = vld [vmem:[%s4927_s1 + $0x580] sm:$0xff]  }
  0x72   :  { %3508 = vmatpush3.bf16.msra.mxu1 %v3844_v16  ;;  %v3896_v16 = vld [vmem:[%s4927_s1 + $0x500] sm:$0xff]  }
  0x73   :  { %3509 = vmatprep.subr.bf16.mxu1 %v3846_v18  ;;  %v692_v18 = vcombine.high %v670_v12, %v670_v12 }
  0x74   :  { %3488 = vmatpush3.bf16.msra.mxu0 %v3847_v19  ;;  %v3898_v19 = vld [vmem:[%s4927_s1 + $0x548] sm:$0xff]  }
  0x75   :  { %3489 = vmatprep.subr.bf16.mxu0 %v3849_v21  ;;  %v695_v21 = vcombine.high %v691_v15, %v691_v15 }
  0x76   :  { %3510 = vmatpush3.bf16.msra.mxu1 %v3848_v20  ;;  %v3899_v20 = vld [vmem:[%s4927_s1 + $0x5c8] sm:$0xff]  }
  0x77   :  { %3511 = vmatprep.subr.bf16.mxu1 %v3850_v22  ;;  %v3900_v22 = vld [vmem:[%s4927_s1 + $0x508] sm:$0xff]  }
  0x78   :  { %3490 = vmatpush3.bf16.msra.mxu0 %v3851_v23  ;;  %v3901_v23 = vld [vmem:[%s4927_s1 + $0x588] sm:$0xff]  }
  0x79   :  { %3491 = vmatprep.subr.bf16.mxu0 %v3853_v25  ;;  %v3903_v25 = vld [vmem:[%s4927_s1 + $0x5d0] sm:$0xff]  }
  0x7a   :  { %3512 = vmatpush3.bf16.msra.mxu1 %v3852_v24  ;;  %v3902_v24 = vld [vmem:[%s4927_s1 + $0x550] sm:$0xff]  }
  0x7b   :  { %3513 = vmatprep.subr.bf16.mxu1 %v3854_v26  ;;  %v3904_v26 = vld [vmem:[%s4927_s1 + $0x510] sm:$0xff]  }
  0x7c   :  { %3492 = vmatpush3.bf16.msra.mxu0 %v3855_v27  ;;  %v3905_v27 = vld [vmem:[%s4927_s1 + $0x590] sm:$0xff]  }
  0x7d   :  { %3493 = vmatprep.subr.bf16.mxu0 %v3857_v29  ;;  %v3907_v29 = vld [vmem:[%s4927_s1 + $0x5d8] sm:$0xff]  }
  0x7e   :  { %3514 = vmatpush3.bf16.msra.mxu1 %v3856_v28  ;;  %v3906_v28 = vld [vmem:[%s4927_s1 + $0x558] sm:$0xff]  }
  0x7f   :  { %3515 = vmatprep.subr.bf16.mxu1 %v3858_v30  ;;  %v3908_v30 = vld [vmem:[%s4927_s1 + $0x518] sm:$0xff]  }
  0x80   :  { %3494 = vmatpush3.bf16.msra.mxu0 %v3859_v31  ;;  %v3909_v31 = vld [vmem:[%s4927_s1 + $0x598] sm:$0xff]  }
  0x81   :  { %3523 = vmatprep.subr.bf16.mxu0 %v3862_v34  ;;  %v3912_v34 = vld [vmem:[%s4927_s1 + $0x520] sm:$0xff]  }
  0x82   :  { %3516 = vmatpush3.bf16.msra.mxu1 %v3860_v32  ;;  %v3910_v32 = vld [vmem:[%s4927_s1 + $0x560] sm:$0xff]  }
  0x83   :  { %2586 = vmatmul.mubr.bf16.vlgmr.msra.gmra.mrb[12].mxu0 %v628_v33  ;;  %3545 = vmatprep.subr.bf16.mxu1 %v3863_v35  ;;  %v3911_v33 = vld [vmem:[%s4927_s1 + $0x5e0] sm:$0xff]  }
  0x84   :  { %3524 = vmatpush3.bf16.msra.mxu0 %v3864_v36  ;;  %2665 = vmatprep.mubr.bf16.mxu0 %v684_v7  ;;  %v3913_v35 = vld [vmem:[%s4927_s1 + $0x5a0] sm:$0xff]   ;;  %v3914_v36 = vld [vmem:[%s4927_s1 + $0x568] sm:$0xff]  }
  0x85   :  { %2626 = vmatmul.mubr.bf16.vlgmr.msra.gmra.mrb[12].mxu1 %v644_v38  ;;  %3525 = vmatprep.subr.bf16.mxu0 %v3866_v39  ;;  %v3916_v38 = vld [vmem:[%s4927_s1 + $0x528] sm:$0xff]  }
  0x86   :  { %3546 = vmatpush3.bf16.msra.mxu1 %v3865_v37  ;;  %2705 = vmatprep.mubr.bf16.mxu1 %v694_v11  ;;  %v3915_v37 = vld [vmem:[%s4927_s1 + $0x5e8] sm:$0xff]   ;;  %v3951_v11 = vld [vmem:[%s4927_s1 + $0x670] sm:$0xff]  }
  0x87   :  { %3547 = vmatprep.subr.bf16.mxu1 %v3867_v40  ;;  %v3917_v39 = vld [vmem:[%s4927_s1 + $0x5a8] sm:$0xff]   ;;  %v3918_v40 = vld [vmem:[%s4927_s1 + $0x570] sm:$0xff]  }
  0x88   :  { %3526 = vmatpush3.bf16.msra.mxu0 %v3868_v42  ;;  %v3919_v42 = vld [vmem:[%s4927_s1 + $0x5f0] sm:$0xff]   ;;  %v3947_v7 = vld [vmem:[%s4927_s1 + $0x668] sm:$0xff]  }
  0x89   :  { %3527 = vmatprep.subr.bf16.mxu0 %v3870_v44  ;;  %v3921_v44 = vld [vmem:[%s4927_s1 + $0x5b0] sm:$0xff]  }
  0x8a   :  { %3548 = vmatpush3.bf16.msra.mxu1 %v3869_v43  ;;  %v3920_v43 = vld [vmem:[%s4927_s1 + $0x530] sm:$0xff]  }
  0x8b   :  { %3549 = vmatprep.subr.bf16.mxu1 %v3871_v45  ;;  %v3922_v45 = vld [vmem:[%s4927_s1 + $0x578] sm:$0xff]  }
  0x8c   :  { %3528 = vmatpush3.bf16.msra.mxu0 %v3872_v46  ;;  %v3923_v46 = vld [vmem:[%s4927_s1 + $0x5f8] sm:$0xff]  }
  0x8d   :  { %3529 = vmatprep.subr.bf16.mxu0 %v3874_v48  ;;  %v3925_v48 = vld [vmem:[%s4927_s1 + $0x5b8] sm:$0xff]  }
  0x8e   :  { %3550 = vmatpush3.bf16.msra.mxu1 %v3873_v47  ;;  %v3924_v47 = vld [vmem:[%s4927_s1 + $0x538] sm:$0xff]  }
  0x8f   :  { %3551 = vmatprep.subr.bf16.mxu1 %v3875_v49  ;;  %v677_v49 = vrot.slane %v4561_v4, %v4163_v41  ;;  %v3944_v4 = vld [vmem:[%s4927_s1 + $0x6e0] sm:$0xff]  }
  0x90   :  { %3530 = vmatpush3.bf16.msra.mxu0 %v3876_v50  ;;  %v3927_v50 = vld [vmem:[%s4927_s1 + $0x640] sm:$0xff]  }
  0x91   :  { %3531 = vmatprep.subr.bf16.mxu0 %v3878_v52  ;;  %v3929_v52 = vld [vmem:[%s4927_s1 + $0x600] sm:$0xff]  }
  0x92   :  { %3552 = vmatpush3.bf16.msra.mxu1 %v3877_v51  ;;  %v3928_v51 = vld [vmem:[%s4927_s1 + $0x6c0] sm:$0xff]  }
  0x93   :  { %3553 = vmatprep.subr.bf16.mxu1 %v3879_v53  ;;  %v3930_v53 = vld [vmem:[%s4927_s1 + $0x680] sm:$0xff]  }
  0x94   :  { %3532 = vmatpush3.bf16.msra.mxu0 %v3880_v54  ;;  %v693_v54 = vcombine.high %v677_v49, %v677_v49 }
  0x95   :  { %3533 = vmatprep.subr.bf16.mxu0 %v3882_v56  ;;  %v3932_v56 = vld [vmem:[%s4927_s1 + $0x6c8] sm:$0xff]  }
  0x96   :  { %3554 = vmatpush3.bf16.msra.mxu1 %v3881_v55  ;;  %v3931_v55 = vld [vmem:[%s4927_s1 + $0x648] sm:$0xff]  }
  0x97   :  { %3555 = vmatprep.subr.bf16.mxu1 %v3883_v57  ;;  %v3933_v57 = vld [vmem:[%s4927_s1 + $0x608] sm:$0xff]  }
  0x98   :  { %3534 = vmatpush3.bf16.msra.mxu0 %v3884_v58  ;;  %v3934_v58 = vld [vmem:[%s4927_s1 + $0x688] sm:$0xff]  }
  0x99   :  { %3535 = vmatprep.subr.bf16.mxu0 %v3886_v60  ;;  %v3936_v60 = vld [vmem:[%s4927_s1 + $0x6d0] sm:$0xff]  }
  0x9a   :  { %3556 = vmatpush3.bf16.msra.mxu1 %v3885_v59  ;;  %v3935_v59 = vld [vmem:[%s4927_s1 + $0x650] sm:$0xff]  }
  0x9b   :  { %3557 = vmatprep.subr.bf16.mxu1 %v3887_v62  ;;  %v3938_v62 = vld [vmem:[%s4927_s1 + $0x690] sm:$0xff]  }
  0x9c   :  { %3536 = vmatpush3.bf16.msra.mxu0 %v3888_v1  ;;  %v3941_v1 = vld [vmem:[%s4927_s1 + $0x618] sm:$0xff]  }
  0x9d   :  { %3537 = vmatprep.subr.bf16.mxu0 %v3890_v5  ;;  %v3945_v5 = vld [vmem:[%s4927_s1 + $0x620] sm:$0xff]  }
  0x9e   :  { %3558 = vmatpush3.bf16.msra.mxu1 %v3889_v2  ;;  %v3942_v2 = vld [vmem:[%s4927_s1 + $0x698] sm:$0xff]  }
  0x9f   :  { %3559 = vmatprep.subr.bf16.mxu1 %v3891_v6  ;;  %v3946_v6 = vld [vmem:[%s4927_s1 + $0x6a0] sm:$0xff]  }
  0xa0   :  { %3538 = vmatpush3.bf16.msra.mxu0 %v3892_v9  ;;  %v3949_v9 = vld [vmem:[%s4927_s1 + $0x628] sm:$0xff]  }
  0xa1   :  { %3567 = vmatprep.subr.bf16.mxu0 %v3894_v13  ;;  %v3952_v13 = vld [vmem:[%s4927_s1 + $0x6f0] sm:$0xff]  }
  0xa2   :  { %3560 = vmatpush3.bf16.msra.mxu1 %v3893_v10  ;;  %v3950_v10 = vld [vmem:[%s4927_s1 + $0x6a8] sm:$0xff]  }
  0xa3   :  { %2666 = vmatmul.mubr.bf16.vlgmr.msra.gmra.mrb[16].mxu0 %v670_v12  ;;  %3589 = vmatprep.subr.bf16.mxu1 %v3895_v14  ;;  %v25_v12 = vld [vmem:[%s4926_s0 + $0x18] sm:$0xff] }
  0xa4   :  { %3568 = vmatpush3.bf16.msra.mxu0 %v3896_v16  ;;  %2745 = vmatprep.mubr.bf16.mxu0 %v691_v15  ;;  %v703_v14 = vrot.slane %v25_v12, %v4163_v41  ;;  %v696_v15 = vcombine.high %v25_v12, %v25_v12  ;;  %v3953_v16 = vld [vmem:[%s4927_s1 + $0x630] sm:$0xff]  }
  0xa5   :  { %2706 = vmatmul.mubr.bf16.vlgmr.msra.gmra.mrb[16].mxu1 %v692_v18  ;;  %3569 = vmatprep.subr.bf16.mxu0 %v3898_v19 }
  0xa6   :  { %3590 = vmatpush3.bf16.msra.mxu1 %v3897_v17  ;;  %2785 = vmatprep.mubr.bf16.mxu1 %v695_v21  ;;  %v3955_v17 = vld [vmem:[%s4927_s1 + $0x678] sm:$0xff]   ;;  %v711_v18 = vcombine.high %v703_v14, %v703_v14  ;;  %v4767_v19 = vrot.slane %v696_v15, %v4163_v41 }
  0xa7   :  { %3591 = vmatprep.subr.bf16.mxu1 %v3899_v20  ;;  %v3954_v20 = vld [vmem:[%s4927_s1 + $0x6b0] sm:$0xff]   ;;  %v3956_v21 = vld [vmem:[%s4927_s1 + $0x6f8] sm:$0xff]  }
  0xa8   :  { %3570 = vmatpush3.bf16.msra.mxu0 %v3900_v22  ;;  %v733_v22 = vrot.slane %v711_v18, %v4163_v41  ;;  %v726_v12 = vrot.slane %v4767_v19, %v4163_v41 }
  0xa9   :  { %3571 = vmatprep.subr.bf16.mxu0 %v3902_v24  ;;  %v3957_v24 = vld [vmem:[%s4927_s1 + $0x638] sm:$0xff]  }
  0xaa   :  { %3592 = vmatpush3.bf16.msra.mxu1 %v3901_v23  ;;  %v712_v23 = vcombine.high %v4767_v19, %v4767_v19 }
  0xab   :  { %3593 = vmatprep.subr.bf16.mxu1 %v3903_v25  ;;  %v743_v25 = vcombine.high %v733_v22, %v733_v22 }
  0xac   :  { %3572 = vmatpush3.bf16.msra.mxu0 %v3904_v26  ;;  %v719_v26 = vrot.slane %v703_v14, %v4163_v41 }
  0xad   :  { %3573 = vmatprep.subr.bf16.mxu0 %v3906_v28  ;;  %v3958_v28 = vld [vmem:[%s4927_s1 + $0x6b8] sm:$0xff]  }
  0xae   :  { %3594 = vmatpush3.bf16.msra.mxu1 %v3905_v27  ;;  %v3959_v27 = vld [vmem:[%s4927_s1 + $0x740] sm:$0xff]  }
  0xaf   :  { %3595 = vmatprep.subr.bf16.mxu1 %v3907_v29  ;;  %v740_v29 = vrot.slane %v712_v23, %v4163_v41 }
  0xb0   :  { %3574 = vmatpush3.bf16.msra.mxu0 %v3908_v30  ;;  %v3960_v30 = vld [vmem:[%s4927_s1 + $0x7c0] sm:$0xff]  }
  0xb1   :  { %3575 = vmatprep.subr.bf16.mxu0 %v3910_v32  ;;  %v741_v32 = vcombine.high %v719_v26, %v719_v26 }
  0xb2   :  { %3596 = vmatpush3.bf16.msra.mxu1 %v3909_v31  ;;  %v3961_v31 = vld [vmem:[%s4927_s1 + $0x700] sm:$0xff]  }
  0xb3   :  { %3597 = vmatprep.subr.bf16.mxu1 %v3911_v33  ;;  %v3963_v33 = vld [vmem:[%s4927_s1 + $0x748] sm:$0xff]  }
  0xb4   :  { %3576 = vmatpush3.bf16.msra.mxu0 %v3912_v34  ;;  %v3962_v34 = vld [vmem:[%s4927_s1 + $0x780] sm:$0xff]  }
  0xb5   :  { %3577 = vmatprep.subr.bf16.mxu0 %v3914_v36  ;;  %v3964_v36 = vld [vmem:[%s4927_s1 + $0x7c8] sm:$0xff]  }
  0xb6   :  { %3598 = vmatpush3.bf16.msra.mxu1 %v3913_v35  ;;  %v744_v35 = vcombine.high %v740_v29, %v740_v29 }
  0xb7   :  { %3599 = vmatprep.subr.bf16.mxu1 %v3915_v37  ;;  %v3965_v37 = vld [vmem:[%s4927_s1 + $0x708] sm:$0xff]  }
  0xb8   :  { %3578 = vmatpush3.bf16.msra.mxu0 %v3916_v38  ;;  %v3967_v38 = vld [vmem:[%s4927_s1 + $0x750] sm:$0xff]  }
  0xb9   :  { %3579 = vmatprep.subr.bf16.mxu0 %v3918_v40  ;;  %v3968_v40 = vld [vmem:[%s4927_s1 + $0x7d0] sm:$0xff]  }
  0xba   :  { %3600 = vmatpush3.bf16.msra.mxu1 %v3917_v39  ;;  %v3966_v39 = vld [vmem:[%s4927_s1 + $0x788] sm:$0xff]  }
  0xbb   :  { %3601 = vmatprep.subr.bf16.mxu1 %v3919_v42  ;;  %v3969_v42 = vld [vmem:[%s4927_s1 + $0x710] sm:$0xff]  }
  0xbc   :  { %3580 = vmatpush3.bf16.msra.mxu0 %v3920_v43  ;;  %v3971_v43 = vld [vmem:[%s4927_s1 + $0x758] sm:$0xff]  }
  0xbd   :  { %3581 = vmatprep.subr.bf16.mxu0 %v3922_v45  ;;  %v3972_v45 = vld [vmem:[%s4927_s1 + $0x7d8] sm:$0xff]  }
  0xbe   :  { %3602 = vmatpush3.bf16.msra.mxu1 %v3921_v44  ;;  %v3970_v44 = vld [vmem:[%s4927_s1 + $0x790] sm:$0xff]  }
  0xbf   :  { %3603 = vmatprep.subr.bf16.mxu1 %v3923_v46  ;;  %v3973_v46 = vld [vmem:[%s4927_s1 + $0x718] sm:$0xff]  }
  0xc0   :  { %3582 = vmatpush3.bf16.msra.mxu0 %v3924_v47  ;;  %v3974_v47 = vld [vmem:[%s4927_s1 + $0x798] sm:$0xff]  }
  0xc1   :  { %3611 = vmatprep.subr.bf16.mxu0 %v3927_v50  ;;  %v3977_v50 = vld [vmem:[%s4927_s1 + $0x720] sm:$0xff]  }
  0xc2   :  { %3604 = vmatpush3.bf16.msra.mxu1 %v3925_v48  ;;  %v3975_v48 = vld [vmem:[%s4927_s1 + $0x760] sm:$0xff]  }
  0xc3   :  { %2746 = vmatmul.mubr.bf16.vlgmr.msra.gmra.mrb[20].mxu0 %v677_v49  ;;  %3633 = vmatprep.subr.bf16.mxu1 %v3928_v51  ;;  %v3976_v49 = vld [vmem:[%s4927_s1 + $0x7e0] sm:$0xff]  }
  0xc4   :  { %3612 = vmatpush3.bf16.msra.mxu0 %v3929_v52  ;;  %2825 = vmatprep.mubr.bf16.mxu0 %v733_v22  ;;  %v3978_v51 = vld [vmem:[%s4927_s1 + $0x7a0] sm:$0xff]   ;;  %v3979_v52 = vld [vmem:[%s4927_s1 + $0x768] sm:$0xff]  }
  0xc5   :  { %2786 = vmatmul.mubr.bf16.vlgmr.msra.gmra.mrb[20].mxu1 %v693_v54  ;;  %3613 = vmatprep.subr.bf16.mxu0 %v3931_v55  ;;  %v3981_v54 = vld [vmem:[%s4927_s1 + $0x728] sm:$0xff]  }
  0xc6   :  { %3634 = vmatpush3.bf16.msra.mxu1 %v3930_v53  ;;  %2865 = vmatprep.mubr.bf16.mxu1 %v743_v25  ;;  %v3980_v53 = vld [vmem:[%s4927_s1 + $0x7e8] sm:$0xff]  }
  0xc7   :  { %3635 = vmatprep.subr.bf16.mxu1 %v3932_v56  ;;  %v3982_v55 = vld [vmem:[%s4927_s1 + $0x7a8] sm:$0xff]   ;;  %v3983_v56 = vld [vmem:[%s4927_s1 + $0x770] sm:$0xff]  }
  0xc8   :  { %3614 = vmatpush3.bf16.msra.mxu0 %v3933_v57  ;;  %v3081_v57 = vld [vmem:[%s4928_s2] ss:$0 sm:$0xff] }
  0xc9   :  { %3615 = vmatprep.subr.bf16.mxu0 %v3935_v59 }
  0xca   :  { %3636 = vmatpush3.bf16.msra.mxu1 %v3934_v58  ;;  %v3984_v58 = vld [vmem:[%s4927_s1 + $0x7f0] sm:$0xff]  }
  0xcb   :  { %3637 = vmatprep.subr.bf16.mxu1 %v3936_v60  ;;  %v3985_v60 = vld [vmem:[%s4927_s1 + $0x730] sm:$0xff]  }
  0xcc   :  { %3616 = vmatpush3.bf16.msra.mxu0 %v3937_v61 }
  0xcd   :  { %3617 = vmatprep.subr.bf16.mxu0 %v3939_v63 }
  0xce   :  { %3638 = vmatpush3.bf16.msra.mxu1 %v3938_v62  ;;  %v3987_v62 = vld [vmem:[%s4927_s1 + $0x778] sm:$0xff]  }
  0xcf   :  { %3639 = vmatprep.subr.bf16.mxu1 %v3940_v0 }
  0xd0   :  { %3618 = vmatpush3.bf16.msra.mxu0 %v3941_v1 }
  0xd1   :  { %3619 = vmatprep.subr.bf16.mxu0 %v3943_v3 }
  0xd2   :  { %3640 = vmatpush3.bf16.msra.mxu1 %v3942_v2  ;;  %v3986_v2 = vld [vmem:[%s4927_s1 + $0x7b0] sm:$0xff]  }
  0xd3   :  { %3641 = vmatprep.subr.bf16.mxu1 %v3944_v4 }
  0xd4   :  { %3620 = vmatpush3.bf16.msra.mxu0 %v3945_v5 }
  0xd5   :  { %3621 = vmatprep.subr.bf16.mxu0 %v3947_v7 }
  0xd6   :  { %3642 = vmatpush3.bf16.msra.mxu1 %v3946_v6 }
  0xd7   :  { %3643 = vmatprep.subr.bf16.mxu1 %v3948_v8  ;;  %v3988_v8 = vld [vmem:[%s4927_s1 + $0x7f8] sm:$0xff]  }
  0xd8   :  { %3622 = vmatpush3.bf16.msra.mxu0 %v3949_v9 }
  0xd9   :  { %3623 = vmatprep.subr.bf16.mxu0 %v3951_v11 }
  0xda   :  { %3644 = vmatpush3.bf16.msra.mxu1 %v3950_v10  ;;  %v3989_v10 = vld [vmem:[%s4927_s1 + $0x738] sm:$0xff]  }
  0xdb   :  { %3645 = vmatprep.subr.bf16.mxu1 %v3952_v13 }
  0xdc   :  { %3624 = vmatpush3.bf16.msra.mxu0 %v3953_v16 }
  0xdd   :  { %3625 = vmatprep.subr.bf16.mxu0 %v3955_v17 }
  0xde   :  { %3646 = vmatpush3.bf16.msra.mxu1 %v3954_v20 }
  0xdf   :  { %3647 = vmatprep.subr.bf16.mxu1 %v3956_v21 }
  0xe0   :  { %3626 = vmatpush3.bf16.msra.mxu0 %v3957_v24 }
  0xe1   :  { %3655 = vmatprep.subr.bf16.mxu0 %v3959_v27 }
  0xe2   :  { %3648 = vmatpush3.bf16.msra.mxu1 %v3958_v28 }
  0xe3   :  { %2826 = vmatmul.mubr.bf16.vlgmr.msra.gmra.mrb[24].mxu0 %v719_v26  ;;  %3677 = vmatprep.subr.bf16.mxu1 %v3960_v30 }
  0xe4   :  { %3656 = vmatpush3.bf16.msra.mxu0 %v3961_v31  ;;  %2905 = vmatprep.mubr.bf16.mxu0 %v740_v29 }
  0xe5   :  { %2866 = vmatmul.mubr.bf16.vlgmr.msra.gmra.mrb[24].mxu1 %v741_v32  ;;  %3657 = vmatprep.subr.bf16.mxu0 %v3963_v33 }
  0xe6   :  { %3678 = vmatpush3.bf16.msra.mxu1 %v3962_v34  ;;  %2945 = vmatprep.mubr.bf16.mxu1 %v744_v35 }
  0xe7   :  { %3679 = vmatprep.subr.bf16.mxu1 %v3964_v36 }
  0xe8   :  { %3658 = vmatpush3.bf16.msra.mxu0 %v3965_v37 }
  0xe9   :  { %3659 = vmatprep.subr.bf16.mxu0 %v3967_v38 }
  0xea   :  { %3680 = vmatpush3.bf16.msra.mxu1 %v3966_v39 }
  0xeb   :  { %3681 = vmatprep.subr.bf16.mxu1 %v3968_v40 }
  0xec   :  { %3660 = vmatpush3.bf16.msra.mxu0 %v3969_v42 }
  0xed   :  { %3661 = vmatprep.subr.bf16.mxu0 %v3971_v43 }
  0xee   :  { %3682 = vmatpush3.bf16.msra.mxu1 %v3970_v44 }
  0xef   :  { %3683 = vmatprep.subr.bf16.mxu1 %v3972_v45 }
  0xf0   :  { %3662 = vmatpush3.bf16.msra.mxu0 %v3973_v46 }
  0xf1   :  { %3663 = vmatprep.subr.bf16.mxu0 %v3975_v48 }
  0xf2   :  { %3684 = vmatpush3.bf16.msra.mxu1 %v3974_v47 }
  0xf3   :  { %3685 = vmatprep.subr.bf16.mxu1 %v3976_v49 }
  0xf4   :  { %3664 = vmatpush3.bf16.msra.mxu0 %v3977_v50 }
  0xf5   :  { %3665 = vmatprep.subr.bf16.mxu0 %v3979_v52 }
  0xf6   :  { %3686 = vmatpush3.bf16.msra.mxu1 %v3978_v51  ;;  %v3363_v59 = vpop.f32.mrb[0].mxu0 }
  0xf7   :  { %v3364_v61 = vpop.f32.mrb[1].mxu0  ;;  %3687 = vmatprep.subr.bf16.mxu1 %v3980_v53  ;;  %v3385_v63 = vpop.f32.mrb[0].mxu1 }
  0xf8   :  { %v3365_v0 = vadd.f32 %v3364_v61, %v3363_v59  ;;  %v3366_v1 = vpop.f32.mrb[2].mxu0  ;;  %3666 = vmatpush3.bf16.msra.mxu0 %v3981_v54  ;;  %v3386_v3 = vpop.f32.mrb[1].mxu1 }
  0xf9   :  { %v3367_v4 = vpop.f32.mrb[3].mxu0  ;;  %3667 = vmatprep.subr.bf16.mxu0 %v3983_v56  ;;  %v3387_v6 = vadd.f32 %v3386_v3, %v3385_v63  ;;  %v3388_v7 = vpop.f32.mrb[2].mxu1 }
  0xfa   :  { %v2348_v5 = vadd.f32 %v3365_v0, %v3081_v57  ;;  %3688 = vmatpush3.bf16.msra.mxu1 %v3982_v55  ;;  %v3389_v9 = vpop.f32.mrb[3].mxu1 }
  0xfb   :  { %3689 = vmatprep.subr.bf16.mxu1 %v3984_v58 }
  0xfc   :  { %v2388_v11 = vadd.f32 %v3387_v6, %v2348_v5  ;;  %3668 = vmatpush3.bf16.msra.mxu0 %v3985_v60 }
  0xfd   :  { %3669 = vmatprep.subr.bf16.mxu0 %v3987_v62 }
  0xfe   :  { %10 = vsyncpa [#allocation3], 0  ;;  %3690 = vmatpush3.bf16.msra.mxu1 %v3986_v2  ;;  %v3990_v13 = vld [vmem:[%s4927_s1 + $0x7b8] sm:$0xff]   ;;  %v742_v14 = vcombine.high %v726_v12, %v726_v12  ;;  %v3992_v38 = vld [vmem:[%s4929_s3] sm:$0xff]   ;;  %v4025_v39 = vmov 0.0   ;;  %vm4026_vm0 = vmmov 0  }
  0xff   :  { %3691 = vmatprep.subr.bf16.mxu1 %v3988_v8  ;;  %v3993_v40 = vld [vmem:[%s4929_s3 + $0x8] sm:$0xff]   ;;  %v3994_v42 = vld [vmem:[%s4929_s3 + $0x10] sm:$0xff]   ;;  %v3995_v43 = vld [vmem:[%s4929_s3 + $0x18] sm:$0xff]   ;;  %s4027_s26 = smov [#allocation2]  }
 0x100   :  { %3670 = vmatpush3.bf16.msra.mxu0 %v3989_v10  ;;  %v3996_v44 = vld [vmem:[%s4929_s3 + $0x20] sm:$0xff]   ;;  %v3997_v47 = vld [vmem:[%s4929_s3 + $0x28] sm:$0xff]   ;;  %v3998_v57 = vld [vmem:[%s4929_s3 + $0x30] sm:$0xff]   ;;  %s3073_s27 = sshll.u32 %s4027_s26, 4  ;;  %s3074_s27 = int_to_ptr.vmem [resolvable:$true] %s3073_s27 }
 0x101   :  { %3708 = vmatprep.subr.bf16.mxu0 %v4025_v39  ;;  %v3999_v59 = vld [vmem:[%s4929_s3 + $0x38] sm:$0xff]   ;;  %s4000_s28 = scalar_lea.vmem %s3074_s27, 32  ;;  %p4005_p1 = scmp.lt.s32.totalorder %s3074_s27, %s3074_s27 }
 0x102   :  { %3692 = vmatpush3.bf16.msra.mxu1 %v3990_v13  ;;  %p4001_p0 = scmp.ne.s32.totalorder %s3074_s27, %s4000_s28  ;;  %p4006_p2 = scmp.lt.s32.totalorder %s4000_s28, %s4000_s28 }
 0x103   :  { %2906 = vmatmul.mubr.bf16.vlgmr.msra.gmra.mrb[28].mxu0 %v726_v12 }
 0x104   :  { %3709 = vmatpush3.bf16.msra.mxu0 %v3992_v38  ;;  %3724 = vmatprep.mubr.msk.bf16.mxu0 %vm4026_vm0, %v4025_v39  ;;  %p4007_p3 = por %p4006_p2, %p4005_p1 }
 0x105   :  { %2946 = vmatmul.mubr.bf16.vlgmr.msra.gmra.mrb[28].mxu1 %v742_v14  ;;  %3710 = vmatprep.subr.bf16.mxu0 %v4025_v39 }
 0x106   :  { %p4008_p4 = pnand %p4007_p3, %p4001_p0 }
 0x108   :  { %3711 = vmatpush3.bf16.msra.mxu0 %v3993_v40 }
 0x109   :  { %3712 = vmatprep.subr.bf16.mxu0 %v4025_v39 }
 0x10c   :  { %3713 = vmatpush3.bf16.msra.mxu0 %v3994_v42 }
 0x10d   :  { %3714 = vmatprep.subr.bf16.mxu0 %v4025_v39 }
 0x110   :  { %3715 = vmatpush3.bf16.msra.mxu0 %v3995_v43 }
 0x111   :  { %3716 = vmatprep.subr.bf16.mxu0 %v4025_v39 }
 0x114   :  { %3717 = vmatpush3.bf16.msra.mxu0 %v3996_v44 }
 0x115   :  { %3718 = vmatprep.subr.bf16.mxu0 %v4025_v39 }
 0x116   :  { %v3407_v15 = vpop.f32.mrb[4].mxu0 }
 0x117   :  { %v3408_v16 = vpop.f32.mrb[5].mxu0  ;;  %v3429_v17 = vpop.f32.mrb[4].mxu1 }
 0x118   :  { %v3409_v18 = vadd.f32 %v3408_v16, %v3407_v15  ;;  %v3410_v20 = vpop.f32.mrb[6].mxu0  ;;  %v3430_v21 = vpop.f32.mrb[5].mxu1  ;;  %3719 = vmatpush3.bf16.msra.mxu0 %v3997_v47 }
 0x119   :  { %v3411_v22 = vpop.f32.mrb[7].mxu0  ;;  %v3431_v19 = vadd.f32 %v3430_v21, %v3429_v17  ;;  %v3432_v23 = vpop.f32.mrb[6].mxu1  ;;  %3720 = vmatprep.subr.bf16.mxu0 %v4025_v39 }
 0x11a   :  { %v2428_v41 = vadd.f32 %v3409_v18, %v2388_v11  ;;  %v3433_v24 = vpop.f32.mrb[7].mxu1 }
 0x11c   :  { %v2468_v25 = vadd.f32 %v3431_v19, %v2428_v41  ;;  %3721 = vmatpush3.bf16.msra.mxu0 %v3998_v57 }
 0x11d   :  { %3722 = vmatprep.subr.bf16.mxu0 %v4025_v39 }
 0x120   :  { %3723 = vmatpush3.bf16.msra.mxu0 %v3999_v59 }
 0x136   :  { %v3451_v26 = vpop.f32.mrb[8].mxu0 }
 0x137   :  { %v3452_v27 = vpop.f32.mrb[9].mxu0 }
 0x138   :  { %v3473_v28 = vpop.f32.mrb[8].mxu1  ;;  %v3453_v29 = vadd.f32 %v3452_v27, %v3451_v26  ;;  %v3454_v30 = vpop.f32.mrb[10].mxu0 }
 0x139   :  { %v3474_v31 = vpop.f32.mrb[9].mxu1  ;;  %v3455_v32 = vpop.f32.mrb[11].mxu0 }
 0x13a   :  { %v2508_v33 = vadd.f32 %v3453_v29, %v2468_v25  ;;  %v3475_v34 = vadd.f32 %v3474_v31, %v3473_v28  ;;  %v3476_v35 = vpop.f32.mrb[10].mxu1 }
 0x13b   :  { %v3477_v36 = vpop.f32.mrb[11].mxu1 }
 0x13c   :  { %v2548_v37 = vadd.f32 %v3475_v34, %v2508_v33 }
 0x156   :  { %v3495_v45 = vpop.f32.mrb[12].mxu0 }
 0x157   :  { %v3496_v46 = vpop.f32.mrb[13].mxu0 }
 0x158   :  { %v3517_v48 = vpop.f32.mrb[12].mxu1  ;;  %v3497_v49 = vadd.f32 %v3496_v46, %v3495_v45  ;;  %v3498_v50 = vpop.f32.mrb[14].mxu0  ;;  %v3338_v46 = vld [vmem:[%s4930_s4] ss:$0 sm:$0xff] }
 0x159   :  { %v3518_v51 = vpop.f32.mrb[13].mxu1  ;;  %v3499_v52 = vpop.f32.mrb[15].mxu0 }
 0x15a   :  { %v2588_v53 = vadd.f32 %v3497_v49, %v2548_v37  ;;  %v3519_v54 = vadd.f32 %v3518_v51, %v3517_v48  ;;  %v3520_v55 = vpop.f32.mrb[14].mxu1 }
 0x15b   :  { %v3521_v56 = vpop.f32.mrb[15].mxu1 }
 0x15c   :  { %v2628_v58 = vadd.f32 %v3519_v54, %v2588_v53 }
 0x176   :  { %v3539_v60 = vpop.f32.mrb[16].mxu0 }
 0x177   :  { %v3540_v61 = vpop.f32.mrb[17].mxu0 }
 0x178   :  { %v3561_v62 = vpop.f32.mrb[16].mxu1  ;;  %v3541_v63 = vadd.f32 %v3540_v61, %v3539_v60  ;;  %v3542_v0 = vpop.f32.mrb[18].mxu0 }
 0x179   :  { %v3562_v1 = vpop.f32.mrb[17].mxu1  ;;  %v3543_v2 = vpop.f32.mrb[19].mxu0 }
 0x17a   :  { %v2668_v3 = vadd.f32 %v3541_v63, %v2628_v58  ;;  %v3563_v4 = vadd.f32 %v3562_v1, %v3561_v62  ;;  %v3564_v5 = vpop.f32.mrb[18].mxu1 }
 0x17b   :  { %v3565_v6 = vpop.f32.mrb[19].mxu1 }
 0x17c   :  { %v2708_v7 = vadd.f32 %v3563_v4, %v2668_v3 }
 0x196   :  { %v3583_v8 = vpop.f32.mrb[20].mxu0 }
 0x197   :  { %v3584_v9 = vpop.f32.mrb[21].mxu0 }
 0x198   :  { %v3605_v10 = vpop.f32.mrb[20].mxu1  ;;  %v3585_v11 = vadd.f32 %v3584_v9, %v3583_v8  ;;  %v3586_v12 = vpop.f32.mrb[22].mxu0 }
 0x199   :  { %v3606_v13 = vpop.f32.mrb[21].mxu1  ;;  %v3587_v14 = vpop.f32.mrb[23].mxu0 }
 0x19a   :  { %v2748_v15 = vadd.f32 %v3585_v11, %v2708_v7  ;;  %v3607_v16 = vadd.f32 %v3606_v13, %v3605_v10  ;;  %v3608_v17 = vpop.f32.mrb[22].mxu1 }
 0x19b   :  { %v3609_v18 = vpop.f32.mrb[23].mxu1 }
 0x19c   :  { %v2788_v20 = vadd.f32 %v3607_v16, %v2748_v15 }
 0x1b6   :  { %v3627_v21 = vpop.f32.mrb[24].mxu0 }
 0x1b7   :  { %v3628_v22 = vpop.f32.mrb[25].mxu0 }
 0x1b8   :  { %v3649_v41 = vpop.f32.mrb[24].mxu1  ;;  %v3629_v19 = vadd.f32 %v3628_v22, %v3627_v21  ;;  %v3630_v23 = vpop.f32.mrb[26].mxu0 }
 0x1b9   :  { %v3650_v24 = vpop.f32.mrb[25].mxu1  ;;  %v3631_v25 = vpop.f32.mrb[27].mxu0 }
 0x1ba   :  { %v2828_v26 = vadd.f32 %v3629_v19, %v2788_v20  ;;  %v3651_v27 = vadd.f32 %v3650_v24, %v3649_v41  ;;  %v3652_v28 = vpop.f32.mrb[26].mxu1 }
 0x1bb   :  { %v3653_v29 = vpop.f32.mrb[27].mxu1 }
 0x1bc   :  { %v2868_v30 = vadd.f32 %v3651_v27, %v2828_v26 }
 0x1d6   :  { %v3671_v31 = vpop.f32.mrb[28].mxu0 }
 0x1d7   :  { %v3672_v32 = vpop.f32.mrb[29].mxu0 }
 0x1d8   :  { %v3693_v33 = vpop.f32.mrb[28].mxu1  ;;  %v3673_v34 = vadd.f32 %v3672_v32, %v3671_v31  ;;  %v3674_v35 = vpop.f32.mrb[30].mxu0 }
 0x1d9   :  { %v3694_v36 = vpop.f32.mrb[29].mxu1  ;;  %v3675_v37 = vpop.f32.mrb[31].mxu0 }
 0x1da   :  { %v2908_v38 = vadd.f32 %v3673_v34, %v2868_v30  ;;  %v3695_v39 = vadd.f32 %v3694_v36, %v3693_v33  ;;  %v3696_v40 = vpop.f32.mrb[30].mxu1 }
 0x1db   :  { %v3697_v42 = vpop.f32.mrb[31].mxu1 }
 0x1dc   :  { %v2948_v43 = vadd.f32 %v3695_v39, %v2908_v38 }
 0x1de   :  { %v2953_v44 = vmax.f32 %v2948_v43, 0.0 }
 0x1e0   :  { %v2954_v45 = vpack.c.bf16 %v2953_v44, %v2953_v44 }
 0x1e2   :  { %3725 = vmatmul.mubr.bf16.vlgmr.msra.gmra.mrb[32].mxu0 %v2954_v45 }
 0x2b5   :  { %v3060_v47 = vpop.f32.mrb[32].mxu0 }
 0x2b6   :  { %v3061_v48 = vadd.f32 %v3338_v46, %v3060_v47  ;;  %v3726_v49 = vpop.f32.mrb[33].mxu0 }
 0x2b7   :  { %v3063_v50 = vpop.f32.mrb[34].mxu0 }
 0x2b8   :  { %3066 = vst [vmem:[#allocation2] sm:$0x3] %v3061_v48  ;;  %v3727_v51 = vpop.f32.mrb[35].mxu0 }
 0x2b9   :  { %4011 = shalt.err (!%p4008_p4)
}
 0x2ba   :  { %s4012_s4 = scalar_lea.hbm %s4931_s5, 32 }
 0x2bb   :  { %p4013_p5 = scmp.ne.s32.totalorder %s4931_s5, %s4012_s4  ;;  %p4016_p6 = scmp.lt.u32.totalorder %s4012_s4, %s4931_s5 }
 0x2bd   :  { %p4018_p7 = pnand %p4016_p6, %p4013_p5 }
 0x2bf   :  { %4021 = shalt.err (!%p4018_p7)
}
 0x2c0   :  { %3076 = dma.vmem_to_hbm [thread:$0]  %s3074_s27, 32, %s4931_s5, [#allocation3]  }
 0x2c1   :  { %4022 = dma.done.wait [#allocation3], 32  }
 0x2c2   :  { %4023 = vsyncadd [#allocation3], 4294967264 }
 0x2c3   :  { %3080 = vsyncpa [#allocation3], 1 }

// kernel: simple_cnn_forward.2
= control target key start
LH: loop header
LB: loop body
LE: loop exit
PB: predicated region body
PF: predicated region fallthrough
CT: control target
= control target key end

     0   :  { %10 = vsyncpa [#allocation4], 0  ;;  %s13942_s0 = inlined_call_operand.vmem [shape: bf16[2,4,9,32], index: 0, kind: input, shape index: {}]   ;;  %s13943_s1 = inlined_call_operand.hbm [shape: bf16[3,32,1024], index: 1, kind: input, shape index: {}]   ;;  %s13944_s2 = inlined_call_operand.hbm [shape: f32[1,512], index: 2, kind: input, shape index: {}]   ;;  %s13945_s3 = inlined_call_operand.hbm [shape: bf16[3,512,1024], index: 3, kind: input, shape index: {}]   ;;  %s13946_s4 = inlined_call_operand.hbm [shape: f32[1,512], index: 4, kind: input, shape index: {}]   ;;  %s13947_s5 = inlined_call_operand.vmem [shape: bf16[2,8,512], index: 5, kind: output, shape index: {}]  }
   0x1   :  { %11 = vsyncpa [#allocation6], 0 }
   0x2   :  { %12 = vsyncpa [#allocation9], 0  ;;  %s10024_s18 = smov [#allocation5]   ;;  %s10025_s20 = smov [#allocation3]  }
   0x3   :  { %s33_s19 = sshll.u32 %s10024_s18, 4  ;;  %s20_s21 = sshll.u32 %s10025_s20, 4  ;;  %s34_s19 = int_to_ptr.vmem [resolvable:$true] %s33_s19  ;;  %s10061_s21 = int_to_ptr.vmem [resolvable:$true] %s20_s21 }
   0x4   :  { %s9930_s24 = scalar_lea.hbm %s13944_s2, 64 }
   0x5   :  { %p9931_p0 = scmp.ne.s32.totalorder %s13944_s2, %s9930_s24  ;;  %p9934_p1 = scmp.lt.u32.totalorder %s9930_s24, %s13944_s2 }
   0x7   :  { %p9936_p2 = pnand %p9934_p1, %p9931_p0 }
   0x9   :  { %9939 = shalt.err (!%p9936_p2)
}
   0xa   :  { %s9940_s29 = scalar_lea.vmem %s34_s19, 64  ;;  %p9945_p4 = scmp.lt.s32.totalorder %s34_s19, %s34_s19 }
   0xb   :  { %p9941_p3 = scmp.ne.s32.totalorder %s34_s19, %s9940_s29  ;;  %p9946_p5 = scmp.lt.s32.totalorder %s9940_s29, %s9940_s29 }
   0xd   :  { %p9947_p6 = por %p9946_p5, %p9945_p4 }
   0xf   :  { %p9948_p7 = pnand %p9947_p6, %p9941_p3 }
  0x11   :  { %9951 = shalt.err (!%p9948_p7)
}
  0x12   :  { %36 = dma.hbm_to_vmem [thread:$0]  %s13944_s2, 64, %s34_s19, [#allocation6]  }
  0x13   :  { %s9952_s9 = scalar_lea.hbm %s13943_s1, 6144 }
  0x14   :  { %p9953_p8 = scmp.ne.s32.totalorder %s13943_s1, %s9952_s9  ;;  %p9956_p9 = scmp.lt.u32.totalorder %s9952_s9, %s13943_s1 }
  0x16   :  { %p9958_p10 = pnand %p9956_p9, %p9953_p8 }
  0x18   :  { %9961 = shalt.err (!%p9958_p10)
}
  0x19   :  { %s9962_s14 = scalar_lea.vmem %s10061_s21, 6144  ;;  %p9967_p12 = scmp.lt.s32.totalorder %s10061_s21, %s10061_s21 }
  0x1a   :  { %p9963_p11 = scmp.ne.s32.totalorder %s10061_s21, %s9962_s14  ;;  %p9968_p13 = scmp.lt.s32.totalorder %s9962_s14, %s9962_s14 }
  0x1c   :  { %p9969_p0 = por %p9968_p13, %p9967_p12 }
  0x1e   :  { %p9970_p1 = pnand %p9969_p0, %p9963_p11 }
  0x20   :  { %9973 = shalt.err (!%p9970_p1)
}
  0x21   :  { %s10026_s2 = smov 512   ;;  %s10027_s15 = smov 32  }
  0x22   :  { %26 = dma.hbm_to_vmem [thread:$0]  %s13943_s1, 6144, %s10061_s21, [#allocation4], %s10026_s2, %s10026_s2, %s10027_s15  }
  0x23   :  { %s10028_s18 = smov [#allocation7]   ;;  %s10029_s20 = smov [#allocation8]  }
  0x24   :  { %s42_s19 = sshll.u32 %s10028_s18, 4  ;;  %s55_s22 = sshll.u32 %s10029_s20, 4  ;;  %s43_s19 = int_to_ptr.vmem [resolvable:$true] %s42_s19  ;;  %s56_s22 = int_to_ptr.vmem [resolvable:$true] %s55_s22 }
  0x25   :  { %s9974_s25 = scalar_lea.hbm %s13945_s3, 98304 }
  0x26   :  { %p9975_p2 = scmp.ne.s32.totalorder %s13945_s3, %s9974_s25  ;;  %p9978_p3 = scmp.lt.u32.totalorder %s9974_s25, %s13945_s3 }
  0x28   :  { %p9980_p4 = pnand %p9978_p3, %p9975_p2 }
  0x2a   :  { %9983 = shalt.err (!%p9980_p4)
}
  0x2b   :  { %s9984_s1 = scalar_lea.vmem %s43_s19, 98304  ;;  %p9989_p6 = scmp.lt.s32.totalorder %s43_s19, %s43_s19 }
  0x2c   :  { %p9985_p5 = scmp.ne.s32.totalorder %s43_s19, %s9984_s1  ;;  %p9990_p7 = scmp.lt.s32.totalorder %s9984_s1, %s9984_s1 }
  0x2e   :  { %p9991_p8 = por %p9990_p7, %p9989_p6 }
  0x30   :  { %p9992_p9 = pnand %p9991_p8, %p9985_p5 }
  0x32   :  { %9995 = shalt.err (!%p9992_p9)
}
  0x33   :  { %48 = dma.hbm_to_vmem [thread:$0]  %s13945_s3, 98304, %s43_s19, [#allocation6], %s10026_s2, %s10026_s2, %s10027_s15  }
  0x34   :  { %s9996_s8 = scalar_lea.hbm %s13946_s4, 64 }
  0x35   :  { %p9997_p10 = scmp.ne.s32.totalorder %s13946_s4, %s9996_s8  ;;  %p10000_p11 = scmp.lt.u32.totalorder %s9996_s8, %s13946_s4 }
  0x37   :  { %p10002_p12 = pnand %p10000_p11, %p9997_p10 }
  0x39   :  { %10005 = shalt.err (!%p10002_p12)
}
  0x3a   :  { %s10006_s13 = scalar_lea.vmem %s56_s22, 64  ;;  %p10011_p0 = scmp.lt.s32.totalorder %s56_s22, %s56_s22 }
  0x3b   :  { %p10007_p13 = scmp.ne.s32.totalorder %s56_s22, %s10006_s13  ;;  %p10012_p1 = scmp.lt.s32.totalorder %s10006_s13, %s10006_s13 }
  0x3d   :  { %p10013_p2 = por %p10012_p1, %p10011_p0 }
  0x3f   :  { %p10014_p3 = pnand %p10013_p2, %p10007_p13 }
  0x41   :  { %10017 = shalt.err (!%p10014_p3)
}
  0x42   :  { %58 = dma.hbm_to_vmem [thread:$0]  %s13946_s4, 64, %s56_s22, [#allocation9]  }
  0x43   :  { %10018 = dma.done.wait [#allocation4], 6144  }
  0x44   :  { %10019 = vsyncadd [#allocation4], 4294961152 }
  0x45   :  { %10020 = dma.done.wait [#allocation6], 98368  }
  0x46   :  { %10021 = vsyncadd [#allocation6], 4294868928 }
  0x47   :  { %10022 = dma.done.wait [#allocation9], 64  }
  0x48   :  { %10023 = vsyncadd [#allocation9], 4294967232  ;;  %v10030_v0 = vmov 0   ;;  %v156_v1 = vld [vmem:[#allocation3 + $0x80] sm:$0xff]  ;;  %v157_v3 = vld [vmem:[#allocation3 + $0x88] sm:$0xff]  ;;  %vm252_vm0 = vcmask 261120  }
  0x49   :  { %297 = vmatprep.mubr.bf16.mxu0 %v10030_v0  ;;  %370 = vmatprep.mubr.bf16.mxu1 %v10030_v0  ;;  %v160_v2 = vld [vmem:[#allocation3 + $0xa0] sm:$0xff]  ;;  %v161_v5 = vld [vmem:[#allocation3 + $0xa8] sm:$0xff]  ;;  %v158_v15 = vld [vmem:[#allocation3 + $0x90] sm:$0xff]  ;;  %vm121_vm1 = vsmask.f32 3328  ;;  %vm1541_vm4 = vcmask 1040384  }
  0x4a   :  { %v8723_v4 = vcombine.high %v156_v1, %v160_v2  ;;  %v8722_v6 = vcombine.low %v156_v1, %v160_v2  ;;  %v164_v7 = vld [vmem:[#allocation3 + $0xc0] sm:$0xff]  ;;  %v8725_v9 = vcombine.high %v157_v3, %v161_v5  ;;  %v8724_v10 = vcombine.low %v157_v3, %v161_v5  ;;  %v165_v12 = vld [vmem:[#allocation3 + $0xc8] sm:$0xff]  ;;  %v162_v16 = vld [vmem:[#allocation3 + $0xb0] sm:$0xff] }
  0x4b   :  { %v168_v8 = vld [vmem:[#allocation3 + $0xe0] sm:$0xff]  ;;  %v169_v13 = vld [vmem:[#allocation3 + $0xe8] sm:$0xff]  ;;  %v8727_v21 = vcombine.high %v158_v15, %v162_v16  ;;  %v166_v23 = vld [vmem:[#allocation3 + $0xd0] sm:$0xff]  ;;  %v8726_v25 = vcombine.low %v158_v15, %v162_v16  ;;  %vm122_vm2 = vsmask.f32 7440  ;;  %v14644_v5 = vmov 0 }
  0x4c   :  { %v8731_v11 = vcombine.high %v164_v7, %v168_v8  ;;  %265 = vmatprep.subr.bf16.mxu0 %v8723_v4  ;;  %v8733_v14 = vcombine.high %v165_v12, %v169_v13  ;;  %338 = vmatprep.subr.bf16.mxu1 %v8725_v9  ;;  %v8730_v17 = vcombine.low %v164_v7, %v168_v8  ;;  %v8711_v18 = vld [vmem:[%s13942_s0 + $0x8] sm:$0xf]  ;;  %v170_v24 = vld [vmem:[#allocation3 + $0xf0] sm:$0xff]  ;;  %v10129_v26 = vld [vmem:[%s13942_s0] sm:$0xf]  ;;  %vm1544_vm6 = vcmask 1044484  }
  0x4d   :  { %266 = vmatpush1.bf16.msra.mxu0 %v8722_v6  ;;  %v8712_v19 = vld [vmem:[%s13942_s0 + $0x28] sm:$0xf]  ;;  %339 = vmatpush1.bf16.msra.mxu1 %v8724_v10  ;;  %v8732_v20 = vcombine.low %v165_v12, %v169_v13  ;;  %v159_v27 = vld [vmem:[#allocation3 + $0x98] sm:$0xff]  ;;  %v10134_v29 = vld [vmem:[%s13942_s0 + $0x20] sm:$0xf]  ;;  %v8735_v32 = vcombine.high %v166_v23, %v170_v24  ;;  %v8734_v37 = vcombine.low %v166_v23, %v170_v24  ;;  %v125_v38 = vshrl.u32 %v10129_v26, 16 }
  0x4e   :  { %267 = vmatprep.subr.bf16.mxu0 %v8731_v11  ;;  %340 = vmatprep.subr.bf16.mxu1 %v8733_v14  ;;  %v10124_v22 = vcombine.low %v8711_v18, %v8712_v19  ;;  %v163_v28 = vld [vmem:[#allocation3 + $0xb8] sm:$0xff]  ;;  %v10136_v34 = vld [vmem:[#allocation3] sm:$0xff]  ;;  %v8713_v36 = vld [vmem:[%s13942_s0 + $0x10] sm:$0xf]  ;;  %v128_v41 = vshll.u32 %v10129_v26, 16  ;;  %v139_v42 = vshrl.u32 %v10134_v29, 16 }
  0x4f   :  { %v167_v30 = vld [vmem:[#allocation3 + $0xd8] sm:$0xff]  ;;  %v8729_v33 = vcombine.high %v159_v27, %v163_v28  ;;  %v10138_v35 = vld [vmem:[#allocation3 + $0x20] sm:$0xff]  ;;  %v8728_v39 = vcombine.low %v159_v27, %v163_v28  ;;  %v8714_v40 = vld [vmem:[%s13942_s0 + $0x30] sm:$0xf]  ;;  %v142_v43 = vshll.u32 %v10134_v29, 16  ;;  %v127_v50 = vrot.slane %v125_v38, 4 }
  0x50   :  { %v171_v31 = vld [vmem:[#allocation3 + $0xf8] sm:$0xff]  ;;  %v8755_v45 = vcombine.high %v10136_v34, %v10138_v35  ;;  %v10158_v46 = vld [vmem:[#allocation3 + $0x8] sm:$0xff]  ;;  %v10162_v48 = vcombine.low %v8713_v36, %v8714_v40  ;;  %v130_v51 = vrot.slane %v128_v41, 5  ;;  %v141_v52 = vrot.slane %v139_v42, 4  ;;  %v119_v54 = vld [vmem:[%s13942_s0 + $0x4] sm:$0x1] }
  0x51   :  { %268 = vmatpush1.bf16.msra.mxu0 %v8730_v17  ;;  %341 = vmatpush1.bf16.msra.mxu1 %v8732_v20  ;;  %v8737_v44 = vcombine.high %v167_v30, %v171_v31  ;;  %v10160_v47 = vld [vmem:[#allocation3 + $0x28] sm:$0xff]  ;;  %v8736_v49 = vcombine.low %v167_v30, %v171_v31  ;;  %v144_v53 = vrot.slane %v142_v43, 5  ;;  %v120_v55 = vld [vmem:[%s13942_s0 + $0x24] sm:$0x1]  ;;  %v8715_v57 = vld [vmem:[%s13942_s0 + $0x18] sm:$0xf]  ;;  %v8754_v11 = vcombine.low %v10136_v34, %v10138_v35 }
  0x52   :  { %411 = vmatprep.subr.bf16.mxu0 %v8727_v21  ;;  %484 = vmatprep.subr.bf16.mxu1 %v8729_v33  ;;  %v8757_v56 = vcombine.high %v10158_v46, %v10160_v47  ;;  %v8716_v58 = vld [vmem:[%s13942_s0 + $0x38] sm:$0xf]  ;;  %v131_v59 = vor.u32 %v130_v51, %v127_v50  ;;  %v134_v60 = vshll.u32 %v119_v54, 16  ;;  %v148_v62 = vshll.u32 %v120_v55, 16  ;;  %vm10186_vm3 = vmor %vm121_vm1, %vm122_vm2  ;;  %v111_v9 = vld [vmem:[#allocation3 + $0x40] sm:$0xff] }
  0x53   :  { %v145_v61 = vor.u32 %v144_v53, %v141_v52  ;;  %v10184_v63 = vcombine.low %v8715_v57, %v8716_v58  ;;  %v14645_v5 = vsel %vm10186_vm3, 4294967295, %v14644_v5  ;;  %v115_v10 = vld [vmem:[#allocation3 + $0x60] sm:$0xff]  ;;  %v112_v12 = vld [vmem:[#allocation3 + $0x48] sm:$0xff]  ;;  %v8756_v15 = vcombine.low %v10158_v46, %v10160_v47  ;;  %v105_v16 = vld [vmem:[#allocation3 + $0x10] sm:$0xff] }
  0x54   :  { %8738 = vmatmul.mubr.msk.bf16.vlgmr.msra.gmra.mrb[0].mxu0 %vm252_vm0, %v10124_v22  ;;  %8742 = vmatmul.mubr.msk.bf16.vlgmr.msra.gmra.mrb[0].mxu1 %vm252_vm0, %v10124_v22  ;;  %v132_v1 = vrot.slane %v131_v59, 4  ;;  %v136_v2 = vrot.slane %v134_v60, 5  ;;  %v150_v4 = vrot.slane %v148_v62, 5  ;;  %14646 = vst [vmem:[#allocation13_spill] sm:$0xff] %v14645_v5  ;;  %v116_v13 = vld [vmem:[#allocation3 + $0x68] sm:$0xff]  ;;  %v8763_v14 = vcombine.high %v111_v9, %v115_v10  ;;  %v109_v17 = vld [vmem:[#allocation3 + $0x30] sm:$0xff] }
  0x55   :  { %412 = vmatpush1.bf16.msra.mxu0 %v8726_v25  ;;  %307 = vmatprep.mubr.bf16.mxu0 %v10030_v0  ;;  %v146_v3 = vrot.slane %v145_v61, 4  ;;  %v8765_v18 = vcombine.high %v112_v12, %v116_v13  ;;  %v8762_v19 = vcombine.low %v111_v9, %v115_v10  ;;  %v106_v20 = vld [vmem:[#allocation3 + $0x18] sm:$0xff]  ;;  %v8759_v23 = vcombine.high %v105_v16, %v109_v17  ;;  %v113_v28 = vld [vmem:[#allocation3 + $0x50] sm:$0xff]  ;;  %v968_v36 = vld [vmem:[#allocation3 + $0x100] sm:$0xff] }
  0x56   :  { %380 = vmatprep.mubr.bf16.mxu1 %v10030_v0  ;;  %413 = vmatprep.subr.bf16.mxu0 %v8735_v32  ;;  %v137_v6 = vsel %vm10186_vm3, %v132_v1, %v136_v2  ;;  %v110_v21 = vld [vmem:[#allocation3 + $0x38] sm:$0xff]  ;;  %v8764_v24 = vcombine.low %v112_v12, %v116_v13  ;;  %v8717_v27 = vcombine.low %v10129_v26, %v10134_v29  ;;  %v117_v30 = vld [vmem:[#allocation3 + $0x70] sm:$0xff]  ;;  %v969_v40 = vld [vmem:[#allocation3 + $0x108] sm:$0xff]  ;;  %vm1542_vm5 = vsmask.f32 256 }
  0x57   :  { %485 = vmatpush1.bf16.msra.mxu1 %v8728_v39  ;;  %v151_v7 = vsel %vm10186_vm3, %v146_v3, %v150_v4  ;;  %v8761_v25 = vcombine.high %v106_v20, %v110_v21  ;;  %v8758_v31 = vcombine.low %v105_v16, %v109_v17  ;;  %v114_v32 = vld [vmem:[#allocation3 + $0x58] sm:$0xff]  ;;  %v8767_v34 = vcombine.high %v113_v28, %v117_v30  ;;  %v973_v41 = vld [vmem:[#allocation3 + $0x128] sm:$0xff]  ;;  %v976_v43 = vld [vmem:[#allocation3 + $0x140] sm:$0xff] }
  0x58   :  { %486 = vmatprep.subr.bf16.mxu1 %v8737_v44  ;;  %v10200_v8 = vcombine.low %v137_v6, %v151_v7  ;;  %v118_v33 = vld [vmem:[#allocation3 + $0x78] sm:$0xff]  ;;  %v8760_v35 = vcombine.low %v106_v20, %v110_v21  ;;  %v8766_v39 = vcombine.low %v113_v28, %v117_v30  ;;  %v8794_v42 = vcombine.high %v969_v40, %v973_v41  ;;  %v980_v44 = vld [vmem:[#allocation3 + $0x160] sm:$0xff]  ;;  %v977_v46 = vld [vmem:[#allocation3 + $0x148] sm:$0xff] }
  0x59   :  { %414 = vmatpush1.bf16.msra.mxu0 %v8734_v37  ;;  %v972_v37 = vld [vmem:[#allocation3 + $0x120] sm:$0xff]  ;;  %v8769_v38 = vcombine.high %v114_v32, %v118_v33  ;;  %v8768_v29 = vcombine.low %v114_v32, %v118_v33  ;;  %v981_v47 = vld [vmem:[#allocation3 + $0x168] sm:$0xff]  ;;  %v8793_v50 = vcombine.low %v969_v40, %v973_v41  ;;  %v970_v51 = vld [vmem:[#allocation3 + $0x110] sm:$0xff]  ;;  %v8799_v54 = vcombine.low %v976_v43, %v980_v44 }
  0x5a   :  { %640 = vmatprep.subr.bf16.mxu0 %v8755_v45  ;;  %v8792_v26 = vcombine.high %v968_v36, %v972_v37  ;;  %v8791_v45 = vcombine.low %v968_v36, %v972_v37  ;;  %v974_v52 = vld [vmem:[#allocation3 + $0x130] sm:$0xff]  ;;  %v8802_v53 = vcombine.high %v977_v46, %v981_v47  ;;  %v971_v55 = vld [vmem:[#allocation3 + $0x118] sm:$0xff]  ;;  %v8801_v58 = vcombine.low %v977_v46, %v981_v47  ;;  %v8786_v62 = vld [vmem:[%s13942_s0 + $0x8] sm:$0xf] }
  0x5b   :  { %487 = vmatpush1.bf16.msra.mxu1 %v8736_v49  ;;  %v8800_v49 = vcombine.high %v976_v43, %v980_v44  ;;  %v8796_v57 = vcombine.high %v970_v51, %v974_v52  ;;  %v982_v60 = vld [vmem:[#allocation3 + $0x170] sm:$0xff]  ;;  %v8795_v61 = vcombine.low %v970_v51, %v974_v52  ;;  %v979_v1 = vld [vmem:[#allocation3 + $0x158] sm:$0xff]  ;;  %v8788_v3 = vld [vmem:[%s13942_s0 + $0x28] sm:$0xf]  ;;  %v937_v7 = vshrl.u32 %v8786_v62, 16 }
  0x5c   :  { %8739 = vmatmul.mubr.msk.bf16.gmra.mrb[4].mxu0 %vm252_vm0, %v10162_v48  ;;  %8743 = vmatmul.mubr.msk.bf16.gmra.mrb[4].mxu1 %vm252_vm0, %v10162_v48  ;;  %v983_v2 = vld [vmem:[#allocation3 + $0x178] sm:$0xff]  ;;  %v951_v12 = vshrl.u32 %v8788_v3, 16  ;;  %v954_v13 = vshll.u32 %v8788_v3, 16  ;;  %v8789_v20 = vld [vmem:[%s13942_s0 + $0x2c] sm:$0x1]  ;;  %v1977_v46 = vld [vmem:[#allocation7 + $0x8a0] sm:$0xff] }
  0x5d   :  { %317 = vmatprep.mubr.bf16.mxu0 %v10030_v0  ;;  %390 = vmatprep.mubr.bf16.mxu1 %v10030_v0  ;;  %v8806_v9 = vcombine.high %v979_v1, %v983_v2  ;;  %v1962_v37 = vld [vmem:[#allocation7 + $0x828] sm:$0xff]  ;;  %vm1545_vm7 = vsmask.f32 4352  ;;  %vm1543_vm8 = vmand %vm1541_vm4, %vm1542_vm5  ;;  %vm1661_vm11 = vcmask 1043456   ;;  %vm1662_vm12 = vsmask.f32 7938 }
  0x5e   :  { %713 = vmatprep.subr.bf16.mxu1 %v8757_v56  ;;  %v975_v56 = vld [vmem:[#allocation3 + $0x138] sm:$0xff]  ;;  %v953_v17 = vrot.slane %v951_v12, 4  ;;  %v1966_v41 = vld [vmem:[#allocation7 + $0x848] sm:$0xff]  ;;  %vm1546_vm9 = vmand %vm1544_vm6, %vm1545_vm7  ;;  %vm1664_vm13 = vcmask 1047556   ;;  %vm1665_vm14 = vsmask.f32 7954 }
  0x5f   :  { %v8798_v59 = vcombine.high %v971_v55, %v975_v56  ;;  %v8797_v6 = vcombine.low %v971_v55, %v975_v56  ;;  %v1974_v47 = vld [vmem:[#allocation7 + $0x888] sm:$0xff]  ;;  %v1985_v55 = vld [vmem:[#allocation7 + $0x8e0] sm:$0xff]  ;;  %vm10542_vm10 = vmor %vm1546_vm9, %vm1543_vm8 }
  0x60   :  { %v1982_v56 = vld [vmem:[#allocation7 + $0x8c8] sm:$0xff]  ;;  %vm10819_vm15 = vmand %vm1661_vm11, %vm1662_vm12 }
  0x61   :  { %v1994_v3 = vld [vmem:[#allocation7 + $0x928] sm:$0xff] }
  0x64   :  { %8740 = vmatmul.mubr.msk.bf16.gmra.mrb[8].mxu0 %vm252_vm0, %v10184_v63  ;;  %8744 = vmatmul.mubr.msk.bf16.gmra.mrb[8].mxu1 %vm252_vm0, %v10184_v63 }
  0x65   :  { %327 = vmatprep.mubr.bf16.mxu0 %v10030_v0  ;;  %400 = vmatprep.mubr.bf16.mxu1 %v10030_v0 }
  0x6c   :  { %8741 = vmatmul.mubr.msk.bf16.gmra.mrb[12].mxu0 %vm252_vm0, %v10200_v8  ;;  %8745 = vmatmul.mubr.msk.bf16.gmra.mrb[12].mxu1 %vm252_vm0, %v10200_v8 }
  0x6d   :  { %443 = vmatprep.mubr.bf16.mxu0 %v10030_v0  ;;  %516 = vmatprep.mubr.bf16.mxu1 %v10030_v0 }
  0x74   :  { %8746 = vmatmul.mubr.msk.bf16.vlgmr.msra.gmra.mrb[16].mxu0 %vm252_vm0, %v10124_v22  ;;  %8750 = vmatmul.mubr.msk.bf16.vlgmr.msra.gmra.mrb[16].mxu1 %vm252_vm0, %v10124_v22 }
  0x75   :  { %641 = vmatpush1.bf16.msra.mxu0 %v8754_v11  ;;  %453 = vmatprep.mubr.bf16.mxu0 %v10030_v0  ;;  %v940_v11 = vshll.u32 %v8786_v62, 16  ;;  %v1993_v62 = vld [vmem:[#allocation7 + $0x920] sm:$0xff] }
  0x76   :  { %526 = vmatprep.mubr.bf16.mxu1 %v10030_v0  ;;  %642 = vmatprep.subr.bf16.mxu0 %v8763_v14  ;;  %v8805_v14 = vcombine.low %v979_v1, %v983_v2  ;;  %v1990_v1 = vld [vmem:[#allocation7 + $0x908] sm:$0xff] }
  0x77   :  { %714 = vmatpush1.bf16.msra.mxu1 %v8756_v15  ;;  %v939_v15 = vrot.slane %v937_v7, 4  ;;  %v942_v16 = vrot.slane %v940_v11, 5  ;;  %v10394_v7 = vcombine.high %v1990_v1, %v1994_v3  ;;  %v1998_v11 = vld [vmem:[#allocation7 + $0x948] sm:$0xff] }
  0x78   :  { %715 = vmatprep.subr.bf16.mxu1 %v8765_v18  ;;  %v956_v18 = vrot.slane %v954_v13, 5  ;;  %v2002_v13 = vld [vmem:[#allocation7 + $0x968] sm:$0xff] }
  0x79   :  { %643 = vmatpush1.bf16.msra.mxu0 %v8762_v19  ;;  %v8787_v19 = vld [vmem:[%s13942_s0 + $0xc] sm:$0x1]  ;;  %v943_v21 = vor.u32 %v942_v16, %v939_v15  ;;  %14666 = vst [vmem:[#allocation33_spill] sm:$0xff] %v10394_v7  ;;  %v10404_v15 = vcombine.low %v1998_v11, %v2002_v13  ;;  %v10406_v16 = vcombine.high %v1998_v11, %v2002_v13 }
  0x7a   :  { %786 = vmatprep.subr.bf16.mxu0 %v8759_v23  ;;  %v946_v23 = vshll.u32 %v8787_v19, 16  ;;  %v2006_v19 = vld [vmem:[#allocation7 + $0x988] sm:$0xff] }
  0x7b   :  { %716 = vmatpush1.bf16.msra.mxu1 %v8764_v24  ;;  %v957_v24 = vor.u32 %v956_v18, %v953_v17  ;;  %14669 = vst [vmem:[#allocation36_spill] sm:$0xff] %v10404_v15  ;;  %14670 = vst [vmem:[#allocation37_spill] sm:$0xff] %v10406_v16  ;;  %v2005_v17 = vld [vmem:[#allocation7 + $0x980] sm:$0xff] }
  0x7c   :  { %8747 = vmatmul.mubr.msk.bf16.gmra.mrb[20].mxu0 %vm252_vm0, %v10162_v48  ;;  %859 = vmatprep.subr.bf16.mxu1 %v8761_v25  ;;  %v960_v25 = vshll.u32 %v8789_v20, 16  ;;  %v948_v28 = vrot.slane %v946_v23, 5  ;;  %v2009_v18 = vld [vmem:[#allocation7 + $0x9a0] sm:$0xff] }
  0x7d   :  { %8751 = vmatmul.mubr.msk.bf16.gmra.mrb[20].mxu1 %vm252_vm0, %v10162_v48  ;;  %463 = vmatprep.mubr.bf16.mxu0 %v10030_v0  ;;  %v958_v30 = vrot.slane %v957_v24, 4  ;;  %v10412_v20 = vcombine.high %v2005_v17, %v2009_v18  ;;  %v10414_v23 = vcombine.low %v2005_v17, %v2009_v18  ;;  %v2045_v18 = vld [vmem:[#allocation7 + $0xac0] sm:$0xff] }
  0x7e   :  { %536 = vmatprep.mubr.bf16.mxu1 %v10030_v0 }
  0x7f   :  { %14671 = vst [vmem:[#allocation38_spill] sm:$0xff] %v10412_v20  ;;  %14672 = vst [vmem:[#allocation39_spill] sm:$0xff] %v10414_v23 }
  0x84   :  { %8748 = vmatmul.mubr.msk.bf16.gmra.mrb[24].mxu0 %vm252_vm0, %v10184_v63 }
  0x85   :  { %8752 = vmatmul.mubr.msk.bf16.gmra.mrb[24].mxu1 %vm252_vm0, %v10184_v63  ;;  %473 = vmatprep.mubr.bf16.mxu0 %v10030_v0 }
  0x86   :  { %546 = vmatprep.mubr.bf16.mxu1 %v10030_v0 }
  0x8c   :  { %8749 = vmatmul.mubr.msk.bf16.gmra.mrb[28].mxu0 %vm252_vm0, %v10200_v8 }
  0x8d   :  { %8753 = vmatmul.mubr.msk.bf16.gmra.mrb[28].mxu1 %vm252_vm0, %v10200_v8  ;;  %672 = vmatprep.mubr.bf16.mxu0 %v10030_v0 }
  0x8e   :  { %745 = vmatprep.mubr.bf16.mxu1 %v10030_v0 }
  0x94   :  { %8770 = vmatmul.mubr.msk.bf16.vlgmr.msra.gmra.mrb[0].mxu0 %vm252_vm0, %v8717_v27 }
  0x95   :  { %8774 = vmatmul.mubr.msk.bf16.vlgmr.msra.gmra.mrb[0].mxu1 %vm252_vm0, %v8717_v27  ;;  %787 = vmatpush1.bf16.msra.mxu0 %v8758_v31  ;;  %v962_v31 = vrot.slane %v960_v25, 5 }
  0x96   :  { %682 = vmatprep.mubr.bf16.mxu0 %v10030_v0  ;;  %755 = vmatprep.mubr.bf16.mxu1 %v10030_v0 }
  0x97   :  { %788 = vmatprep.subr.bf16.mxu0 %v8767_v34  ;;  %860 = vmatpush1.bf16.msra.mxu1 %v8760_v35  ;;  %v963_v33 = vsel %vm10186_vm3, %v958_v30, %v962_v31  ;;  %v1958_v35 = vld [vmem:[#allocation7 + $0x808] sm:$0xff] }
  0x98   :  { %861 = vmatprep.subr.bf16.mxu1 %v8769_v38  ;;  %v10346_v40 = vcombine.high %v1958_v35, %v1962_v37  ;;  %v2014_v30 = vld [vmem:[#allocation7 + $0x9c8] sm:$0xff] }
  0x99   :  { %789 = vmatpush1.bf16.msra.mxu0 %v8766_v39  ;;  %v10344_v39 = vcombine.low %v1958_v35, %v1962_v37  ;;  %v2025_v35 = vld [vmem:[#allocation7 + $0xa20] sm:$0xff]  ;;  %v2022_v37 = vld [vmem:[#allocation7 + $0xa08] sm:$0xff] }
  0x9a   :  { %1067 = vmatprep.subr.bf16.mxu0 %v8792_v26  ;;  %14650 = vst [vmem:[#allocation17_spill] sm:$0xff] %v10346_v40 }
  0x9b   :  { %862 = vmatpush1.bf16.msra.mxu1 %v8768_v29  ;;  %14649 = vst [vmem:[#allocation16_spill] sm:$0xff] %v10344_v39  ;;  %v1970_v29 = vld [vmem:[#allocation7 + $0x868] sm:$0xff] }
  0x9c   :  { %8771 = vmatmul.mubr.msk.bf16.gmra.mrb[4].mxu0 %vm252_vm0, %v10124_v22  ;;  %1140 = vmatprep.subr.bf16.mxu1 %v8794_v42  ;;  %v10356_v43 = vcombine.low %v1966_v41, %v1970_v29  ;;  %v10358_v44 = vcombine.high %v1966_v41, %v1970_v29 }
  0x9d   :  { %8775 = vmatmul.mubr.msk.bf16.gmra.mrb[4].mxu1 %vm252_vm0, %v10124_v22  ;;  %692 = vmatprep.mubr.bf16.mxu0 %v10030_v0 }
  0x9e   :  { %765 = vmatprep.mubr.bf16.mxu1 %v10030_v0  ;;  %14653 = vst [vmem:[#allocation20_spill] sm:$0xff] %v10356_v43  ;;  %14654 = vst [vmem:[#allocation21_spill] sm:$0xff] %v10358_v44 }
  0xa4   :  { %8772 = vmatmul.mubr.msk.bf16.gmra.mrb[8].mxu0 %vm252_vm0, %v10162_v48 }
  0xa5   :  { %8776 = vmatmul.mubr.msk.bf16.gmra.mrb[8].mxu1 %vm252_vm0, %v10162_v48  ;;  %702 = vmatprep.mubr.bf16.mxu0 %v10030_v0 }
  0xa6   :  { %775 = vmatprep.mubr.bf16.mxu1 %v10030_v0 }
  0xac   :  { %8773 = vmatmul.mubr.msk.bf16.gmra.mrb[12].mxu0 %vm252_vm0, %v10184_v63 }
  0xad   :  { %8777 = vmatmul.mubr.msk.bf16.gmra.mrb[12].mxu1 %vm252_vm0, %v10184_v63  ;;  %818 = vmatprep.mubr.bf16.mxu0 %v10030_v0 }
  0xae   :  { %891 = vmatprep.mubr.bf16.mxu1 %v10030_v0 }
  0xb4   :  { %8778 = vmatmul.mubr.msk.bf16.vlgmr.msra.gmra.mrb[16].mxu0 %vm252_vm0, %v8717_v27 }
  0xb5   :  { %8782 = vmatmul.mubr.msk.bf16.vlgmr.msra.gmra.mrb[16].mxu1 %vm252_vm0, %v8717_v27  ;;  %1068 = vmatpush1.bf16.msra.mxu0 %v8791_v45  ;;  %v944_v27 = vrot.slane %v943_v21, 4  ;;  %v1973_v45 = vld [vmem:[#allocation7 + $0x880] sm:$0xff]  ;;  %v2010_v21 = vld [vmem:[#allocation7 + $0x9a8] sm:$0xff] }
  0xb6   :  { %828 = vmatprep.mubr.bf16.mxu0 %v10030_v0  ;;  %901 = vmatprep.mubr.bf16.mxu1 %v10030_v0  ;;  %v10366_v51 = vcombine.low %v1973_v45, %v1977_v46  ;;  %v10416_v24 = vcombine.low %v2006_v19, %v2010_v21  ;;  %v10418_v25 = vcombine.high %v2006_v19, %v2010_v21  ;;  %v2049_v19 = vld [vmem:[#allocation7 + $0xae0] sm:$0xff]  ;;  %v2046_v21 = vld [vmem:[#allocation7 + $0xac8] sm:$0xff] }
  0xb7   :  { %1069 = vmatprep.subr.bf16.mxu0 %v8800_v49  ;;  %1141 = vmatpush1.bf16.msra.mxu1 %v8793_v50  ;;  %v949_v32 = vsel %vm10186_vm3, %v944_v27, %v948_v28  ;;  %v10364_v49 = vcombine.high %v1973_v45, %v1977_v46  ;;  %v1978_v50 = vld [vmem:[#allocation7 + $0x8a8] sm:$0xff]  ;;  %v2013_v27 = vld [vmem:[#allocation7 + $0x9c0] sm:$0xff] }
  0xb8   :  { %1142 = vmatprep.subr.bf16.mxu1 %v8802_v53  ;;  %v8790_v34 = vcombine.low %v949_v32, %v963_v33  ;;  %14656 = vst [vmem:[#allocation23_spill] sm:$0xff] %v10366_v51  ;;  %v10368_v52 = vcombine.low %v1974_v47, %v1978_v50  ;;  %v10370_v53 = vcombine.high %v1974_v47, %v1978_v50  ;;  %14673 = vst [vmem:[#allocation40_spill] sm:$0xff] %v10416_v24  ;;  %v2017_v28 = vld [vmem:[#allocation7 + $0x9e0] sm:$0xff]  ;;  %v2018_v32 = vld [vmem:[#allocation7 + $0x9e8] sm:$0xff] }
  0xb9   :  { %1070 = vmatpush1.bf16.msra.mxu0 %v8799_v54  ;;  %14655 = vst [vmem:[#allocation22_spill] sm:$0xff] %v10364_v49  ;;  %v1981_v54 = vld [vmem:[#allocation7 + $0x8c0] sm:$0xff]  ;;  %14674 = vst [vmem:[#allocation41_spill] sm:$0xff] %v10418_v25  ;;  %v10424_v31 = vcombine.high %v2013_v27, %v2017_v28  ;;  %v10426_v33 = vcombine.low %v2013_v27, %v2017_v28  ;;  %v2030_v50 = vld [vmem:[#allocation7 + $0xa48] sm:$0xff]  ;;  %v10472_v27 = vcombine.high %v2045_v18, %v2049_v19 }
  0xba   :  { %1213 = vmatprep.subr.bf16.mxu0 %v8796_v57  ;;  %14657 = vst [vmem:[#allocation24_spill] sm:$0xff] %v10368_v52  ;;  %14658 = vst [vmem:[#allocation25_spill] sm:$0xff] %v10370_v53  ;;  %v10376_v57 = vcombine.high %v1981_v54, %v1985_v55  ;;  %v2029_v46 = vld [vmem:[#allocation7 + $0xa40] sm:$0xff]  ;;  %v2050_v28 = vld [vmem:[#allocation7 + $0xae8] sm:$0xff] }
  0xbb   :  { %1143 = vmatpush1.bf16.msra.mxu1 %v8801_v58  ;;  %v1986_v58 = vld [vmem:[#allocation7 + $0x8e8] sm:$0xff]  ;;  %14675 = vst [vmem:[#allocation42_spill] sm:$0xff] %v10424_v31  ;;  %14676 = vst [vmem:[#allocation43_spill] sm:$0xff] %v10426_v33  ;;  %v2033_v47 = vld [vmem:[#allocation7 + $0xa60] sm:$0xff] }
  0xbc   :  { %8779 = vmatmul.mubr.msk.bf16.gmra.mrb[20].mxu0 %vm252_vm0, %v10124_v22  ;;  %1286 = vmatprep.subr.bf16.mxu1 %v8798_v59  ;;  %14659 = vst [vmem:[#allocation26_spill] sm:$0xff] %v10376_v57  ;;  %v10378_v59 = vcombine.low %v1981_v54, %v1985_v55  ;;  %v10448_v54 = vcombine.high %v2029_v46, %v2033_v47  ;;  %v2034_v55 = vld [vmem:[#allocation7 + $0xa68] sm:$0xff]  ;;  %14691 = vst [vmem:[#allocation58_spill] sm:$0xff] %v10472_v27 }
  0xbd   :  { %8783 = vmatmul.mubr.msk.bf16.gmra.mrb[20].mxu1 %vm252_vm0, %v10124_v22  ;;  %838 = vmatprep.mubr.bf16.mxu0 %v10030_v0  ;;  %v978_v22 = vld [vmem:[#allocation3 + $0x150] sm:$0xff] }
  0xbe   :  { %911 = vmatprep.mubr.bf16.mxu1 %v10030_v0  ;;  %v8804_v4 = vcombine.high %v978_v22, %v982_v60  ;;  %v8803_v10 = vcombine.low %v978_v22, %v982_v60  ;;  %14660 = vst [vmem:[#allocation27_spill] sm:$0xff] %v10378_v59  ;;  %v10380_v22 = vcombine.low %v1982_v56, %v1986_v58  ;;  %14683 = vst [vmem:[#allocation50_spill] sm:$0xff] %v10448_v54 }
  0xbf   :  { %v10382_v60 = vcombine.high %v1982_v56, %v1986_v58  ;;  %v10450_v56 = vcombine.low %v2029_v46, %v2033_v47  ;;  %v10452_v58 = vcombine.low %v2030_v50, %v2034_v55  ;;  %v2058_v47 = vld [vmem:[#allocation7 + $0xb28] sm:$0xff] }
  0xc0   :  { %14661 = vst [vmem:[#allocation28_spill] sm:$0xff] %v10380_v22 }
  0xc1   :  { %14662 = vst [vmem:[#allocation29_spill] sm:$0xff] %v10382_v60  ;;  %14684 = vst [vmem:[#allocation51_spill] sm:$0xff] %v10450_v56 }
  0xc2   :  { %14685 = vst [vmem:[#allocation52_spill] sm:$0xff] %v10452_v58 }
  0xc4   :  { %8780 = vmatmul.mubr.msk.bf16.gmra.mrb[24].mxu0 %vm252_vm0, %v10162_v48 }
  0xc5   :  { %8784 = vmatmul.mubr.msk.bf16.gmra.mrb[24].mxu1 %vm252_vm0, %v10162_v48  ;;  %848 = vmatprep.mubr.bf16.mxu0 %v10030_v0 }
  0xc6   :  { %921 = vmatprep.mubr.bf16.mxu1 %v10030_v0 }
  0xcc   :  { %8781 = vmatmul.mubr.msk.bf16.gmra.mrb[28].mxu0 %vm252_vm0, %v10184_v63 }
  0xcd   :  { %8785 = vmatmul.mubr.msk.bf16.gmra.mrb[28].mxu1 %vm252_vm0, %v10184_v63  ;;  %1099 = vmatprep.mubr.bf16.mxu0 %v10030_v0 }
  0xce   :  { %1172 = vmatprep.mubr.bf16.mxu1 %v10030_v0 }
  0xd4   :  { %8807 = vmatmul.mubr.msk.bf16.vlgmr.msra.gmra.mrb[0].mxu0 %vm252_vm0, %v10162_v48 }
  0xd5   :  { %8811 = vmatmul.mubr.msk.bf16.vlgmr.msra.gmra.mrb[0].mxu1 %vm252_vm0, %v10162_v48  ;;  %1214 = vmatpush1.bf16.msra.mxu0 %v8795_v61  ;;  %v1989_v61 = vld [vmem:[#allocation7 + $0x900] sm:$0xff] }
  0xd6   :  { %1109 = vmatprep.mubr.bf16.mxu0 %v10030_v0  ;;  %1182 = vmatprep.mubr.bf16.mxu1 %v10030_v0  ;;  %v10388_v2 = vcombine.high %v1989_v61, %v1993_v62 }
  0xd7   :  { %1215 = vmatprep.subr.bf16.mxu0 %v8804_v4  ;;  %1287 = vmatpush1.bf16.msra.mxu1 %v8797_v6  ;;  %v10390_v4 = vcombine.low %v1989_v61, %v1993_v62  ;;  %v10392_v6 = vcombine.low %v1990_v1, %v1994_v3  ;;  %v10454_v61 = vcombine.high %v2030_v50, %v2034_v55  ;;  %v2037_v62 = vld [vmem:[#allocation7 + $0xa80] sm:$0xff]  ;;  %v2038_v3 = vld [vmem:[#allocation7 + $0xa88] sm:$0xff] }
  0xd8   :  { %1288 = vmatprep.subr.bf16.mxu1 %v8806_v9  ;;  %14663 = vst [vmem:[#allocation30_spill] sm:$0xff] %v10388_v2  ;;  %v1997_v9 = vld [vmem:[#allocation7 + $0x940] sm:$0xff] }
  0xd9   :  { %1216 = vmatpush1.bf16.msra.mxu0 %v8803_v10  ;;  %14664 = vst [vmem:[#allocation31_spill] sm:$0xff] %v10390_v4  ;;  %14665 = vst [vmem:[#allocation32_spill] sm:$0xff] %v10392_v6  ;;  %v2001_v10 = vld [vmem:[#allocation7 + $0x960] sm:$0xff] }
  0xda   :  { %v10400_v12 = vcombine.high %v1997_v9, %v2001_v10  ;;  %14686 = vst [vmem:[#allocation53_spill] sm:$0xff] %v10454_v61  ;;  %v2041_v1 = vld [vmem:[#allocation7 + $0xaa0] sm:$0xff] }
  0xdb   :  { %1289 = vmatpush1.bf16.msra.mxu1 %v8805_v14  ;;  %v10402_v14 = vcombine.low %v1997_v9, %v2001_v10  ;;  %v10460_v9 = vcombine.high %v2037_v62, %v2041_v1  ;;  %v2042_v10 = vld [vmem:[#allocation7 + $0xaa8] sm:$0xff]  ;;  %v10462_v11 = vcombine.low %v2037_v62, %v2041_v1  ;;  %v2061_v1 = vld [vmem:[#allocation7 + $0xb40] sm:$0xff] }
  0xdc   :  { %8808 = vmatmul.mubr.msk.bf16.gmra.mrb[4].mxu0 %vm252_vm0, %v10184_v63  ;;  %3599 = vmatprep.subr.bf16.mxu1 %v10346_v40  ;;  %14667 = vst [vmem:[#allocation34_spill] sm:$0xff] %v10400_v12  ;;  %v10464_v13 = vcombine.low %v2038_v3, %v2042_v10  ;;  %v10466_v17 = vcombine.high %v2038_v3, %v2042_v10  ;;  %v2065_v3 = vld [vmem:[#allocation7 + $0xb60] sm:$0xff]  ;;  %v2062_v10 = vld [vmem:[#allocation7 + $0xb48] sm:$0xff] }
  0xdd   :  { %8812 = vmatmul.mubr.msk.bf16.gmra.mrb[4].mxu1 %vm252_vm0, %v10184_v63  ;;  %1119 = vmatprep.mubr.bf16.mxu0 %v10030_v0  ;;  %14668 = vst [vmem:[#allocation35_spill] sm:$0xff] %v10402_v14  ;;  %14687 = vst [vmem:[#allocation54_spill] sm:$0xff] %v10460_v9 }
  0xde   :  { %1192 = vmatprep.mubr.bf16.mxu1 %v10030_v0  ;;  %14688 = vst [vmem:[#allocation55_spill] sm:$0xff] %v10462_v11  ;;  %14689 = vst [vmem:[#allocation56_spill] sm:$0xff] %v10464_v13 }
  0xdf   :  { %14690 = vst [vmem:[#allocation57_spill] sm:$0xff] %v10466_v17 }
  0xe4   :  { %8809 = vmatmul.mubr.msk.bf16.gmra.mrb[8].mxu0 %vm252_vm0, %v10200_v8 }
  0xe5   :  { %8813 = vmatmul.mubr.msk.bf16.gmra.mrb[8].mxu1 %vm252_vm0, %v10200_v8  ;;  %1129 = vmatprep.mubr.bf16.mxu0 %v10030_v0 }
  0xe6   :  { %1202 = vmatprep.mubr.bf16.mxu1 %v10030_v0 }
  0xec   :  { %8810 = vmatmul.mubr.msk.bf16.gmra.mrb[12].mxu0 %vm252_vm0, %v8790_v34 }
  0xed   :  { %8814 = vmatmul.mubr.msk.bf16.gmra.mrb[12].mxu1 %vm252_vm0, %v8790_v34  ;;  %1245 = vmatprep.mubr.bf16.mxu0 %v10030_v0 }
  0xee   :  { %1318 = vmatprep.mubr.bf16.mxu1 %v10030_v0 }
  0xf4   :  { %8815 = vmatmul.mubr.msk.bf16.vlgmr.msra.gmra.mrb[16].mxu0 %vm252_vm0, %v10162_v48 }
  0xf5   :  { %8819 = vmatmul.mubr.msk.bf16.vlgmr.msra.gmra.mrb[16].mxu1 %vm252_vm0, %v10162_v48  ;;  %1255 = vmatprep.mubr.bf16.mxu0 %v10030_v0  ;;  %v1957_v48 = vld [vmem:[#allocation7 + $0x800] sm:$0xff] }
  0xf6   :  { %1328 = vmatprep.mubr.bf16.mxu1 %v10030_v0  ;;  %3600 = vmatpush1.bf16.msra.mxu1 %v10344_v39 }
  0xf7   :  { %3601 = vmatprep.subr.bf16.mxu1 %v10358_v44 }
  0xfa   :  { %3602 = vmatpush1.bf16.msra.mxu1 %v10356_v43 }
  0xfb   :  { %3603 = vmatprep.subr.bf16.mxu1 %v10370_v53 }
  0xfc   :  { %8816 = vmatmul.mubr.msk.bf16.gmra.mrb[20].mxu0 %vm252_vm0, %v10184_v63 }
  0xfd   :  { %8820 = vmatmul.mubr.msk.bf16.gmra.mrb[20].mxu1 %vm252_vm0, %v10184_v63  ;;  %1265 = vmatprep.mubr.bf16.mxu0 %v10030_v0  ;;  %v1961_v63 = vld [vmem:[#allocation7 + $0x820] sm:$0xff] }
  0xfe   :  { %1338 = vmatprep.mubr.bf16.mxu1 %v10030_v0  ;;  %v10340_v36 = vcombine.high %v1957_v48, %v1961_v63  ;;  %v10342_v38 = vcombine.low %v1957_v48, %v1961_v63  ;;  %3604 = vmatpush1.bf16.msra.mxu1 %v10368_v52  ;;  %v10430_v48 = vcombine.high %v2014_v30, %v2018_v32  ;;  %v2021_v63 = vld [vmem:[#allocation7 + $0xa00] sm:$0xff] }
  0xff   :  { %3605 = vmatprep.subr.bf16.mxu1 %v10382_v60  ;;  %v10438_v41 = vcombine.low %v2021_v63, %v2025_v35 }
 0x100   :  { %14647 = vst [vmem:[#allocation14_spill] sm:$0xff] %v10340_v36  ;;  %14648 = vst [vmem:[#allocation15_spill] sm:$0xff] %v10342_v38  ;;  %3513 = vmatprep.subr.bf16.mxu0 %v10340_v36 }
 0x101   :  { %3514 = vmatpush1.bf16.msra.mxu0 %v10342_v38  ;;  %14678 = vst [vmem:[#allocation45_spill] sm:$0xff] %v10430_v48  ;;  %14680 = vst [vmem:[#allocation47_spill] sm:$0xff] %v10438_v41 }
 0x102   :  { %3606 = vmatpush1.bf16.msra.mxu1 %v10380_v22 }
 0x103   :  { %3607 = vmatprep.subr.bf16.mxu1 %v10394_v7 }
 0x104   :  { %8817 = vmatmul.mubr.msk.bf16.gmra.mrb[24].mxu0 %vm252_vm0, %v10200_v8 }
 0x105   :  { %8821 = vmatmul.mubr.msk.bf16.gmra.mrb[24].mxu1 %vm252_vm0, %v10200_v8  ;;  %1275 = vmatprep.mubr.bf16.mxu0 %v10030_v0  ;;  %v1969_v8 = vld [vmem:[#allocation7 + $0x860] sm:$0xff] }
 0x106   :  { %1348 = vmatprep.mubr.bf16.mxu1 %v10030_v0  ;;  %v1965_v0 = vld [vmem:[#allocation7 + $0x840] sm:$0xff]  ;;  %3608 = vmatpush1.bf16.msra.mxu1 %v10392_v6 }
 0x107   :  { %v10352_v26 = vcombine.high %v1965_v0, %v1969_v8  ;;  %v10354_v42 = vcombine.low %v1965_v0, %v1969_v8  ;;  %3609 = vmatprep.subr.bf16.mxu1 %v10406_v16  ;;  %v10436_v0 = vcombine.high %v2021_v63, %v2025_v35  ;;  %v2026_v8 = vld [vmem:[#allocation7 + $0xa28] sm:$0xff]  ;;  %v10478_v63 = vcombine.high %v2046_v21, %v2050_v28  ;;  %v2053_v35 = vld [vmem:[#allocation7 + $0xb00] sm:$0xff] }
 0x108   :  { %v10440_v29 = vcombine.low %v2022_v37, %v2026_v8  ;;  %v10442_v45 = vcombine.high %v2022_v37, %v2026_v8  ;;  %v2057_v37 = vld [vmem:[#allocation7 + $0xb20] sm:$0xff]  ;;  %v2054_v8 = vld [vmem:[#allocation7 + $0xb08] sm:$0xff] }
 0x109   :  { %14651 = vst [vmem:[#allocation18_spill] sm:$0xff] %v10352_v26  ;;  %14652 = vst [vmem:[#allocation19_spill] sm:$0xff] %v10354_v42  ;;  %3515 = vmatprep.subr.bf16.mxu0 %v10352_v26  ;;  %v10484_v46 = vcombine.high %v2053_v35, %v2057_v37  ;;  %v10486_v50 = vcombine.low %v2053_v35, %v2057_v37  ;;  %v10488_v55 = vcombine.low %v2054_v8, %v2058_v47  ;;  %v2069_v37 = vld [vmem:[#allocation7 + $0xb80] sm:$0xff] }
 0x10a   :  { %3516 = vmatpush1.bf16.msra.mxu0 %v10354_v42  ;;  %3610 = vmatpush1.bf16.msra.mxu1 %v10404_v15  ;;  %14679 = vst [vmem:[#allocation46_spill] sm:$0xff] %v10436_v0  ;;  %14681 = vst [vmem:[#allocation48_spill] sm:$0xff] %v10440_v29  ;;  %v10490_v62 = vcombine.high %v2054_v8, %v2058_v47  ;;  %v2073_v8 = vld [vmem:[#allocation7 + $0xba0] sm:$0xff]  ;;  %v2070_v47 = vld [vmem:[#allocation7 + $0xb88] sm:$0xff] }
 0x10b   :  { %3517 = vmatprep.subr.bf16.mxu0 %v10364_v49  ;;  %3611 = vmatprep.subr.bf16.mxu1 %v10418_v25  ;;  %14682 = vst [vmem:[#allocation49_spill] sm:$0xff] %v10442_v45  ;;  %14694 = vst [vmem:[#allocation61_spill] sm:$0xff] %v10478_v63 }
 0x10c   :  { %8818 = vmatmul.mubr.msk.bf16.gmra.mrb[28].mxu0 %vm252_vm0, %v8790_v34  ;;  %14695 = vst [vmem:[#allocation62_spill] sm:$0xff] %v10484_v46  ;;  %14696 = vst [vmem:[#allocation63_spill] sm:$0xff] %v10486_v50 }
 0x10d   :  { %8822 = vmatmul.mubr.msk.bf16.gmra.mrb[28].mxu1 %vm252_vm0, %v8790_v34  ;;  %v10428_v34 = vcombine.low %v2014_v30, %v2018_v32  ;;  %v10474_v30 = vcombine.low %v2045_v18, %v2049_v19  ;;  %v10476_v32 = vcombine.low %v2046_v21, %v2050_v28  ;;  %14697 = vst [vmem:[#allocation64_spill] sm:$0xff] %v10488_v55  ;;  %14698 = vst [vmem:[#allocation65_spill] sm:$0xff] %v10490_v62  ;;  %v2066_v19 = vld [vmem:[#allocation7 + $0xb68] sm:$0xff] }
 0x10e   :  { %3518 = vmatpush1.bf16.msra.mxu0 %v10366_v51  ;;  %3612 = vmatpush1.bf16.msra.mxu1 %v10416_v24  ;;  %v10496_v18 = vcombine.high %v2061_v1, %v2065_v3  ;;  %v10498_v21 = vcombine.low %v2061_v1, %v2065_v3  ;;  %v10500_v28 = vcombine.low %v2062_v10, %v2066_v19  ;;  %vm10831_vm0 = vmand %vm1664_vm13, %vm1665_vm14 }
 0x10f   :  { %3519 = vmatprep.subr.bf16.mxu0 %v10376_v57  ;;  %14677 = vst [vmem:[#allocation44_spill] sm:$0xff] %v10428_v34  ;;  %3613 = vmatprep.subr.bf16.mxu1 %v10430_v48  ;;  %14692 = vst [vmem:[#allocation59_spill] sm:$0xff] %v10474_v30  ;;  %v10503_v35 = vcombine.high %v2062_v10, %v2066_v19  ;;  %v10510_v1 = vcombine.low %v2069_v37, %v2073_v8  ;;  %v2077_v10 = vld [vmem:[#allocation7 + $0xbc0] sm:$0xff] }
 0x110   :  { %14693 = vst [vmem:[#allocation60_spill] sm:$0xff] %v10476_v32  ;;  %14699 = vst [vmem:[#allocation66_spill] sm:$0xff] %v10496_v18  ;;  %v2081_v19 = vld [vmem:[#allocation7 + $0xbe0] sm:$0xff] }
 0x111   :  { %14700 = vst [vmem:[#allocation67_spill] sm:$0xff] %v10498_v21  ;;  %14701 = vst [vmem:[#allocation68_spill] sm:$0xff] %v10500_v28 }
 0x112   :  { %3520 = vmatpush1.bf16.msra.mxu0 %v10378_v59  ;;  %3614 = vmatpush1.bf16.msra.mxu1 %v10428_v34  ;;  %14702 = vst [vmem:[#allocation69_spill] sm:$0xff] %v10503_v35  ;;  %14704 = vst [vmem:[#allocation71_spill] sm:$0xff] %v10510_v1  ;;  %v1423_v59 = vld [vmem:[#allocation5] sm:$0xf] }
 0x113   :  { %3521 = vmatprep.subr.bf16.mxu0 %v10388_v2  ;;  %3615 = vmatprep.subr.bf16.mxu1 %v10442_v45  ;;  %vm10855_vm1 = vmor %vm10831_vm0, %vm10819_vm15 }
 0x116   :  { %3522 = vmatpush1.bf16.msra.mxu0 %v10390_v4  ;;  %3616 = vmatpush1.bf16.msra.mxu1 %v10440_v29 }
 0x117   :  { %3523 = vmatprep.subr.bf16.mxu0 %v10400_v12  ;;  %3617 = vmatprep.subr.bf16.mxu1 %v10454_v61 }
 0x11a   :  { %3524 = vmatpush1.bf16.msra.mxu0 %v10402_v14  ;;  %3618 = vmatpush1.bf16.msra.mxu1 %v10452_v58  ;;  %v1449_v14 = vlaneseq }
 0x11b   :  { %3525 = vmatprep.subr.bf16.mxu0 %v10412_v20  ;;  %3619 = vmatprep.subr.bf16.mxu1 %v10466_v17 }
 0x11c   :  { %v10658_v58 = vshrl.u32 %v1449_v14, 7 }
 0x11e   :  { %3526 = vmatpush1.bf16.msra.mxu0 %v10414_v23  ;;  %3620 = vmatpush1.bf16.msra.mxu1 %v10464_v13  ;;  %14715 = vst [vmem:[#allocation80_spill] sm:$0xff] %v10658_v58  ;;  %v14010_v34 = vsub.s32 0, %v10658_v58  ;;  %v14014_v60 = vsub.s32 1, %v10658_v58  ;;  %v14717_v39 = vsub.s32 3, %v10658_v58 }
 0x11f   :  { %3527 = vmatprep.subr.bf16.mxu0 %v10424_v31  ;;  %3621 = vmatprep.subr.bf16.mxu1 %v10478_v63 }
 0x120   :  { %v10666_v14 = vrot.slane %v1423_v59, %v14010_v34  ;;  %v10674_v44 = vrot.slane %v1423_v59, %v14014_v60  ;;  %v10681_v38 = vrot.slane %v1423_v59, %v14717_v39 }
 0x122   :  { %3528 = vmatpush1.bf16.msra.mxu0 %v10426_v33  ;;  %3622 = vmatpush1.bf16.msra.mxu1 %v10476_v32  ;;  %v14013_v33 = vsub.s32 2, %v10658_v58  ;;  %v2194_v58 = vld [vmem:[#allocation7 + $0xf68] sm:$0xff] }
 0x123   :  { %3529 = vmatprep.subr.bf16.mxu0 %v10436_v0  ;;  %3623 = vmatprep.subr.bf16.mxu1 %v10490_v62 }
 0x124   :  { %v10670_v43 = vrot.slane %v1423_v59, %v14013_v33 }
 0x126   :  { %3530 = vmatpush1.bf16.msra.mxu0 %v10438_v41  ;;  %3624 = vmatpush1.bf16.msra.mxu1 %v10488_v55  ;;  %v2074_v55 = vld [vmem:[#allocation7 + $0xba8] sm:$0xff] }
 0x127   :  { %3531 = vmatprep.subr.bf16.mxu0 %v10448_v54  ;;  %3625 = vmatprep.subr.bf16.mxu1 %v10503_v35  ;;  %v10512_v3 = vcombine.low %v2070_v47, %v2074_v55  ;;  %v10514_v62 = vcombine.high %v2070_v47, %v2074_v55  ;;  %v10519_v35 = vcombine.high %v2077_v10, %v2081_v19  ;;  %v2085_v47 = vld [vmem:[#allocation7 + $0xc00] sm:$0xff] }
 0x129   :  { %14705 = vst [vmem:[#allocation72_spill] sm:$0xff] %v10512_v3  ;;  %14706 = vst [vmem:[#allocation73_spill] sm:$0xff] %v10514_v62 }
 0x12a   :  { %3532 = vmatpush1.bf16.msra.mxu0 %v10450_v56  ;;  %3626 = vmatpush1.bf16.msra.mxu1 %v10500_v28  ;;  %14707 = vst [vmem:[#allocation74_spill] sm:$0xff] %v10519_v35  ;;  %v2090_v28 = vld [vmem:[#allocation7 + $0xc28] sm:$0xff] }
 0x12b   :  { %3533 = vmatprep.subr.bf16.mxu0 %v10460_v9  ;;  %3627 = vmatprep.subr.bf16.mxu1 %v10514_v62 }
 0x12e   :  { %3534 = vmatpush1.bf16.msra.mxu0 %v10462_v11  ;;  %3628 = vmatpush1.bf16.msra.mxu1 %v10512_v3 }
 0x12f   :  { %3535 = vmatprep.subr.bf16.mxu0 %v10472_v27 }
 0x132   :  { %3536 = vmatpush1.bf16.msra.mxu0 %v10474_v30 }
 0x133   :  { %3537 = vmatprep.subr.bf16.mxu0 %v10484_v46 }
 0x136   :  { %3538 = vmatpush1.bf16.msra.mxu0 %v10486_v50  ;;  %v10507_v50 = vcombine.high %v2069_v37, %v2073_v8  ;;  %v10522_v37 = vcombine.low %v2077_v10, %v2081_v19 }
 0x137   :  { %3539 = vmatprep.subr.bf16.mxu0 %v10496_v18  ;;  %v2082_v18 = vld [vmem:[#allocation7 + $0xbe8] sm:$0xff] }
 0x138   :  { %14703 = vst [vmem:[#allocation70_spill] sm:$0xff] %v10507_v50  ;;  %14708 = vst [vmem:[#allocation75_spill] sm:$0xff] %v10522_v37 }
 0x13a   :  { %3540 = vmatpush1.bf16.msra.mxu0 %v10498_v21  ;;  %v2078_v21 = vld [vmem:[#allocation7 + $0xbc8] sm:$0xff] }
 0x13b   :  { %3541 = vmatprep.subr.bf16.mxu0 %v10507_v50  ;;  %v10524_v8 = vcombine.low %v2078_v21, %v2082_v18  ;;  %v10526_v55 = vcombine.high %v2078_v21, %v2082_v18  ;;  %v2086_v50 = vld [vmem:[#allocation7 + $0xc08] sm:$0xff] }
 0x13c   :  { %v10536_v18 = vcombine.low %v2086_v50, %v2090_v28  ;;  %v10538_v21 = vcombine.high %v2086_v50, %v2090_v28 }
 0x13d   :  { %14709 = vst [vmem:[#allocation76_spill] sm:$0xff] %v10524_v8  ;;  %14710 = vst [vmem:[#allocation77_spill] sm:$0xff] %v10526_v55  ;;  %3629 = vmatprep.subr.bf16.mxu1 %v10526_v55 }
 0x13e   :  { %3542 = vmatpush1.bf16.msra.mxu0 %v10510_v1  ;;  %v2089_v1 = vld [vmem:[#allocation7 + $0xc20] sm:$0xff]  ;;  %3630 = vmatpush1.bf16.msra.mxu1 %v10524_v8  ;;  %14712 = vst [vmem:[#allocation79_spill] sm:$0xff] %v10538_v21  ;;  %v1561_v8 = vld [vmem:[#allocation2 + $0x30] sm:$0x11] }
 0x13f   :  { %3543 = vmatprep.subr.bf16.mxu0 %v10519_v35  ;;  %v10531_v62 = vcombine.high %v2085_v47, %v2089_v1  ;;  %v10534_v10 = vcombine.low %v2085_v47, %v2089_v1  ;;  %3642 = vmatprep.subr.bf16.mxu1 %v10538_v21  ;;  %v1551_v47 = vld [vmem:[#allocation2 + $0x8] sm:$0x11]  ;;  %v1562_v28 = vsel %vm10542_vm10, 0, %v1561_v8  ;;  %v1554_v21 = vld [vmem:[#allocation2 + $0x40] sm:$0x11] }
 0x140   :  { %v1552_v50 = vsel %vm10542_vm10, 0, %v1551_v47  ;;  %1563 = vst [vmem:[#allocation2 + $0x30] sm:$0x11] %v1562_v28  ;;  %v1555_v55 = vsel %vm10542_vm10, 0, %v1554_v21  ;;  %v1564_v47 = vld [vmem:[#allocation2 + $0x38] sm:$0x11] }
 0x141   :  { %14711 = vst [vmem:[#allocation78_spill] sm:$0xff] %v10531_v62  ;;  %1553 = vst [vmem:[#allocation2 + $0x8] sm:$0x11] %v1552_v50  ;;  %v1565_v8 = vsel %vm10542_vm10, 0, %v1564_v47  ;;  %v1570_v50 = vld [vmem:[#allocation2 + $0x78] sm:$0x11] }
 0x142   :  { %3544 = vmatpush1.bf16.msra.mxu0 %v10522_v37  ;;  %v1548_v37 = vld [vmem:[#allocation2] sm:$0x11]  ;;  %1556 = vst [vmem:[#allocation2 + $0x40] sm:$0x11] %v1555_v55  ;;  %1566 = vst [vmem:[#allocation2 + $0x38] sm:$0x11] %v1565_v8 }
 0x143   :  { %3556 = vmatprep.subr.bf16.mxu0 %v10531_v62  ;;  %v1549_v1 = vsel %vm10542_vm10, 0, %v1548_v37  ;;  %v1557_v62 = vld [vmem:[#allocation2 + $0x48] sm:$0x11]  ;;  %v1567_v37 = vld [vmem:[#allocation2 + $0x70] sm:$0x11]  ;;  %v1571_v28 = vsel %vm10542_vm10, 0, %v1570_v50 }
 0x144   :  { %1550 = vst [vmem:[#allocation2] sm:$0x11] %v1549_v1  ;;  %v1558_v35 = vsel %vm10542_vm10, 0, %v1557_v62  ;;  %v1568_v1 = vsel %vm10542_vm10, 0, %v1567_v37  ;;  %1572 = vst [vmem:[#allocation2 + $0x78] sm:$0x11] %v1571_v28 }
 0x145   :  { %1559 = vst [vmem:[#allocation2 + $0x48] sm:$0x11] %v1558_v35  ;;  %1569 = vst [vmem:[#allocation2 + $0x70] sm:$0x11] %v1568_v1 }
 0x1a7   :  { %v10562_v21 = vpop.f32.mrb[0].mxu0 }
 0x1a8   :  { %v10564_v62 = vpop.f32.mrb[0].mxu1  ;;  %v10566_v35 = vpop.f32.mrb[1].mxu0 }
 0x1a9   :  { %v10568_v55 = vpop.f32.mrb[1].mxu1  ;;  %v10570_v37 = vpop.f32.mrb[2].mxu0 }
 0x1aa   :  { %v10572_v1 = vpop.f32.mrb[2].mxu1  ;;  %v10574_v3 = vpop.f32.mrb[3].mxu0 }
 0x1ab   :  { %v10576_v47 = vpop.f32.mrb[3].mxu1 }
 0x1af   :  { %v10578_v8 = vpop.f32.mrb[4].mxu0 }
 0x1b0   :  { %v10582_v28 = vpop.f32.mrb[4].mxu1  ;;  %v10584_v46 = vpop.f32.mrb[5].mxu0 }
 0x1b1   :  { %v10590_v63 = vpop.f32.mrb[5].mxu1  ;;  %v10592_v27 = vpop.f32.mrb[6].mxu0  ;;  %v14719_v60 = vmax.f32 %v10566_v35, %v10584_v46 }
 0x1b2   :  { %v10598_v11 = vpop.f32.mrb[6].mxu1  ;;  %v10600_v17 = vpop.f32.mrb[7].mxu0  ;;  %v14720_v39 = vmax.f32 %v10568_v55, %v10590_v63  ;;  %v14721_v59 = vmax.f32 %v10570_v37, %v10592_v27  ;;  %v2093_v37 = vld [vmem:[#allocation7 + $0xc40] sm:$0xff] }
 0x1b3   :  { %v10606_v9 = vpop.f32.mrb[7].mxu1 }
 0x1b7   :  { %v10610_v56 = vpop.f32.mrb[8].mxu0 }
 0x1b8   :  { %v10612_v13 = vpop.f32.mrb[8].mxu1  ;;  %v10614_v50 = vpop.f32.mrb[9].mxu0 }
 0x1b9   :  { %v10616_v61 = vpop.f32.mrb[9].mxu1  ;;  %v10618_v54 = vpop.f32.mrb[10].mxu0 }
 0x1ba   :  { %v10620_v29 = vpop.f32.mrb[10].mxu1  ;;  %v10622_v32 = vpop.f32.mrb[11].mxu0 }
 0x1bb   :  { %v10624_v30 = vpop.f32.mrb[11].mxu1 }
 0x1bf   :  { %v10626_v41 = vpop.f32.mrb[12].mxu0 }
 0x1c0   :  { %v10630_v45 = vpop.f32.mrb[12].mxu1  ;;  %v10632_v0 = vpop.f32.mrb[13].mxu0 }
 0x1c1   :  { %v10638_v48 = vpop.f32.mrb[13].mxu1  ;;  %v10640_v31 = vpop.f32.mrb[14].mxu0 }
 0x1c2   :  { %v10646_v23 = vpop.f32.mrb[14].mxu1  ;;  %v10648_v25 = vpop.f32.mrb[15].mxu0 }
 0x1c3   :  { %v10654_v20 = vpop.f32.mrb[15].mxu1 }
 0x1c7   :  { %v1247_v24 = vpop.f32.mrb[16].mxu0 }
 0x1c8   :  { %v1320_v16 = vpop.f32.mrb[16].mxu1  ;;  %v1249_v12 = vpop.f32.mrb[17].mxu0 }
 0x1c9   :  { %v1322_v6 = vpop.f32.mrb[17].mxu1  ;;  %v1251_v4 = vpop.f32.mrb[18].mxu0 }
 0x1ca   :  { %v1324_v7 = vpop.f32.mrb[18].mxu1  ;;  %v1253_v2 = vpop.f32.mrb[19].mxu0 }
 0x1cb   :  { %v1326_v22 = vpop.f32.mrb[19].mxu1 }
 0x1cf   :  { %v1257_v57 = vpop.f32.mrb[20].mxu0 }
 0x1d0   :  { %v1428_v52 = vmax.f32 %v1247_v24, %v1257_v57  ;;  %v1330_v51 = vpop.f32.mrb[20].mxu1  ;;  %v1259_v53 = vpop.f32.mrb[21].mxu0  ;;  %v14716_v57 = vmax.f32 %v10562_v21, %v10578_v8 }
 0x1d1   :  { %v1430_v49 = vmax.f32 %v1320_v16, %v1330_v51  ;;  %v1429_v42 = vmax.f32 %v1249_v12, %v1259_v53  ;;  %v1332_v26 = vpop.f32.mrb[21].mxu1  ;;  %v1261_v15 = vpop.f32.mrb[22].mxu0  ;;  %v14718_v53 = vmax.f32 %v10564_v62, %v10582_v28 }
 0x1d2   :  { %v1440_v24 = vmax.f32 %v14716_v57, %v1428_v52  ;;  %v1431_v34 = vmax.f32 %v1322_v6, %v1332_v26  ;;  %v1436_v51 = vmax.f32 %v1251_v4, %v1261_v15  ;;  %v1334_v16 = vpop.f32.mrb[22].mxu1  ;;  %v1263_v33 = vpop.f32.mrb[23].mxu0 }
 0x1d3   :  { %v1442_v12 = vmax.f32 %v14718_v53, %v1430_v49  ;;  %v1441_v40 = vmax.f32 %v14719_v60, %v1429_v42  ;;  %v1438_v36 = vmax.f32 %v1324_v7, %v1334_v16  ;;  %v1437_v5 = vmax.f32 %v1253_v2, %v1263_v33  ;;  %v1336_v21 = vpop.f32.mrb[23].mxu1 }
 0x1d4   :  { %v1469_v26 = vadd.f32 %v10666_v14, %v1440_v24  ;;  %v1443_v52 = vmax.f32 %v14720_v39, %v1431_v34  ;;  %v1444_v4 = vmax.f32 %v14721_v59, %v1436_v51  ;;  %v1439_v6 = vmax.f32 %v1326_v22, %v1336_v21  ;;  %v2094_v24 = vld [vmem:[#allocation7 + $0xc48] sm:$0xff]  ;;  %v2105_v39 = vld [vmem:[#allocation7 + $0xca0] sm:$0xff] }
 0x1d5   :  { %v1471_v49 = vadd.f32 %v10670_v43, %v1442_v12  ;;  %v1470_v15 = vadd.f32 %v10674_v44, %v1441_v40  ;;  %v14722_v42 = vmax.f32 %v10572_v1, %v10598_v11  ;;  %v14723_v2 = vmax.f32 %v10574_v3, %v10600_v17  ;;  %v2097_v1 = vld [vmem:[#allocation7 + $0xc60] sm:$0xff]  ;;  %v2098_v51 = vld [vmem:[#allocation7 + $0xc68] sm:$0xff] }
 0x1d6   :  { %v1477_v33 = vmax.f32 %v1469_v26, 0.0  ;;  %v1472_v34 = vadd.f32 %v10681_v38, %v1443_v52  ;;  %v1473_v63 = vadd.f32 %v10666_v14, %v1444_v4  ;;  %v14724_v22 = vmax.f32 %v10576_v47, %v10606_v9  ;;  %v2101_v26 = vld [vmem:[#allocation7 + $0xc80] sm:$0xff]  ;;  %v2102_v4 = vld [vmem:[#allocation7 + $0xc88] sm:$0xff] }
 0x1d7   :  { %v1446_v60 = vmax.f32 %v14722_v42, %v1438_v36  ;;  %v1445_v7 = vmax.f32 %v14723_v2, %v1437_v5  ;;  %v1479_v46 = vmax.f32 %v1471_v49, 0.0  ;;  %v1478_v62 = vmax.f32 %v1470_v15, 0.0  ;;  %v10711_v36 = vpop.f32.mrb[24].mxu0  ;;  %v2109_v2 = vld [vmem:[#allocation7 + $0xcc0] sm:$0xff] }
 0x1d8   :  { %v1447_v27 = vmax.f32 %v14724_v22, %v1439_v6  ;;  %v1480_v35 = vmax.f32 %v1472_v34, 0.0  ;;  %v1481_v17 = vmax.f32 %v1473_v63, 0.0  ;;  %v10714_v3 = vpop.f32.mrb[24].mxu1  ;;  %v10716_v55 = vpop.f32.mrb[25].mxu0  ;;  %v2106_v6 = vld [vmem:[#allocation7 + $0xca8] sm:$0xff]  ;;  %v10728_v15 = vcombine.low %v2093_v37, %v2097_v1 }
 0x1d9   :  { %v1475_v40 = vadd.f32 %v10670_v43, %v1446_v60  ;;  %v1474_v11 = vadd.f32 %v10674_v44, %v1445_v7  ;;  %v9619_v9 = vpack.c.bf16 %v1478_v62, %v1477_v33  ;;  %v10718_v28 = vpop.f32.mrb[25].mxu1  ;;  %v10720_v57 = vpop.f32.mrb[26].mxu0  ;;  %v10730_v42 = vcombine.high %v2093_v37, %v2097_v1  ;;  %v2113_v7 = vld [vmem:[#allocation7 + $0xce0] sm:$0xff] }
 0x1da   :  { %v1476_v5 = vadd.f32 %v10681_v38, %v1447_v27  ;;  %v9620_v16 = vpack.c.bf16 %v1480_v35, %v1479_v46  ;;  %v10722_v12 = vpop.f32.mrb[26].mxu1  ;;  %v10724_v21 = vpop.f32.mrb[27].mxu0  ;;  %v10732_v60 = vcombine.low %v2094_v24, %v2098_v51  ;;  %v10736_v63 = vpack.c.bf16 %v1481_v17, %v1477_v33 }
 0x1db   :  { %v1483_v47 = vmax.f32 %v1475_v40, 0.0  ;;  %v1482_v8 = vmax.f32 %v1474_v11, 0.0  ;;  %1597 = vst [vmem:[#allocation2 + $0x20] sm:$0xff] %v9619_v9  ;;  %v10726_v59 = vpop.f32.mrb[27].mxu1  ;;  %v10738_v22 = vcombine.high %v2094_v24, %v2098_v51  ;;  %v10740_v27 = vcombine.high %v2101_v26, %v2105_v39  ;;  %v2110_v40 = vld [vmem:[#allocation7 + $0xcc8] sm:$0xff] }
 0x1dc   :  { %v1484_v53 = vmax.f32 %v1476_v5, 0.0  ;;  %1598 = vst [vmem:[#allocation2 + $0x28] sm:$0xff] %v9620_v16  ;;  %14726 = vst [vmem:[#allocation82_spill] sm:$0xff] %v10736_v63  ;;  %v2114_v11 = vld [vmem:[#allocation7 + $0xce8] sm:$0xff]  ;;  %v10744_v37 = vcombine.low %v2101_v26, %v2105_v39  ;;  %v10746_v1 = vcombine.low %v2102_v4, %v2106_v6  ;;  %v10752_v33 = vcombine.high %v2102_v4, %v2106_v6 }
 0x1dd   :  { %v9621_v52 = vpack.c.bf16 %v1482_v8, %v1481_v17  ;;  %v10734_v34 = vpack.c.bf16 %v1482_v8, %v1478_v62  ;;  %v10748_v9 = vpack.c.bf16 %v1483_v47, %v1479_v46  ;;  %v10754_v62 = vcombine.low %v2109_v2, %v2113_v7 }
 0x1de   :  { %v9622_v49 = vpack.c.bf16 %v1484_v53, %v1483_v47  ;;  %v10742_v5 = vpack.c.bf16 %v1484_v53, %v1480_v35  ;;  %v10756_v17 = vcombine.high %v2109_v2, %v2113_v7  ;;  %v10761_v46 = vcombine.low %v2110_v40, %v2114_v11 }
 0x1df   :  { %1599 = vst [vmem:[#allocation2 + $0x60] sm:$0xff] %v9621_v52  ;;  %14725 = vst [vmem:[#allocation81_spill] sm:$0xff] %v10734_v34  ;;  %v1277_v16 = vpop.f32.mrb[28].mxu0  ;;  %3545 = vmatprep.mubr.bf16.mxu0 %v10734_v34  ;;  %3631 = vmatprep.mubr.bf16.mxu1 %v10734_v34  ;;  %v10763_v47 = vcombine.high %v2110_v40, %v2114_v11  ;;  %v14731_v7 = vmax.f32 %v10614_v50, %v10632_v0 }
 0x1e0   :  { %1600 = vst [vmem:[#allocation2 + $0x68] sm:$0xff] %v9622_v49  ;;  %14727 = vst [vmem:[#allocation83_spill] sm:$0xff] %v10742_v5  ;;  %v1497_v35 = vmax.f32 %v10711_v36, %v1277_v16  ;;  %v1350_v8 = vpop.f32.mrb[28].mxu1  ;;  %v1279_v24 = vpop.f32.mrb[29].mxu0  ;;  %3546 = vmatmul.mubr.bf16.vlgmr.msra.gmra.mrb[32].mxu0 %v10736_v63  ;;  %3632 = vmatmul.mubr.bf16.vlgmr.msra.gmra.mrb[32].mxu1 %v10736_v63  ;;  %v14729_v36 = vmax.f32 %v10610_v56, %v10626_v41 }
 0x1e1   :  { %14728 = vst [vmem:[#allocation84_spill] sm:$0xff] %v10748_v9  ;;  %v1499_v51 = vmax.f32 %v10714_v3, %v1350_v8  ;;  %v1498_v53 = vmax.f32 %v10716_v55, %v1279_v24  ;;  %v1352_v26 = vpop.f32.mrb[29].mxu1  ;;  %v1281_v39 = vpop.f32.mrb[30].mxu0  ;;  %3557 = vmatpush1.bf16.msra.mxu0 %v10534_v10  ;;  %3643 = vmatpush1.bf16.msra.mxu1 %v10536_v18 }
 0x1e2   :  { %v1509_v52 = vmax.f32 %v14729_v36, %v1497_v35  ;;  %v1500_v4 = vmax.f32 %v10718_v28, %v1352_v26  ;;  %v1505_v6 = vmax.f32 %v10720_v57, %v1281_v39  ;;  %v1354_v3 = vpop.f32.mrb[30].mxu1  ;;  %v1283_v49 = vpop.f32.mrb[31].mxu0  ;;  %3588 = vmatprep.mubr.bf16.mxu0 %v10742_v5  ;;  %3674 = vmatprep.mubr.bf16.mxu1 %v10742_v5  ;;  %v2118_v26 = vld [vmem:[#allocation7 + $0xd08] sm:$0xff]  ;;  %v2125_v36 = vld [vmem:[#allocation7 + $0xd40] sm:$0xff] }
 0x1e3   :  { %v14730_v55 = vmax.f32 %v10612_v13, %v10630_v45  ;;  %v1510_v41 = vmax.f32 %v14731_v7, %v1498_v53  ;;  %v1507_v56 = vmax.f32 %v10722_v12, %v1354_v3  ;;  %v1506_v28 = vmax.f32 %v10724_v21, %v1283_v49  ;;  %v1356_v40 = vpop.f32.mrb[31].mxu1  ;;  %3558 = vmatprep.subr.bf16.mxu0 %v10730_v42 }
 0x1e4   :  { %v1517_v57 = vadd.f32 %v1509_v52, %v10666_v14  ;;  %v14732_v11 = vmax.f32 %v10616_v61, %v10638_v48  ;;  %v14733_v45 = vmax.f32 %v10618_v54, %v10640_v31  ;;  %v1508_v0 = vmax.f32 %v10726_v59, %v1356_v40  ;;  %3644 = vmatprep.subr.bf16.mxu1 %v10738_v22  ;;  %v2129_v52 = vld [vmem:[#allocation7 + $0xd60] sm:$0xff] }
 0x1e5   :  { %v1511_v2 = vmax.f32 %v14730_v55, %v1499_v51  ;;  %v1518_v12 = vadd.f32 %v1510_v41, %v10674_v44  ;;  %v14734_v21 = vmax.f32 %v10620_v29, %v10646_v23  ;;  %v14735_v48 = vmax.f32 %v10622_v32, %v10648_v25  ;;  %3559 = vmatpush1.bf16.msra.mxu0 %v10728_v15  ;;  %v2117_v23 = vld [vmem:[#allocation7 + $0xd00] sm:$0xff] }
 0x1e6   :  { %v1512_v16 = vmax.f32 %v14732_v11, %v1500_v4  ;;  %v1513_v13 = vmax.f32 %v14733_v45, %v1505_v6  ;;  %v1525_v31 = vmax.f32 %v1517_v57, 0.0  ;;  %v14736_v8 = vmax.f32 %v10624_v30, %v10654_v20  ;;  %3645 = vmatpush1.bf16.msra.mxu1 %v10732_v60  ;;  %3560 = vmatprep.subr.bf16.mxu0 %v10740_v27  ;;  %v2121_v29 = vld [vmem:[#allocation7 + $0xd20] sm:$0xff] }
 0x1e7   :  { %v1519_v50 = vadd.f32 %v1511_v2, %v10670_v43  ;;  %v1515_v35 = vmax.f32 %v14734_v21, %v1507_v56  ;;  %v1514_v61 = vmax.f32 %v14735_v48, %v1506_v28  ;;  %v1526_v25 = vmax.f32 %v1518_v12, 0.0  ;;  %3646 = vmatprep.subr.bf16.mxu1 %v10752_v33  ;;  %v10842_v45 = vld [vmem:[#allocation7 + $0xda0] sm:$0xff]  ;;  %v1674_v48 = vld [vmem:[#allocation2 + $0x10] sm:$0x11] }
 0x1e8   :  { %v1520_v54 = vadd.f32 %v1512_v16, %v10681_v38  ;;  %v1521_v59 = vadd.f32 %v1513_v13, %v10666_v14  ;;  %v1516_v24 = vmax.f32 %v14736_v8, %v1508_v0  ;;  %v2122_v14 = vld [vmem:[#allocation7 + $0xd28] sm:$0xff]  ;;  %v10815_v49 = vcombine.low %v2117_v23, %v2121_v29  ;;  %v10840_v16 = vld [vmem:[#allocation7 + $0xd80] sm:$0xff] }
 0x1e9   :  { %v1527_v51 = vmax.f32 %v1519_v50, 0.0  ;;  %v1523_v32 = vadd.f32 %v1515_v35, %v10670_v43  ;;  %v1522_v53 = vadd.f32 %v1514_v61, %v10674_v44  ;;  %v9623_v4 = vpack.c.bf16 %v1526_v25, %v1525_v31  ;;  %3561 = vmatpush1.bf16.msra.mxu0 %v10744_v37  ;;  %v2126_v43 = vld [vmem:[#allocation7 + $0xd48] sm:$0xff] }
 0x1ea   :  { %v1528_v39 = vmax.f32 %v1520_v54, 0.0  ;;  %v1529_v20 = vmax.f32 %v1521_v59, 0.0  ;;  %v1524_v30 = vadd.f32 %v1516_v24, %v10681_v38  ;;  %v2130_v44 = vld [vmem:[#allocation7 + $0xd68] sm:$0xff]  ;;  %3647 = vmatpush1.bf16.msra.mxu1 %v10746_v1  ;;  %3562 = vmatprep.subr.bf16.mxu0 %v10756_v17  ;;  %v10825_v38 = vcombine.high %v2117_v23, %v2121_v29  ;;  %v1668_v59 = vld [vmem:[#allocation2] sm:$0xff]  ;;  %v1677_v23 = vld [vmem:[#allocation2 + $0x18] sm:$0x11] }
 0x1eb   :  { %v1531_v6 = vmax.f32 %v1523_v32, 0.0  ;;  %v1530_v3 = vmax.f32 %v1522_v53, 0.0  ;;  %v10827_v41 = vcombine.low %v2118_v26, %v2122_v14  ;;  %v1622_v56 = vshrl.u32 %v9623_v4, 16  ;;  %3648 = vmatprep.subr.bf16.mxu1 %v10763_v47  ;;  %v1671_v53 = vld [vmem:[#allocation2 + $0x8] sm:$0xff] }
 0x1ec   :  { %v9624_v2 = vpack.c.bf16 %v1528_v39, %v1527_v51  ;;  %v1532_v7 = vmax.f32 %v1524_v30, 0.0  ;;  %v10836_v57 = vcombine.high %v2118_v26, %v2122_v14  ;;  %v10838_v11 = vcombine.low %v2125_v36, %v2129_v52  ;;  %v1686_v39 = vld [vmem:[#allocation2 + $0x50] sm:$0x11] }
 0x1ed   :  { %v9625_v40 = vpack.c.bf16 %v1530_v3, %v1529_v20  ;;  %v10844_v50 = vcombine.high %v2125_v36, %v2129_v52  ;;  %v10846_v12 = vcombine.low %v2126_v43, %v2130_v44  ;;  %v1624_v21 = vrot.slane %v1622_v56, 7  ;;  %3563 = vmatpush1.bf16.msra.mxu0 %v10754_v62  ;;  %v1680_v36 = vld [vmem:[#allocation2 + $0x40] sm:$0xff]  ;;  %v2138_v3 = vld [vmem:[#allocation7 + $0xda8] sm:$0xff]  ;;  %v1689_v56 = vld [vmem:[#allocation2 + $0x58] sm:$0x11] }
 0x1ee   :  { %v1629_v13 = vshrl.u32 %v9624_v2, 16  ;;  %v9626_v0 = vpack.c.bf16 %v1532_v7, %v1531_v6  ;;  %v1625_v35 = vshll.u32 %v9623_v4, 16  ;;  %v10849_v31 = vcombine.high %v2126_v43, %v2130_v44  ;;  %3649 = vmatpush1.bf16.msra.mxu1 %v10761_v46  ;;  %3564 = vmatprep.subr.bf16.mxu0 %v10825_v38  ;;  %v2134_v6 = vld [vmem:[#allocation7 + $0xd88] sm:$0xff] }
 0x1ef   :  { %v1638_v61 = vshrl.u32 %v9625_v40, 16  ;;  %v1632_v24 = vshll.u32 %v9624_v2, 16  ;;  %v10863_v51 = vcombine.high %v10840_v16, %v10842_v45  ;;  %v1635_v32 = vrot.slane %v1624_v21, 4  ;;  %3650 = vmatprep.subr.bf16.mxu1 %v10836_v57  ;;  %v1683_v7 = vld [vmem:[#allocation2 + $0x48] sm:$0xff] }
 0x1f0   :  { %v1631_v8 = vrot.slane %v1629_v13, 7  ;;  %v1645_v29 = vshrl.u32 %v9626_v0, 16  ;;  %v1627_v25 = vor.u32 %v1625_v35, %v1624_v21  ;;  %v1641_v14 = vshll.u32 %v9625_v40, 16 }
 0x1f1   :  { %v1640_v26 = vrot.slane %v1638_v61, 7  ;;  %v1648_v4 = vshll.u32 %v9626_v0, 16  ;;  %v1675_v44 = vsel %vm10542_vm10, %v1635_v32, %v1674_v48  ;;  %3565 = vmatpush1.bf16.msra.mxu0 %v10815_v49  ;;  %v10882_v48 = vcombine.high %v2134_v6, %v2138_v3  ;;  %v2141_v61 = vld [vmem:[#allocation7 + $0xdc0] sm:$0xff] }
 0x1f2   :  { %v1634_v20 = vor.u32 %v1632_v24, %v1631_v8  ;;  %v1636_v30 = vrot.slane %v1631_v8, 4  ;;  %v1647_v52 = vrot.slane %v1645_v29, 7  ;;  %v1669_v43 = vsel %vm10855_vm1, %v1627_v25, %v1668_v59  ;;  %1676 = vst [vmem:[#allocation2 + $0x10] sm:$0x11] %v1675_v44  ;;  %3651 = vmatpush1.bf16.msra.mxu1 %v10827_v41  ;;  %3566 = vmatprep.subr.bf16.mxu0 %v10844_v50  ;;  %v2145_v59 = vld [vmem:[#allocation7 + $0xde0] sm:$0xff]  ;;  %v2146_v29 = vld [vmem:[#allocation7 + $0xde8] sm:$0xff] }
 0x1f3   :  { %v1643_v55 = vor.u32 %v1641_v14, %v1640_v26  ;;  %v1651_v2 = vrot.slane %v1640_v26, 4  ;;  %1670 = vst [vmem:[#allocation2] sm:$0xff] %v1669_v43  ;;  %3652 = vmatprep.subr.bf16.mxu1 %v10849_v31  ;;  %v10891_v25 = vcombine.low %v10840_v16, %v10842_v45  ;;  %v10895_v32 = vcombine.low %v2134_v6, %v2138_v3  ;;  %v2153_v26 = vld [vmem:[#allocation7 + $0xe20] sm:$0xff]  ;;  %v2150_v14 = vld [vmem:[#allocation7 + $0xe08] sm:$0xff] }
 0x1f4   :  { %v1672_v28 = vsel %vm10855_vm1, %v1634_v20, %v1671_v53  ;;  %v1678_v40 = vsel %vm10542_vm10, %v1636_v30, %v1677_v23  ;;  %v1650_v13 = vor.u32 %v1648_v4, %v1647_v52  ;;  %v1652_v0 = vrot.slane %v1647_v52, 4  ;;  %v2142_v23 = vld [vmem:[#allocation7 + $0xdc8] sm:$0xff]  ;;  %v2149_v53 = vld [vmem:[#allocation7 + $0xe00] sm:$0xff] }
 0x1f5   :  { %1673 = vst [vmem:[#allocation2 + $0x8] sm:$0xff] %v1672_v28  ;;  %1679 = vst [vmem:[#allocation2 + $0x18] sm:$0x11] %v1678_v40  ;;  %v1681_v21 = vsel %vm10855_vm1, %v1643_v55, %v1680_v36  ;;  %v1687_v35 = vsel %vm10542_vm10, %v1651_v2, %v1686_v39  ;;  %3567 = vmatpush1.bf16.msra.mxu0 %v10838_v11  ;;  %v10897_v54 = vcombine.high %v2141_v61, %v2145_v59  ;;  %v2154_v39 = vld [vmem:[#allocation7 + $0xe28] sm:$0xff]  ;;  %v2157_v36 = vld [vmem:[#allocation7 + $0xe40] sm:$0xff] }
 0x1f6   :  { %1682 = vst [vmem:[#allocation2 + $0x40] sm:$0xff] %v1681_v21  ;;  %1688 = vst [vmem:[#allocation2 + $0x50] sm:$0x11] %v1687_v35  ;;  %v1684_v8 = vsel %vm10855_vm1, %v1650_v13, %v1683_v7  ;;  %v1690_v24 = vsel %vm10542_vm10, %v1652_v0, %v1689_v56  ;;  %3653 = vmatpush1.bf16.msra.mxu1 %v10846_v12  ;;  %3568 = vmatprep.subr.bf16.mxu0 %v10863_v51  ;;  %v2161_v52 = vld [vmem:[#allocation7 + $0xe60] sm:$0xff]  ;;  %v2158_v4 = vld [vmem:[#allocation7 + $0xe48] sm:$0xff] }
 0x1f7   :  { %1685 = vst [vmem:[#allocation2 + $0x48] sm:$0xff] %v1684_v8  ;;  %1691 = vst [vmem:[#allocation2 + $0x58] sm:$0x11] %v1690_v24  ;;  %3654 = vmatprep.subr.bf16.mxu1 %v10882_v48  ;;  %v10900_v19 = vcombine.high %v2142_v23, %v2146_v29  ;;  %v10903_v16 = vcombine.low %v2141_v61, %v2145_v59  ;;  %v10907_v45 = vcombine.low %v2142_v23, %v2146_v29  ;;  %v2162_v6 = vld [vmem:[#allocation7 + $0xe68] sm:$0xff]  ;;  %v2165_v2 = vld [vmem:[#allocation7 + $0xe80] sm:$0xff] }
 0x1f8   :  { %v10909_v20 = vcombine.high %v2149_v53, %v2153_v26  ;;  %v10912_v30 = vcombine.high %v2150_v14, %v2154_v39  ;;  %v10915_v3 = vcombine.low %v2149_v53, %v2153_v26  ;;  %v10919_v43 = vcombine.low %v2150_v14, %v2154_v39  ;;  %v2169_v7 = vld [vmem:[#allocation7 + $0xea0] sm:$0xff]  ;;  %v2166_v56 = vld [vmem:[#allocation7 + $0xe88] sm:$0xff] }
 0x1f9   :  { %3569 = vmatpush1.bf16.msra.mxu0 %v10891_v25  ;;  %v10921_v44 = vcombine.high %v2157_v36, %v2161_v52  ;;  %v10924_v55 = vcombine.high %v2158_v4, %v2162_v6  ;;  %v2170_v28 = vld [vmem:[#allocation7 + $0xea8] sm:$0xff]  ;;  %v10927_v40 = vcombine.low %v2157_v36, %v2161_v52  ;;  %v10931_v13 = vcombine.low %v2158_v4, %v2162_v6  ;;  %v2173_v35 = vld [vmem:[#allocation7 + $0xec0] sm:$0xff] }
 0x1fa   :  { %3655 = vmatpush1.bf16.msra.mxu1 %v10895_v32  ;;  %3570 = vmatprep.subr.bf16.mxu0 %v10897_v54  ;;  %v10933_v0 = vcombine.high %v2165_v2, %v2169_v7  ;;  %v10936_v21 = vcombine.high %v2166_v56, %v2170_v28  ;;  %v2177_v61 = vld [vmem:[#allocation7 + $0xee0] sm:$0xff]  ;;  %v2174_v59 = vld [vmem:[#allocation7 + $0xec8] sm:$0xff]  ;;  %v10939_v24 = vcombine.low %v2165_v2, %v2169_v7 }
 0x1fb   :  { %3656 = vmatprep.subr.bf16.mxu1 %v10900_v19  ;;  %v2178_v8 = vld [vmem:[#allocation7 + $0xee8] sm:$0xff]  ;;  %v10943_v23 = vcombine.low %v2166_v56, %v2170_v28  ;;  %v10945_v29 = vcombine.high %v2173_v35, %v2177_v61  ;;  %v2181_v26 = vld [vmem:[#allocation7 + $0xf00] sm:$0xff]  ;;  %v10951_v52 = vcombine.low %v2173_v35, %v2177_v61 }
 0x1fc   :  { %14743 = vst [vmem:[#allocation85_spill] sm:$0xff] %v10933_v0  ;;  %14744 = vst [vmem:[#allocation86_spill] sm:$0xff] %v10936_v21  ;;  %v10948_v53 = vcombine.high %v2174_v59, %v2178_v8  ;;  %v2185_v14 = vld [vmem:[#allocation7 + $0xf20] sm:$0xff]  ;;  %v2182_v39 = vld [vmem:[#allocation7 + $0xf08] sm:$0xff]  ;;  %v10955_v4 = vcombine.low %v2174_v59, %v2178_v8 }
 0x1fd   :  { %3571 = vmatpush1.bf16.msra.mxu0 %v10903_v16  ;;  %14745 = vst [vmem:[#allocation87_spill] sm:$0xff] %v10939_v24  ;;  %14746 = vst [vmem:[#allocation88_spill] sm:$0xff] %v10943_v23  ;;  %v2186_v36 = vld [vmem:[#allocation7 + $0xf28] sm:$0xff]  ;;  %v10957_v6 = vcombine.high %v2181_v26, %v2185_v14  ;;  %v2189_v7 = vld [vmem:[#allocation7 + $0xf40] sm:$0xff]  ;;  %v10963_v35 = vcombine.low %v2181_v26, %v2185_v14 }
 0x1fe   :  { %3657 = vmatpush1.bf16.msra.mxu1 %v10907_v45  ;;  %3572 = vmatprep.subr.bf16.mxu0 %v10909_v20  ;;  %14747 = vst [vmem:[#allocation89_spill] sm:$0xff] %v10945_v29  ;;  %14748 = vst [vmem:[#allocation90_spill] sm:$0xff] %v10948_v53  ;;  %v10960_v2 = vcombine.high %v2182_v39, %v2186_v36  ;;  %v2193_v56 = vld [vmem:[#allocation7 + $0xf60] sm:$0xff]  ;;  %v2190_v28 = vld [vmem:[#allocation7 + $0xf48] sm:$0xff]  ;;  %v10967_v61 = vcombine.low %v2182_v39, %v2186_v36 }
 0x1ff   :  { %3658 = vmatprep.subr.bf16.mxu1 %v10912_v30  ;;  %14749 = vst [vmem:[#allocation91_spill] sm:$0xff] %v10951_v52  ;;  %14750 = vst [vmem:[#allocation92_spill] sm:$0xff] %v10955_v4  ;;  %v10969_v59 = vcombine.high %v2189_v7, %v2193_v56  ;;  %v10972_v8 = vcombine.high %v2190_v28, %v2194_v58  ;;  %v10975_v26 = vcombine.low %v2189_v7, %v2193_v56 }
 0x200   :  { %14751 = vst [vmem:[#allocation93_spill] sm:$0xff] %v10957_v6  ;;  %14752 = vst [vmem:[#allocation94_spill] sm:$0xff] %v10960_v2  ;;  %v10979_v14 = vcombine.low %v2190_v28, %v2194_v58 }
 0x201   :  { %3573 = vmatpush1.bf16.msra.mxu0 %v10915_v3  ;;  %14753 = vst [vmem:[#allocation95_spill] sm:$0xff] %v10963_v35  ;;  %14754 = vst [vmem:[#allocation96_spill] sm:$0xff] %v10967_v61 }
 0x202   :  { %3659 = vmatpush1.bf16.msra.mxu1 %v10919_v43  ;;  %3574 = vmatprep.subr.bf16.mxu0 %v10921_v44  ;;  %14755 = vst [vmem:[#allocation97_spill] sm:$0xff] %v10969_v59  ;;  %14756 = vst [vmem:[#allocation98_spill] sm:$0xff] %v10972_v8 }
 0x203   :  { %3660 = vmatprep.subr.bf16.mxu1 %v10924_v55  ;;  %14757 = vst [vmem:[#allocation99_spill] sm:$0xff] %v10975_v26  ;;  %14758 = vst [vmem:[#allocation100_spill] sm:$0xff] %v10979_v14 }
 0x205   :  { %3575 = vmatpush1.bf16.msra.mxu0 %v10927_v40 }
 0x206   :  { %3661 = vmatpush1.bf16.msra.mxu1 %v10931_v13  ;;  %3576 = vmatprep.subr.bf16.mxu0 %v10933_v0 }
 0x207   :  { %3662 = vmatprep.subr.bf16.mxu1 %v10936_v21  ;;  %v1857_v21 = vld [vmem:[#allocation7 + $0x528] sm:$0xff] }
 0x209   :  { %3577 = vmatpush1.bf16.msra.mxu0 %v10939_v24  ;;  %v2202_v24 = vld [vmem:[#allocation7 + $0xfa8] sm:$0xff] }
 0x20a   :  { %3663 = vmatpush1.bf16.msra.mxu1 %v10943_v23  ;;  %3578 = vmatprep.subr.bf16.mxu0 %v10945_v29  ;;  %v2201_v29 = vld [vmem:[#allocation7 + $0xfa0] sm:$0xff]  ;;  %v2198_v23 = vld [vmem:[#allocation7 + $0xf88] sm:$0xff] }
 0x20b   :  { %3664 = vmatprep.subr.bf16.mxu1 %v10948_v53  ;;  %v2197_v53 = vld [vmem:[#allocation7 + $0xf80] sm:$0xff]  ;;  %v10984_v36 = vcombine.high %v2198_v23, %v2202_v24  ;;  %v10991_v58 = vcombine.low %v2198_v23, %v2202_v24 }
 0x20c   :  { %v10981_v39 = vcombine.high %v2197_v53, %v2201_v29  ;;  %v10987_v7 = vcombine.low %v2197_v53, %v2201_v29 }
 0x20d   :  { %3579 = vmatpush1.bf16.msra.mxu0 %v10951_v52  ;;  %14760 = vst [vmem:[#allocation102_spill] sm:$0xff] %v10984_v36  ;;  %v2210_v52 = vld [vmem:[#allocation7 + $0xfe8] sm:$0xff]  ;;  %14762 = vst [vmem:[#allocation104_spill] sm:$0xff] %v10991_v58 }
 0x20e   :  { %3665 = vmatpush1.bf16.msra.mxu1 %v10955_v4  ;;  %3580 = vmatprep.subr.bf16.mxu0 %v10957_v6  ;;  %14759 = vst [vmem:[#allocation101_spill] sm:$0xff] %v10981_v39  ;;  %v2209_v6 = vld [vmem:[#allocation7 + $0xfe0] sm:$0xff]  ;;  %v2206_v4 = vld [vmem:[#allocation7 + $0xfc8] sm:$0xff]  ;;  %14761 = vst [vmem:[#allocation103_spill] sm:$0xff] %v10987_v7 }
 0x20f   :  { %3666 = vmatprep.subr.bf16.mxu1 %v10960_v2  ;;  %v2205_v2 = vld [vmem:[#allocation7 + $0xfc0] sm:$0xff]  ;;  %v10996_v28 = vcombine.high %v2206_v4, %v2210_v52  ;;  %v11003_v24 = vcombine.low %v2206_v4, %v2210_v52 }
 0x210   :  { %v10993_v56 = vcombine.high %v2205_v2, %v2209_v6  ;;  %v10999_v29 = vcombine.low %v2205_v2, %v2209_v6  ;;  %v1968_v6 = vld [vmem:[#allocation7 + $0x858] sm:$0xff] }
 0x211   :  { %3581 = vmatpush1.bf16.msra.mxu0 %v10963_v35  ;;  %14764 = vst [vmem:[#allocation106_spill] sm:$0xff] %v10996_v28  ;;  %v1964_v35 = vld [vmem:[#allocation7 + $0x838] sm:$0xff]  ;;  %14766 = vst [vmem:[#allocation108_spill] sm:$0xff] %v11003_v24 }
 0x212   :  { %3667 = vmatpush1.bf16.msra.mxu1 %v10967_v61  ;;  %3582 = vmatprep.subr.bf16.mxu0 %v10969_v59  ;;  %14763 = vst [vmem:[#allocation105_spill] sm:$0xff] %v10993_v56  ;;  %v1963_v59 = vld [vmem:[#allocation7 + $0x830] sm:$0xff]  ;;  %v1960_v61 = vld [vmem:[#allocation7 + $0x818] sm:$0xff]  ;;  %14765 = vst [vmem:[#allocation107_spill] sm:$0xff] %v10999_v29 }
 0x213   :  { %3668 = vmatprep.subr.bf16.mxu1 %v10972_v8  ;;  %v1959_v8 = vld [vmem:[#allocation7 + $0x810] sm:$0xff]  ;;  %v11008_v53 = vcombine.high %v1960_v61, %v1964_v35  ;;  %v1972_v2 = vld [vmem:[#allocation7 + $0x878] sm:$0xff]  ;;  %v11015_v52 = vcombine.low %v1960_v61, %v1964_v35 }
 0x214   :  { %v11005_v23 = vcombine.high %v1959_v8, %v1963_v59  ;;  %v11029_v35 = vcombine.low %v1968_v6, %v1972_v2 }
 0x215   :  { %3583 = vmatpush1.bf16.msra.mxu0 %v10975_v26  ;;  %14768 = vst [vmem:[#allocation110_spill] sm:$0xff] %v11008_v53  ;;  %14770 = vst [vmem:[#allocation112_spill] sm:$0xff] %v11015_v52  ;;  %v1853_v26 = vld [vmem:[#allocation7 + $0x508] sm:$0xff] }
 0x216   :  { %3669 = vmatpush1.bf16.msra.mxu1 %v10979_v14  ;;  %3584 = vmatprep.subr.bf16.mxu0 %v10981_v39  ;;  %14767 = vst [vmem:[#allocation109_spill] sm:$0xff] %v11005_v23  ;;  %v1971_v39 = vld [vmem:[#allocation7 + $0x870] sm:$0xff]  ;;  %v11011_v14 = vcombine.low %v1959_v8, %v1963_v59  ;;  %v1976_v59 = vld [vmem:[#allocation7 + $0x898] sm:$0xff]  ;;  %14774 = vst [vmem:[#allocation116_spill] sm:$0xff] %v11029_v35 }
 0x217   :  { %3670 = vmatprep.subr.bf16.mxu1 %v10984_v36  ;;  %v1967_v36 = vld [vmem:[#allocation7 + $0x850] sm:$0xff]  ;;  %v1980_v8 = vld [vmem:[#allocation7 + $0x8b8] sm:$0xff] }
 0x218   :  { %14769 = vst [vmem:[#allocation111_spill] sm:$0xff] %v11011_v14  ;;  %v11018_v4 = vcombine.high %v1967_v36, %v1971_v39 }
 0x219   :  { %3585 = vmatpush1.bf16.msra.mxu0 %v10987_v7  ;;  %v1996_v7 = vld [vmem:[#allocation7 + $0x938] sm:$0xff] }
 0x21a   :  { %3671 = vmatpush1.bf16.msra.mxu1 %v10991_v58  ;;  %3586 = vmatprep.subr.bf16.mxu0 %v10993_v56  ;;  %14771 = vst [vmem:[#allocation113_spill] sm:$0xff] %v11018_v4  ;;  %v1979_v56 = vld [vmem:[#allocation7 + $0x8b0] sm:$0xff]  ;;  %v11021_v58 = vcombine.high %v1968_v6, %v1972_v2  ;;  %v11043_v6 = vcombine.low %v1976_v59, %v1980_v8 }
 0x21b   :  { %3672 = vmatprep.subr.bf16.mxu1 %v10996_v28  ;;  %v1975_v28 = vld [vmem:[#allocation7 + $0x890] sm:$0xff] }
 0x21c   :  { %14772 = vst [vmem:[#allocation114_spill] sm:$0xff] %v11021_v58  ;;  %v11031_v61 = vcombine.high %v1975_v28, %v1979_v56  ;;  %14778 = vst [vmem:[#allocation120_spill] sm:$0xff] %v11043_v6 }
 0x21d   :  { %3587 = vmatpush1.bf16.msra.mxu0 %v10999_v29  ;;  %v1987_v29 = vld [vmem:[#allocation7 + $0x8f0] sm:$0xff] }
 0x21e   :  { %3673 = vmatpush1.bf16.msra.mxu1 %v11003_v24  ;;  %3685 = vmatprep.subr.bf16.mxu0 %v11005_v23  ;;  %v11025_v24 = vcombine.low %v1967_v36, %v1971_v39  ;;  %14775 = vst [vmem:[#allocation117_spill] sm:$0xff] %v11031_v61  ;;  %v1983_v23 = vld [vmem:[#allocation7 + $0x8d0] sm:$0xff]  ;;  %v1984_v39 = vld [vmem:[#allocation7 + $0x8d8] sm:$0xff] }
 0x21f   :  { %3771 = vmatprep.subr.bf16.mxu1 %v11008_v53  ;;  %v11035_v53 = vcombine.high %v1976_v59, %v1980_v8  ;;  %v1988_v36 = vld [vmem:[#allocation7 + $0x8f8] sm:$0xff]  ;;  %v11045_v2 = vcombine.high %v1983_v23, %v1987_v29 }
 0x220   :  { %3589 = vmatmul.mubr.bf16.vlgmr.msra.gmra.mrb[32].mxu0 %v10748_v9  ;;  %14773 = vst [vmem:[#allocation115_spill] sm:$0xff] %v11025_v24 }
 0x221   :  { %3675 = vmatmul.mubr.bf16.vlgmr.msra.gmra.mrb[32].mxu1 %v10748_v9  ;;  %3686 = vmatpush1.bf16.msra.mxu0 %v11011_v14  ;;  %14776 = vst [vmem:[#allocation118_spill] sm:$0xff] %v11035_v53  ;;  %v11039_v14 = vcombine.low %v1975_v28, %v1979_v56  ;;  %14779 = vst [vmem:[#allocation121_spill] sm:$0xff] %v11045_v2  ;;  %v11051_v56 = vcombine.low %v1983_v23, %v1987_v29 }
 0x222   :  { %3717 = vmatprep.mubr.bf16.mxu0 %v10734_v34  ;;  %3772 = vmatpush1.bf16.msra.mxu1 %v11015_v52  ;;  %v1992_v52 = vld [vmem:[#allocation7 + $0x918] sm:$0xff]  ;;  %v11055_v28 = vcombine.low %v1984_v39, %v1988_v36 }
 0x223   :  { %3803 = vmatprep.mubr.bf16.mxu1 %v10734_v34  ;;  %3687 = vmatprep.subr.bf16.mxu0 %v11018_v4  ;;  %14777 = vst [vmem:[#allocation119_spill] sm:$0xff] %v11039_v14  ;;  %v11048_v34 = vcombine.high %v1984_v39, %v1988_v36  ;;  %v1991_v4 = vld [vmem:[#allocation7 + $0x910] sm:$0xff]  ;;  %14781 = vst [vmem:[#allocation123_spill] sm:$0xff] %v11051_v56  ;;  %v11060_v8 = vcombine.high %v1992_v52, %v1996_v7 }
 0x224   :  { %3773 = vmatprep.subr.bf16.mxu1 %v11021_v58  ;;  %v1995_v58 = vld [vmem:[#allocation7 + $0x930] sm:$0xff]  ;;  %14782 = vst [vmem:[#allocation124_spill] sm:$0xff] %v11055_v28  ;;  %v11067_v23 = vcombine.low %v1992_v52, %v1996_v7 }
 0x225   :  { %3688 = vmatpush1.bf16.msra.mxu0 %v11025_v24  ;;  %14780 = vst [vmem:[#allocation122_spill] sm:$0xff] %v11048_v34  ;;  %v11057_v59 = vcombine.high %v1991_v4, %v1995_v58  ;;  %14784 = vst [vmem:[#allocation126_spill] sm:$0xff] %v11060_v8  ;;  %v2004_v24 = vld [vmem:[#allocation7 + $0x978] sm:$0xff]  ;;  %v11063_v29 = vcombine.low %v1991_v4, %v1995_v58 }
 0x226   :  { %3774 = vmatpush1.bf16.msra.mxu1 %v11029_v35  ;;  %3689 = vmatprep.subr.bf16.mxu0 %v11031_v61  ;;  %v2003_v61 = vld [vmem:[#allocation7 + $0x970] sm:$0xff]  ;;  %v2000_v35 = vld [vmem:[#allocation7 + $0x958] sm:$0xff]  ;;  %14786 = vst [vmem:[#allocation128_spill] sm:$0xff] %v11067_v23 }
 0x227   :  { %3775 = vmatprep.subr.bf16.mxu1 %v11035_v53  ;;  %14783 = vst [vmem:[#allocation125_spill] sm:$0xff] %v11057_v59  ;;  %v1999_v53 = vld [vmem:[#allocation7 + $0x950] sm:$0xff]  ;;  %14785 = vst [vmem:[#allocation127_spill] sm:$0xff] %v11063_v29  ;;  %v11072_v36 = vcombine.high %v2000_v35, %v2004_v24  ;;  %v11079_v7 = vcombine.low %v2000_v35, %v2004_v24 }
 0x228   :  { %v11069_v39 = vcombine.high %v1999_v53, %v2003_v61  ;;  %v11075_v58 = vcombine.low %v1999_v53, %v2003_v61 }
 0x229   :  { %3690 = vmatpush1.bf16.msra.mxu0 %v11039_v14  ;;  %14788 = vst [vmem:[#allocation130_spill] sm:$0xff] %v11072_v36  ;;  %v2012_v14 = vld [vmem:[#allocation7 + $0x9b8] sm:$0xff]  ;;  %14790 = vst [vmem:[#allocation132_spill] sm:$0xff] %v11079_v7 }
 0x22a   :  { %3776 = vmatpush1.bf16.msra.mxu1 %v11043_v6  ;;  %3691 = vmatprep.subr.bf16.mxu0 %v11045_v2  ;;  %14787 = vst [vmem:[#allocation129_spill] sm:$0xff] %v11069_v39  ;;  %v2011_v2 = vld [vmem:[#allocation7 + $0x9b0] sm:$0xff]  ;;  %v2008_v6 = vld [vmem:[#allocation7 + $0x998] sm:$0xff]  ;;  %14789 = vst [vmem:[#allocation131_spill] sm:$0xff] %v11075_v58 }
 0x22b   :  { %3777 = vmatprep.subr.bf16.mxu1 %v11048_v34  ;;  %v2007_v34 = vld [vmem:[#allocation7 + $0x990] sm:$0xff]  ;;  %v11084_v4 = vcombine.high %v2008_v6, %v2012_v14  ;;  %v11091_v24 = vcombine.low %v2008_v6, %v2012_v14 }
 0x22c   :  { %v11081_v52 = vcombine.high %v2007_v34, %v2011_v2  ;;  %v11087_v53 = vcombine.low %v2007_v34, %v2011_v2 }
 0x22d   :  { %3692 = vmatpush1.bf16.msra.mxu0 %v11051_v56  ;;  %14792 = vst [vmem:[#allocation134_spill] sm:$0xff] %v11084_v4  ;;  %v2020_v56 = vld [vmem:[#allocation7 + $0x9f8] sm:$0xff]  ;;  %14794 = vst [vmem:[#allocation136_spill] sm:$0xff] %v11091_v24 }
 0x22e   :  { %3778 = vmatpush1.bf16.msra.mxu1 %v11055_v28  ;;  %3693 = vmatprep.subr.bf16.mxu0 %v11057_v59  ;;  %14791 = vst [vmem:[#allocation133_spill] sm:$0xff] %v11081_v52  ;;  %v2019_v59 = vld [vmem:[#allocation7 + $0x9f0] sm:$0xff]  ;;  %v2016_v28 = vld [vmem:[#allocation7 + $0x9d8] sm:$0xff]  ;;  %14793 = vst [vmem:[#allocation135_spill] sm:$0xff] %v11087_v53 }
 0x22f   :  { %3779 = vmatprep.subr.bf16.mxu1 %v11060_v8  ;;  %v2015_v8 = vld [vmem:[#allocation7 + $0x9d0] sm:$0xff]  ;;  %v11096_v61 = vcombine.high %v2016_v28, %v2020_v56  ;;  %v11103_v14 = vcombine.low %v2016_v28, %v2020_v56 }
 0x230   :  { %v11093_v35 = vcombine.high %v2015_v8, %v2019_v59  ;;  %v11099_v34 = vcombine.low %v2015_v8, %v2019_v59 }
 0x231   :  { %3694 = vmatpush1.bf16.msra.mxu0 %v11063_v29  ;;  %14796 = vst [vmem:[#allocation138_spill] sm:$0xff] %v11096_v61  ;;  %v2028_v29 = vld [vmem:[#allocation7 + $0xa38] sm:$0xff]  ;;  %14798 = vst [vmem:[#allocation140_spill] sm:$0xff] %v11103_v14 }
 0x232   :  { %3780 = vmatpush1.bf16.msra.mxu1 %v11067_v23  ;;  %3695 = vmatprep.subr.bf16.mxu0 %v11069_v39  ;;  %14795 = vst [vmem:[#allocation137_spill] sm:$0xff] %v11093_v35  ;;  %v2027_v39 = vld [vmem:[#allocation7 + $0xa30] sm:$0xff]  ;;  %v2024_v23 = vld [vmem:[#allocation7 + $0xa18] sm:$0xff]  ;;  %14797 = vst [vmem:[#allocation139_spill] sm:$0xff] %v11099_v34 }
 0x233   :  { %3781 = vmatprep.subr.bf16.mxu1 %v11072_v36  ;;  %v2023_v36 = vld [vmem:[#allocation7 + $0xa10] sm:$0xff]  ;;  %v11108_v2 = vcombine.high %v2024_v23, %v2028_v29  ;;  %v11115_v56 = vcombine.low %v2024_v23, %v2028_v29 }
 0x234   :  { %v11105_v6 = vcombine.high %v2023_v36, %v2027_v39  ;;  %v11111_v59 = vcombine.low %v2023_v36, %v2027_v39 }
 0x235   :  { %3696 = vmatpush1.bf16.msra.mxu0 %v11075_v58  ;;  %14800 = vst [vmem:[#allocation142_spill] sm:$0xff] %v11108_v2  ;;  %v2036_v58 = vld [vmem:[#allocation7 + $0xa78] sm:$0xff]  ;;  %14802 = vst [vmem:[#allocation144_spill] sm:$0xff] %v11115_v56 }
 0x236   :  { %3782 = vmatpush1.bf16.msra.mxu1 %v11079_v7  ;;  %3697 = vmatprep.subr.bf16.mxu0 %v11081_v52  ;;  %14799 = vst [vmem:[#allocation141_spill] sm:$0xff] %v11105_v6  ;;  %v2035_v52 = vld [vmem:[#allocation7 + $0xa70] sm:$0xff]  ;;  %v2032_v7 = vld [vmem:[#allocation7 + $0xa58] sm:$0xff]  ;;  %14801 = vst [vmem:[#allocation143_spill] sm:$0xff] %v11111_v59 }
 0x237   :  { %3783 = vmatprep.subr.bf16.mxu1 %v11084_v4  ;;  %v2031_v4 = vld [vmem:[#allocation7 + $0xa50] sm:$0xff]  ;;  %v11120_v8 = vcombine.high %v2032_v7, %v2036_v58  ;;  %v11127_v29 = vcombine.low %v2032_v7, %v2036_v58 }
 0x238   :  { %v11117_v28 = vcombine.high %v2031_v4, %v2035_v52  ;;  %v11123_v39 = vcombine.low %v2031_v4, %v2035_v52 }
 0x239   :  { %3698 = vmatpush1.bf16.msra.mxu0 %v11087_v53  ;;  %14804 = vst [vmem:[#allocation146_spill] sm:$0xff] %v11120_v8  ;;  %v2044_v53 = vld [vmem:[#allocation7 + $0xab8] sm:$0xff]  ;;  %14806 = vst [vmem:[#allocation148_spill] sm:$0xff] %v11127_v29 }
 0x23a   :  { %3784 = vmatpush1.bf16.msra.mxu1 %v11091_v24  ;;  %3699 = vmatprep.subr.bf16.mxu0 %v11093_v35  ;;  %14803 = vst [vmem:[#allocation145_spill] sm:$0xff] %v11117_v28  ;;  %v2043_v35 = vld [vmem:[#allocation7 + $0xab0] sm:$0xff]  ;;  %v2040_v24 = vld [vmem:[#allocation7 + $0xa98] sm:$0xff]  ;;  %14805 = vst [vmem:[#allocation147_spill] sm:$0xff] %v11123_v39 }
 0x23b   :  { %3785 = vmatprep.subr.bf16.mxu1 %v11096_v61  ;;  %v2039_v61 = vld [vmem:[#allocation7 + $0xa90] sm:$0xff]  ;;  %v11132_v36 = vcombine.high %v2040_v24, %v2044_v53  ;;  %v11139_v58 = vcombine.low %v2040_v24, %v2044_v53 }
 0x23c   :  { %v11129_v23 = vcombine.high %v2039_v61, %v2043_v35  ;;  %v11135_v52 = vcombine.low %v2039_v61, %v2043_v35 }
 0x23d   :  { %3700 = vmatpush1.bf16.msra.mxu0 %v11099_v34  ;;  %14808 = vst [vmem:[#allocation150_spill] sm:$0xff] %v11132_v36  ;;  %v2052_v34 = vld [vmem:[#allocation7 + $0xaf8] sm:$0xff]  ;;  %14810 = vst [vmem:[#allocation152_spill] sm:$0xff] %v11139_v58 }
 0x23e   :  { %3786 = vmatpush1.bf16.msra.mxu1 %v11103_v14  ;;  %3701 = vmatprep.subr.bf16.mxu0 %v11105_v6  ;;  %14807 = vst [vmem:[#allocation149_spill] sm:$0xff] %v11129_v23  ;;  %v2051_v6 = vld [vmem:[#allocation7 + $0xaf0] sm:$0xff]  ;;  %v2048_v14 = vld [vmem:[#allocation7 + $0xad8] sm:$0xff]  ;;  %14809 = vst [vmem:[#allocation151_spill] sm:$0xff] %v11135_v52 }
 0x23f   :  { %3787 = vmatprep.subr.bf16.mxu1 %v11108_v2  ;;  %v2047_v2 = vld [vmem:[#allocation7 + $0xad0] sm:$0xff]  ;;  %v11144_v4 = vcombine.high %v2048_v14, %v2052_v34  ;;  %v11151_v53 = vcombine.low %v2048_v14, %v2052_v34 }
 0x240   :  { %v11141_v7 = vcombine.high %v2047_v2, %v2051_v6  ;;  %v11147_v35 = vcombine.low %v2047_v2, %v2051_v6 }
 0x241   :  { %3702 = vmatpush1.bf16.msra.mxu0 %v11111_v59  ;;  %14812 = vst [vmem:[#allocation154_spill] sm:$0xff] %v11144_v4  ;;  %v2060_v59 = vld [vmem:[#allocation7 + $0xb38] sm:$0xff]  ;;  %14814 = vst [vmem:[#allocation156_spill] sm:$0xff] %v11151_v53 }
 0x242   :  { %3788 = vmatpush1.bf16.msra.mxu1 %v11115_v56  ;;  %3703 = vmatprep.subr.bf16.mxu0 %v11117_v28  ;;  %14811 = vst [vmem:[#allocation153_spill] sm:$0xff] %v11141_v7  ;;  %v2059_v28 = vld [vmem:[#allocation7 + $0xb30] sm:$0xff]  ;;  %v2056_v56 = vld [vmem:[#allocation7 + $0xb18] sm:$0xff]  ;;  %14813 = vst [vmem:[#allocation155_spill] sm:$0xff] %v11147_v35 }
 0x243   :  { %3789 = vmatprep.subr.bf16.mxu1 %v11120_v8  ;;  %v2055_v8 = vld [vmem:[#allocation7 + $0xb10] sm:$0xff]  ;;  %v11156_v61 = vcombine.high %v2056_v56, %v2060_v59  ;;  %v11163_v34 = vcombine.low %v2056_v56, %v2060_v59 }
 0x244   :  { %v11153_v24 = vcombine.high %v2055_v8, %v2059_v28  ;;  %v11159_v6 = vcombine.low %v2055_v8, %v2059_v28 }
 0x245   :  { %3704 = vmatpush1.bf16.msra.mxu0 %v11123_v39  ;;  %14816 = vst [vmem:[#allocation158_spill] sm:$0xff] %v11156_v61  ;;  %v2068_v39 = vld [vmem:[#allocation7 + $0xb78] sm:$0xff]  ;;  %14818 = vst [vmem:[#allocation160_spill] sm:$0xff] %v11163_v34 }
 0x246   :  { %3790 = vmatpush1.bf16.msra.mxu1 %v11127_v29  ;;  %3705 = vmatprep.subr.bf16.mxu0 %v11129_v23  ;;  %14815 = vst [vmem:[#allocation157_spill] sm:$0xff] %v11153_v24  ;;  %v2067_v23 = vld [vmem:[#allocation7 + $0xb70] sm:$0xff]  ;;  %v2064_v29 = vld [vmem:[#allocation7 + $0xb58] sm:$0xff]  ;;  %14817 = vst [vmem:[#allocation159_spill] sm:$0xff] %v11159_v6 }
 0x247   :  { %3791 = vmatprep.subr.bf16.mxu1 %v11132_v36  ;;  %v2063_v36 = vld [vmem:[#allocation7 + $0xb50] sm:$0xff]  ;;  %v11168_v2 = vcombine.high %v2064_v29, %v2068_v39  ;;  %v11175_v59 = vcombine.low %v2064_v29, %v2068_v39 }
 0x248   :  { %v11165_v14 = vcombine.high %v2063_v36, %v2067_v23  ;;  %v11171_v28 = vcombine.low %v2063_v36, %v2067_v23 }
 0x249   :  { %3706 = vmatpush1.bf16.msra.mxu0 %v11135_v52  ;;  %14820 = vst [vmem:[#allocation162_spill] sm:$0xff] %v11168_v2  ;;  %v2076_v52 = vld [vmem:[#allocation7 + $0xbb8] sm:$0xff]  ;;  %14822 = vst [vmem:[#allocation164_spill] sm:$0xff] %v11175_v59 }
 0x24a   :  { %3792 = vmatpush1.bf16.msra.mxu1 %v11139_v58  ;;  %3707 = vmatprep.subr.bf16.mxu0 %v11141_v7  ;;  %14819 = vst [vmem:[#allocation161_spill] sm:$0xff] %v11165_v14  ;;  %v2075_v7 = vld [vmem:[#allocation7 + $0xbb0] sm:$0xff]  ;;  %v2072_v58 = vld [vmem:[#allocation7 + $0xb98] sm:$0xff]  ;;  %14821 = vst [vmem:[#allocation163_spill] sm:$0xff] %v11171_v28 }
 0x24b   :  { %3793 = vmatprep.subr.bf16.mxu1 %v11144_v4  ;;  %v2071_v4 = vld [vmem:[#allocation7 + $0xb90] sm:$0xff]  ;;  %v11180_v8 = vcombine.high %v2072_v58, %v2076_v52  ;;  %v11187_v39 = vcombine.low %v2072_v58, %v2076_v52 }
 0x24c   :  { %v11177_v56 = vcombine.high %v2071_v4, %v2075_v7  ;;  %v11183_v23 = vcombine.low %v2071_v4, %v2075_v7 }
 0x24d   :  { %3708 = vmatpush1.bf16.msra.mxu0 %v11147_v35  ;;  %14824 = vst [vmem:[#allocation166_spill] sm:$0xff] %v11180_v8  ;;  %v2084_v35 = vld [vmem:[#allocation7 + $0xbf8] sm:$0xff]  ;;  %14826 = vst [vmem:[#allocation168_spill] sm:$0xff] %v11187_v39 }
 0x24e   :  { %3794 = vmatpush1.bf16.msra.mxu1 %v11151_v53  ;;  %3709 = vmatprep.subr.bf16.mxu0 %v11153_v24  ;;  %14823 = vst [vmem:[#allocation165_spill] sm:$0xff] %v11177_v56  ;;  %v2083_v24 = vld [vmem:[#allocation7 + $0xbf0] sm:$0xff]  ;;  %v2080_v53 = vld [vmem:[#allocation7 + $0xbd8] sm:$0xff]  ;;  %14825 = vst [vmem:[#allocation167_spill] sm:$0xff] %v11183_v23 }
 0x24f   :  { %3795 = vmatprep.subr.bf16.mxu1 %v11156_v61  ;;  %v2079_v61 = vld [vmem:[#allocation7 + $0xbd0] sm:$0xff]  ;;  %v11192_v36 = vcombine.high %v2080_v53, %v2084_v35  ;;  %v11199_v52 = vcombine.low %v2080_v53, %v2084_v35 }
 0x250   :  { %v11189_v29 = vcombine.high %v2079_v61, %v2083_v24  ;;  %v11195_v7 = vcombine.low %v2079_v61, %v2083_v24  ;;  %v2096_v24 = vld [vmem:[#allocation7 + $0xc58] sm:$0xff] }
 0x251   :  { %3710 = vmatpush1.bf16.msra.mxu0 %v11159_v6  ;;  %14828 = vst [vmem:[#allocation170_spill] sm:$0xff] %v11192_v36  ;;  %v2092_v6 = vld [vmem:[#allocation7 + $0xc38] sm:$0xff]  ;;  %14830 = vst [vmem:[#allocation172_spill] sm:$0xff] %v11199_v52 }
 0x252   :  { %3796 = vmatpush1.bf16.msra.mxu1 %v11163_v34  ;;  %3711 = vmatprep.subr.bf16.mxu0 %v11165_v14  ;;  %14827 = vst [vmem:[#allocation169_spill] sm:$0xff] %v11189_v29  ;;  %v2091_v14 = vld [vmem:[#allocation7 + $0xc30] sm:$0xff]  ;;  %v2088_v34 = vld [vmem:[#allocation7 + $0xc18] sm:$0xff]  ;;  %14829 = vst [vmem:[#allocation171_spill] sm:$0xff] %v11195_v7 }
 0x253   :  { %3797 = vmatprep.subr.bf16.mxu1 %v11168_v2  ;;  %v2087_v2 = vld [vmem:[#allocation7 + $0xc10] sm:$0xff]  ;;  %v11204_v4 = vcombine.high %v2088_v34, %v2092_v6  ;;  %v2100_v61 = vld [vmem:[#allocation7 + $0xc78] sm:$0xff]  ;;  %v11211_v35 = vcombine.low %v2088_v34, %v2092_v6 }
 0x254   :  { %v11201_v58 = vcombine.high %v2087_v2, %v2091_v14  ;;  %v11225_v6 = vcombine.low %v2096_v24, %v2100_v61 }
 0x255   :  { %3712 = vmatpush1.bf16.msra.mxu0 %v11171_v28  ;;  %14832 = vst [vmem:[#allocation174_spill] sm:$0xff] %v11204_v4  ;;  %14834 = vst [vmem:[#allocation176_spill] sm:$0xff] %v11211_v35  ;;  %v1729_v28 = vld [vmem:[#allocation7 + $0x128] sm:$0xff] }
 0x256   :  { %3798 = vmatpush1.bf16.msra.mxu1 %v11175_v59  ;;  %3713 = vmatprep.subr.bf16.mxu0 %v11177_v56  ;;  %14831 = vst [vmem:[#allocation173_spill] sm:$0xff] %v11201_v58  ;;  %v2099_v56 = vld [vmem:[#allocation7 + $0xc70] sm:$0xff]  ;;  %v11207_v59 = vcombine.low %v2087_v2, %v2091_v14  ;;  %v2104_v14 = vld [vmem:[#allocation7 + $0xc98] sm:$0xff]  ;;  %14838 = vst [vmem:[#allocation180_spill] sm:$0xff] %v11225_v6 }
 0x257   :  { %3799 = vmatprep.subr.bf16.mxu1 %v11180_v8  ;;  %v2095_v8 = vld [vmem:[#allocation7 + $0xc50] sm:$0xff]  ;;  %v2108_v2 = vld [vmem:[#allocation7 + $0xcb8] sm:$0xff] }
 0x258   :  { %14833 = vst [vmem:[#allocation175_spill] sm:$0xff] %v11207_v59  ;;  %v11214_v53 = vcombine.high %v2095_v8, %v2099_v56 }
 0x259   :  { %3714 = vmatpush1.bf16.msra.mxu0 %v11183_v23  ;;  %v1725_v23 = vld [vmem:[#allocation7 + $0x108] sm:$0xff] }
 0x25a   :  { %3800 = vmatpush1.bf16.msra.mxu1 %v11187_v39  ;;  %3715 = vmatprep.subr.bf16.mxu0 %v11189_v29  ;;  %14835 = vst [vmem:[#allocation177_spill] sm:$0xff] %v11214_v53  ;;  %v2107_v29 = vld [vmem:[#allocation7 + $0xcb0] sm:$0xff]  ;;  %v11217_v39 = vcombine.high %v2096_v24, %v2100_v61  ;;  %v11239_v24 = vcombine.low %v2104_v14, %v2108_v2 }
 0x25b   :  { %3801 = vmatprep.subr.bf16.mxu1 %v11192_v36  ;;  %v2103_v36 = vld [vmem:[#allocation7 + $0xc90] sm:$0xff] }
 0x25c   :  { %14836 = vst [vmem:[#allocation178_spill] sm:$0xff] %v11217_v39  ;;  %v11227_v34 = vcombine.high %v2103_v36, %v2107_v29  ;;  %14842 = vst [vmem:[#allocation184_spill] sm:$0xff] %v11239_v24 }
 0x25d   :  { %3716 = vmatpush1.bf16.msra.mxu0 %v11195_v7  ;;  %v2124_v7 = vld [vmem:[#allocation7 + $0xd38] sm:$0xff] }
 0x25e   :  { %3802 = vmatpush1.bf16.msra.mxu1 %v11199_v52  ;;  %3728 = vmatprep.subr.bf16.mxu0 %v11201_v58  ;;  %v11221_v52 = vcombine.low %v2095_v8, %v2099_v56  ;;  %14839 = vst [vmem:[#allocation181_spill] sm:$0xff] %v11227_v34  ;;  %v2111_v58 = vld [vmem:[#allocation7 + $0xcd0] sm:$0xff]  ;;  %v2112_v56 = vld [vmem:[#allocation7 + $0xcd8] sm:$0xff] }
 0x25f   :  { %3814 = vmatprep.subr.bf16.mxu1 %v11204_v4  ;;  %v11231_v4 = vcombine.high %v2104_v14, %v2108_v2  ;;  %v2116_v8 = vld [vmem:[#allocation7 + $0xcf8] sm:$0xff] }
 0x260   :  { %3718 = vmatmul.mubr.bf16.vlgmr.msra.gmra.mrb[36].mxu0 %v10736_v63  ;;  %14837 = vst [vmem:[#allocation179_spill] sm:$0xff] %v11221_v52 }
 0x261   :  { %3804 = vmatmul.mubr.bf16.vlgmr.msra.gmra.mrb[36].mxu1 %v10736_v63  ;;  %3729 = vmatpush1.bf16.msra.mxu0 %v11207_v59  ;;  %14840 = vst [vmem:[#allocation182_spill] sm:$0xff] %v11231_v4  ;;  %v2115_v63 = vld [vmem:[#allocation7 + $0xcf0] sm:$0xff]  ;;  %v11235_v59 = vcombine.low %v2103_v36, %v2107_v29  ;;  %v11251_v36 = vcombine.low %v2112_v56, %v2116_v8 }
 0x262   :  { %3760 = vmatprep.mubr.bf16.mxu0 %v10742_v5  ;;  %3815 = vmatpush1.bf16.msra.mxu1 %v11211_v35  ;;  %v11241_v61 = vcombine.high %v2111_v58, %v2115_v63  ;;  %v2120_v35 = vld [vmem:[#allocation7 + $0xd18] sm:$0xff]  ;;  %v11247_v29 = vcombine.low %v2111_v58, %v2115_v63 }
 0x263   :  { %3846 = vmatprep.mubr.bf16.mxu1 %v10742_v5  ;;  %3730 = vmatprep.subr.bf16.mxu0 %v11214_v53  ;;  %14841 = vst [vmem:[#allocation183_spill] sm:$0xff] %v11235_v59  ;;  %v11244_v5 = vcombine.high %v2112_v56, %v2116_v8  ;;  %v2119_v53 = vld [vmem:[#allocation7 + $0xd10] sm:$0xff]  ;;  %14846 = vst [vmem:[#allocation188_spill] sm:$0xff] %v11251_v36  ;;  %v11256_v2 = vcombine.high %v2120_v35, %v2124_v7 }
 0x264   :  { %3816 = vmatprep.subr.bf16.mxu1 %v11217_v39  ;;  %14843 = vst [vmem:[#allocation185_spill] sm:$0xff] %v11241_v61  ;;  %v2123_v39 = vld [vmem:[#allocation7 + $0xd30] sm:$0xff]  ;;  %14845 = vst [vmem:[#allocation187_spill] sm:$0xff] %v11247_v29  ;;  %v11263_v58 = vcombine.low %v2120_v35, %v2124_v7 }
 0x265   :  { %3731 = vmatpush1.bf16.msra.mxu0 %v11221_v52  ;;  %14844 = vst [vmem:[#allocation186_spill] sm:$0xff] %v11244_v5  ;;  %v11253_v14 = vcombine.high %v2119_v53, %v2123_v39  ;;  %14848 = vst [vmem:[#allocation190_spill] sm:$0xff] %v11256_v2  ;;  %v2132_v52 = vld [vmem:[#allocation7 + $0xd78] sm:$0xff]  ;;  %v11259_v63 = vcombine.low %v2119_v53, %v2123_v39 }
 0x266   :  { %3817 = vmatpush1.bf16.msra.mxu1 %v11225_v6  ;;  %3732 = vmatprep.subr.bf16.mxu0 %v11227_v34  ;;  %v2131_v34 = vld [vmem:[#allocation7 + $0xd70] sm:$0xff]  ;;  %v2128_v6 = vld [vmem:[#allocation7 + $0xd58] sm:$0xff]  ;;  %14850 = vst [vmem:[#allocation192_spill] sm:$0xff] %v11263_v58 }
 0x267   :  { %3818 = vmatprep.subr.bf16.mxu1 %v11231_v4  ;;  %14847 = vst [vmem:[#allocation189_spill] sm:$0xff] %v11253_v14  ;;  %v2127_v4 = vld [vmem:[#allocation7 + $0xd50] sm:$0xff]  ;;  %14849 = vst [vmem:[#allocation191_spill] sm:$0xff] %v11259_v63  ;;  %v11268_v8 = vcombine.high %v2128_v6, %v2132_v52  ;;  %v11275_v7 = vcombine.low %v2128_v6, %v2132_v52 }
 0x268   :  { %v11265_v56 = vcombine.high %v2127_v4, %v2131_v34  ;;  %v11271_v39 = vcombine.low %v2127_v4, %v2131_v34 }
 0x269   :  { %3733 = vmatpush1.bf16.msra.mxu0 %v11235_v59  ;;  %14852 = vst [vmem:[#allocation194_spill] sm:$0xff] %v11268_v8  ;;  %v2140_v59 = vld [vmem:[#allocation7 + $0xdb8] sm:$0xff]  ;;  %14854 = vst [vmem:[#allocation196_spill] sm:$0xff] %v11275_v7 }
 0x26a   :  { %3819 = vmatpush1.bf16.msra.mxu1 %v11239_v24  ;;  %3734 = vmatprep.subr.bf16.mxu0 %v11241_v61  ;;  %14851 = vst [vmem:[#allocation193_spill] sm:$0xff] %v11265_v56  ;;  %v2139_v61 = vld [vmem:[#allocation7 + $0xdb0] sm:$0xff]  ;;  %v2136_v24 = vld [vmem:[#allocation7 + $0xd98] sm:$0xff]  ;;  %14853 = vst [vmem:[#allocation195_spill] sm:$0xff] %v11271_v39 }
 0x26b   :  { %3820 = vmatprep.subr.bf16.mxu1 %v11244_v5  ;;  %v2135_v5 = vld [vmem:[#allocation7 + $0xd90] sm:$0xff]  ;;  %v11280_v53 = vcombine.high %v2136_v24, %v2140_v59  ;;  %v11287_v52 = vcombine.low %v2136_v24, %v2140_v59 }
 0x26c   :  { %v11277_v35 = vcombine.high %v2135_v5, %v2139_v61  ;;  %v11283_v4 = vcombine.low %v2135_v5, %v2139_v61 }
 0x26d   :  { %3735 = vmatpush1.bf16.msra.mxu0 %v11247_v29  ;;  %14856 = vst [vmem:[#allocation198_spill] sm:$0xff] %v11280_v53  ;;  %v2148_v29 = vld [vmem:[#allocation7 + $0xdf8] sm:$0xff]  ;;  %14858 = vst [vmem:[#allocation200_spill] sm:$0xff] %v11287_v52 }
 0x26e   :  { %3821 = vmatpush1.bf16.msra.mxu1 %v11251_v36  ;;  %3736 = vmatprep.subr.bf16.mxu0 %v11253_v14  ;;  %14855 = vst [vmem:[#allocation197_spill] sm:$0xff] %v11277_v35  ;;  %v2147_v14 = vld [vmem:[#allocation7 + $0xdf0] sm:$0xff]  ;;  %v2144_v36 = vld [vmem:[#allocation7 + $0xdd8] sm:$0xff]  ;;  %14857 = vst [vmem:[#allocation199_spill] sm:$0xff] %v11283_v4 }
 0x26f   :  { %3822 = vmatprep.subr.bf16.mxu1 %v11256_v2  ;;  %v2143_v2 = vld [vmem:[#allocation7 + $0xdd0] sm:$0xff]  ;;  %v11292_v34 = vcombine.high %v2144_v36, %v2148_v29  ;;  %v11299_v59 = vcombine.low %v2144_v36, %v2148_v29 }
 0x270   :  { %v11289_v6 = vcombine.high %v2143_v2, %v2147_v14  ;;  %v11295_v5 = vcombine.low %v2143_v2, %v2147_v14 }
 0x271   :  { %3737 = vmatpush1.bf16.msra.mxu0 %v11259_v63  ;;  %14860 = vst [vmem:[#allocation202_spill] sm:$0xff] %v11292_v34  ;;  %v2156_v63 = vld [vmem:[#allocation7 + $0xe38] sm:$0xff]  ;;  %14862 = vst [vmem:[#allocation204_spill] sm:$0xff] %v11299_v59 }
 0x272   :  { %3823 = vmatpush1.bf16.msra.mxu1 %v11263_v58  ;;  %3738 = vmatprep.subr.bf16.mxu0 %v11265_v56  ;;  %14859 = vst [vmem:[#allocation201_spill] sm:$0xff] %v11289_v6  ;;  %v2155_v56 = vld [vmem:[#allocation7 + $0xe30] sm:$0xff]  ;;  %v2152_v58 = vld [vmem:[#allocation7 + $0xe18] sm:$0xff]  ;;  %14861 = vst [vmem:[#allocation203_spill] sm:$0xff] %v11295_v5 }
 0x273   :  { %3824 = vmatprep.subr.bf16.mxu1 %v11268_v8  ;;  %v2151_v8 = vld [vmem:[#allocation7 + $0xe10] sm:$0xff]  ;;  %v11304_v61 = vcombine.high %v2152_v58, %v2156_v63  ;;  %v11311_v29 = vcombine.low %v2152_v58, %v2156_v63 }
 0x274   :  { %v11301_v24 = vcombine.high %v2151_v8, %v2155_v56  ;;  %v11307_v14 = vcombine.low %v2151_v8, %v2155_v56 }
 0x275   :  { %3739 = vmatpush1.bf16.msra.mxu0 %v11271_v39  ;;  %14864 = vst [vmem:[#allocation206_spill] sm:$0xff] %v11304_v61  ;;  %v2164_v39 = vld [vmem:[#allocation7 + $0xe78] sm:$0xff]  ;;  %14866 = vst [vmem:[#allocation208_spill] sm:$0xff] %v11311_v29 }
 0x276   :  { %3825 = vmatpush1.bf16.msra.mxu1 %v11275_v7  ;;  %3740 = vmatprep.subr.bf16.mxu0 %v11277_v35  ;;  %14863 = vst [vmem:[#allocation205_spill] sm:$0xff] %v11301_v24  ;;  %v2163_v35 = vld [vmem:[#allocation7 + $0xe70] sm:$0xff]  ;;  %v2160_v7 = vld [vmem:[#allocation7 + $0xe58] sm:$0xff]  ;;  %14865 = vst [vmem:[#allocation207_spill] sm:$0xff] %v11307_v14 }
 0x277   :  { %3826 = vmatprep.subr.bf16.mxu1 %v11280_v53  ;;  %v2159_v53 = vld [vmem:[#allocation7 + $0xe50] sm:$0xff]  ;;  %v11316_v2 = vcombine.high %v2160_v7, %v2164_v39  ;;  %v11323_v63 = vcombine.low %v2160_v7, %v2164_v39 }
 0x278   :  { %v11313_v36 = vcombine.high %v2159_v53, %v2163_v35  ;;  %v11319_v56 = vcombine.low %v2159_v53, %v2163_v35 }
 0x279   :  { %3741 = vmatpush1.bf16.msra.mxu0 %v11283_v4  ;;  %14868 = vst [vmem:[#allocation210_spill] sm:$0xff] %v11316_v2  ;;  %v2172_v4 = vld [vmem:[#allocation7 + $0xeb8] sm:$0xff]  ;;  %14870 = vst [vmem:[#allocation212_spill] sm:$0xff] %v11323_v63 }
 0x27a   :  { %3827 = vmatpush1.bf16.msra.mxu1 %v11287_v52  ;;  %3742 = vmatprep.subr.bf16.mxu0 %v11289_v6  ;;  %14867 = vst [vmem:[#allocation209_spill] sm:$0xff] %v11313_v36  ;;  %v2171_v6 = vld [vmem:[#allocation7 + $0xeb0] sm:$0xff]  ;;  %v2168_v52 = vld [vmem:[#allocation7 + $0xe98] sm:$0xff]  ;;  %14869 = vst [vmem:[#allocation211_spill] sm:$0xff] %v11319_v56 }
 0x27b   :  { %3828 = vmatprep.subr.bf16.mxu1 %v11292_v34  ;;  %v2167_v34 = vld [vmem:[#allocation7 + $0xe90] sm:$0xff]  ;;  %v11328_v8 = vcombine.high %v2168_v52, %v2172_v4  ;;  %v11335_v39 = vcombine.low %v2168_v52, %v2172_v4 }
 0x27c   :  { %v11325_v58 = vcombine.high %v2167_v34, %v2171_v6  ;;  %v11331_v35 = vcombine.low %v2167_v34, %v2171_v6 }
 0x27d   :  { %3743 = vmatpush1.bf16.msra.mxu0 %v11295_v5  ;;  %14872 = vst [vmem:[#allocation214_spill] sm:$0xff] %v11328_v8  ;;  %v2180_v5 = vld [vmem:[#allocation7 + $0xef8] sm:$0xff]  ;;  %14874 = vst [vmem:[#allocation216_spill] sm:$0xff] %v11335_v39 }
 0x27e   :  { %3829 = vmatpush1.bf16.msra.mxu1 %v11299_v59  ;;  %3744 = vmatprep.subr.bf16.mxu0 %v11301_v24  ;;  %14871 = vst [vmem:[#allocation213_spill] sm:$0xff] %v11325_v58  ;;  %v2179_v24 = vld [vmem:[#allocation7 + $0xef0] sm:$0xff]  ;;  %v2176_v59 = vld [vmem:[#allocation7 + $0xed8] sm:$0xff]  ;;  %14873 = vst [vmem:[#allocation215_spill] sm:$0xff] %v11331_v35 }
 0x27f   :  { %3830 = vmatprep.subr.bf16.mxu1 %v11304_v61  ;;  %v2175_v61 = vld [vmem:[#allocation7 + $0xed0] sm:$0xff]  ;;  %v11340_v53 = vcombine.high %v2176_v59, %v2180_v5  ;;  %v11347_v4 = vcombine.low %v2176_v59, %v2180_v5 }
 0x280   :  { %v11337_v7 = vcombine.high %v2175_v61, %v2179_v24  ;;  %v11343_v6 = vcombine.low %v2175_v61, %v2179_v24 }
 0x281   :  { %3745 = vmatpush1.bf16.msra.mxu0 %v11307_v14  ;;  %14876 = vst [vmem:[#allocation218_spill] sm:$0xff] %v11340_v53  ;;  %v2188_v14 = vld [vmem:[#allocation7 + $0xf38] sm:$0xff]  ;;  %14878 = vst [vmem:[#allocation220_spill] sm:$0xff] %v11347_v4 }
 0x282   :  { %3831 = vmatpush1.bf16.msra.mxu1 %v11311_v29  ;;  %3746 = vmatprep.subr.bf16.mxu0 %v11313_v36  ;;  %14875 = vst [vmem:[#allocation217_spill] sm:$0xff] %v11337_v7  ;;  %v2187_v36 = vld [vmem:[#allocation7 + $0xf30] sm:$0xff]  ;;  %v2184_v29 = vld [vmem:[#allocation7 + $0xf18] sm:$0xff]  ;;  %14877 = vst [vmem:[#allocation219_spill] sm:$0xff] %v11343_v6 }
 0x283   :  { %3832 = vmatprep.subr.bf16.mxu1 %v11316_v2  ;;  %v2183_v2 = vld [vmem:[#allocation7 + $0xf10] sm:$0xff]  ;;  %v11352_v34 = vcombine.high %v2184_v29, %v2188_v14  ;;  %v11359_v5 = vcombine.low %v2184_v29, %v2188_v14 }
 0x284   :  { %v11349_v52 = vcombine.high %v2183_v2, %v2187_v36  ;;  %v11355_v24 = vcombine.low %v2183_v2, %v2187_v36 }
 0x285   :  { %3747 = vmatpush1.bf16.msra.mxu0 %v11319_v56  ;;  %14880 = vst [vmem:[#allocation222_spill] sm:$0xff] %v11352_v34  ;;  %v2196_v56 = vld [vmem:[#allocation7 + $0xf78] sm:$0xff]  ;;  %14882 = vst [vmem:[#allocation224_spill] sm:$0xff] %v11359_v5 }
 0x286   :  { %3833 = vmatpush1.bf16.msra.mxu1 %v11323_v63  ;;  %3748 = vmatprep.subr.bf16.mxu0 %v11325_v58  ;;  %14879 = vst [vmem:[#allocation221_spill] sm:$0xff] %v11349_v52  ;;  %v2195_v58 = vld [vmem:[#allocation7 + $0xf70] sm:$0xff]  ;;  %v2192_v63 = vld [vmem:[#allocation7 + $0xf58] sm:$0xff]  ;;  %14881 = vst [vmem:[#allocation223_spill] sm:$0xff] %v11355_v24 }
 0x287   :  { %3834 = vmatprep.subr.bf16.mxu1 %v11328_v8  ;;  %v2191_v8 = vld [vmem:[#allocation7 + $0xf50] sm:$0xff]  ;;  %v11364_v61 = vcombine.high %v2192_v63, %v2196_v56  ;;  %v11371_v14 = vcombine.low %v2192_v63, %v2196_v56 }
 0x288   :  { %v11361_v59 = vcombine.high %v2191_v8, %v2195_v58  ;;  %v11367_v36 = vcombine.low %v2191_v8, %v2195_v58 }
 0x289   :  { %3749 = vmatpush1.bf16.msra.mxu0 %v11331_v35  ;;  %14884 = vst [vmem:[#allocation226_spill] sm:$0xff] %v11364_v61  ;;  %v2204_v35 = vld [vmem:[#allocation7 + $0xfb8] sm:$0xff]  ;;  %14886 = vst [vmem:[#allocation228_spill] sm:$0xff] %v11371_v14 }
 0x28a   :  { %3835 = vmatpush1.bf16.msra.mxu1 %v11335_v39  ;;  %3750 = vmatprep.subr.bf16.mxu0 %v11337_v7  ;;  %14883 = vst [vmem:[#allocation225_spill] sm:$0xff] %v11361_v59  ;;  %v2203_v7 = vld [vmem:[#allocation7 + $0xfb0] sm:$0xff]  ;;  %v2200_v39 = vld [vmem:[#allocation7 + $0xf98] sm:$0xff]  ;;  %14885 = vst [vmem:[#allocation227_spill] sm:$0xff] %v11367_v36 }
 0x28b   :  { %3836 = vmatprep.subr.bf16.mxu1 %v11340_v53  ;;  %v2199_v53 = vld [vmem:[#allocation7 + $0xf90] sm:$0xff]  ;;  %v11376_v2 = vcombine.high %v2200_v39, %v2204_v35  ;;  %v11383_v56 = vcombine.low %v2200_v39, %v2204_v35 }
 0x28c   :  { %v11373_v29 = vcombine.high %v2199_v53, %v2203_v7  ;;  %v11379_v58 = vcombine.low %v2199_v53, %v2203_v7 }
 0x28d   :  { %3751 = vmatpush1.bf16.msra.mxu0 %v11343_v6  ;;  %14888 = vst [vmem:[#allocation230_spill] sm:$0xff] %v11376_v2  ;;  %v2212_v6 = vld [vmem:[#allocation7 + $0xff8] sm:$0xff]  ;;  %14890 = vst [vmem:[#allocation232_spill] sm:$0xff] %v11383_v56 }
 0x28e   :  { %3837 = vmatpush1.bf16.msra.mxu1 %v11347_v4  ;;  %3752 = vmatprep.subr.bf16.mxu0 %v11349_v52  ;;  %14887 = vst [vmem:[#allocation229_spill] sm:$0xff] %v11373_v29  ;;  %v2211_v52 = vld [vmem:[#allocation7 + $0xff0] sm:$0xff]  ;;  %v2208_v4 = vld [vmem:[#allocation7 + $0xfd8] sm:$0xff]  ;;  %14889 = vst [vmem:[#allocation231_spill] sm:$0xff] %v11379_v58 }
 0x28f   :  { %3838 = vmatprep.subr.bf16.mxu1 %v11352_v34  ;;  %v2207_v34 = vld [vmem:[#allocation7 + $0xfd0] sm:$0xff]  ;;  %v11388_v8 = vcombine.high %v2208_v4, %v2212_v6  ;;  %v11395_v35 = vcombine.low %v2208_v4, %v2212_v6  ;;  %v11412_v4 = vld [vmem:[#allocation2] sm:$0xff] }
 0x290   :  { %v11385_v63 = vcombine.high %v2207_v34, %v2211_v52  ;;  %v11391_v7 = vcombine.low %v2207_v34, %v2211_v52  ;;  %v11405_v52 = vld [vmem:[#allocation2 + $0x40] sm:$0xff]  ;;  %v1701_v34 = vld [vmem:[#allocation7 + $0x48] sm:$0xff] }
 0x291   :  { %3753 = vmatpush1.bf16.msra.mxu0 %v11355_v24  ;;  %14892 = vst [vmem:[#allocation234_spill] sm:$0xff] %v11388_v8  ;;  %v1697_v24 = vld [vmem:[#allocation7 + $0x28] sm:$0xff]  ;;  %14894 = vst [vmem:[#allocation236_spill] sm:$0xff] %v11395_v35 }
 0x292   :  { %3839 = vmatpush1.bf16.msra.mxu1 %v11359_v5  ;;  %3754 = vmatprep.subr.bf16.mxu0 %v11361_v59  ;;  %14891 = vst [vmem:[#allocation233_spill] sm:$0xff] %v11385_v63  ;;  %v1696_v59 = vld [vmem:[#allocation7 + $0x20] sm:$0xff]  ;;  %v1693_v5 = vld [vmem:[#allocation7 + $0x8] sm:$0xff]  ;;  %14893 = vst [vmem:[#allocation235_spill] sm:$0xff] %v11391_v7 }
 0x293   :  { %3840 = vmatprep.subr.bf16.mxu1 %v11364_v61  ;;  %v1692_v61 = vld [vmem:[#allocation7] sm:$0xff]  ;;  %v11400_v53 = vcombine.high %v1693_v5, %v1697_v24  ;;  %v11409_v6 = vcombine.low %v1693_v5, %v1697_v24 }
 0x294   :  { %v11397_v39 = vcombine.high %v1692_v61, %v1696_v59 }
 0x295   :  { %3755 = vmatpush1.bf16.msra.mxu0 %v11367_v36  ;;  %14896 = vst [vmem:[#allocation238_spill] sm:$0xff] %v11400_v53  ;;  %14898 = vst [vmem:[#allocation240_spill] sm:$0xff] %v11409_v6  ;;  %v1716_v36 = vld [vmem:[#allocation7 + $0xc0] sm:$0xff] }
 0x296   :  { %3841 = vmatpush1.bf16.msra.mxu1 %v11371_v14  ;;  %3756 = vmatprep.subr.bf16.mxu0 %v11373_v29  ;;  %14895 = vst [vmem:[#allocation237_spill] sm:$0xff] %v11397_v39  ;;  %v1704_v29 = vld [vmem:[#allocation7 + $0x60] sm:$0xff]  ;;  %v11403_v14 = vcombine.low %v1692_v61, %v1696_v59  ;;  %v11419_v59 = vcombine.high %v11412_v4, %v11405_v52 }
 0x297   :  { %3842 = vmatprep.subr.bf16.mxu1 %v11376_v2  ;;  %v1700_v2 = vld [vmem:[#allocation7 + $0x40] sm:$0xff] }
 0x298   :  { %14897 = vst [vmem:[#allocation239_spill] sm:$0xff] %v11403_v14  ;;  %v11425_v24 = vcombine.low %v1700_v2, %v1704_v29 }
 0x299   :  { %3757 = vmatpush1.bf16.msra.mxu0 %v11379_v58 }
 0x29a   :  { %3843 = vmatpush1.bf16.msra.mxu1 %v11383_v56  ;;  %3758 = vmatprep.subr.bf16.mxu0 %v11385_v63  ;;  %v1705_v56 = vld [vmem:[#allocation7 + $0x68] sm:$0xff]  ;;  %v1708_v63 = vld [vmem:[#allocation7 + $0x80] sm:$0xff]  ;;  %14901 = vst [vmem:[#allocation243_spill] sm:$0xff] %v11425_v24 }
 0x29b   :  { %3844 = vmatprep.subr.bf16.mxu1 %v11388_v8  ;;  %v11414_v8 = vcombine.high %v1700_v2, %v1704_v29  ;;  %v11421_v61 = vcombine.high %v1701_v34, %v1705_v56  ;;  %v11429_v5 = vcombine.low %v1701_v34, %v1705_v56  ;;  %v1717_v29 = vld [vmem:[#allocation7 + $0xc8] sm:$0xff] }
 0x29c   :  { %v1721_v2 = vld [vmem:[#allocation7 + $0xe8] sm:$0xff] }
 0x29d   :  { %3759 = vmatpush1.bf16.msra.mxu0 %v11391_v7  ;;  %14899 = vst [vmem:[#allocation241_spill] sm:$0xff] %v11414_v8  ;;  %v1712_v7 = vld [vmem:[#allocation7 + $0xa0] sm:$0xff]  ;;  %14900 = vst [vmem:[#allocation242_spill] sm:$0xff] %v11421_v61 }
 0x29e   :  { %3845 = vmatpush1.bf16.msra.mxu1 %v11395_v35  ;;  %5157 = vmatprep.subr.bf16.mxu0 %v11397_v39  ;;  %v1709_v35 = vld [vmem:[#allocation7 + $0x88] sm:$0xff]  ;;  %14902 = vst [vmem:[#allocation244_spill] sm:$0xff] %v11429_v5 }
 0x29f   :  { %5243 = vmatprep.subr.bf16.mxu1 %v11400_v53  ;;  %v1713_v39 = vld [vmem:[#allocation7 + $0xa8] sm:$0xff]  ;;  %v11431_v53 = vcombine.high %v1708_v63, %v1712_v7 }
 0x2a0   :  { %3761 = vmatmul.mubr.bf16.vlgmr.msra.gmra.mrb[36].mxu0 %v10748_v9  ;;  %v11435_v58 = vcombine.high %v1709_v35, %v1713_v39  ;;  %v11443_v56 = vcombine.low %v1709_v35, %v1713_v39  ;;  %v11460_v39 = vcombine.high %v1725_v23, %v1729_v28 }
 0x2a1   :  { %3847 = vmatmul.mubr.bf16.vlgmr.msra.gmra.mrb[36].mxu1 %v10748_v9  ;;  %5158 = vmatpush1.bf16.msra.mxu0 %v11403_v14  ;;  %14903 = vst [vmem:[#allocation245_spill] sm:$0xff] %v11431_v53  ;;  %v1720_v9 = vld [vmem:[#allocation7 + $0xe0] sm:$0xff]  ;;  %v11439_v14 = vcombine.low %v1708_v63, %v1712_v7  ;;  %v11455_v7 = vcombine.low %v1717_v29, %v1721_v2 }
 0x2a2   :  { %5189 = vmatprep.mubr.bf16.mxu0 %v11419_v59  ;;  %5244 = vmatpush1.bf16.msra.mxu1 %v11409_v6  ;;  %14904 = vst [vmem:[#allocation246_spill] sm:$0xff] %v11435_v58  ;;  %14906 = vst [vmem:[#allocation248_spill] sm:$0xff] %v11443_v56  ;;  %v11445_v34 = vcombine.high %v1716_v36, %v1720_v9  ;;  %v1724_v6 = vld [vmem:[#allocation7 + $0x100] sm:$0xff]  ;;  %v11451_v63 = vcombine.low %v1716_v36, %v1720_v9 }
 0x2a3   :  { %5275 = vmatprep.mubr.bf16.mxu1 %v11419_v59  ;;  %5159 = vmatprep.subr.bf16.mxu0 %v11414_v8  ;;  %14905 = vst [vmem:[#allocation247_spill] sm:$0xff] %v11439_v14  ;;  %v11448_v8 = vcombine.high %v1717_v29, %v1721_v2  ;;  %14910 = vst [vmem:[#allocation252_spill] sm:$0xff] %v11455_v7  ;;  %v11467_v36 = vcombine.low %v1725_v23, %v1729_v28 }
 0x2a4   :  { %5245 = vmatprep.subr.bf16.mxu1 %v11421_v61  ;;  %14907 = vst [vmem:[#allocation249_spill] sm:$0xff] %v11445_v34  ;;  %v1728_v61 = vld [vmem:[#allocation7 + $0x120] sm:$0xff]  ;;  %14909 = vst [vmem:[#allocation251_spill] sm:$0xff] %v11451_v63 }
 0x2a5   :  { %5160 = vmatpush1.bf16.msra.mxu0 %v11425_v24  ;;  %14908 = vst [vmem:[#allocation250_spill] sm:$0xff] %v11448_v8  ;;  %v11457_v35 = vcombine.high %v1724_v6, %v1728_v61  ;;  %14912 = vst [vmem:[#allocation254_spill] sm:$0xff] %v11460_v39  ;;  %v1737_v24 = vld [vmem:[#allocation7 + $0x168] sm:$0xff]  ;;  %v11463_v9 = vcombine.low %v1724_v6, %v1728_v61 }
 0x2a6   :  { %5246 = vmatpush1.bf16.msra.mxu1 %v11429_v5  ;;  %5161 = vmatprep.subr.bf16.mxu0 %v11431_v53  ;;  %v1736_v53 = vld [vmem:[#allocation7 + $0x160] sm:$0xff]  ;;  %v1733_v5 = vld [vmem:[#allocation7 + $0x148] sm:$0xff]  ;;  %14914 = vst [vmem:[#allocation256_spill] sm:$0xff] %v11467_v36 }
 0x2a7   :  { %5247 = vmatprep.subr.bf16.mxu1 %v11435_v58  ;;  %14911 = vst [vmem:[#allocation253_spill] sm:$0xff] %v11457_v35  ;;  %v1732_v58 = vld [vmem:[#allocation7 + $0x140] sm:$0xff]  ;;  %14913 = vst [vmem:[#allocation255_spill] sm:$0xff] %v11463_v9  ;;  %v11472_v2 = vcombine.high %v1733_v5, %v1737_v24  ;;  %v11479_v28 = vcombine.low %v1733_v5, %v1737_v24 }
 0x2a8   :  { %v11469_v29 = vcombine.high %v1732_v58, %v1736_v53  ;;  %v11475_v6 = vcombine.low %v1732_v58, %v1736_v53 }
 0x2a9   :  { %5162 = vmatpush1.bf16.msra.mxu0 %v11439_v14  ;;  %14916 = vst [vmem:[#allocation258_spill] sm:$0xff] %v11472_v2  ;;  %v1745_v14 = vld [vmem:[#allocation7 + $0x1a8] sm:$0xff]  ;;  %14918 = vst [vmem:[#allocation260_spill] sm:$0xff] %v11479_v28 }
 0x2aa   :  { %5248 = vmatpush1.bf16.msra.mxu1 %v11443_v56  ;;  %5163 = vmatprep.subr.bf16.mxu0 %v11445_v34  ;;  %14915 = vst [vmem:[#allocation257_spill] sm:$0xff] %v11469_v29  ;;  %v1744_v34 = vld [vmem:[#allocation7 + $0x1a0] sm:$0xff]  ;;  %v1741_v56 = vld [vmem:[#allocation7 + $0x188] sm:$0xff]  ;;  %14917 = vst [vmem:[#allocation259_spill] sm:$0xff] %v11475_v6 }
 0x2ab   :  { %5249 = vmatprep.subr.bf16.mxu1 %v11448_v8  ;;  %v1740_v8 = vld [vmem:[#allocation7 + $0x180] sm:$0xff]  ;;  %v11484_v61 = vcombine.high %v1741_v56, %v1745_v14  ;;  %v11491_v53 = vcombine.low %v1741_v56, %v1745_v14 }
 0x2ac   :  { %v11481_v23 = vcombine.high %v1740_v8, %v1744_v34  ;;  %v11487_v58 = vcombine.low %v1740_v8, %v1744_v34 }
 0x2ad   :  { %5164 = vmatpush1.bf16.msra.mxu0 %v11451_v63  ;;  %14920 = vst [vmem:[#allocation262_spill] sm:$0xff] %v11484_v61  ;;  %v1753_v63 = vld [vmem:[#allocation7 + $0x1e8] sm:$0xff]  ;;  %14922 = vst [vmem:[#allocation264_spill] sm:$0xff] %v11491_v53 }
 0x2ae   :  { %5250 = vmatpush1.bf16.msra.mxu1 %v11455_v7  ;;  %5165 = vmatprep.subr.bf16.mxu0 %v11457_v35  ;;  %14919 = vst [vmem:[#allocation261_spill] sm:$0xff] %v11481_v23  ;;  %v1752_v35 = vld [vmem:[#allocation7 + $0x1e0] sm:$0xff]  ;;  %v1749_v7 = vld [vmem:[#allocation7 + $0x1c8] sm:$0xff]  ;;  %14921 = vst [vmem:[#allocation263_spill] sm:$0xff] %v11487_v58 }
 0x2af   :  { %5251 = vmatprep.subr.bf16.mxu1 %v11460_v39  ;;  %v1748_v39 = vld [vmem:[#allocation7 + $0x1c0] sm:$0xff]  ;;  %v11496_v5 = vcombine.high %v1749_v7, %v1753_v63  ;;  %v11503_v14 = vcombine.low %v1749_v7, %v1753_v63 }
 0x2b0   :  { %v11493_v24 = vcombine.high %v1748_v39, %v1752_v35  ;;  %v11499_v8 = vcombine.low %v1748_v39, %v1752_v35 }
 0x2b1   :  { %5166 = vmatpush1.bf16.msra.mxu0 %v11463_v9  ;;  %14924 = vst [vmem:[#allocation266_spill] sm:$0xff] %v11496_v5  ;;  %v1761_v9 = vld [vmem:[#allocation7 + $0x228] sm:$0xff]  ;;  %14926 = vst [vmem:[#allocation268_spill] sm:$0xff] %v11503_v14 }
 0x2b2   :  { %5252 = vmatpush1.bf16.msra.mxu1 %v11467_v36  ;;  %5167 = vmatprep.subr.bf16.mxu0 %v11469_v29  ;;  %14923 = vst [vmem:[#allocation265_spill] sm:$0xff] %v11493_v24  ;;  %v1760_v29 = vld [vmem:[#allocation7 + $0x220] sm:$0xff]  ;;  %v1757_v36 = vld [vmem:[#allocation7 + $0x208] sm:$0xff]  ;;  %14925 = vst [vmem:[#allocation267_spill] sm:$0xff] %v11499_v8 }
 0x2b3   :  { %5253 = vmatprep.subr.bf16.mxu1 %v11472_v2  ;;  %v1756_v2 = vld [vmem:[#allocation7 + $0x200] sm:$0xff]  ;;  %v11508_v34 = vcombine.high %v1757_v36, %v1761_v9  ;;  %v11515_v63 = vcombine.low %v1757_v36, %v1761_v9 }
 0x2b4   :  { %v11505_v56 = vcombine.high %v1756_v2, %v1760_v29  ;;  %v11511_v35 = vcombine.low %v1756_v2, %v1760_v29 }
 0x2b5   :  { %5168 = vmatpush1.bf16.msra.mxu0 %v11475_v6  ;;  %14928 = vst [vmem:[#allocation270_spill] sm:$0xff] %v11508_v34  ;;  %v1769_v6 = vld [vmem:[#allocation7 + $0x268] sm:$0xff]  ;;  %14930 = vst [vmem:[#allocation272_spill] sm:$0xff] %v11515_v63 }
 0x2b6   :  { %5254 = vmatpush1.bf16.msra.mxu1 %v11479_v28  ;;  %5169 = vmatprep.subr.bf16.mxu0 %v11481_v23  ;;  %14927 = vst [vmem:[#allocation269_spill] sm:$0xff] %v11505_v56  ;;  %v1768_v23 = vld [vmem:[#allocation7 + $0x260] sm:$0xff]  ;;  %v1765_v28 = vld [vmem:[#allocation7 + $0x248] sm:$0xff]  ;;  %14929 = vst [vmem:[#allocation271_spill] sm:$0xff] %v11511_v35 }
 0x2b7   :  { %5255 = vmatprep.subr.bf16.mxu1 %v11484_v61  ;;  %v1764_v61 = vld [vmem:[#allocation7 + $0x240] sm:$0xff]  ;;  %v11520_v39 = vcombine.high %v1765_v28, %v1769_v6  ;;  %v11527_v9 = vcombine.low %v1765_v28, %v1769_v6 }
 0x2b8   :  { %v11517_v7 = vcombine.high %v1764_v61, %v1768_v23  ;;  %v11523_v29 = vcombine.low %v1764_v61, %v1768_v23 }
 0x2b9   :  { %5170 = vmatpush1.bf16.msra.mxu0 %v11487_v58  ;;  %14932 = vst [vmem:[#allocation274_spill] sm:$0xff] %v11520_v39  ;;  %v1777_v58 = vld [vmem:[#allocation7 + $0x2a8] sm:$0xff]  ;;  %14934 = vst [vmem:[#allocation276_spill] sm:$0xff] %v11527_v9 }
 0x2ba   :  { %5256 = vmatpush1.bf16.msra.mxu1 %v11491_v53  ;;  %5171 = vmatprep.subr.bf16.mxu0 %v11493_v24  ;;  %14931 = vst [vmem:[#allocation273_spill] sm:$0xff] %v11517_v7  ;;  %v1776_v24 = vld [vmem:[#allocation7 + $0x2a0] sm:$0xff]  ;;  %v1773_v53 = vld [vmem:[#allocation7 + $0x288] sm:$0xff]  ;;  %14933 = vst [vmem:[#allocation275_spill] sm:$0xff] %v11523_v29 }
 0x2bb   :  { %5257 = vmatprep.subr.bf16.mxu1 %v11496_v5  ;;  %v1772_v5 = vld [vmem:[#allocation7 + $0x280] sm:$0xff]  ;;  %v11532_v2 = vcombine.high %v1773_v53, %v1777_v58  ;;  %v11539_v6 = vcombine.low %v1773_v53, %v1777_v58 }
 0x2bc   :  { %v11529_v36 = vcombine.high %v1772_v5, %v1776_v24  ;;  %v11535_v23 = vcombine.low %v1772_v5, %v1776_v24 }
 0x2bd   :  { %5172 = vmatpush1.bf16.msra.mxu0 %v11499_v8  ;;  %14936 = vst [vmem:[#allocation278_spill] sm:$0xff] %v11532_v2  ;;  %v1785_v8 = vld [vmem:[#allocation7 + $0x2e8] sm:$0xff]  ;;  %14938 = vst [vmem:[#allocation280_spill] sm:$0xff] %v11539_v6 }
 0x2be   :  { %5258 = vmatpush1.bf16.msra.mxu1 %v11503_v14  ;;  %5173 = vmatprep.subr.bf16.mxu0 %v11505_v56  ;;  %14935 = vst [vmem:[#allocation277_spill] sm:$0xff] %v11529_v36  ;;  %v1784_v56 = vld [vmem:[#allocation7 + $0x2e0] sm:$0xff]  ;;  %v1781_v14 = vld [vmem:[#allocation7 + $0x2c8] sm:$0xff]  ;;  %14937 = vst [vmem:[#allocation279_spill] sm:$0xff] %v11535_v23 }
 0x2bf   :  { %5259 = vmatprep.subr.bf16.mxu1 %v11508_v34  ;;  %v1780_v34 = vld [vmem:[#allocation7 + $0x2c0] sm:$0xff]  ;;  %v11544_v61 = vcombine.high %v1781_v14, %v1785_v8  ;;  %v11551_v58 = vcombine.low %v1781_v14, %v1785_v8 }
 0x2c0   :  { %v11541_v28 = vcombine.high %v1780_v34, %v1784_v56  ;;  %v11547_v24 = vcombine.low %v1780_v34, %v1784_v56 }
 0x2c1   :  { %5174 = vmatpush1.bf16.msra.mxu0 %v11511_v35  ;;  %14940 = vst [vmem:[#allocation282_spill] sm:$0xff] %v11544_v61  ;;  %v1793_v35 = vld [vmem:[#allocation7 + $0x328] sm:$0xff]  ;;  %14942 = vst [vmem:[#allocation284_spill] sm:$0xff] %v11551_v58 }
 0x2c2   :  { %5260 = vmatpush1.bf16.msra.mxu1 %v11515_v63  ;;  %5175 = vmatprep.subr.bf16.mxu0 %v11517_v7  ;;  %14939 = vst [vmem:[#allocation281_spill] sm:$0xff] %v11541_v28  ;;  %v1792_v7 = vld [vmem:[#allocation7 + $0x320] sm:$0xff]  ;;  %v1789_v63 = vld [vmem:[#allocation7 + $0x308] sm:$0xff]  ;;  %14941 = vst [vmem:[#allocation283_spill] sm:$0xff] %v11547_v24 }
 0x2c3   :  { %5261 = vmatprep.subr.bf16.mxu1 %v11520_v39  ;;  %v1788_v39 = vld [vmem:[#allocation7 + $0x300] sm:$0xff]  ;;  %v11556_v5 = vcombine.high %v1789_v63, %v1793_v35  ;;  %v11563_v8 = vcombine.low %v1789_v63, %v1793_v35 }
 0x2c4   :  { %v11553_v53 = vcombine.high %v1788_v39, %v1792_v7  ;;  %v11559_v56 = vcombine.low %v1788_v39, %v1792_v7 }
 0x2c5   :  { %5176 = vmatpush1.bf16.msra.mxu0 %v11523_v29  ;;  %14944 = vst [vmem:[#allocation286_spill] sm:$0xff] %v11556_v5  ;;  %v1801_v29 = vld [vmem:[#allocation7 + $0x368] sm:$0xff]  ;;  %14946 = vst [vmem:[#allocation288_spill] sm:$0xff] %v11563_v8 }
 0x2c6   :  { %5262 = vmatpush1.bf16.msra.mxu1 %v11527_v9  ;;  %5177 = vmatprep.subr.bf16.mxu0 %v11529_v36  ;;  %14943 = vst [vmem:[#allocation285_spill] sm:$0xff] %v11553_v53  ;;  %v1800_v36 = vld [vmem:[#allocation7 + $0x360] sm:$0xff]  ;;  %v1797_v9 = vld [vmem:[#allocation7 + $0x348] sm:$0xff]  ;;  %14945 = vst [vmem:[#allocation287_spill] sm:$0xff] %v11559_v56 }
 0x2c7   :  { %5263 = vmatprep.subr.bf16.mxu1 %v11532_v2  ;;  %v1796_v2 = vld [vmem:[#allocation7 + $0x340] sm:$0xff]  ;;  %v11568_v34 = vcombine.high %v1797_v9, %v1801_v29  ;;  %v11575_v35 = vcombine.low %v1797_v9, %v1801_v29 }
 0x2c8   :  { %v11565_v14 = vcombine.high %v1796_v2, %v1800_v36  ;;  %v11571_v7 = vcombine.low %v1796_v2, %v1800_v36 }
 0x2c9   :  { %5178 = vmatpush1.bf16.msra.mxu0 %v11535_v23  ;;  %14948 = vst [vmem:[#allocation290_spill] sm:$0xff] %v11568_v34  ;;  %v1809_v23 = vld [vmem:[#allocation7 + $0x3a8] sm:$0xff]  ;;  %14950 = vst [vmem:[#allocation292_spill] sm:$0xff] %v11575_v35 }
 0x2ca   :  { %5264 = vmatpush1.bf16.msra.mxu1 %v11539_v6  ;;  %5179 = vmatprep.subr.bf16.mxu0 %v11541_v28  ;;  %14947 = vst [vmem:[#allocation289_spill] sm:$0xff] %v11565_v14  ;;  %v1808_v28 = vld [vmem:[#allocation7 + $0x3a0] sm:$0xff]  ;;  %v1805_v6 = vld [vmem:[#allocation7 + $0x388] sm:$0xff]  ;;  %14949 = vst [vmem:[#allocation291_spill] sm:$0xff] %v11571_v7 }
 0x2cb   :  { %5265 = vmatprep.subr.bf16.mxu1 %v11544_v61  ;;  %v1804_v61 = vld [vmem:[#allocation7 + $0x380] sm:$0xff]  ;;  %v11580_v39 = vcombine.high %v1805_v6, %v1809_v23  ;;  %v11587_v29 = vcombine.low %v1805_v6, %v1809_v23 }
 0x2cc   :  { %v11577_v63 = vcombine.high %v1804_v61, %v1808_v28  ;;  %v11583_v36 = vcombine.low %v1804_v61, %v1808_v28 }
 0x2cd   :  { %5180 = vmatpush1.bf16.msra.mxu0 %v11547_v24  ;;  %14952 = vst [vmem:[#allocation294_spill] sm:$0xff] %v11580_v39  ;;  %v1817_v24 = vld [vmem:[#allocation7 + $0x3e8] sm:$0xff]  ;;  %14954 = vst [vmem:[#allocation296_spill] sm:$0xff] %v11587_v29 }
 0x2ce   :  { %5266 = vmatpush1.bf16.msra.mxu1 %v11551_v58  ;;  %5181 = vmatprep.subr.bf16.mxu0 %v11553_v53  ;;  %14951 = vst [vmem:[#allocation293_spill] sm:$0xff] %v11577_v63  ;;  %v1816_v53 = vld [vmem:[#allocation7 + $0x3e0] sm:$0xff]  ;;  %v1813_v58 = vld [vmem:[#allocation7 + $0x3c8] sm:$0xff]  ;;  %14953 = vst [vmem:[#allocation295_spill] sm:$0xff] %v11583_v36 }
 0x2cf   :  { %5267 = vmatprep.subr.bf16.mxu1 %v11556_v5  ;;  %v1812_v5 = vld [vmem:[#allocation7 + $0x3c0] sm:$0xff]  ;;  %v11592_v2 = vcombine.high %v1813_v58, %v1817_v24  ;;  %v11599_v23 = vcombine.low %v1813_v58, %v1817_v24  ;;  %v11614_v24 = vcombine.low %v11412_v4, %v11405_v52  ;;  %v1837_v4 = vld [vmem:[#allocation7 + $0x488] sm:$0xff] }
 0x2d0   :  { %v11589_v9 = vcombine.high %v1812_v5, %v1816_v53  ;;  %v11595_v28 = vcombine.low %v1812_v5, %v1816_v53  ;;  %v11609_v53 = vld [vmem:[#allocation2 + $0x48] sm:$0xff] }
 0x2d1   :  { %5182 = vmatpush1.bf16.msra.mxu0 %v11559_v56  ;;  %14956 = vst [vmem:[#allocation298_spill] sm:$0xff] %v11592_v2  ;;  %v1825_v56 = vld [vmem:[#allocation7 + $0x428] sm:$0xff]  ;;  %14958 = vst [vmem:[#allocation300_spill] sm:$0xff] %v11599_v23 }
 0x2d2   :  { %5268 = vmatpush1.bf16.msra.mxu1 %v11563_v8  ;;  %5183 = vmatprep.subr.bf16.mxu0 %v11565_v14  ;;  %14955 = vst [vmem:[#allocation297_spill] sm:$0xff] %v11589_v9  ;;  %v1824_v14 = vld [vmem:[#allocation7 + $0x420] sm:$0xff]  ;;  %v1821_v8 = vld [vmem:[#allocation7 + $0x408] sm:$0xff]  ;;  %14957 = vst [vmem:[#allocation299_spill] sm:$0xff] %v11595_v28 }
 0x2d3   :  { %5269 = vmatprep.subr.bf16.mxu1 %v11568_v34  ;;  %v1820_v34 = vld [vmem:[#allocation7 + $0x400] sm:$0xff]  ;;  %v11604_v61 = vcombine.high %v1821_v8, %v1825_v56  ;;  %v1829_v5 = vld [vmem:[#allocation7 + $0x448] sm:$0xff]  ;;  %v11617_v58 = vcombine.low %v1821_v8, %v1825_v56 }
 0x2d4   :  { %v11601_v6 = vcombine.high %v1820_v34, %v1824_v14 }
 0x2d5   :  { %5184 = vmatpush1.bf16.msra.mxu0 %v11571_v7  ;;  %14960 = vst [vmem:[#allocation302_spill] sm:$0xff] %v11604_v61  ;;  %14962 = vst [vmem:[#allocation304_spill] sm:$0xff] %v11617_v58  ;;  %v1848_v7 = vld [vmem:[#allocation7 + $0x4e0] sm:$0xff] }
 0x2d6   :  { %5270 = vmatpush1.bf16.msra.mxu1 %v11575_v35  ;;  %5185 = vmatprep.subr.bf16.mxu0 %v11577_v63  ;;  %14959 = vst [vmem:[#allocation301_spill] sm:$0xff] %v11601_v6  ;;  %v1832_v63 = vld [vmem:[#allocation7 + $0x460] sm:$0xff]  ;;  %v11607_v35 = vcombine.low %v1820_v34, %v1824_v14 }
 0x2d7   :  { %5271 = vmatprep.subr.bf16.mxu1 %v11580_v39  ;;  %v1828_v39 = vld [vmem:[#allocation7 + $0x440] sm:$0xff] }
 0x2d8   :  { %14961 = vst [vmem:[#allocation303_spill] sm:$0xff] %v11607_v35  ;;  %v11622_v14 = vcombine.high %v1828_v39, %v1832_v63  ;;  %v1836_v34 = vld [vmem:[#allocation7 + $0x480] sm:$0xff]  ;;  %v11633_v56 = vcombine.low %v1828_v39, %v1832_v63  ;;  %v1845_v63 = vld [vmem:[#allocation7 + $0x4c8] sm:$0xff] }
 0x2d9   :  { %5186 = vmatpush1.bf16.msra.mxu0 %v11583_v36  ;;  %v1844_v36 = vld [vmem:[#allocation7 + $0x4c0] sm:$0xff]  ;;  %v1849_v39 = vld [vmem:[#allocation7 + $0x4e8] sm:$0xff] }
 0x2da   :  { %5272 = vmatpush1.bf16.msra.mxu1 %v11587_v29  ;;  %5187 = vmatprep.subr.bf16.mxu0 %v11589_v9  ;;  %v1833_v29 = vld [vmem:[#allocation7 + $0x468] sm:$0xff]  ;;  %14963 = vst [vmem:[#allocation305_spill] sm:$0xff] %v11622_v14  ;;  %14965 = vst [vmem:[#allocation307_spill] sm:$0xff] %v11633_v56 }
 0x2db   :  { %5273 = vmatprep.subr.bf16.mxu1 %v11592_v2  ;;  %v11620_v2 = vld [vmem:[#allocation2 + $0x8] sm:$0xff]  ;;  %v11629_v52 = vcombine.high %v1829_v5, %v1833_v29  ;;  %v11637_v8 = vcombine.low %v1829_v5, %v1833_v29  ;;  %v11653_v5 = vcombine.high %v1844_v36, %v1848_v7 }
 0x2dd   :  { %5188 = vmatpush1.bf16.msra.mxu0 %v11595_v28  ;;  %v1840_v28 = vld [vmem:[#allocation7 + $0x4a0] sm:$0xff]  ;;  %14964 = vst [vmem:[#allocation306_spill] sm:$0xff] %v11629_v52  ;;  %14966 = vst [vmem:[#allocation308_spill] sm:$0xff] %v11637_v8 }
 0x2de   :  { %5274 = vmatpush1.bf16.msra.mxu1 %v11599_v23  ;;  %5200 = vmatprep.subr.bf16.mxu0 %v11601_v6  ;;  %v11627_v23 = vcombine.high %v11620_v2, %v11609_v53  ;;  %v1841_v6 = vld [vmem:[#allocation7 + $0x4a8] sm:$0xff]  ;;  %14971 = vst [vmem:[#allocation313_spill] sm:$0xff] %v11653_v5 }
 0x2df   :  { %5286 = vmatprep.subr.bf16.mxu1 %v11604_v61  ;;  %v11639_v61 = vcombine.high %v1836_v34, %v1840_v28  ;;  %v11643_v9 = vcombine.high %v1837_v4, %v1841_v6  ;;  %v11651_v29 = vcombine.low %v1837_v4, %v1841_v6  ;;  %v11663_v6 = vcombine.low %v1845_v63, %v1849_v39 }
 0x2e0   :  { %5190 = vmatmul.mubr.bf16.vlgmr.msra.gmra.mrb[32].mxu0 %v11614_v24  ;;  %v11668_v4 = vcombine.high %v1853_v26, %v1857_v21 }
 0x2e1   :  { %5276 = vmatmul.mubr.bf16.vlgmr.msra.gmra.mrb[32].mxu1 %v11614_v24  ;;  %5201 = vmatpush1.bf16.msra.mxu0 %v11607_v35  ;;  %14967 = vst [vmem:[#allocation309_spill] sm:$0xff] %v11639_v61  ;;  %14968 = vst [vmem:[#allocation310_spill] sm:$0xff] %v11643_v9  ;;  %v11647_v35 = vcombine.low %v1836_v34, %v1840_v28  ;;  %v11659_v28 = vcombine.low %v1844_v36, %v1848_v7 }
 0x2e2   :  { %5232 = vmatprep.mubr.bf16.mxu0 %v11627_v23  ;;  %5287 = vmatpush1.bf16.msra.mxu1 %v11617_v58  ;;  %14970 = vst [vmem:[#allocation312_spill] sm:$0xff] %v11651_v29  ;;  %v1852_v58 = vld [vmem:[#allocation7 + $0x500] sm:$0xff]  ;;  %14974 = vst [vmem:[#allocation316_spill] sm:$0xff] %v11663_v6  ;;  %v11675_v36 = vcombine.low %v1853_v26, %v1857_v21 }
 0x2e3   :  { %5318 = vmatprep.mubr.bf16.mxu1 %v11627_v23  ;;  %5202 = vmatprep.subr.bf16.mxu0 %v11622_v14  ;;  %14969 = vst [vmem:[#allocation311_spill] sm:$0xff] %v11647_v35  ;;  %v11656_v14 = vcombine.high %v1845_v63, %v1849_v39  ;;  %14973 = vst [vmem:[#allocation315_spill] sm:$0xff] %v11659_v28 }
 0x2e4   :  { %5288 = vmatprep.subr.bf16.mxu1 %v11629_v52  ;;  %v1856_v52 = vld [vmem:[#allocation7 + $0x520] sm:$0xff]  ;;  %14976 = vst [vmem:[#allocation318_spill] sm:$0xff] %v11668_v4  ;;  %14978 = vst [vmem:[#allocation320_spill] sm:$0xff] %v11675_v36 }
 0x2e5   :  { %5203 = vmatpush1.bf16.msra.mxu0 %v11633_v56  ;;  %14972 = vst [vmem:[#allocation314_spill] sm:$0xff] %v11656_v14  ;;  %v11665_v34 = vcombine.high %v1852_v58, %v1856_v52  ;;  %v1865_v56 = vld [vmem:[#allocation7 + $0x568] sm:$0xff]  ;;  %v11671_v7 = vcombine.low %v1852_v58, %v1856_v52 }
 0x2e6   :  { %5289 = vmatpush1.bf16.msra.mxu1 %v11637_v8  ;;  %5204 = vmatprep.subr.bf16.mxu0 %v11639_v61  ;;  %v1864_v61 = vld [vmem:[#allocation7 + $0x560] sm:$0xff]  ;;  %v1861_v8 = vld [vmem:[#allocation7 + $0x548] sm:$0xff] }
 0x2e7   :  { %5290 = vmatprep.subr.bf16.mxu1 %v11643_v9  ;;  %14975 = vst [vmem:[#allocation317_spill] sm:$0xff] %v11665_v34  ;;  %v1860_v9 = vld [vmem:[#allocation7 + $0x540] sm:$0xff]  ;;  %14977 = vst [vmem:[#allocation319_spill] sm:$0xff] %v11671_v7  ;;  %v11680_v39 = vcombine.high %v1861_v8, %v1865_v56  ;;  %v11687_v21 = vcombine.low %v1861_v8, %v1865_v56 }
 0x2e8   :  { %v11677_v63 = vcombine.high %v1860_v9, %v1864_v61  ;;  %v11683_v58 = vcombine.low %v1860_v9, %v1864_v61 }
 0x2e9   :  { %5205 = vmatpush1.bf16.msra.mxu0 %v11647_v35  ;;  %14980 = vst [vmem:[#allocation322_spill] sm:$0xff] %v11680_v39  ;;  %v1873_v35 = vld [vmem:[#allocation7 + $0x5a8] sm:$0xff]  ;;  %14982 = vst [vmem:[#allocation324_spill] sm:$0xff] %v11687_v21 }
 0x2ea   :  { %5291 = vmatpush1.bf16.msra.mxu1 %v11651_v29  ;;  %5206 = vmatprep.subr.bf16.mxu0 %v11653_v5  ;;  %14979 = vst [vmem:[#allocation321_spill] sm:$0xff] %v11677_v63  ;;  %v1872_v5 = vld [vmem:[#allocation7 + $0x5a0] sm:$0xff]  ;;  %v1869_v29 = vld [vmem:[#allocation7 + $0x588] sm:$0xff]  ;;  %14981 = vst [vmem:[#allocation323_spill] sm:$0xff] %v11683_v58 }
 0x2eb   :  { %5292 = vmatprep.subr.bf16.mxu1 %v11656_v14  ;;  %v1868_v14 = vld [vmem:[#allocation7 + $0x580] sm:$0xff]  ;;  %v11692_v52 = vcombine.high %v1869_v29, %v1873_v35  ;;  %v11699_v61 = vcombine.low %v1869_v29, %v1873_v35 }
 0x2ec   :  { %v11689_v26 = vcombine.high %v1868_v14, %v1872_v5  ;;  %v11695_v9 = vcombine.low %v1868_v14, %v1872_v5 }
 0x2ed   :  { %5207 = vmatpush1.bf16.msra.mxu0 %v11659_v28  ;;  %14984 = vst [vmem:[#allocation326_spill] sm:$0xff] %v11692_v52  ;;  %v1881_v28 = vld [vmem:[#allocation7 + $0x5e8] sm:$0xff]  ;;  %14986 = vst [vmem:[#allocation328_spill] sm:$0xff] %v11699_v61 }
 0x2ee   :  { %5293 = vmatpush1.bf16.msra.mxu1 %v11663_v6  ;;  %5208 = vmatprep.subr.bf16.mxu0 %v11665_v34  ;;  %14983 = vst [vmem:[#allocation325_spill] sm:$0xff] %v11689_v26  ;;  %v1880_v34 = vld [vmem:[#allocation7 + $0x5e0] sm:$0xff]  ;;  %v1877_v6 = vld [vmem:[#allocation7 + $0x5c8] sm:$0xff]  ;;  %14985 = vst [vmem:[#allocation327_spill] sm:$0xff] %v11695_v9 }
 0x2ef   :  { %5294 = vmatprep.subr.bf16.mxu1 %v11668_v4  ;;  %v1876_v4 = vld [vmem:[#allocation7 + $0x5c0] sm:$0xff]  ;;  %v11704_v8 = vcombine.high %v1877_v6, %v1881_v28  ;;  %v11711_v35 = vcombine.low %v1877_v6, %v1881_v28 }
 0x2f0   :  { %v11701_v56 = vcombine.high %v1876_v4, %v1880_v34  ;;  %v11707_v14 = vcombine.low %v1876_v4, %v1880_v34 }
 0x2f1   :  { %5209 = vmatpush1.bf16.msra.mxu0 %v11671_v7  ;;  %14988 = vst [vmem:[#allocation330_spill] sm:$0xff] %v11704_v8  ;;  %v1889_v7 = vld [vmem:[#allocation7 + $0x628] sm:$0xff]  ;;  %14990 = vst [vmem:[#allocation332_spill] sm:$0xff] %v11711_v35 }
 0x2f2   :  { %5295 = vmatpush1.bf16.msra.mxu1 %v11675_v36  ;;  %5210 = vmatprep.subr.bf16.mxu0 %v11677_v63  ;;  %14987 = vst [vmem:[#allocation329_spill] sm:$0xff] %v11701_v56  ;;  %v1888_v63 = vld [vmem:[#allocation7 + $0x620] sm:$0xff]  ;;  %v1885_v36 = vld [vmem:[#allocation7 + $0x608] sm:$0xff]  ;;  %14989 = vst [vmem:[#allocation331_spill] sm:$0xff] %v11707_v14 }
 0x2f3   :  { %5296 = vmatprep.subr.bf16.mxu1 %v11680_v39  ;;  %v1884_v39 = vld [vmem:[#allocation7 + $0x600] sm:$0xff]  ;;  %v11716_v5 = vcombine.high %v1885_v36, %v1889_v7  ;;  %v11723_v28 = vcombine.low %v1885_v36, %v1889_v7 }
 0x2f4   :  { %v11713_v29 = vcombine.high %v1884_v39, %v1888_v63  ;;  %v11719_v34 = vcombine.low %v1884_v39, %v1888_v63 }
 0x2f5   :  { %5211 = vmatpush1.bf16.msra.mxu0 %v11683_v58  ;;  %14992 = vst [vmem:[#allocation334_spill] sm:$0xff] %v11716_v5  ;;  %v1897_v58 = vld [vmem:[#allocation7 + $0x668] sm:$0xff]  ;;  %14994 = vst [vmem:[#allocation336_spill] sm:$0xff] %v11723_v28 }
 0x2f6   :  { %5297 = vmatpush1.bf16.msra.mxu1 %v11687_v21  ;;  %5212 = vmatprep.subr.bf16.mxu0 %v11689_v26  ;;  %14991 = vst [vmem:[#allocation333_spill] sm:$0xff] %v11713_v29  ;;  %v1896_v26 = vld [vmem:[#allocation7 + $0x660] sm:$0xff]  ;;  %v1893_v21 = vld [vmem:[#allocation7 + $0x648] sm:$0xff]  ;;  %14993 = vst [vmem:[#allocation335_spill] sm:$0xff] %v11719_v34 }
 0x2f7   :  { %5298 = vmatprep.subr.bf16.mxu1 %v11692_v52  ;;  %v1892_v52 = vld [vmem:[#allocation7 + $0x640] sm:$0xff]  ;;  %v11728_v4 = vcombine.high %v1893_v21, %v1897_v58  ;;  %v11735_v7 = vcombine.low %v1893_v21, %v1897_v58 }
 0x2f8   :  { %v11725_v6 = vcombine.high %v1892_v52, %v1896_v26  ;;  %v11731_v63 = vcombine.low %v1892_v52, %v1896_v26 }
 0x2f9   :  { %5213 = vmatpush1.bf16.msra.mxu0 %v11695_v9  ;;  %14996 = vst [vmem:[#allocation338_spill] sm:$0xff] %v11728_v4  ;;  %v1905_v9 = vld [vmem:[#allocation7 + $0x6a8] sm:$0xff]  ;;  %14998 = vst [vmem:[#allocation340_spill] sm:$0xff] %v11735_v7 }
 0x2fa   :  { %5299 = vmatpush1.bf16.msra.mxu1 %v11699_v61  ;;  %5214 = vmatprep.subr.bf16.mxu0 %v11701_v56  ;;  %14995 = vst [vmem:[#allocation337_spill] sm:$0xff] %v11725_v6  ;;  %v1904_v56 = vld [vmem:[#allocation7 + $0x6a0] sm:$0xff]  ;;  %v1901_v61 = vld [vmem:[#allocation7 + $0x688] sm:$0xff]  ;;  %14997 = vst [vmem:[#allocation339_spill] sm:$0xff] %v11731_v63 }
 0x2fb   :  { %5300 = vmatprep.subr.bf16.mxu1 %v11704_v8  ;;  %v1900_v8 = vld [vmem:[#allocation7 + $0x680] sm:$0xff]  ;;  %v11740_v39 = vcombine.high %v1901_v61, %v1905_v9  ;;  %v11747_v58 = vcombine.low %v1901_v61, %v1905_v9 }
 0x2fc   :  { %v11737_v36 = vcombine.high %v1900_v8, %v1904_v56  ;;  %v11743_v26 = vcombine.low %v1900_v8, %v1904_v56 }
 0x2fd   :  { %5215 = vmatpush1.bf16.msra.mxu0 %v11707_v14  ;;  %15000 = vst [vmem:[#allocation342_spill] sm:$0xff] %v11740_v39  ;;  %v1913_v14 = vld [vmem:[#allocation7 + $0x6e8] sm:$0xff]  ;;  %15002 = vst [vmem:[#allocation344_spill] sm:$0xff] %v11747_v58 }
 0x2fe   :  { %5301 = vmatpush1.bf16.msra.mxu1 %v11711_v35  ;;  %5216 = vmatprep.subr.bf16.mxu0 %v11713_v29  ;;  %14999 = vst [vmem:[#allocation341_spill] sm:$0xff] %v11737_v36  ;;  %v1912_v29 = vld [vmem:[#allocation7 + $0x6e0] sm:$0xff]  ;;  %v1909_v35 = vld [vmem:[#allocation7 + $0x6c8] sm:$0xff]  ;;  %15001 = vst [vmem:[#allocation343_spill] sm:$0xff] %v11743_v26 }
 0x2ff   :  { %5302 = vmatprep.subr.bf16.mxu1 %v11716_v5  ;;  %v1908_v5 = vld [vmem:[#allocation7 + $0x6c0] sm:$0xff]  ;;  %v11752_v52 = vcombine.high %v1909_v35, %v1913_v14  ;;  %v11759_v9 = vcombine.low %v1909_v35, %v1913_v14 }
 0x300   :  { %v11749_v21 = vcombine.high %v1908_v5, %v1912_v29  ;;  %v11755_v56 = vcombine.low %v1908_v5, %v1912_v29 }
 0x301   :  { %5217 = vmatpush1.bf16.msra.mxu0 %v11719_v34  ;;  %15004 = vst [vmem:[#allocation346_spill] sm:$0xff] %v11752_v52  ;;  %v1921_v34 = vld [vmem:[#allocation7 + $0x728] sm:$0xff]  ;;  %15006 = vst [vmem:[#allocation348_spill] sm:$0xff] %v11759_v9 }
 0x302   :  { %5303 = vmatpush1.bf16.msra.mxu1 %v11723_v28  ;;  %5218 = vmatprep.subr.bf16.mxu0 %v11725_v6  ;;  %15003 = vst [vmem:[#allocation345_spill] sm:$0xff] %v11749_v21  ;;  %v1920_v6 = vld [vmem:[#allocation7 + $0x720] sm:$0xff]  ;;  %v1917_v28 = vld [vmem:[#allocation7 + $0x708] sm:$0xff]  ;;  %15005 = vst [vmem:[#allocation347_spill] sm:$0xff] %v11755_v56 }
 0x303   :  { %5304 = vmatprep.subr.bf16.mxu1 %v11728_v4  ;;  %v1916_v4 = vld [vmem:[#allocation7 + $0x700] sm:$0xff]  ;;  %v11764_v8 = vcombine.high %v1917_v28, %v1921_v34  ;;  %v11771_v14 = vcombine.low %v1917_v28, %v1921_v34 }
 0x304   :  { %v11761_v61 = vcombine.high %v1916_v4, %v1920_v6  ;;  %v11767_v29 = vcombine.low %v1916_v4, %v1920_v6 }
 0x305   :  { %5219 = vmatpush1.bf16.msra.mxu0 %v11731_v63  ;;  %15008 = vst [vmem:[#allocation350_spill] sm:$0xff] %v11764_v8  ;;  %v1929_v63 = vld [vmem:[#allocation7 + $0x768] sm:$0xff]  ;;  %15010 = vst [vmem:[#allocation352_spill] sm:$0xff] %v11771_v14 }
 0x306   :  { %5305 = vmatpush1.bf16.msra.mxu1 %v11735_v7  ;;  %5220 = vmatprep.subr.bf16.mxu0 %v11737_v36  ;;  %15007 = vst [vmem:[#allocation349_spill] sm:$0xff] %v11761_v61  ;;  %v1928_v36 = vld [vmem:[#allocation7 + $0x760] sm:$0xff]  ;;  %v1925_v7 = vld [vmem:[#allocation7 + $0x748] sm:$0xff]  ;;  %15009 = vst [vmem:[#allocation351_spill] sm:$0xff] %v11767_v29 }
 0x307   :  { %5306 = vmatprep.subr.bf16.mxu1 %v11740_v39  ;;  %v1924_v39 = vld [vmem:[#allocation7 + $0x740] sm:$0xff]  ;;  %v11776_v5 = vcombine.high %v1925_v7, %v1929_v63  ;;  %v11783_v34 = vcombine.low %v1925_v7, %v1929_v63 }
 0x308   :  { %v11773_v35 = vcombine.high %v1924_v39, %v1928_v36  ;;  %v11779_v6 = vcombine.low %v1924_v39, %v1928_v36 }
 0x309   :  { %5221 = vmatpush1.bf16.msra.mxu0 %v11743_v26  ;;  %15012 = vst [vmem:[#allocation354_spill] sm:$0xff] %v11776_v5  ;;  %v1937_v26 = vld [vmem:[#allocation7 + $0x7a8] sm:$0xff]  ;;  %15014 = vst [vmem:[#allocation356_spill] sm:$0xff] %v11783_v34 }
 0x30a   :  { %5307 = vmatpush1.bf16.msra.mxu1 %v11747_v58  ;;  %5222 = vmatprep.subr.bf16.mxu0 %v11749_v21  ;;  %15011 = vst [vmem:[#allocation353_spill] sm:$0xff] %v11773_v35  ;;  %v1936_v21 = vld [vmem:[#allocation7 + $0x7a0] sm:$0xff]  ;;  %v1933_v58 = vld [vmem:[#allocation7 + $0x788] sm:$0xff]  ;;  %15013 = vst [vmem:[#allocation355_spill] sm:$0xff] %v11779_v6 }
 0x30b   :  { %5308 = vmatprep.subr.bf16.mxu1 %v11752_v52  ;;  %v1932_v52 = vld [vmem:[#allocation7 + $0x780] sm:$0xff]  ;;  %v11788_v4 = vcombine.high %v1933_v58, %v1937_v26  ;;  %v11795_v63 = vcombine.low %v1933_v58, %v1937_v26 }
 0x30c   :  { %v11785_v28 = vcombine.high %v1932_v52, %v1936_v21  ;;  %v11791_v36 = vcombine.low %v1932_v52, %v1936_v21 }
 0x30d   :  { %5223 = vmatpush1.bf16.msra.mxu0 %v11755_v56  ;;  %15016 = vst [vmem:[#allocation358_spill] sm:$0xff] %v11788_v4  ;;  %v1945_v56 = vld [vmem:[#allocation7 + $0x7e8] sm:$0xff]  ;;  %15018 = vst [vmem:[#allocation360_spill] sm:$0xff] %v11795_v63 }
 0x30e   :  { %5309 = vmatpush1.bf16.msra.mxu1 %v11759_v9  ;;  %5224 = vmatprep.subr.bf16.mxu0 %v11761_v61  ;;  %15015 = vst [vmem:[#allocation357_spill] sm:$0xff] %v11785_v28  ;;  %v1944_v61 = vld [vmem:[#allocation7 + $0x7e0] sm:$0xff]  ;;  %v1941_v9 = vld [vmem:[#allocation7 + $0x7c8] sm:$0xff]  ;;  %15017 = vst [vmem:[#allocation359_spill] sm:$0xff] %v11791_v36 }
 0x30f   :  { %5310 = vmatprep.subr.bf16.mxu1 %v11764_v8  ;;  %v1940_v8 = vld [vmem:[#allocation7 + $0x7c0] sm:$0xff]  ;;  %v11800_v39 = vcombine.high %v1941_v9, %v1945_v56  ;;  %v11807_v26 = vcombine.low %v1941_v9, %v1945_v56  ;;  %v11820_v56 = vcombine.low %v11620_v2, %v11609_v53 }
 0x310   :  { %v11797_v7 = vcombine.high %v1940_v8, %v1944_v61  ;;  %v11803_v21 = vcombine.low %v1940_v8, %v1944_v61  ;;  %v1703_v61 = vld [vmem:[#allocation7 + $0x58] sm:$0xff] }
 0x311   :  { %5225 = vmatpush1.bf16.msra.mxu0 %v11767_v29  ;;  %15020 = vst [vmem:[#allocation362_spill] sm:$0xff] %v11800_v39  ;;  %v1699_v29 = vld [vmem:[#allocation7 + $0x38] sm:$0xff]  ;;  %15022 = vst [vmem:[#allocation364_spill] sm:$0xff] %v11807_v26 }
 0x312   :  { %5311 = vmatpush1.bf16.msra.mxu1 %v11771_v14  ;;  %5226 = vmatprep.subr.bf16.mxu0 %v11773_v35  ;;  %15019 = vst [vmem:[#allocation361_spill] sm:$0xff] %v11797_v7  ;;  %v1698_v35 = vld [vmem:[#allocation7 + $0x30] sm:$0xff]  ;;  %v1695_v14 = vld [vmem:[#allocation7 + $0x18] sm:$0xff]  ;;  %15021 = vst [vmem:[#allocation363_spill] sm:$0xff] %v11803_v21 }
 0x313   :  { %5312 = vmatprep.subr.bf16.mxu1 %v11776_v5  ;;  %v1694_v5 = vld [vmem:[#allocation7 + $0x10] sm:$0xff]  ;;  %v11812_v52 = vcombine.high %v1695_v14, %v1699_v29  ;;  %v1707_v8 = vld [vmem:[#allocation7 + $0x78] sm:$0xff]  ;;  %v11823_v9 = vcombine.low %v1695_v14, %v1699_v29 }
 0x314   :  { %v11809_v58 = vcombine.high %v1694_v5, %v1698_v35  ;;  %v11837_v53 = vcombine.low %v1703_v61, %v1707_v8 }
 0x315   :  { %5227 = vmatpush1.bf16.msra.mxu0 %v11779_v6  ;;  %15024 = vst [vmem:[#allocation366_spill] sm:$0xff] %v11812_v52  ;;  %15026 = vst [vmem:[#allocation368_spill] sm:$0xff] %v11823_v9  ;;  %v1946_v6 = vld [vmem:[#allocation7 + $0x7f0] sm:$0xff] }
 0x316   :  { %5313 = vmatpush1.bf16.msra.mxu1 %v11783_v34  ;;  %5228 = vmatprep.subr.bf16.mxu0 %v11785_v28  ;;  %15023 = vst [vmem:[#allocation365_spill] sm:$0xff] %v11809_v58  ;;  %v1706_v28 = vld [vmem:[#allocation7 + $0x70] sm:$0xff]  ;;  %v11815_v34 = vcombine.low %v1694_v5, %v1698_v35  ;;  %v11829_v35 = vcombine.high %v1703_v61, %v1707_v8  ;;  %v1711_v5 = vld [vmem:[#allocation7 + $0x98] sm:$0xff]  ;;  %15030 = vst [vmem:[#allocation372_spill] sm:$0xff] %v11837_v53 }
 0x317   :  { %5314 = vmatprep.subr.bf16.mxu1 %v11788_v4  ;;  %v1702_v4 = vld [vmem:[#allocation7 + $0x50] sm:$0xff] }
 0x318   :  { %15025 = vst [vmem:[#allocation367_spill] sm:$0xff] %v11815_v34  ;;  %15028 = vst [vmem:[#allocation370_spill] sm:$0xff] %v11829_v35  ;;  %v11833_v2 = vcombine.low %v1702_v4, %v1706_v28 }
 0x319   :  { %5229 = vmatpush1.bf16.msra.mxu0 %v11791_v36 }
 0x31a   :  { %5315 = vmatpush1.bf16.msra.mxu1 %v11795_v63  ;;  %5230 = vmatprep.subr.bf16.mxu0 %v11797_v7  ;;  %v1710_v7 = vld [vmem:[#allocation7 + $0x90] sm:$0xff]  ;;  %15029 = vst [vmem:[#allocation371_spill] sm:$0xff] %v11833_v2  ;;  %v1731_v63 = vld [vmem:[#allocation7 + $0x138] sm:$0xff] }
 0x31b   :  { %5316 = vmatprep.subr.bf16.mxu1 %v11800_v39  ;;  %v11826_v39 = vcombine.high %v1702_v4, %v1706_v28  ;;  %v1719_v28 = vld [vmem:[#allocation7 + $0xd8] sm:$0xff] }
 0x31c   :  { %v1723_v4 = vld [vmem:[#allocation7 + $0xf8] sm:$0xff] }
 0x31d   :  { %5231 = vmatpush1.bf16.msra.mxu0 %v11803_v21  ;;  %15027 = vst [vmem:[#allocation369_spill] sm:$0xff] %v11826_v39  ;;  %v1714_v21 = vld [vmem:[#allocation7 + $0xb0] sm:$0xff]  ;;  %v11856_v8 = vcombine.high %v1719_v28, %v1723_v4 }
 0x31e   :  { %5317 = vmatpush1.bf16.msra.mxu1 %v11807_v26  ;;  %5329 = vmatprep.subr.bf16.mxu0 %v11809_v58  ;;  %v1715_v26 = vld [vmem:[#allocation7 + $0xb8] sm:$0xff]  ;;  %v11839_v29 = vcombine.high %v1710_v7, %v1714_v21  ;;  %v1722_v58 = vld [vmem:[#allocation7 + $0xf0] sm:$0xff] }
 0x31f   :  { %5415 = vmatprep.subr.bf16.mxu1 %v11812_v52  ;;  %v11843_v14 = vcombine.high %v1711_v5, %v1715_v26  ;;  %v1718_v52 = vld [vmem:[#allocation7 + $0xd0] sm:$0xff]  ;;  %v11851_v61 = vcombine.low %v1711_v5, %v1715_v26  ;;  %15036 = vst [vmem:[#allocation378_spill] sm:$0xff] %v11856_v8 }
 0x320   :  { %5233 = vmatmul.mubr.bf16.vlgmr.msra.gmra.mrb[32].mxu0 %v11820_v56  ;;  %15031 = vst [vmem:[#allocation373_spill] sm:$0xff] %v11839_v29 }
 0x321   :  { %5319 = vmatmul.mubr.bf16.vlgmr.msra.gmra.mrb[32].mxu1 %v11820_v56  ;;  %5330 = vmatpush1.bf16.msra.mxu0 %v11815_v34  ;;  %15032 = vst [vmem:[#allocation374_spill] sm:$0xff] %v11843_v14  ;;  %v11847_v34 = vcombine.low %v1710_v7, %v1714_v21  ;;  %15034 = vst [vmem:[#allocation376_spill] sm:$0xff] %v11851_v61  ;;  %v11859_v7 = vcombine.low %v1718_v52, %v1722_v58 }
 0x322   :  { %5361 = vmatprep.mubr.bf16.mxu0 %v11419_v59  ;;  %5416 = vmatpush1.bf16.msra.mxu1 %v11823_v9  ;;  %v1727_v9 = vld [vmem:[#allocation7 + $0x118] sm:$0xff]  ;;  %v11863_v21 = vcombine.low %v1719_v28, %v1723_v4 }
 0x323   :  { %5447 = vmatprep.mubr.bf16.mxu1 %v11419_v59  ;;  %5331 = vmatprep.subr.bf16.mxu0 %v11826_v39  ;;  %15033 = vst [vmem:[#allocation375_spill] sm:$0xff] %v11847_v34  ;;  %v11853_v59 = vcombine.high %v1718_v52, %v1722_v58  ;;  %v1726_v39 = vld [vmem:[#allocation7 + $0x110] sm:$0xff]  ;;  %15037 = vst [vmem:[#allocation379_spill] sm:$0xff] %v11859_v7  ;;  %v11868_v5 = vcombine.high %v1727_v9, %v1731_v63 }
 0x324   :  { %5417 = vmatprep.subr.bf16.mxu1 %v11829_v35  ;;  %v1730_v35 = vld [vmem:[#allocation7 + $0x130] sm:$0xff]  ;;  %15038 = vst [vmem:[#allocation380_spill] sm:$0xff] %v11863_v21  ;;  %v11875_v52 = vcombine.low %v1727_v9, %v1731_v63 }
 0x325   :  { %5332 = vmatpush1.bf16.msra.mxu0 %v11833_v2  ;;  %15035 = vst [vmem:[#allocation377_spill] sm:$0xff] %v11853_v59  ;;  %v11865_v26 = vcombine.high %v1726_v39, %v1730_v35  ;;  %15040 = vst [vmem:[#allocation382_spill] sm:$0xff] %v11868_v5  ;;  %v1739_v2 = vld [vmem:[#allocation7 + $0x178] sm:$0xff]  ;;  %v11871_v58 = vcombine.low %v1726_v39, %v1730_v35 }
 0x326   :  { %5418 = vmatpush1.bf16.msra.mxu1 %v11837_v53  ;;  %5333 = vmatprep.subr.bf16.mxu0 %v11839_v29  ;;  %v1738_v29 = vld [vmem:[#allocation7 + $0x170] sm:$0xff]  ;;  %v1735_v53 = vld [vmem:[#allocation7 + $0x158] sm:$0xff]  ;;  %15042 = vst [vmem:[#allocation384_spill] sm:$0xff] %v11875_v52 }
 0x327   :  { %5419 = vmatprep.subr.bf16.mxu1 %v11843_v14  ;;  %15039 = vst [vmem:[#allocation381_spill] sm:$0xff] %v11865_v26  ;;  %v1734_v14 = vld [vmem:[#allocation7 + $0x150] sm:$0xff]  ;;  %15041 = vst [vmem:[#allocation383_spill] sm:$0xff] %v11871_v58  ;;  %v11880_v4 = vcombine.high %v1735_v53, %v1739_v2  ;;  %v11887_v63 = vcombine.low %v1735_v53, %v1739_v2 }
 0x328   :  { %v11877_v28 = vcombine.high %v1734_v14, %v1738_v29  ;;  %v11883_v39 = vcombine.low %v1734_v14, %v1738_v29 }
 0x329   :  { %5334 = vmatpush1.bf16.msra.mxu0 %v11847_v34  ;;  %15044 = vst [vmem:[#allocation386_spill] sm:$0xff] %v11880_v4  ;;  %v1747_v34 = vld [vmem:[#allocation7 + $0x1b8] sm:$0xff]  ;;  %15046 = vst [vmem:[#allocation388_spill] sm:$0xff] %v11887_v63 }
 0x32a   :  { %5420 = vmatpush1.bf16.msra.mxu1 %v11851_v61  ;;  %5335 = vmatprep.subr.bf16.mxu0 %v11853_v59  ;;  %15043 = vst [vmem:[#allocation385_spill] sm:$0xff] %v11877_v28  ;;  %v1746_v59 = vld [vmem:[#allocation7 + $0x1b0] sm:$0xff]  ;;  %v1743_v61 = vld [vmem:[#allocation7 + $0x198] sm:$0xff]  ;;  %15045 = vst [vmem:[#allocation387_spill] sm:$0xff] %v11883_v39 }
 0x32b   :  { %5421 = vmatprep.subr.bf16.mxu1 %v11856_v8  ;;  %v1742_v8 = vld [vmem:[#allocation7 + $0x190] sm:$0xff]  ;;  %v11892_v35 = vcombine.high %v1743_v61, %v1747_v34  ;;  %v11899_v2 = vcombine.low %v1743_v61, %v1747_v34 }
 0x32c   :  { %v11889_v9 = vcombine.high %v1742_v8, %v1746_v59  ;;  %v11895_v29 = vcombine.low %v1742_v8, %v1746_v59 }
 0x32d   :  { %5336 = vmatpush1.bf16.msra.mxu0 %v11859_v7  ;;  %15048 = vst [vmem:[#allocation390_spill] sm:$0xff] %v11892_v35  ;;  %v1755_v7 = vld [vmem:[#allocation7 + $0x1f8] sm:$0xff]  ;;  %15050 = vst [vmem:[#allocation392_spill] sm:$0xff] %v11899_v2 }
 0x32e   :  { %5422 = vmatpush1.bf16.msra.mxu1 %v11863_v21  ;;  %5337 = vmatprep.subr.bf16.mxu0 %v11865_v26  ;;  %15047 = vst [vmem:[#allocation389_spill] sm:$0xff] %v11889_v9  ;;  %v1754_v26 = vld [vmem:[#allocation7 + $0x1f0] sm:$0xff]  ;;  %v1751_v21 = vld [vmem:[#allocation7 + $0x1d8] sm:$0xff]  ;;  %15049 = vst [vmem:[#allocation391_spill] sm:$0xff] %v11895_v29 }
 0x32f   :  { %5423 = vmatprep.subr.bf16.mxu1 %v11868_v5  ;;  %v1750_v5 = vld [vmem:[#allocation7 + $0x1d0] sm:$0xff]  ;;  %v11904_v14 = vcombine.high %v1751_v21, %v1755_v7  ;;  %v11911_v34 = vcombine.low %v1751_v21, %v1755_v7 }
 0x330   :  { %v11901_v53 = vcombine.high %v1750_v5, %v1754_v26  ;;  %v11907_v59 = vcombine.low %v1750_v5, %v1754_v26 }
 0x331   :  { %5338 = vmatpush1.bf16.msra.mxu0 %v11871_v58  ;;  %15052 = vst [vmem:[#allocation394_spill] sm:$0xff] %v11904_v14  ;;  %v1763_v58 = vld [vmem:[#allocation7 + $0x238] sm:$0xff]  ;;  %15054 = vst [vmem:[#allocation396_spill] sm:$0xff] %v11911_v34 }
 0x332   :  { %5424 = vmatpush1.bf16.msra.mxu1 %v11875_v52  ;;  %5339 = vmatprep.subr.bf16.mxu0 %v11877_v28  ;;  %15051 = vst [vmem:[#allocation393_spill] sm:$0xff] %v11901_v53  ;;  %v1762_v28 = vld [vmem:[#allocation7 + $0x230] sm:$0xff]  ;;  %v1759_v52 = vld [vmem:[#allocation7 + $0x218] sm:$0xff]  ;;  %15053 = vst [vmem:[#allocation395_spill] sm:$0xff] %v11907_v59 }
 0x333   :  { %5425 = vmatprep.subr.bf16.mxu1 %v11880_v4  ;;  %v1758_v4 = vld [vmem:[#allocation7 + $0x210] sm:$0xff]  ;;  %v11916_v8 = vcombine.high %v1759_v52, %v1763_v58  ;;  %v11923_v7 = vcombine.low %v1759_v52, %v1763_v58 }
 0x334   :  { %v11913_v61 = vcombine.high %v1758_v4, %v1762_v28  ;;  %v11919_v26 = vcombine.low %v1758_v4, %v1762_v28 }
 0x335   :  { %5340 = vmatpush1.bf16.msra.mxu0 %v11883_v39  ;;  %15056 = vst [vmem:[#allocation398_spill] sm:$0xff] %v11916_v8  ;;  %v1771_v39 = vld [vmem:[#allocation7 + $0x278] sm:$0xff]  ;;  %15058 = vst [vmem:[#allocation400_spill] sm:$0xff] %v11923_v7 }
 0x336   :  { %5426 = vmatpush1.bf16.msra.mxu1 %v11887_v63  ;;  %5341 = vmatprep.subr.bf16.mxu0 %v11889_v9  ;;  %15055 = vst [vmem:[#allocation397_spill] sm:$0xff] %v11913_v61  ;;  %v1770_v9 = vld [vmem:[#allocation7 + $0x270] sm:$0xff]  ;;  %v1767_v63 = vld [vmem:[#allocation7 + $0x258] sm:$0xff]  ;;  %15057 = vst [vmem:[#allocation399_spill] sm:$0xff] %v11919_v26 }
 0x337   :  { %5427 = vmatprep.subr.bf16.mxu1 %v11892_v35  ;;  %v1766_v35 = vld [vmem:[#allocation7 + $0x250] sm:$0xff]  ;;  %v11928_v5 = vcombine.high %v1767_v63, %v1771_v39  ;;  %v11935_v58 = vcombine.low %v1767_v63, %v1771_v39 }
 0x338   :  { %v11925_v21 = vcombine.high %v1766_v35, %v1770_v9  ;;  %v11931_v28 = vcombine.low %v1766_v35, %v1770_v9 }
 0x339   :  { %5342 = vmatpush1.bf16.msra.mxu0 %v11895_v29  ;;  %15060 = vst [vmem:[#allocation402_spill] sm:$0xff] %v11928_v5  ;;  %v1779_v29 = vld [vmem:[#allocation7 + $0x2b8] sm:$0xff]  ;;  %15062 = vst [vmem:[#allocation404_spill] sm:$0xff] %v11935_v58 }
 0x33a   :  { %5428 = vmatpush1.bf16.msra.mxu1 %v11899_v2  ;;  %5343 = vmatprep.subr.bf16.mxu0 %v11901_v53  ;;  %15059 = vst [vmem:[#allocation401_spill] sm:$0xff] %v11925_v21  ;;  %v1778_v53 = vld [vmem:[#allocation7 + $0x2b0] sm:$0xff]  ;;  %v1775_v2 = vld [vmem:[#allocation7 + $0x298] sm:$0xff]  ;;  %15061 = vst [vmem:[#allocation403_spill] sm:$0xff] %v11931_v28 }
 0x33b   :  { %5429 = vmatprep.subr.bf16.mxu1 %v11904_v14  ;;  %v1774_v14 = vld [vmem:[#allocation7 + $0x290] sm:$0xff]  ;;  %v11940_v4 = vcombine.high %v1775_v2, %v1779_v29  ;;  %v11947_v39 = vcombine.low %v1775_v2, %v1779_v29 }
 0x33c   :  { %v11937_v52 = vcombine.high %v1774_v14, %v1778_v53  ;;  %v11943_v9 = vcombine.low %v1774_v14, %v1778_v53 }
 0x33d   :  { %5344 = vmatpush1.bf16.msra.mxu0 %v11907_v59  ;;  %15064 = vst [vmem:[#allocation406_spill] sm:$0xff] %v11940_v4  ;;  %v1787_v59 = vld [vmem:[#allocation7 + $0x2f8] sm:$0xff]  ;;  %15066 = vst [vmem:[#allocation408_spill] sm:$0xff] %v11947_v39 }
 0x33e   :  { %5430 = vmatpush1.bf16.msra.mxu1 %v11911_v34  ;;  %5345 = vmatprep.subr.bf16.mxu0 %v11913_v61  ;;  %15063 = vst [vmem:[#allocation405_spill] sm:$0xff] %v11937_v52  ;;  %v1786_v61 = vld [vmem:[#allocation7 + $0x2f0] sm:$0xff]  ;;  %v1783_v34 = vld [vmem:[#allocation7 + $0x2d8] sm:$0xff]  ;;  %15065 = vst [vmem:[#allocation407_spill] sm:$0xff] %v11943_v9 }
 0x33f   :  { %5431 = vmatprep.subr.bf16.mxu1 %v11916_v8  ;;  %v1782_v8 = vld [vmem:[#allocation7 + $0x2d0] sm:$0xff]  ;;  %v11952_v35 = vcombine.high %v1783_v34, %v1787_v59  ;;  %v11959_v29 = vcombine.low %v1783_v34, %v1787_v59 }
 0x340   :  { %v11949_v63 = vcombine.high %v1782_v8, %v1786_v61  ;;  %v11955_v53 = vcombine.low %v1782_v8, %v1786_v61 }
 0x341   :  { %5346 = vmatpush1.bf16.msra.mxu0 %v11919_v26  ;;  %15068 = vst [vmem:[#allocation410_spill] sm:$0xff] %v11952_v35  ;;  %v1795_v26 = vld [vmem:[#allocation7 + $0x338] sm:$0xff]  ;;  %15070 = vst [vmem:[#allocation412_spill] sm:$0xff] %v11959_v29 }
 0x342   :  { %5432 = vmatpush1.bf16.msra.mxu1 %v11923_v7  ;;  %5347 = vmatprep.subr.bf16.mxu0 %v11925_v21  ;;  %15067 = vst [vmem:[#allocation409_spill] sm:$0xff] %v11949_v63  ;;  %v1794_v21 = vld [vmem:[#allocation7 + $0x330] sm:$0xff]  ;;  %v1791_v7 = vld [vmem:[#allocation7 + $0x318] sm:$0xff]  ;;  %15069 = vst [vmem:[#allocation411_spill] sm:$0xff] %v11955_v53 }
 0x343   :  { %5433 = vmatprep.subr.bf16.mxu1 %v11928_v5  ;;  %v1790_v5 = vld [vmem:[#allocation7 + $0x310] sm:$0xff]  ;;  %v11964_v14 = vcombine.high %v1791_v7, %v1795_v26  ;;  %v11971_v59 = vcombine.low %v1791_v7, %v1795_v26 }
 0x344   :  { %v11961_v2 = vcombine.high %v1790_v5, %v1794_v21  ;;  %v11967_v61 = vcombine.low %v1790_v5, %v1794_v21 }
 0x345   :  { %5348 = vmatpush1.bf16.msra.mxu0 %v11931_v28  ;;  %15072 = vst [vmem:[#allocation414_spill] sm:$0xff] %v11964_v14  ;;  %v1803_v28 = vld [vmem:[#allocation7 + $0x378] sm:$0xff]  ;;  %15074 = vst [vmem:[#allocation416_spill] sm:$0xff] %v11971_v59 }
 0x346   :  { %5434 = vmatpush1.bf16.msra.mxu1 %v11935_v58  ;;  %5349 = vmatprep.subr.bf16.mxu0 %v11937_v52  ;;  %15071 = vst [vmem:[#allocation413_spill] sm:$0xff] %v11961_v2  ;;  %v1802_v52 = vld [vmem:[#allocation7 + $0x370] sm:$0xff]  ;;  %v1799_v58 = vld [vmem:[#allocation7 + $0x358] sm:$0xff]  ;;  %15073 = vst [vmem:[#allocation415_spill] sm:$0xff] %v11967_v61 }
 0x347   :  { %5435 = vmatprep.subr.bf16.mxu1 %v11940_v4  ;;  %v1798_v4 = vld [vmem:[#allocation7 + $0x350] sm:$0xff]  ;;  %v11976_v8 = vcombine.high %v1799_v58, %v1803_v28  ;;  %v11983_v26 = vcombine.low %v1799_v58, %v1803_v28 }
 0x348   :  { %v11973_v34 = vcombine.high %v1798_v4, %v1802_v52  ;;  %v11979_v21 = vcombine.low %v1798_v4, %v1802_v52 }
 0x349   :  { %5350 = vmatpush1.bf16.msra.mxu0 %v11943_v9  ;;  %15076 = vst [vmem:[#allocation418_spill] sm:$0xff] %v11976_v8  ;;  %v1811_v9 = vld [vmem:[#allocation7 + $0x3b8] sm:$0xff]  ;;  %15078 = vst [vmem:[#allocation420_spill] sm:$0xff] %v11983_v26 }
 0x34a   :  { %5436 = vmatpush1.bf16.msra.mxu1 %v11947_v39  ;;  %5351 = vmatprep.subr.bf16.mxu0 %v11949_v63  ;;  %15075 = vst [vmem:[#allocation417_spill] sm:$0xff] %v11973_v34  ;;  %v1810_v63 = vld [vmem:[#allocation7 + $0x3b0] sm:$0xff]  ;;  %v1807_v39 = vld [vmem:[#allocation7 + $0x398] sm:$0xff]  ;;  %15077 = vst [vmem:[#allocation419_spill] sm:$0xff] %v11979_v21 }
 0x34b   :  { %5437 = vmatprep.subr.bf16.mxu1 %v11952_v35  ;;  %v1806_v35 = vld [vmem:[#allocation7 + $0x390] sm:$0xff]  ;;  %v11988_v5 = vcombine.high %v1807_v39, %v1811_v9  ;;  %v11995_v28 = vcombine.low %v1807_v39, %v1811_v9 }
 0x34c   :  { %v11985_v7 = vcombine.high %v1806_v35, %v1810_v63  ;;  %v11991_v52 = vcombine.low %v1806_v35, %v1810_v63 }
 0x34d   :  { %5352 = vmatpush1.bf16.msra.mxu0 %v11955_v53  ;;  %15080 = vst [vmem:[#allocation422_spill] sm:$0xff] %v11988_v5  ;;  %v1819_v53 = vld [vmem:[#allocation7 + $0x3f8] sm:$0xff]  ;;  %15082 = vst [vmem:[#allocation424_spill] sm:$0xff] %v11995_v28 }
 0x34e   :  { %5438 = vmatpush1.bf16.msra.mxu1 %v11959_v29  ;;  %5353 = vmatprep.subr.bf16.mxu0 %v11961_v2  ;;  %15079 = vst [vmem:[#allocation421_spill] sm:$0xff] %v11985_v7  ;;  %v1818_v2 = vld [vmem:[#allocation7 + $0x3f0] sm:$0xff]  ;;  %v1815_v29 = vld [vmem:[#allocation7 + $0x3d8] sm:$0xff]  ;;  %15081 = vst [vmem:[#allocation423_spill] sm:$0xff] %v11991_v52 }
 0x34f   :  { %5439 = vmatprep.subr.bf16.mxu1 %v11964_v14  ;;  %v1814_v14 = vld [vmem:[#allocation7 + $0x3d0] sm:$0xff]  ;;  %v12000_v4 = vcombine.high %v1815_v29, %v1819_v53  ;;  %v12007_v9 = vcombine.low %v1815_v29, %v1819_v53 }
 0x350   :  { %v11997_v58 = vcombine.high %v1814_v14, %v1818_v2  ;;  %v12003_v63 = vcombine.low %v1814_v14, %v1818_v2  ;;  %v1831_v2 = vld [vmem:[#allocation7 + $0x458] sm:$0xff] }
 0x351   :  { %5354 = vmatpush1.bf16.msra.mxu0 %v11967_v61  ;;  %15084 = vst [vmem:[#allocation426_spill] sm:$0xff] %v12000_v4  ;;  %v1827_v61 = vld [vmem:[#allocation7 + $0x438] sm:$0xff]  ;;  %15086 = vst [vmem:[#allocation428_spill] sm:$0xff] %v12007_v9 }
 0x352   :  { %5440 = vmatpush1.bf16.msra.mxu1 %v11971_v59  ;;  %5355 = vmatprep.subr.bf16.mxu0 %v11973_v34  ;;  %15083 = vst [vmem:[#allocation425_spill] sm:$0xff] %v11997_v58  ;;  %v1826_v34 = vld [vmem:[#allocation7 + $0x430] sm:$0xff]  ;;  %v1823_v59 = vld [vmem:[#allocation7 + $0x418] sm:$0xff]  ;;  %15085 = vst [vmem:[#allocation427_spill] sm:$0xff] %v12003_v63 }
 0x353   :  { %5441 = vmatprep.subr.bf16.mxu1 %v11976_v8  ;;  %v1822_v8 = vld [vmem:[#allocation7 + $0x410] sm:$0xff]  ;;  %v12012_v35 = vcombine.high %v1823_v59, %v1827_v61  ;;  %v1835_v14 = vld [vmem:[#allocation7 + $0x478] sm:$0xff]  ;;  %v12019_v53 = vcombine.low %v1823_v59, %v1827_v61 }
 0x354   :  { %v12009_v39 = vcombine.high %v1822_v8, %v1826_v34  ;;  %v12033_v61 = vcombine.low %v1831_v2, %v1835_v14 }
 0x355   :  { %5356 = vmatpush1.bf16.msra.mxu0 %v11979_v21  ;;  %15088 = vst [vmem:[#allocation430_spill] sm:$0xff] %v12012_v35  ;;  %15090 = vst [vmem:[#allocation432_spill] sm:$0xff] %v12019_v53  ;;  %v1938_v21 = vld [vmem:[#allocation7 + $0x7b0] sm:$0xff] }
 0x356   :  { %5442 = vmatpush1.bf16.msra.mxu1 %v11983_v26  ;;  %5357 = vmatprep.subr.bf16.mxu0 %v11985_v7  ;;  %15087 = vst [vmem:[#allocation429_spill] sm:$0xff] %v12009_v39  ;;  %v1834_v7 = vld [vmem:[#allocation7 + $0x470] sm:$0xff]  ;;  %v12015_v26 = vcombine.low %v1822_v8, %v1826_v34  ;;  %v1839_v34 = vld [vmem:[#allocation7 + $0x498] sm:$0xff]  ;;  %15094 = vst [vmem:[#allocation436_spill] sm:$0xff] %v12033_v61 }
 0x357   :  { %5443 = vmatprep.subr.bf16.mxu1 %v11988_v5  ;;  %v1830_v5 = vld [vmem:[#allocation7 + $0x450] sm:$0xff]  ;;  %v1843_v8 = vld [vmem:[#allocation7 + $0x4b8] sm:$0xff] }
 0x358   :  { %15089 = vst [vmem:[#allocation431_spill] sm:$0xff] %v12015_v26  ;;  %v12022_v29 = vcombine.high %v1830_v5, %v1834_v7 }
 0x359   :  { %5358 = vmatpush1.bf16.msra.mxu0 %v11991_v52  ;;  %v1931_v52 = vld [vmem:[#allocation7 + $0x778] sm:$0xff] }
 0x35a   :  { %5444 = vmatpush1.bf16.msra.mxu1 %v11995_v28  ;;  %5359 = vmatprep.subr.bf16.mxu0 %v11997_v58  ;;  %15091 = vst [vmem:[#allocation433_spill] sm:$0xff] %v12022_v29  ;;  %v1842_v58 = vld [vmem:[#allocation7 + $0x4b0] sm:$0xff]  ;;  %v12025_v28 = vcombine.high %v1831_v2, %v1835_v14  ;;  %v12047_v2 = vcombine.low %v1839_v34, %v1843_v8 }
 0x35b   :  { %5445 = vmatprep.subr.bf16.mxu1 %v12000_v4  ;;  %v1838_v4 = vld [vmem:[#allocation7 + $0x490] sm:$0xff] }
 0x35c   :  { %15092 = vst [vmem:[#allocation434_spill] sm:$0xff] %v12025_v28  ;;  %v12035_v59 = vcombine.high %v1838_v4, %v1842_v58  ;;  %15098 = vst [vmem:[#allocation440_spill] sm:$0xff] %v12047_v2 }
 0x35d   :  { %5360 = vmatpush1.bf16.msra.mxu0 %v12003_v63  ;;  %v1859_v63 = vld [vmem:[#allocation7 + $0x538] sm:$0xff] }
 0x35e   :  { %5446 = vmatpush1.bf16.msra.mxu1 %v12007_v9  ;;  %5372 = vmatprep.subr.bf16.mxu0 %v12009_v39  ;;  %v12029_v9 = vcombine.low %v1830_v5, %v1834_v7  ;;  %15095 = vst [vmem:[#allocation437_spill] sm:$0xff] %v12035_v59  ;;  %v1846_v39 = vld [vmem:[#allocation7 + $0x4d0] sm:$0xff]  ;;  %v1847_v7 = vld [vmem:[#allocation7 + $0x4d8] sm:$0xff] }
 0x35f   :  { %5458 = vmatprep.subr.bf16.mxu1 %v12012_v35  ;;  %v12039_v35 = vcombine.high %v1839_v34, %v1843_v8  ;;  %v1851_v5 = vld [vmem:[#allocation7 + $0x4f8] sm:$0xff] }
 0x360   :  { %5362 = vmatmul.mubr.bf16.vlgmr.msra.gmra.mrb[36].mxu0 %v11614_v24  ;;  %15093 = vst [vmem:[#allocation435_spill] sm:$0xff] %v12029_v9  ;;  %v12052_v14 = vcombine.high %v1847_v7, %v1851_v5 }
 0x361   :  { %5448 = vmatmul.mubr.bf16.vlgmr.msra.gmra.mrb[36].mxu1 %v11614_v24  ;;  %5373 = vmatpush1.bf16.msra.mxu0 %v12015_v26  ;;  %15096 = vst [vmem:[#allocation438_spill] sm:$0xff] %v12039_v35  ;;  %v1850_v24 = vld [vmem:[#allocation7 + $0x4f0] sm:$0xff]  ;;  %v12043_v26 = vcombine.low %v1838_v4, %v1842_v58  ;;  %v12059_v4 = vcombine.low %v1847_v7, %v1851_v5 }
 0x362   :  { %5404 = vmatprep.mubr.bf16.mxu0 %v11627_v23  ;;  %5459 = vmatpush1.bf16.msra.mxu1 %v12019_v53  ;;  %15100 = vst [vmem:[#allocation442_spill] sm:$0xff] %v12052_v14  ;;  %v1855_v53 = vld [vmem:[#allocation7 + $0x518] sm:$0xff]  ;;  %v12055_v58 = vcombine.low %v1846_v39, %v1850_v24 }
 0x363   :  { %5490 = vmatprep.mubr.bf16.mxu1 %v11627_v23  ;;  %5374 = vmatprep.subr.bf16.mxu0 %v12022_v29  ;;  %15097 = vst [vmem:[#allocation439_spill] sm:$0xff] %v12043_v26  ;;  %v12049_v23 = vcombine.high %v1846_v39, %v1850_v24  ;;  %v1854_v29 = vld [vmem:[#allocation7 + $0x510] sm:$0xff]  ;;  %15102 = vst [vmem:[#allocation444_spill] sm:$0xff] %v12059_v4  ;;  %v12064_v8 = vcombine.high %v1855_v53, %v1859_v63 }
 0x364   :  { %5460 = vmatprep.subr.bf16.mxu1 %v12025_v28  ;;  %v1858_v28 = vld [vmem:[#allocation7 + $0x530] sm:$0xff]  ;;  %15101 = vst [vmem:[#allocation443_spill] sm:$0xff] %v12055_v58  ;;  %v12071_v24 = vcombine.low %v1855_v53, %v1859_v63 }
 0x365   :  { %5375 = vmatpush1.bf16.msra.mxu0 %v12029_v9  ;;  %15099 = vst [vmem:[#allocation441_spill] sm:$0xff] %v12049_v23  ;;  %v12061_v34 = vcombine.high %v1854_v29, %v1858_v28  ;;  %15104 = vst [vmem:[#allocation446_spill] sm:$0xff] %v12064_v8  ;;  %v1867_v9 = vld [vmem:[#allocation7 + $0x578] sm:$0xff]  ;;  %v12067_v39 = vcombine.low %v1854_v29, %v1858_v28 }
 0x366   :  { %5461 = vmatpush1.bf16.msra.mxu1 %v12033_v61  ;;  %5376 = vmatprep.subr.bf16.mxu0 %v12035_v59  ;;  %v1866_v59 = vld [vmem:[#allocation7 + $0x570] sm:$0xff]  ;;  %v1863_v61 = vld [vmem:[#allocation7 + $0x558] sm:$0xff]  ;;  %15106 = vst [vmem:[#allocation448_spill] sm:$0xff] %v12071_v24 }
 0x367   :  { %5462 = vmatprep.subr.bf16.mxu1 %v12039_v35  ;;  %15103 = vst [vmem:[#allocation445_spill] sm:$0xff] %v12061_v34  ;;  %v1862_v35 = vld [vmem:[#allocation7 + $0x550] sm:$0xff]  ;;  %15105 = vst [vmem:[#allocation447_spill] sm:$0xff] %v12067_v39  ;;  %v12076_v5 = vcombine.high %v1863_v61, %v1867_v9  ;;  %v12083_v63 = vcombine.low %v1863_v61, %v1867_v9 }
 0x368   :  { %v12073_v7 = vcombine.high %v1862_v35, %v1866_v59  ;;  %v12079_v28 = vcombine.low %v1862_v35, %v1866_v59 }
 0x369   :  { %5377 = vmatpush1.bf16.msra.mxu0 %v12043_v26  ;;  %15108 = vst [vmem:[#allocation450_spill] sm:$0xff] %v12076_v5  ;;  %v1875_v26 = vld [vmem:[#allocation7 + $0x5b8] sm:$0xff]  ;;  %15110 = vst [vmem:[#allocation452_spill] sm:$0xff] %v12083_v63 }
 0x36a   :  { %5463 = vmatpush1.bf16.msra.mxu1 %v12047_v2  ;;  %5378 = vmatprep.subr.bf16.mxu0 %v12049_v23  ;;  %15107 = vst [vmem:[#allocation449_spill] sm:$0xff] %v12073_v7  ;;  %v1874_v23 = vld [vmem:[#allocation7 + $0x5b0] sm:$0xff]  ;;  %v1871_v2 = vld [vmem:[#allocation7 + $0x598] sm:$0xff]  ;;  %15109 = vst [vmem:[#allocation451_spill] sm:$0xff] %v12079_v28 }
 0x36b   :  { %5464 = vmatprep.subr.bf16.mxu1 %v12052_v14  ;;  %v1870_v14 = vld [vmem:[#allocation7 + $0x590] sm:$0xff]  ;;  %v12088_v29 = vcombine.high %v1871_v2, %v1875_v26  ;;  %v12095_v9 = vcombine.low %v1871_v2, %v1875_v26 }
 0x36c   :  { %v12085_v53 = vcombine.high %v1870_v14, %v1874_v23  ;;  %v12091_v35 = vcombine.low %v1870_v14, %v1874_v23 }
 0x36d   :  { %5379 = vmatpush1.bf16.msra.mxu0 %v12055_v58  ;;  %15112 = vst [vmem:[#allocation454_spill] sm:$0xff] %v12088_v29  ;;  %v1883_v58 = vld [vmem:[#allocation7 + $0x5f8] sm:$0xff]  ;;  %15114 = vst [vmem:[#allocation456_spill] sm:$0xff] %v12095_v9 }
 0x36e   :  { %5465 = vmatpush1.bf16.msra.mxu1 %v12059_v4  ;;  %5380 = vmatprep.subr.bf16.mxu0 %v12061_v34  ;;  %15111 = vst [vmem:[#allocation453_spill] sm:$0xff] %v12085_v53  ;;  %v1882_v34 = vld [vmem:[#allocation7 + $0x5f0] sm:$0xff]  ;;  %v1879_v4 = vld [vmem:[#allocation7 + $0x5d8] sm:$0xff]  ;;  %15113 = vst [vmem:[#allocation455_spill] sm:$0xff] %v12091_v35 }
 0x36f   :  { %5466 = vmatprep.subr.bf16.mxu1 %v12064_v8  ;;  %v1878_v8 = vld [vmem:[#allocation7 + $0x5d0] sm:$0xff]  ;;  %v12100_v59 = vcombine.high %v1879_v4, %v1883_v58  ;;  %v12107_v26 = vcombine.low %v1879_v4, %v1883_v58 }
 0x370   :  { %v12097_v61 = vcombine.high %v1878_v8, %v1882_v34  ;;  %v12103_v23 = vcombine.low %v1878_v8, %v1882_v34 }
 0x371   :  { %5381 = vmatpush1.bf16.msra.mxu0 %v12067_v39  ;;  %15116 = vst [vmem:[#allocation458_spill] sm:$0xff] %v12100_v59  ;;  %v1891_v39 = vld [vmem:[#allocation7 + $0x638] sm:$0xff]  ;;  %15118 = vst [vmem:[#allocation460_spill] sm:$0xff] %v12107_v26 }
 0x372   :  { %5467 = vmatpush1.bf16.msra.mxu1 %v12071_v24  ;;  %5382 = vmatprep.subr.bf16.mxu0 %v12073_v7  ;;  %15115 = vst [vmem:[#allocation457_spill] sm:$0xff] %v12097_v61  ;;  %v1890_v7 = vld [vmem:[#allocation7 + $0x630] sm:$0xff]  ;;  %v1887_v24 = vld [vmem:[#allocation7 + $0x618] sm:$0xff]  ;;  %15117 = vst [vmem:[#allocation459_spill] sm:$0xff] %v12103_v23 }
 0x373   :  { %5468 = vmatprep.subr.bf16.mxu1 %v12076_v5  ;;  %v1886_v5 = vld [vmem:[#allocation7 + $0x610] sm:$0xff]  ;;  %v12112_v14 = vcombine.high %v1887_v24, %v1891_v39  ;;  %v12119_v58 = vcombine.low %v1887_v24, %v1891_v39 }
 0x374   :  { %v12109_v2 = vcombine.high %v1886_v5, %v1890_v7  ;;  %v12115_v34 = vcombine.low %v1886_v5, %v1890_v7 }
 0x375   :  { %5383 = vmatpush1.bf16.msra.mxu0 %v12079_v28  ;;  %15120 = vst [vmem:[#allocation462_spill] sm:$0xff] %v12112_v14  ;;  %v1899_v28 = vld [vmem:[#allocation7 + $0x678] sm:$0xff]  ;;  %15122 = vst [vmem:[#allocation464_spill] sm:$0xff] %v12119_v58 }
 0x376   :  { %5469 = vmatpush1.bf16.msra.mxu1 %v12083_v63  ;;  %5384 = vmatprep.subr.bf16.mxu0 %v12085_v53  ;;  %15119 = vst [vmem:[#allocation461_spill] sm:$0xff] %v12109_v2  ;;  %v1898_v53 = vld [vmem:[#allocation7 + $0x670] sm:$0xff]  ;;  %v1895_v63 = vld [vmem:[#allocation7 + $0x658] sm:$0xff]  ;;  %15121 = vst [vmem:[#allocation463_spill] sm:$0xff] %v12115_v34 }
 0x377   :  { %5470 = vmatprep.subr.bf16.mxu1 %v12088_v29  ;;  %v1894_v29 = vld [vmem:[#allocation7 + $0x650] sm:$0xff]  ;;  %v12124_v8 = vcombine.high %v1895_v63, %v1899_v28  ;;  %v12131_v39 = vcombine.low %v1895_v63, %v1899_v28 }
 0x378   :  { %v12121_v4 = vcombine.high %v1894_v29, %v1898_v53  ;;  %v12127_v7 = vcombine.low %v1894_v29, %v1898_v53 }
 0x379   :  { %5385 = vmatpush1.bf16.msra.mxu0 %v12091_v35  ;;  %15124 = vst [vmem:[#allocation466_spill] sm:$0xff] %v12124_v8  ;;  %v1907_v35 = vld [vmem:[#allocation7 + $0x6b8] sm:$0xff]  ;;  %15126 = vst [vmem:[#allocation468_spill] sm:$0xff] %v12131_v39 }
 0x37a   :  { %5471 = vmatpush1.bf16.msra.mxu1 %v12095_v9  ;;  %5386 = vmatprep.subr.bf16.mxu0 %v12097_v61  ;;  %15123 = vst [vmem:[#allocation465_spill] sm:$0xff] %v12121_v4  ;;  %v1906_v61 = vld [vmem:[#allocation7 + $0x6b0] sm:$0xff]  ;;  %v1903_v9 = vld [vmem:[#allocation7 + $0x698] sm:$0xff]  ;;  %15125 = vst [vmem:[#allocation467_spill] sm:$0xff] %v12127_v7 }
 0x37b   :  { %5472 = vmatprep.subr.bf16.mxu1 %v12100_v59  ;;  %v1902_v59 = vld [vmem:[#allocation7 + $0x690] sm:$0xff]  ;;  %v12136_v5 = vcombine.high %v1903_v9, %v1907_v35  ;;  %v12143_v28 = vcombine.low %v1903_v9, %v1907_v35 }
 0x37c   :  { %v12133_v24 = vcombine.high %v1902_v59, %v1906_v61  ;;  %v12139_v53 = vcombine.low %v1902_v59, %v1906_v61  ;;  %v5505_v59 = vld [vmem:[#allocation2 + $0x40] sm:$0xff] }
 0x37d   :  { %5387 = vmatpush1.bf16.msra.mxu0 %v12103_v23  ;;  %15128 = vst [vmem:[#allocation470_spill] sm:$0xff] %v12136_v5  ;;  %v1915_v23 = vld [vmem:[#allocation7 + $0x6f8] sm:$0xff]  ;;  %15130 = vst [vmem:[#allocation472_spill] sm:$0xff] %v12143_v28 }
 0x37e   :  { %5473 = vmatpush1.bf16.msra.mxu1 %v12107_v26  ;;  %5388 = vmatprep.subr.bf16.mxu0 %v12109_v2  ;;  %15127 = vst [vmem:[#allocation469_spill] sm:$0xff] %v12133_v24  ;;  %v1914_v2 = vld [vmem:[#allocation7 + $0x6f0] sm:$0xff]  ;;  %v1911_v26 = vld [vmem:[#allocation7 + $0x6d8] sm:$0xff]  ;;  %15129 = vst [vmem:[#allocation471_spill] sm:$0xff] %v12139_v53 }
 0x37f   :  { %5474 = vmatprep.subr.bf16.mxu1 %v12112_v14  ;;  %v1910_v14 = vld [vmem:[#allocation7 + $0x6d0] sm:$0xff]  ;;  %v12148_v29 = vcombine.high %v1911_v26, %v1915_v23  ;;  %v12155_v35 = vcombine.low %v1911_v26, %v1915_v23 }
 0x380   :  { %v12145_v63 = vcombine.high %v1910_v14, %v1914_v2  ;;  %v12151_v61 = vcombine.low %v1910_v14, %v1914_v2  ;;  %v5538_v14 = vshrl.u32 %v5505_v59, 16 }
 0x381   :  { %5389 = vmatpush1.bf16.msra.mxu0 %v12115_v34  ;;  %15132 = vst [vmem:[#allocation474_spill] sm:$0xff] %v12148_v29  ;;  %v1923_v34 = vld [vmem:[#allocation7 + $0x738] sm:$0xff]  ;;  %15134 = vst [vmem:[#allocation476_spill] sm:$0xff] %v12155_v35 }
 0x382   :  { %5475 = vmatpush1.bf16.msra.mxu1 %v12119_v58  ;;  %5390 = vmatprep.subr.bf16.mxu0 %v12121_v4  ;;  %15131 = vst [vmem:[#allocation473_spill] sm:$0xff] %v12145_v63  ;;  %v1922_v4 = vld [vmem:[#allocation7 + $0x730] sm:$0xff]  ;;  %v1919_v58 = vld [vmem:[#allocation7 + $0x718] sm:$0xff]  ;;  %15133 = vst [vmem:[#allocation475_spill] sm:$0xff] %v12151_v61 }
 0x383   :  { %5476 = vmatprep.subr.bf16.mxu1 %v12124_v8  ;;  %v1918_v8 = vld [vmem:[#allocation7 + $0x710] sm:$0xff]  ;;  %v12167_v23 = vcombine.low %v1919_v58, %v1923_v34 }
 0x384   :  { %v12157_v9 = vcombine.high %v1918_v8, %v1922_v4  ;;  %v12163_v2 = vcombine.low %v1918_v8, %v1922_v4  ;;  %v1935_v4 = vld [vmem:[#allocation7 + $0x798] sm:$0xff] }
 0x385   :  { %5391 = vmatpush1.bf16.msra.mxu0 %v12127_v7  ;;  %v1927_v7 = vld [vmem:[#allocation7 + $0x758] sm:$0xff]  ;;  %15138 = vst [vmem:[#allocation480_spill] sm:$0xff] %v12167_v23 }
 0x386   :  { %5477 = vmatpush1.bf16.msra.mxu1 %v12131_v39  ;;  %5392 = vmatprep.subr.bf16.mxu0 %v12133_v24  ;;  %15135 = vst [vmem:[#allocation477_spill] sm:$0xff] %v12157_v9  ;;  %v1926_v24 = vld [vmem:[#allocation7 + $0x750] sm:$0xff]  ;;  %15137 = vst [vmem:[#allocation479_spill] sm:$0xff] %v12163_v2  ;;  %v1939_v8 = vld [vmem:[#allocation7 + $0x7b8] sm:$0xff] }
 0x387   :  { %5478 = vmatprep.subr.bf16.mxu1 %v12136_v5  ;;  %v12160_v5 = vcombine.high %v1919_v58, %v1923_v34  ;;  %v1930_v39 = vld [vmem:[#allocation7 + $0x770] sm:$0xff]  ;;  %v12179_v34 = vcombine.low %v1927_v7, %v1931_v52 }
 0x388   :  { %v12169_v26 = vcombine.high %v1926_v24, %v1930_v39 }
 0x389   :  { %5393 = vmatpush1.bf16.msra.mxu0 %v12139_v53  ;;  %15136 = vst [vmem:[#allocation478_spill] sm:$0xff] %v12160_v5  ;;  %v5501_v53 = vld [vmem:[#allocation2] sm:$0xff] }
 0x38a   :  { %5479 = vmatpush1.bf16.msra.mxu1 %v12143_v28  ;;  %5394 = vmatprep.subr.bf16.mxu0 %v12145_v63  ;;  %v5541_v63 = vshll.u32 %v5505_v59, 16  ;;  %15139 = vst [vmem:[#allocation481_spill] sm:$0xff] %v12169_v26  ;;  %v1934_v28 = vld [vmem:[#allocation7 + $0x790] sm:$0xff]  ;;  %v5510_v36 = vshrl.u32 %v5501_v53, 16  ;;  %v12175_v59 = vcombine.low %v1926_v24, %v1930_v39  ;;  %v1943_v39 = vld [vmem:[#allocation7 + $0x7d8] sm:$0xff] }
 0x38b   :  { %5480 = vmatprep.subr.bf16.mxu1 %v12148_v29  ;;  %v12172_v29 = vcombine.high %v1927_v7, %v1931_v52  ;;  %v12181_v58 = vcombine.high %v1934_v28, %v1938_v21  ;;  %v1947_v24 = vld [vmem:[#allocation7 + $0x7f8] sm:$0xff]  ;;  %v12191_v52 = vcombine.low %v1935_v4, %v1939_v8 }
 0x38c   :  { %v5512_v0 = vrot.slane %v5510_v36, 4  ;;  %v12196_v36 = vcombine.high %v1943_v39, %v1947_v24 }
 0x38d   :  { %5395 = vmatpush1.bf16.msra.mxu0 %v12151_v61  ;;  %15140 = vst [vmem:[#allocation482_spill] sm:$0xff] %v12172_v29  ;;  %v5513_v61 = vshll.u32 %v5501_v53, 16  ;;  %v1942_v53 = vld [vmem:[#allocation7 + $0x7d0] sm:$0xff]  ;;  %15143 = vst [vmem:[#allocation485_spill] sm:$0xff] %v12191_v52 }
 0x38e   :  { %5481 = vmatpush1.bf16.msra.mxu1 %v12155_v35  ;;  %5396 = vmatprep.subr.bf16.mxu0 %v12157_v9  ;;  %v5540_v35 = vrot.slane %v5538_v14, 4  ;;  %v5543_v9 = vrot.slane %v5541_v63, 5  ;;  %v5507_v14 = vld [vmem:[#allocation2 + $0x50] sm:$0x11]  ;;  %v12187_v63 = vcombine.low %v1934_v28, %v1938_v21  ;;  %v12193_v7 = vcombine.high %v1942_v53, %v1946_v6  ;;  %15145 = vst [vmem:[#allocation487_spill] sm:$0xff] %v12196_v36 }
 0x38f   :  { %5482 = vmatprep.subr.bf16.mxu1 %v12160_v5  ;;  %v12184_v5 = vcombine.high %v1935_v4, %v1939_v8  ;;  %v12199_v21 = vcombine.low %v1942_v53, %v1946_v6  ;;  %v15149_v6 = vld [vmem:[#allocation14_spill] sm:$0xff]  ;;  %v15151_v53 = vld [vmem:[#allocation15_spill] sm:$0xff] }
 0x390   :  { %15142 = vst [vmem:[#allocation484_spill] sm:$0xff] %v12187_v63  ;;  %15144 = vst [vmem:[#allocation486_spill] sm:$0xff] %v12193_v7 }
 0x391   :  { %5397 = vmatpush1.bf16.msra.mxu0 %v12163_v2  ;;  %15141 = vst [vmem:[#allocation483_spill] sm:$0xff] %v12184_v5  ;;  %v5515_v2 = vrot.slane %v5513_v61, 5  ;;  %15146 = vst [vmem:[#allocation488_spill] sm:$0xff] %v12199_v21 }
 0x392   :  { %5483 = vmatpush1.bf16.msra.mxu1 %v12167_v23  ;;  %5398 = vmatprep.subr.bf16.mxu0 %v12169_v26  ;;  %v5544_v26 = vor.u32 %v5543_v9, %v5540_v35  ;;  %v5547_v23 = vshll.u32 %v5507_v14, 16  ;;  %v12203_v9 = vcombine.low %v1943_v39, %v1947_v24  ;;  %v15152_v39 = vld [vmem:[#allocation16_spill] sm:$0xff]  ;;  %v15153_v24 = vld [vmem:[#allocation18_spill] sm:$0xff] }
 0x393   :  { %5484 = vmatprep.subr.bf16.mxu1 %v12172_v29  ;;  %v5503_v29 = vld [vmem:[#allocation2 + $0x10] sm:$0x11]  ;;  %v5516_v61 = vor.u32 %v5515_v2, %v5512_v0 }
 0x394   :  { %v5519_v28 = vshll.u32 %v5503_v29, 16  ;;  %v5545_v35 = vrot.slane %v5544_v26, 4  ;;  %15147 = vst [vmem:[#allocation489_spill] sm:$0xff] %v12203_v9  ;;  %v5549_v8 = vrot.slane %v5547_v23, 5  ;;  %v15150_v29 = vld [vmem:[#allocation17_spill] sm:$0xff] }
 0x395   :  { %5399 = vmatpush1.bf16.msra.mxu0 %v12175_v59  ;;  %v5517_v4 = vrot.slane %v5516_v61, 4  ;;  %v15154_v61 = vld [vmem:[#allocation21_spill] sm:$0xff] }
 0x396   :  { %5485 = vmatpush1.bf16.msra.mxu1 %v12179_v34  ;;  %5400 = vmatprep.subr.bf16.mxu0 %v12181_v58  ;;  %v5521_v0 = vrot.slane %v5519_v28, 5  ;;  %v12209_v14 = vsel %vm10186_vm3, %v5545_v35, %v5549_v8  ;;  %v15155_v28 = vld [vmem:[#allocation19_spill] sm:$0xff]  ;;  %v15156_v35 = vld [vmem:[#allocation20_spill] sm:$0xff]  ;;  %v15158_v8 = vld [vmem:[#allocation25_spill] sm:$0xff] }
 0x397   :  { %5486 = vmatprep.subr.bf16.mxu1 %v12184_v5 }
 0x398   :  { %v12216_v26 = vsel %vm10186_vm3, %v5517_v4, %v5521_v0  ;;  %v15157_v4 = vld [vmem:[#allocation22_spill] sm:$0xff]  ;;  %v15160_v0 = vld [vmem:[#allocation24_spill] sm:$0xff] }
 0x399   :  { %5401 = vmatpush1.bf16.msra.mxu0 %v12187_v63  ;;  %v12221_v23 = vcombine.high %v12216_v26, %v12209_v14  ;;  %v15204_v63 = vld [vmem:[#allocation68_spill] sm:$0xff] }
 0x39a   :  { %5487 = vmatpush1.bf16.msra.mxu1 %v12191_v52  ;;  %5402 = vmatprep.subr.bf16.mxu0 %v12193_v7  ;;  %v15202_v7 = vld [vmem:[#allocation69_spill] sm:$0xff]  ;;  %v5508_v52 = vld [vmem:[#allocation2 + $0x58] sm:$0x11] }
 0x39b   :  { %5488 = vmatprep.subr.bf16.mxu1 %v12196_v36  ;;  %v15200_v36 = vld [vmem:[#allocation64_spill] sm:$0xff] }
 0x39d   :  { %5403 = vmatpush1.bf16.msra.mxu0 %v12199_v21  ;;  %v15199_v21 = vld [vmem:[#allocation63_spill] sm:$0xff] }
 0x39e   :  { %5489 = vmatpush1.bf16.msra.mxu1 %v12203_v9  ;;  %5581 = vmatprep.subr.bf16.mxu0 %v15149_v6  ;;  %v15161_v6 = vld [vmem:[#allocation26_spill] sm:$0xff]  ;;  %v15196_v9 = vld [vmem:[#allocation60_spill] sm:$0xff] }
 0x39f   :  { %5667 = vmatprep.subr.bf16.mxu1 %v15150_v29  ;;  %v15162_v29 = vld [vmem:[#allocation29_spill] sm:$0xff] }
 0x3a0   :  { %5405 = vmatmul.mubr.bf16.vlgmr.msra.gmra.mrb[36].mxu0 %v11820_v56 }
 0x3a1   :  { %5491 = vmatmul.mubr.bf16.vlgmr.msra.gmra.mrb[36].mxu1 %v11820_v56  ;;  %5582 = vmatpush1.bf16.msra.mxu0 %v15151_v53  ;;  %v15159_v56 = vld [vmem:[#allocation23_spill] sm:$0xff] }
 0x3a2   :  { %5613 = vmatprep.mubr.bf16.mxu0 %v12221_v23  ;;  %5668 = vmatpush1.bf16.msra.mxu1 %v15152_v39  ;;  %v15163_v53 = vld [vmem:[#allocation27_spill] sm:$0xff]  ;;  %v15164_v39 = vld [vmem:[#allocation28_spill] sm:$0xff] }
 0x3a3   :  { %5699 = vmatprep.mubr.bf16.mxu1 %v12221_v23  ;;  %5583 = vmatprep.subr.bf16.mxu0 %v15153_v24  ;;  %v15165_v24 = vld [vmem:[#allocation30_spill] sm:$0xff] }
 0x3a4   :  { %5669 = vmatprep.subr.bf16.mxu1 %v15154_v61  ;;  %v15166_v61 = vld [vmem:[#allocation33_spill] sm:$0xff] }
 0x3a5   :  { %5584 = vmatpush1.bf16.msra.mxu0 %v15155_v28  ;;  %v15167_v28 = vld [vmem:[#allocation31_spill] sm:$0xff] }
 0x3a6   :  { %5670 = vmatpush1.bf16.msra.mxu1 %v15156_v35  ;;  %5585 = vmatprep.subr.bf16.mxu0 %v15157_v4  ;;  %v15168_v35 = vld [vmem:[#allocation32_spill] sm:$0xff]  ;;  %v15169_v4 = vld [vmem:[#allocation34_spill] sm:$0xff] }
 0x3a7   :  { %5671 = vmatprep.subr.bf16.mxu1 %v15158_v8  ;;  %v15170_v8 = vld [vmem:[#allocation37_spill] sm:$0xff] }
 0x3a9   :  { %5586 = vmatpush1.bf16.msra.mxu0 %v15159_v56  ;;  %v15171_v56 = vld [vmem:[#allocation35_spill] sm:$0xff] }
 0x3aa   :  { %5672 = vmatpush1.bf16.msra.mxu1 %v15160_v0  ;;  %5587 = vmatprep.subr.bf16.mxu0 %v15161_v6  ;;  %v15172_v0 = vld [vmem:[#allocation36_spill] sm:$0xff]  ;;  %v15173_v6 = vld [vmem:[#allocation38_spill] sm:$0xff] }
 0x3ab   :  { %5673 = vmatprep.subr.bf16.mxu1 %v15162_v29  ;;  %v15174_v29 = vld [vmem:[#allocation41_spill] sm:$0xff] }
 0x3ad   :  { %5588 = vmatpush1.bf16.msra.mxu0 %v15163_v53  ;;  %v15175_v53 = vld [vmem:[#allocation39_spill] sm:$0xff] }
 0x3ae   :  { %5674 = vmatpush1.bf16.msra.mxu1 %v15164_v39  ;;  %5589 = vmatprep.subr.bf16.mxu0 %v15165_v24  ;;  %v15176_v39 = vld [vmem:[#allocation40_spill] sm:$0xff]  ;;  %v15177_v24 = vld [vmem:[#allocation42_spill] sm:$0xff] }
 0x3af   :  { %5675 = vmatprep.subr.bf16.mxu1 %v15166_v61  ;;  %v15178_v61 = vld [vmem:[#allocation45_spill] sm:$0xff] }
 0x3b1   :  { %5590 = vmatpush1.bf16.msra.mxu0 %v15167_v28  ;;  %v15179_v28 = vld [vmem:[#allocation43_spill] sm:$0xff] }
 0x3b2   :  { %5676 = vmatpush1.bf16.msra.mxu1 %v15168_v35  ;;  %5591 = vmatprep.subr.bf16.mxu0 %v15169_v4  ;;  %v15180_v35 = vld [vmem:[#allocation44_spill] sm:$0xff]  ;;  %v15181_v4 = vld [vmem:[#allocation46_spill] sm:$0xff] }
 0x3b3   :  { %5677 = vmatprep.subr.bf16.mxu1 %v15170_v8  ;;  %v15182_v8 = vld [vmem:[#allocation49_spill] sm:$0xff] }
 0x3b5   :  { %5592 = vmatpush1.bf16.msra.mxu0 %v15171_v56  ;;  %v15183_v56 = vld [vmem:[#allocation47_spill] sm:$0xff] }
 0x3b6   :  { %5678 = vmatpush1.bf16.msra.mxu1 %v15172_v0  ;;  %5593 = vmatprep.subr.bf16.mxu0 %v15173_v6  ;;  %v15184_v0 = vld [vmem:[#allocation48_spill] sm:$0xff]  ;;  %v15185_v6 = vld [vmem:[#allocation50_spill] sm:$0xff] }
 0x3b7   :  { %5679 = vmatprep.subr.bf16.mxu1 %v15174_v29  ;;  %v15186_v29 = vld [vmem:[#allocation53_spill] sm:$0xff] }
 0x3b9   :  { %5594 = vmatpush1.bf16.msra.mxu0 %v15175_v53  ;;  %v15187_v53 = vld [vmem:[#allocation51_spill] sm:$0xff] }
 0x3ba   :  { %5680 = vmatpush1.bf16.msra.mxu1 %v15176_v39  ;;  %5595 = vmatprep.subr.bf16.mxu0 %v15177_v24  ;;  %v15188_v39 = vld [vmem:[#allocation52_spill] sm:$0xff]  ;;  %v15189_v24 = vld [vmem:[#allocation54_spill] sm:$0xff] }
 0x3bb   :  { %5681 = vmatprep.subr.bf16.mxu1 %v15178_v61  ;;  %v15190_v61 = vld [vmem:[#allocation57_spill] sm:$0xff] }
 0x3bd   :  { %5596 = vmatpush1.bf16.msra.mxu0 %v15179_v28  ;;  %v15191_v28 = vld [vmem:[#allocation55_spill] sm:$0xff] }
 0x3be   :  { %5682 = vmatpush1.bf16.msra.mxu1 %v15180_v35  ;;  %5597 = vmatprep.subr.bf16.mxu0 %v15181_v4  ;;  %v15192_v35 = vld [vmem:[#allocation56_spill] sm:$0xff]  ;;  %v15193_v4 = vld [vmem:[#allocation58_spill] sm:$0xff] }
 0x3bf   :  { %5683 = vmatprep.subr.bf16.mxu1 %v15182_v8  ;;  %v5506_v8 = vld [vmem:[#allocation2 + $0x48] sm:$0xff] }
 0x3c1   :  { %5598 = vmatpush1.bf16.msra.mxu0 %v15183_v56  ;;  %v15194_v56 = vld [vmem:[#allocation61_spill] sm:$0xff] }
 0x3c2   :  { %5684 = vmatpush1.bf16.msra.mxu1 %v15184_v0  ;;  %5599 = vmatprep.subr.bf16.mxu0 %v15185_v6  ;;  %v5502_v0 = vld [vmem:[#allocation2 + $0x8] sm:$0xff]  ;;  %v15195_v6 = vld [vmem:[#allocation59_spill] sm:$0xff] }
 0x3c3   :  { %5685 = vmatprep.subr.bf16.mxu1 %v15186_v29  ;;  %v5552_v29 = vshrl.u32 %v5506_v8, 16 }
 0x3c5   :  { %5600 = vmatpush1.bf16.msra.mxu0 %v15187_v53  ;;  %v5555_v53 = vshll.u32 %v5506_v8, 16 }
 0x3c6   :  { %5686 = vmatpush1.bf16.msra.mxu1 %v15188_v39  ;;  %5601 = vmatprep.subr.bf16.mxu0 %v15189_v24  ;;  %v15197_v39 = vld [vmem:[#allocation62_spill] sm:$0xff]  ;;  %v15198_v24 = vld [vmem:[#allocation65_spill] sm:$0xff] }
 0x3c7   :  { %5687 = vmatprep.subr.bf16.mxu1 %v15190_v61  ;;  %v5524_v61 = vshrl.u32 %v5502_v0, 16 }
 0x3c9   :  { %5602 = vmatpush1.bf16.msra.mxu0 %v15191_v28  ;;  %v5527_v28 = vshll.u32 %v5502_v0, 16  ;;  %v5504_v0 = vld [vmem:[#allocation2 + $0x18] sm:$0x11] }
 0x3ca   :  { %5688 = vmatpush1.bf16.msra.mxu1 %v15192_v35  ;;  %5603 = vmatprep.subr.bf16.mxu0 %v15193_v4  ;;  %v5554_v35 = vrot.slane %v5552_v29, 4  ;;  %v5557_v4 = vrot.slane %v5555_v53, 5  ;;  %v5561_v53 = vshll.u32 %v5508_v52, 16  ;;  %v15212_v52 = vld [vmem:[#allocation76_spill] sm:$0xff] }
 0x3cb   :  { %5689 = vmatprep.subr.bf16.mxu1 %v15194_v56  ;;  %v15201_v56 = vld [vmem:[#allocation66_spill] sm:$0xff]  ;;  %v5529_v8 = vrot.slane %v5527_v28, 5  ;;  %v15210_v28 = vld [vmem:[#allocation77_spill] sm:$0xff] }
 0x3cd   :  { %5604 = vmatpush1.bf16.msra.mxu0 %v15195_v6  ;;  %v5526_v6 = vrot.slane %v5524_v61, 4  ;;  %v15209_v61 = vld [vmem:[#allocation74_spill] sm:$0xff] }
 0x3ce   :  { %5690 = vmatpush1.bf16.msra.mxu1 %v15196_v9  ;;  %5605 = vmatprep.subr.bf16.mxu0 %v15197_v39  ;;  %v15203_v9 = vld [vmem:[#allocation67_spill] sm:$0xff]  ;;  %v5558_v39 = vor.u32 %v5557_v4, %v5554_v35  ;;  %v5563_v4 = vrot.slane %v5561_v53, 5  ;;  %v15256_v53 = vld [vmem:[#allocation126_spill] sm:$0xff] }
 0x3cf   :  { %5691 = vmatprep.subr.bf16.mxu1 %v15198_v24  ;;  %v15205_v24 = vld [vmem:[#allocation70_spill] sm:$0xff]  ;;  %v5530_v29 = vor.u32 %v5529_v8, %v5526_v6  ;;  %v12294_v6 = vcombine.low %v12216_v26, %v12209_v14  ;;  %v15253_v26 = vld [vmem:[#allocation123_spill] sm:$0xff] }
 0x3d0   :  { %v5559_v5 = vrot.slane %v5558_v39, 4  ;;  %v15213_v8 = vld [vmem:[#allocation78_spill] sm:$0xff]  ;;  %v15214_v39 = vld [vmem:[#allocation79_spill] sm:$0xff] }
 0x3d1   :  { %5606 = vmatpush1.bf16.msra.mxu0 %v15199_v21  ;;  %v15206_v21 = vld [vmem:[#allocation73_spill] sm:$0xff]  ;;  %v5531_v35 = vrot.slane %v5530_v29, 4  ;;  %v15252_v14 = vld [vmem:[#allocation122_spill] sm:$0xff] }
 0x3d2   :  { %5692 = vmatpush1.bf16.msra.mxu1 %v15200_v36  ;;  %5607 = vmatprep.subr.bf16.mxu0 %v15201_v56  ;;  %v15207_v36 = vld [vmem:[#allocation71_spill] sm:$0xff]  ;;  %v5533_v56 = vshll.u32 %v5504_v0, 16  ;;  %v15255_v29 = vld [vmem:[#allocation125_spill] sm:$0xff] }
 0x3d3   :  { %5693 = vmatprep.subr.bf16.mxu1 %v15202_v7  ;;  %v15208_v7 = vld [vmem:[#allocation72_spill] sm:$0xff] }
 0x3d5   :  { %5608 = vmatpush1.bf16.msra.mxu0 %v15203_v9  ;;  %v5535_v9 = vrot.slane %v5533_v56, 5  ;;  %v15258_v56 = vld [vmem:[#allocation128_spill] sm:$0xff] }
 0x3d6   :  { %5694 = vmatpush1.bf16.msra.mxu1 %v15204_v63  ;;  %5609 = vmatprep.subr.bf16.mxu0 %v15205_v24  ;;  %v15211_v63 = vld [vmem:[#allocation75_spill] sm:$0xff]  ;;  %v12289_v24 = vsel %vm10186_vm3, %v5559_v5, %v5563_v4  ;;  %v15263_v4 = vld [vmem:[#allocation133_spill] sm:$0xff] }
 0x3d7   :  { %5695 = vmatprep.subr.bf16.mxu1 %v15206_v21  ;;  %v12300_v0 = vsel %vm10186_vm3, %v5531_v35, %v5535_v9  ;;  %v15254_v21 = vld [vmem:[#allocation124_spill] sm:$0xff]  ;;  %v15265_v9 = vld [vmem:[#allocation135_spill] sm:$0xff] }
 0x3d8   :  { %v12305_v5 = vcombine.high %v12300_v0, %v12289_v24  ;;  %v15262_v35 = vld [vmem:[#allocation132_spill] sm:$0xff] }
 0x3d9   :  { %5610 = vmatpush1.bf16.msra.mxu0 %v15207_v36  ;;  %v15257_v36 = vld [vmem:[#allocation127_spill] sm:$0xff] }
 0x3da   :  { %5696 = vmatpush1.bf16.msra.mxu1 %v15208_v7  ;;  %5611 = vmatprep.subr.bf16.mxu0 %v15209_v61  ;;  %v15259_v7 = vld [vmem:[#allocation129_spill] sm:$0xff]  ;;  %v15260_v61 = vld [vmem:[#allocation130_spill] sm:$0xff] }
 0x3db   :  { %5697 = vmatprep.subr.bf16.mxu1 %v15210_v28  ;;  %v15261_v28 = vld [vmem:[#allocation131_spill] sm:$0xff] }
 0x3dd   :  { %5612 = vmatpush1.bf16.msra.mxu0 %v15211_v63  ;;  %v15264_v63 = vld [vmem:[#allocation134_spill] sm:$0xff] }
 0x3de   :  { %5698 = vmatpush1.bf16.msra.mxu1 %v15212_v52  ;;  %5624 = vmatprep.subr.bf16.mxu0 %v15213_v8  ;;  %v15267_v52 = vld [vmem:[#allocation137_spill] sm:$0xff]  ;;  %v15268_v8 = vld [vmem:[#allocation138_spill] sm:$0xff] }
 0x3df   :  { %5710 = vmatprep.subr.bf16.mxu1 %v15214_v39  ;;  %v15269_v39 = vld [vmem:[#allocation139_spill] sm:$0xff] }
 0x3e0   :  { %5614 = vmatmul.mubr.bf16.vlgmr.msra.gmra.mrb[40].mxu0 %v12294_v6 }
 0x3e1   :  { %5700 = vmatmul.mubr.bf16.vlgmr.msra.gmra.mrb[40].mxu1 %v12294_v6  ;;  %5625 = vmatpush1.bf16.msra.mxu0 %v10534_v10  ;;  %v15215_v10 = vld [vmem:[#allocation85_spill] sm:$0xff] }
 0x3e2   :  { %5656 = vmatprep.mubr.bf16.mxu0 %v12305_v5  ;;  %5711 = vmatpush1.bf16.msra.mxu1 %v10536_v18  ;;  %v15216_v18 = vld [vmem:[#allocation86_spill] sm:$0xff] }
 0x3e3   :  { %5742 = vmatprep.mubr.bf16.mxu1 %v12305_v5  ;;  %5626 = vmatprep.subr.bf16.mxu0 %v10730_v42  ;;  %v15218_v42 = vld [vmem:[#allocation88_spill] sm:$0xff] }
 0x3e4   :  { %5712 = vmatprep.subr.bf16.mxu1 %v10738_v22  ;;  %v15220_v22 = vld [vmem:[#allocation90_spill] sm:$0xff] }
 0x3e5   :  { %5627 = vmatpush1.bf16.msra.mxu0 %v10728_v15  ;;  %v15217_v15 = vld [vmem:[#allocation87_spill] sm:$0xff] }
 0x3e6   :  { %5713 = vmatpush1.bf16.msra.mxu1 %v10732_v60  ;;  %5628 = vmatprep.subr.bf16.mxu0 %v10740_v27  ;;  %v15219_v60 = vld [vmem:[#allocation89_spill] sm:$0xff]  ;;  %v15221_v27 = vld [vmem:[#allocation91_spill] sm:$0xff] }
 0x3e7   :  { %5714 = vmatprep.subr.bf16.mxu1 %v10752_v33  ;;  %v15224_v33 = vld [vmem:[#allocation94_spill] sm:$0xff] }
 0x3e9   :  { %5629 = vmatpush1.bf16.msra.mxu0 %v10744_v37  ;;  %v15222_v37 = vld [vmem:[#allocation92_spill] sm:$0xff] }
 0x3ea   :  { %5715 = vmatpush1.bf16.msra.mxu1 %v10746_v1  ;;  %5630 = vmatprep.subr.bf16.mxu0 %v10756_v17  ;;  %v15223_v1 = vld [vmem:[#allocation93_spill] sm:$0xff]  ;;  %v15226_v17 = vld [vmem:[#allocation96_spill] sm:$0xff] }
 0x3eb   :  { %5716 = vmatprep.subr.bf16.mxu1 %v10763_v47  ;;  %v15228_v47 = vld [vmem:[#allocation98_spill] sm:$0xff] }
 0x3ed   :  { %5631 = vmatpush1.bf16.msra.mxu0 %v10754_v62  ;;  %v15225_v62 = vld [vmem:[#allocation95_spill] sm:$0xff] }
 0x3ee   :  { %5717 = vmatpush1.bf16.msra.mxu1 %v10761_v46  ;;  %5632 = vmatprep.subr.bf16.mxu0 %v10825_v38  ;;  %v15227_v46 = vld [vmem:[#allocation97_spill] sm:$0xff]  ;;  %v15230_v38 = vld [vmem:[#allocation100_spill] sm:$0xff] }
 0x3ef   :  { %5718 = vmatprep.subr.bf16.mxu1 %v10836_v57  ;;  %v15232_v57 = vld [vmem:[#allocation102_spill] sm:$0xff] }
 0x3f1   :  { %5633 = vmatpush1.bf16.msra.mxu0 %v10815_v49  ;;  %v15229_v49 = vld [vmem:[#allocation99_spill] sm:$0xff] }
 0x3f2   :  { %5719 = vmatpush1.bf16.msra.mxu1 %v10827_v41  ;;  %5634 = vmatprep.subr.bf16.mxu0 %v10844_v50  ;;  %v15231_v41 = vld [vmem:[#allocation101_spill] sm:$0xff]  ;;  %v15234_v50 = vld [vmem:[#allocation104_spill] sm:$0xff] }
 0x3f3   :  { %5720 = vmatprep.subr.bf16.mxu1 %v10849_v31  ;;  %v15236_v31 = vld [vmem:[#allocation106_spill] sm:$0xff] }
 0x3f5   :  { %5635 = vmatpush1.bf16.msra.mxu0 %v10838_v11  ;;  %v15233_v11 = vld [vmem:[#allocation103_spill] sm:$0xff] }
 0x3f6   :  { %5721 = vmatpush1.bf16.msra.mxu1 %v10846_v12  ;;  %5636 = vmatprep.subr.bf16.mxu0 %v10863_v51  ;;  %v15235_v12 = vld [vmem:[#allocation105_spill] sm:$0xff]  ;;  %v15237_v51 = vld [vmem:[#allocation107_spill] sm:$0xff] }
 0x3f7   :  { %5722 = vmatprep.subr.bf16.mxu1 %v10882_v48  ;;  %v15238_v48 = vld [vmem:[#allocation108_spill] sm:$0xff] }
 0x3f9   :  { %5637 = vmatpush1.bf16.msra.mxu0 %v10891_v25  ;;  %v12374_v25 = vcombine.low %v12300_v0, %v12289_v24  ;;  %v15266_v24 = vld [vmem:[#allocation136_spill] sm:$0xff] }
 0x3fa   :  { %5723 = vmatpush1.bf16.msra.mxu1 %v10895_v32  ;;  %5638 = vmatprep.subr.bf16.mxu0 %v10897_v54  ;;  %v15239_v32 = vld [vmem:[#allocation109_spill] sm:$0xff]  ;;  %v15240_v54 = vld [vmem:[#allocation110_spill] sm:$0xff]  ;;  %v15270_v0 = vld [vmem:[#allocation140_spill] sm:$0xff] }
 0x3fb   :  { %5724 = vmatprep.subr.bf16.mxu1 %v10900_v19  ;;  %v15241_v19 = vld [vmem:[#allocation111_spill] sm:$0xff] }
 0x3fd   :  { %5639 = vmatpush1.bf16.msra.mxu0 %v10903_v16  ;;  %v15242_v16 = vld [vmem:[#allocation112_spill] sm:$0xff] }
 0x3fe   :  { %5725 = vmatpush1.bf16.msra.mxu1 %v10907_v45  ;;  %5640 = vmatprep.subr.bf16.mxu0 %v10909_v20  ;;  %v15243_v45 = vld [vmem:[#allocation113_spill] sm:$0xff]  ;;  %v15244_v20 = vld [vmem:[#allocation114_spill] sm:$0xff] }
 0x3ff   :  { %5726 = vmatprep.subr.bf16.mxu1 %v10912_v30  ;;  %v15245_v30 = vld [vmem:[#allocation115_spill] sm:$0xff] }
 0x401   :  { %5641 = vmatpush1.bf16.msra.mxu0 %v10915_v3  ;;  %v15246_v3 = vld [vmem:[#allocation116_spill] sm:$0xff] }
 0x402   :  { %5727 = vmatpush1.bf16.msra.mxu1 %v10919_v43  ;;  %5642 = vmatprep.subr.bf16.mxu0 %v10921_v44  ;;  %v15247_v43 = vld [vmem:[#allocation117_spill] sm:$0xff]  ;;  %v15248_v44 = vld [vmem:[#allocation118_spill] sm:$0xff] }
 0x403   :  { %5728 = vmatprep.subr.bf16.mxu1 %v10924_v55  ;;  %v15249_v55 = vld [vmem:[#allocation119_spill] sm:$0xff] }
 0x405   :  { %5643 = vmatpush1.bf16.msra.mxu0 %v10927_v40  ;;  %v15250_v40 = vld [vmem:[#allocation120_spill] sm:$0xff] }
 0x406   :  { %5729 = vmatpush1.bf16.msra.mxu1 %v10931_v13  ;;  %5644 = vmatprep.subr.bf16.mxu0 %v15215_v10  ;;  %v15251_v13 = vld [vmem:[#allocation121_spill] sm:$0xff] }
 0x407   :  { %5730 = vmatprep.subr.bf16.mxu1 %v15216_v18  ;;  %v15271_v10 = vld [vmem:[#allocation141_spill] sm:$0xff]  ;;  %v15272_v18 = vld [vmem:[#allocation142_spill] sm:$0xff] }
 0x409   :  { %5645 = vmatpush1.bf16.msra.mxu0 %v15217_v15  ;;  %v15273_v15 = vld [vmem:[#allocation143_spill] sm:$0xff] }
 0x40a   :  { %5731 = vmatpush1.bf16.msra.mxu1 %v15218_v42  ;;  %5646 = vmatprep.subr.bf16.mxu0 %v15219_v60  ;;  %v15274_v42 = vld [vmem:[#allocation144_spill] sm:$0xff]  ;;  %v15275_v60 = vld [vmem:[#allocation145_spill] sm:$0xff] }
 0x40b   :  { %5732 = vmatprep.subr.bf16.mxu1 %v15220_v22  ;;  %v15276_v22 = vld [vmem:[#allocation146_spill] sm:$0xff] }
 0x40d   :  { %5647 = vmatpush1.bf16.msra.mxu0 %v15221_v27  ;;  %v15277_v27 = vld [vmem:[#allocation147_spill] sm:$0xff] }
 0x40e   :  { %5733 = vmatpush1.bf16.msra.mxu1 %v15222_v37  ;;  %5648 = vmatprep.subr.bf16.mxu0 %v15223_v1  ;;  %v15278_v37 = vld [vmem:[#allocation148_spill] sm:$0xff]  ;;  %v15279_v1 = vld [vmem:[#allocation149_spill] sm:$0xff] }
 0x40f   :  { %5734 = vmatprep.subr.bf16.mxu1 %v15224_v33  ;;  %v15280_v33 = vld [vmem:[#allocation150_spill] sm:$0xff] }
 0x411   :  { %5649 = vmatpush1.bf16.msra.mxu0 %v15225_v62  ;;  %v15281_v62 = vld [vmem:[#allocation151_spill] sm:$0xff] }
 0x412   :  { %5735 = vmatpush1.bf16.msra.mxu1 %v15226_v17  ;;  %5650 = vmatprep.subr.bf16.mxu0 %v15227_v46  ;;  %v15282_v17 = vld [vmem:[#allocation152_spill] sm:$0xff]  ;;  %v15283_v46 = vld [vmem:[#allocation153_spill] sm:$0xff] }
 0x413   :  { %5736 = vmatprep.subr.bf16.mxu1 %v15228_v47  ;;  %v15284_v47 = vld [vmem:[#allocation154_spill] sm:$0xff] }
 0x415   :  { %5651 = vmatpush1.bf16.msra.mxu0 %v15229_v49  ;;  %v15285_v49 = vld [vmem:[#allocation155_spill] sm:$0xff] }
 0x416   :  { %5737 = vmatpush1.bf16.msra.mxu1 %v15230_v38  ;;  %5652 = vmatprep.subr.bf16.mxu0 %v15231_v41  ;;  %v15286_v38 = vld [vmem:[#allocation156_spill] sm:$0xff]  ;;  %v15287_v41 = vld [vmem:[#allocation157_spill] sm:$0xff] }
 0x417   :  { %5738 = vmatprep.subr.bf16.mxu1 %v15232_v57  ;;  %v15288_v57 = vld [vmem:[#allocation158_spill] sm:$0xff] }
 0x419   :  { %5653 = vmatpush1.bf16.msra.mxu0 %v15233_v11  ;;  %v15289_v11 = vld [vmem:[#allocation159_spill] sm:$0xff] }
 0x41a   :  { %5739 = vmatpush1.bf16.msra.mxu1 %v15234_v50  ;;  %5654 = vmatprep.subr.bf16.mxu0 %v15235_v12  ;;  %v15290_v50 = vld [vmem:[#allocation160_spill] sm:$0xff]  ;;  %v15291_v12 = vld [vmem:[#allocation161_spill] sm:$0xff] }
 0x41b   :  { %5740 = vmatprep.subr.bf16.mxu1 %v15236_v31  ;;  %v15292_v31 = vld [vmem:[#allocation162_spill] sm:$0xff] }
 0x41d   :  { %5655 = vmatpush1.bf16.msra.mxu0 %v15237_v51  ;;  %v15293_v51 = vld [vmem:[#allocation163_spill] sm:$0xff] }
 0x41e   :  { %5741 = vmatpush1.bf16.msra.mxu1 %v15238_v48  ;;  %5753 = vmatprep.subr.bf16.mxu0 %v15239_v32  ;;  %v15294_v48 = vld [vmem:[#allocation164_spill] sm:$0xff]  ;;  %v15295_v32 = vld [vmem:[#allocation165_spill] sm:$0xff] }
 0x41f   :  { %5839 = vmatprep.subr.bf16.mxu1 %v15240_v54  ;;  %v15296_v54 = vld [vmem:[#allocation166_spill] sm:$0xff] }
 0x420   :  { %5657 = vmatmul.mubr.bf16.vlgmr.msra.gmra.mrb[40].mxu0 %v12374_v25 }
 0x421   :  { %5743 = vmatmul.mubr.bf16.vlgmr.msra.gmra.mrb[40].mxu1 %v12374_v25  ;;  %5754 = vmatpush1.bf16.msra.mxu0 %v15241_v19  ;;  %v15297_v19 = vld [vmem:[#allocation167_spill] sm:$0xff] }
 0x422   :  { %5785 = vmatprep.mubr.bf16.mxu0 %v12221_v23  ;;  %5840 = vmatpush1.bf16.msra.mxu1 %v15242_v16  ;;  %v15298_v16 = vld [vmem:[#allocation168_spill] sm:$0xff] }
 0x423   :  { %5871 = vmatprep.mubr.bf16.mxu1 %v12221_v23  ;;  %5755 = vmatprep.subr.bf16.mxu0 %v15243_v45  ;;  %v15299_v45 = vld [vmem:[#allocation169_spill] sm:$0xff] }
 0x424   :  { %5841 = vmatprep.subr.bf16.mxu1 %v15244_v20  ;;  %v15300_v20 = vld [vmem:[#allocation170_spill] sm:$0xff] }
 0x425   :  { %5756 = vmatpush1.bf16.msra.mxu0 %v15245_v30  ;;  %v15301_v30 = vld [vmem:[#allocation171_spill] sm:$0xff] }
 0x426   :  { %5842 = vmatpush1.bf16.msra.mxu1 %v15246_v3  ;;  %5757 = vmatprep.subr.bf16.mxu0 %v15247_v43  ;;  %v15302_v3 = vld [vmem:[#allocation172_spill] sm:$0xff]  ;;  %v15303_v43 = vld [vmem:[#allocation173_spill] sm:$0xff] }
 0x427   :  { %5843 = vmatprep.subr.bf16.mxu1 %v15248_v44  ;;  %v15304_v44 = vld [vmem:[#allocation174_spill] sm:$0xff] }
 0x429   :  { %5758 = vmatpush1.bf16.msra.mxu0 %v15249_v55  ;;  %v15305_v55 = vld [vmem:[#allocation175_spill] sm:$0xff] }
 0x42a   :  { %5844 = vmatpush1.bf16.msra.mxu1 %v15250_v40  ;;  %5759 = vmatprep.subr.bf16.mxu0 %v15251_v13  ;;  %v15306_v40 = vld [vmem:[#allocation176_spill] sm:$0xff]  ;;  %v15307_v13 = vld [vmem:[#allocation177_spill] sm:$0xff] }
 0x42b   :  { %5845 = vmatprep.subr.bf16.mxu1 %v15252_v14  ;;  %v15308_v14 = vld [vmem:[#allocation178_spill] sm:$0xff] }
 0x42d   :  { %5760 = vmatpush1.bf16.msra.mxu0 %v15253_v26  ;;  %v15309_v26 = vld [vmem:[#allocation179_spill] sm:$0xff] }
 0x42e   :  { %5846 = vmatpush1.bf16.msra.mxu1 %v15254_v21  ;;  %5761 = vmatprep.subr.bf16.mxu0 %v15255_v29  ;;  %v15310_v21 = vld [vmem:[#allocation180_spill] sm:$0xff]  ;;  %v15311_v29 = vld [vmem:[#allocation181_spill] sm:$0xff] }
 0x42f   :  { %5847 = vmatprep.subr.bf16.mxu1 %v15256_v53  ;;  %v15312_v53 = vld [vmem:[#allocation182_spill] sm:$0xff] }
 0x431   :  { %5762 = vmatpush1.bf16.msra.mxu0 %v15257_v36  ;;  %v15313_v36 = vld [vmem:[#allocation183_spill] sm:$0xff] }
 0x432   :  { %5848 = vmatpush1.bf16.msra.mxu1 %v15258_v56  ;;  %5763 = vmatprep.subr.bf16.mxu0 %v15259_v7  ;;  %v15314_v56 = vld [vmem:[#allocation184_spill] sm:$0xff]  ;;  %v15315_v7 = vld [vmem:[#allocation185_spill] sm:$0xff] }
 0x433   :  { %5849 = vmatprep.subr.bf16.mxu1 %v15260_v61  ;;  %v15316_v61 = vld [vmem:[#allocation186_spill] sm:$0xff] }
 0x435   :  { %5764 = vmatpush1.bf16.msra.mxu0 %v15261_v28  ;;  %v15317_v28 = vld [vmem:[#allocation187_spill] sm:$0xff] }
 0x436   :  { %5850 = vmatpush1.bf16.msra.mxu1 %v15262_v35  ;;  %5765 = vmatprep.subr.bf16.mxu0 %v15263_v4  ;;  %v15318_v35 = vld [vmem:[#allocation188_spill] sm:$0xff]  ;;  %v15319_v4 = vld [vmem:[#allocation189_spill] sm:$0xff] }
 0x437   :  { %5851 = vmatprep.subr.bf16.mxu1 %v15264_v63  ;;  %v15320_v63 = vld [vmem:[#allocation190_spill] sm:$0xff] }
 0x439   :  { %5766 = vmatpush1.bf16.msra.mxu0 %v15265_v9  ;;  %v15321_v9 = vld [vmem:[#allocation191_spill] sm:$0xff] }
 0x43a   :  { %5852 = vmatpush1.bf16.msra.mxu1 %v15266_v24  ;;  %5767 = vmatprep.subr.bf16.mxu0 %v15267_v52  ;;  %v15322_v24 = vld [vmem:[#allocation192_spill] sm:$0xff]  ;;  %v15323_v52 = vld [vmem:[#allocation193_spill] sm:$0xff] }
 0x43b   :  { %5853 = vmatprep.subr.bf16.mxu1 %v15268_v8  ;;  %v15324_v8 = vld [vmem:[#allocation194_spill] sm:$0xff] }
 0x43d   :  { %5768 = vmatpush1.bf16.msra.mxu0 %v15269_v39  ;;  %v15325_v39 = vld [vmem:[#allocation195_spill] sm:$0xff] }
 0x43e   :  { %5854 = vmatpush1.bf16.msra.mxu1 %v15270_v0  ;;  %5769 = vmatprep.subr.bf16.mxu0 %v15271_v10  ;;  %v15326_v0 = vld [vmem:[#allocation196_spill] sm:$0xff]  ;;  %v15327_v10 = vld [vmem:[#allocation197_spill] sm:$0xff] }
 0x43f   :  { %5855 = vmatprep.subr.bf16.mxu1 %v15272_v18  ;;  %v15328_v18 = vld [vmem:[#allocation198_spill] sm:$0xff] }
 0x441   :  { %5770 = vmatpush1.bf16.msra.mxu0 %v15273_v15  ;;  %v15329_v15 = vld [vmem:[#allocation199_spill] sm:$0xff] }
 0x442   :  { %5856 = vmatpush1.bf16.msra.mxu1 %v15274_v42  ;;  %5771 = vmatprep.subr.bf16.mxu0 %v15275_v60  ;;  %v15330_v42 = vld [vmem:[#allocation200_spill] sm:$0xff]  ;;  %v15331_v60 = vld [vmem:[#allocation201_spill] sm:$0xff] }
 0x443   :  { %5857 = vmatprep.subr.bf16.mxu1 %v15276_v22  ;;  %v15332_v22 = vld [vmem:[#allocation202_spill] sm:$0xff] }
 0x445   :  { %5772 = vmatpush1.bf16.msra.mxu0 %v15277_v27  ;;  %v15333_v27 = vld [vmem:[#allocation203_spill] sm:$0xff] }
 0x446   :  { %5858 = vmatpush1.bf16.msra.mxu1 %v15278_v37  ;;  %5773 = vmatprep.subr.bf16.mxu0 %v15279_v1  ;;  %v15334_v37 = vld [vmem:[#allocation204_spill] sm:$0xff]  ;;  %v15335_v1 = vld [vmem:[#allocation205_spill] sm:$0xff] }
 0x447   :  { %5859 = vmatprep.subr.bf16.mxu1 %v15280_v33  ;;  %v15336_v33 = vld [vmem:[#allocation206_spill] sm:$0xff] }
 0x449   :  { %5774 = vmatpush1.bf16.msra.mxu0 %v15281_v62  ;;  %v15337_v62 = vld [vmem:[#allocation207_spill] sm:$0xff] }
 0x44a   :  { %5860 = vmatpush1.bf16.msra.mxu1 %v15282_v17  ;;  %5775 = vmatprep.subr.bf16.mxu0 %v15283_v46  ;;  %v15338_v17 = vld [vmem:[#allocation208_spill] sm:$0xff]  ;;  %v15339_v46 = vld [vmem:[#allocation209_spill] sm:$0xff] }
 0x44b   :  { %5861 = vmatprep.subr.bf16.mxu1 %v15284_v47  ;;  %v15340_v47 = vld [vmem:[#allocation210_spill] sm:$0xff] }
 0x44d   :  { %5776 = vmatpush1.bf16.msra.mxu0 %v15285_v49  ;;  %v15341_v49 = vld [vmem:[#allocation211_spill] sm:$0xff] }
 0x44e   :  { %5862 = vmatpush1.bf16.msra.mxu1 %v15286_v38  ;;  %5777 = vmatprep.subr.bf16.mxu0 %v15287_v41  ;;  %v15342_v38 = vld [vmem:[#allocation212_spill] sm:$0xff]  ;;  %v15343_v41 = vld [vmem:[#allocation213_spill] sm:$0xff] }
 0x44f   :  { %5863 = vmatprep.subr.bf16.mxu1 %v15288_v57  ;;  %v15344_v57 = vld [vmem:[#allocation214_spill] sm:$0xff] }
 0x451   :  { %5778 = vmatpush1.bf16.msra.mxu0 %v15289_v11  ;;  %v15345_v11 = vld [vmem:[#allocation215_spill] sm:$0xff] }
 0x452   :  { %5864 = vmatpush1.bf16.msra.mxu1 %v15290_v50  ;;  %5779 = vmatprep.subr.bf16.mxu0 %v15291_v12  ;;  %v15346_v50 = vld [vmem:[#allocation216_spill] sm:$0xff]  ;;  %v15347_v12 = vld [vmem:[#allocation217_spill] sm:$0xff] }
 0x453   :  { %5865 = vmatprep.subr.bf16.mxu1 %v15292_v31  ;;  %v15348_v31 = vld [vmem:[#allocation218_spill] sm:$0xff] }
 0x455   :  { %5780 = vmatpush1.bf16.msra.mxu0 %v15293_v51  ;;  %v15349_v51 = vld [vmem:[#allocation219_spill] sm:$0xff] }
 0x456   :  { %5866 = vmatpush1.bf16.msra.mxu1 %v15294_v48  ;;  %5781 = vmatprep.subr.bf16.mxu0 %v15295_v32  ;;  %v15350_v48 = vld [vmem:[#allocation220_spill] sm:$0xff]  ;;  %v15351_v32 = vld [vmem:[#allocation221_spill] sm:$0xff] }
 0x457   :  { %5867 = vmatprep.subr.bf16.mxu1 %v15296_v54  ;;  %v15352_v54 = vld [vmem:[#allocation222_spill] sm:$0xff] }
 0x459   :  { %5782 = vmatpush1.bf16.msra.mxu0 %v15297_v19  ;;  %v15353_v19 = vld [vmem:[#allocation223_spill] sm:$0xff] }
 0x45a   :  { %5868 = vmatpush1.bf16.msra.mxu1 %v15298_v16  ;;  %5783 = vmatprep.subr.bf16.mxu0 %v15299_v45  ;;  %v15354_v16 = vld [vmem:[#allocation224_spill] sm:$0xff]  ;;  %v15355_v45 = vld [vmem:[#allocation225_spill] sm:$0xff] }
 0x45b   :  { %5869 = vmatprep.subr.bf16.mxu1 %v15300_v20  ;;  %v15356_v20 = vld [vmem:[#allocation226_spill] sm:$0xff] }
 0x45d   :  { %5784 = vmatpush1.bf16.msra.mxu0 %v15301_v30  ;;  %v15357_v30 = vld [vmem:[#allocation227_spill] sm:$0xff] }
 0x45e   :  { %5870 = vmatpush1.bf16.msra.mxu1 %v15302_v3  ;;  %5796 = vmatprep.subr.bf16.mxu0 %v15303_v43  ;;  %v15358_v3 = vld [vmem:[#allocation228_spill] sm:$0xff]  ;;  %v15359_v43 = vld [vmem:[#allocation229_spill] sm:$0xff] }
 0x45f   :  { %5882 = vmatprep.subr.bf16.mxu1 %v15304_v44  ;;  %v15360_v44 = vld [vmem:[#allocation230_spill] sm:$0xff] }
 0x460   :  { %5786 = vmatmul.mubr.bf16.vlgmr.msra.gmra.mrb[44].mxu0 %v12294_v6 }
 0x461   :  { %5872 = vmatmul.mubr.bf16.vlgmr.msra.gmra.mrb[44].mxu1 %v12294_v6  ;;  %5797 = vmatpush1.bf16.msra.mxu0 %v15305_v55  ;;  %v15361_v55 = vld [vmem:[#allocation231_spill] sm:$0xff] }
 0x462   :  { %5828 = vmatprep.mubr.bf16.mxu0 %v12305_v5  ;;  %5883 = vmatpush1.bf16.msra.mxu1 %v15306_v40  ;;  %v15362_v40 = vld [vmem:[#allocation232_spill] sm:$0xff] }
 0x463   :  { %5914 = vmatprep.mubr.bf16.mxu1 %v12305_v5  ;;  %5798 = vmatprep.subr.bf16.mxu0 %v15307_v13  ;;  %v15363_v13 = vld [vmem:[#allocation233_spill] sm:$0xff] }
 0x464   :  { %5884 = vmatprep.subr.bf16.mxu1 %v15308_v14  ;;  %v15364_v14 = vld [vmem:[#allocation234_spill] sm:$0xff] }
 0x465   :  { %5799 = vmatpush1.bf16.msra.mxu0 %v15309_v26  ;;  %v15365_v26 = vld [vmem:[#allocation235_spill] sm:$0xff] }
 0x466   :  { %5885 = vmatpush1.bf16.msra.mxu1 %v15310_v21  ;;  %5800 = vmatprep.subr.bf16.mxu0 %v15311_v29  ;;  %v15366_v21 = vld [vmem:[#allocation236_spill] sm:$0xff]  ;;  %v15367_v29 = vld [vmem:[#allocation237_spill] sm:$0xff] }
 0x467   :  { %5886 = vmatprep.subr.bf16.mxu1 %v15312_v53  ;;  %v15368_v53 = vld [vmem:[#allocation238_spill] sm:$0xff] }
 0x469   :  { %5801 = vmatpush1.bf16.msra.mxu0 %v15313_v36  ;;  %v15369_v36 = vld [vmem:[#allocation239_spill] sm:$0xff] }
 0x46a   :  { %5887 = vmatpush1.bf16.msra.mxu1 %v15314_v56  ;;  %5802 = vmatprep.subr.bf16.mxu0 %v15315_v7  ;;  %v15370_v56 = vld [vmem:[#allocation81_spill] sm:$0xff]  ;;  %v15371_v7 = vld [vmem:[#allocation240_spill] sm:$0xff] }
 0x46b   :  { %5888 = vmatprep.subr.bf16.mxu1 %v15316_v61  ;;  %v15372_v61 = vld [vmem:[#allocation241_spill] sm:$0xff] }
 0x46d   :  { %5803 = vmatpush1.bf16.msra.mxu0 %v15317_v28  ;;  %v15373_v28 = vld [vmem:[#allocation242_spill] sm:$0xff] }
 0x46e   :  { %5889 = vmatpush1.bf16.msra.mxu1 %v15318_v35  ;;  %5804 = vmatprep.subr.bf16.mxu0 %v15319_v4  ;;  %v15374_v35 = vld [vmem:[#allocation243_spill] sm:$0xff]  ;;  %v15375_v4 = vld [vmem:[#allocation244_spill] sm:$0xff] }
 0x46f   :  { %5890 = vmatprep.subr.bf16.mxu1 %v15320_v63  ;;  %v15376_v63 = vld [vmem:[#allocation245_spill] sm:$0xff] }
 0x471   :  { %5805 = vmatpush1.bf16.msra.mxu0 %v15321_v9  ;;  %v15377_v9 = vld [vmem:[#allocation246_spill] sm:$0xff] }
 0x472   :  { %5891 = vmatpush1.bf16.msra.mxu1 %v15322_v24  ;;  %5806 = vmatprep.subr.bf16.mxu0 %v15323_v52  ;;  %v15378_v24 = vld [vmem:[#allocation247_spill] sm:$0xff]  ;;  %v15379_v52 = vld [vmem:[#allocation248_spill] sm:$0xff] }
 0x473   :  { %5892 = vmatprep.subr.bf16.mxu1 %v15324_v8  ;;  %v15380_v8 = vld [vmem:[#allocation249_spill] sm:$0xff] }
 0x475   :  { %5807 = vmatpush1.bf16.msra.mxu0 %v15325_v39  ;;  %v15381_v39 = vld [vmem:[#allocation250_spill] sm:$0xff] }
 0x476   :  { %5893 = vmatpush1.bf16.msra.mxu1 %v15326_v0  ;;  %5808 = vmatprep.subr.bf16.mxu0 %v15327_v10  ;;  %v15382_v0 = vld [vmem:[#allocation251_spill] sm:$0xff]  ;;  %v15383_v10 = vld [vmem:[#allocation252_spill] sm:$0xff] }
 0x477   :  { %5894 = vmatprep.subr.bf16.mxu1 %v15328_v18  ;;  %v15384_v18 = vld [vmem:[#allocation253_spill] sm:$0xff] }
 0x479   :  { %5809 = vmatpush1.bf16.msra.mxu0 %v15329_v15  ;;  %v15385_v15 = vld [vmem:[#allocation254_spill] sm:$0xff] }
 0x47a   :  { %5895 = vmatpush1.bf16.msra.mxu1 %v15330_v42  ;;  %5810 = vmatprep.subr.bf16.mxu0 %v15331_v60  ;;  %v15386_v42 = vld [vmem:[#allocation255_spill] sm:$0xff]  ;;  %v15387_v60 = vld [vmem:[#allocation256_spill] sm:$0xff] }
 0x47b   :  { %5896 = vmatprep.subr.bf16.mxu1 %v15332_v22  ;;  %v15388_v22 = vld [vmem:[#allocation257_spill] sm:$0xff] }
 0x47d   :  { %5811 = vmatpush1.bf16.msra.mxu0 %v15333_v27  ;;  %v15389_v27 = vld [vmem:[#allocation258_spill] sm:$0xff] }
 0x47e   :  { %5897 = vmatpush1.bf16.msra.mxu1 %v15334_v37  ;;  %5812 = vmatprep.subr.bf16.mxu0 %v15335_v1  ;;  %v15390_v37 = vld [vmem:[#allocation259_spill] sm:$0xff]  ;;  %v15391_v1 = vld [vmem:[#allocation260_spill] sm:$0xff] }
 0x47f   :  { %5898 = vmatprep.subr.bf16.mxu1 %v15336_v33  ;;  %v15392_v33 = vld [vmem:[#allocation261_spill] sm:$0xff] }
 0x481   :  { %5813 = vmatpush1.bf16.msra.mxu0 %v15337_v62  ;;  %v15393_v62 = vld [vmem:[#allocation262_spill] sm:$0xff] }
 0x482   :  { %5899 = vmatpush1.bf16.msra.mxu1 %v15338_v17  ;;  %5814 = vmatprep.subr.bf16.mxu0 %v15339_v46  ;;  %v15394_v17 = vld [vmem:[#allocation263_spill] sm:$0xff]  ;;  %v15395_v46 = vld [vmem:[#allocation264_spill] sm:$0xff] }
 0x483   :  { %5900 = vmatprep.subr.bf16.mxu1 %v15340_v47  ;;  %v15396_v47 = vld [vmem:[#allocation265_spill] sm:$0xff] }
 0x485   :  { %5815 = vmatpush1.bf16.msra.mxu0 %v15341_v49  ;;  %v15397_v49 = vld [vmem:[#allocation266_spill] sm:$0xff] }
 0x486   :  { %5901 = vmatpush1.bf16.msra.mxu1 %v15342_v38  ;;  %5816 = vmatprep.subr.bf16.mxu0 %v15343_v41  ;;  %v15398_v38 = vld [vmem:[#allocation267_spill] sm:$0xff]  ;;  %v15399_v41 = vld [vmem:[#allocation268_spill] sm:$0xff] }
 0x487   :  { %5902 = vmatprep.subr.bf16.mxu1 %v15344_v57  ;;  %v15400_v57 = vld [vmem:[#allocation269_spill] sm:$0xff] }
 0x489   :  { %5817 = vmatpush1.bf16.msra.mxu0 %v15345_v11  ;;  %v15401_v11 = vld [vmem:[#allocation270_spill] sm:$0xff] }
 0x48a   :  { %5903 = vmatpush1.bf16.msra.mxu1 %v15346_v50  ;;  %5818 = vmatprep.subr.bf16.mxu0 %v15347_v12  ;;  %v15402_v50 = vld [vmem:[#allocation271_spill] sm:$0xff]  ;;  %v15403_v12 = vld [vmem:[#allocation272_spill] sm:$0xff] }
 0x48b   :  { %5904 = vmatprep.subr.bf16.mxu1 %v15348_v31  ;;  %v15404_v31 = vld [vmem:[#allocation273_spill] sm:$0xff] }
 0x48d   :  { %5819 = vmatpush1.bf16.msra.mxu0 %v15349_v51  ;;  %v15405_v51 = vld [vmem:[#allocation274_spill] sm:$0xff] }
 0x48e   :  { %5905 = vmatpush1.bf16.msra.mxu1 %v15350_v48  ;;  %5820 = vmatprep.subr.bf16.mxu0 %v15351_v32  ;;  %v15406_v48 = vld [vmem:[#allocation275_spill] sm:$0xff]  ;;  %v15407_v32 = vld [vmem:[#allocation276_spill] sm:$0xff] }
 0x48f   :  { %5906 = vmatprep.subr.bf16.mxu1 %v15352_v54  ;;  %v15408_v54 = vld [vmem:[#allocation277_spill] sm:$0xff] }
 0x491   :  { %5821 = vmatpush1.bf16.msra.mxu0 %v15353_v19  ;;  %v15409_v19 = vld [vmem:[#allocation278_spill] sm:$0xff] }
 0x492   :  { %5907 = vmatpush1.bf16.msra.mxu1 %v15354_v16  ;;  %5822 = vmatprep.subr.bf16.mxu0 %v15355_v45  ;;  %v15410_v16 = vld [vmem:[#allocation279_spill] sm:$0xff]  ;;  %v15411_v45 = vld [vmem:[#allocation280_spill] sm:$0xff] }
 0x493   :  { %5908 = vmatprep.subr.bf16.mxu1 %v15356_v20  ;;  %v15412_v20 = vld [vmem:[#allocation281_spill] sm:$0xff] }
 0x495   :  { %5823 = vmatpush1.bf16.msra.mxu0 %v15357_v30  ;;  %v15413_v30 = vld [vmem:[#allocation282_spill] sm:$0xff] }
 0x496   :  { %5909 = vmatpush1.bf16.msra.mxu1 %v15358_v3  ;;  %5824 = vmatprep.subr.bf16.mxu0 %v15359_v43  ;;  %v15414_v3 = vld [vmem:[#allocation283_spill] sm:$0xff]  ;;  %v15415_v43 = vld [vmem:[#allocation284_spill] sm:$0xff] }
 0x497   :  { %5910 = vmatprep.subr.bf16.mxu1 %v15360_v44  ;;  %v15416_v44 = vld [vmem:[#allocation285_spill] sm:$0xff] }
 0x499   :  { %5825 = vmatpush1.bf16.msra.mxu0 %v15361_v55  ;;  %v15417_v55 = vld [vmem:[#allocation286_spill] sm:$0xff] }
 0x49a   :  { %5911 = vmatpush1.bf16.msra.mxu1 %v15362_v40  ;;  %5826 = vmatprep.subr.bf16.mxu0 %v15363_v13  ;;  %v15418_v40 = vld [vmem:[#allocation287_spill] sm:$0xff]  ;;  %v15419_v13 = vld [vmem:[#allocation288_spill] sm:$0xff] }
 0x49b   :  { %5912 = vmatprep.subr.bf16.mxu1 %v15364_v14  ;;  %v15420_v14 = vld [vmem:[#allocation289_spill] sm:$0xff] }
 0x49d   :  { %5827 = vmatpush1.bf16.msra.mxu0 %v15365_v26  ;;  %v15421_v26 = vld [vmem:[#allocation290_spill] sm:$0xff] }
 0x49e   :  { %5913 = vmatpush1.bf16.msra.mxu1 %v15366_v21  ;;  %5925 = vmatprep.subr.bf16.mxu0 %v15367_v29  ;;  %v15422_v21 = vld [vmem:[#allocation291_spill] sm:$0xff]  ;;  %v15423_v29 = vld [vmem:[#allocation292_spill] sm:$0xff] }
 0x49f   :  { %6011 = vmatprep.subr.bf16.mxu1 %v15368_v53  ;;  %v15424_v53 = vld [vmem:[#allocation293_spill] sm:$0xff] }
 0x4a0   :  { %5829 = vmatmul.mubr.bf16.vlgmr.msra.gmra.mrb[44].mxu0 %v12374_v25 }
 0x4a1   :  { %5915 = vmatmul.mubr.bf16.vlgmr.msra.gmra.mrb[44].mxu1 %v12374_v25  ;;  %5926 = vmatpush1.bf16.msra.mxu0 %v15369_v36  ;;  %v15425_v36 = vld [vmem:[#allocation294_spill] sm:$0xff] }
 0x4a2   :  { %5957 = vmatprep.mubr.bf16.mxu0 %v15370_v56  ;;  %6012 = vmatpush1.bf16.msra.mxu1 %v15371_v7  ;;  %v15426_v7 = vld [vmem:[#allocation295_spill] sm:$0xff] }
 0x4a3   :  { %6043 = vmatprep.mubr.bf16.mxu1 %v15370_v56  ;;  %5927 = vmatprep.subr.bf16.mxu0 %v15372_v61  ;;  %v15427_v61 = vld [vmem:[#allocation296_spill] sm:$0xff] }
 0x4a4   :  { %6013 = vmatprep.subr.bf16.mxu1 %v15373_v28  ;;  %v15428_v28 = vld [vmem:[#allocation297_spill] sm:$0xff] }
 0x4a5   :  { %5928 = vmatpush1.bf16.msra.mxu0 %v15374_v35  ;;  %v15429_v35 = vld [vmem:[#allocation298_spill] sm:$0xff] }
 0x4a6   :  { %6014 = vmatpush1.bf16.msra.mxu1 %v15375_v4  ;;  %5929 = vmatprep.subr.bf16.mxu0 %v15376_v63  ;;  %v15430_v4 = vld [vmem:[#allocation299_spill] sm:$0xff]  ;;  %v15431_v63 = vld [vmem:[#allocation300_spill] sm:$0xff] }
 0x4a7   :  { %6015 = vmatprep.subr.bf16.mxu1 %v15377_v9  ;;  %v15432_v9 = vld [vmem:[#allocation301_spill] sm:$0xff] }
 0x4a9   :  { %5930 = vmatpush1.bf16.msra.mxu0 %v15378_v24  ;;  %v15433_v24 = vld [vmem:[#allocation302_spill] sm:$0xff] }
 0x4aa   :  { %6016 = vmatpush1.bf16.msra.mxu1 %v15379_v52  ;;  %5931 = vmatprep.subr.bf16.mxu0 %v15380_v8  ;;  %v15434_v52 = vld [vmem:[#allocation82_spill] sm:$0xff]  ;;  %v15435_v8 = vld [vmem:[#allocation303_spill] sm:$0xff] }
 0x4ab   :  { %6017 = vmatprep.subr.bf16.mxu1 %v15381_v39  ;;  %v15436_v39 = vld [vmem:[#allocation83_spill] sm:$0xff] }
 0x4ad   :  { %5932 = vmatpush1.bf16.msra.mxu0 %v15382_v0  ;;  %v15437_v0 = vld [vmem:[#allocation304_spill] sm:$0xff] }
 0x4ae   :  { %6018 = vmatpush1.bf16.msra.mxu1 %v15383_v10  ;;  %5933 = vmatprep.subr.bf16.mxu0 %v15384_v18  ;;  %v15438_v10 = vld [vmem:[#allocation305_spill] sm:$0xff]  ;;  %v15439_v18 = vld [vmem:[#allocation306_spill] sm:$0xff] }
 0x4af   :  { %6019 = vmatprep.subr.bf16.mxu1 %v15385_v15  ;;  %v15440_v15 = vld [vmem:[#allocation307_spill] sm:$0xff] }
 0x4b1   :  { %5934 = vmatpush1.bf16.msra.mxu0 %v15386_v42  ;;  %v15441_v42 = vld [vmem:[#allocation308_spill] sm:$0xff] }
 0x4b2   :  { %6020 = vmatpush1.bf16.msra.mxu1 %v15387_v60  ;;  %5935 = vmatprep.subr.bf16.mxu0 %v15388_v22  ;;  %v15442_v60 = vld [vmem:[#allocation309_spill] sm:$0xff]  ;;  %v15443_v22 = vld [vmem:[#allocation310_spill] sm:$0xff] }
 0x4b3   :  { %6021 = vmatprep.subr.bf16.mxu1 %v15389_v27  ;;  %v15444_v27 = vld [vmem:[#allocation311_spill] sm:$0xff] }
 0x4b5   :  { %5936 = vmatpush1.bf16.msra.mxu0 %v15390_v37  ;;  %v15445_v37 = vld [vmem:[#allocation312_spill] sm:$0xff] }
 0x4b6   :  { %6022 = vmatpush1.bf16.msra.mxu1 %v15391_v1  ;;  %5937 = vmatprep.subr.bf16.mxu0 %v15392_v33  ;;  %v15446_v1 = vld [vmem:[#allocation313_spill] sm:$0xff]  ;;  %v15447_v33 = vld [vmem:[#allocation314_spill] sm:$0xff] }
 0x4b7   :  { %6023 = vmatprep.subr.bf16.mxu1 %v15393_v62  ;;  %v15448_v62 = vld [vmem:[#allocation315_spill] sm:$0xff] }
 0x4b9   :  { %5938 = vmatpush1.bf16.msra.mxu0 %v15394_v17  ;;  %v15449_v17 = vld [vmem:[#allocation316_spill] sm:$0xff] }
 0x4ba   :  { %6024 = vmatpush1.bf16.msra.mxu1 %v15395_v46  ;;  %5939 = vmatprep.subr.bf16.mxu0 %v15396_v47  ;;  %v15450_v46 = vld [vmem:[#allocation317_spill] sm:$0xff]  ;;  %v15451_v47 = vld [vmem:[#allocation318_spill] sm:$0xff] }
 0x4bb   :  { %6025 = vmatprep.subr.bf16.mxu1 %v15397_v49  ;;  %v15452_v49 = vld [vmem:[#allocation319_spill] sm:$0xff] }
 0x4bd   :  { %5940 = vmatpush1.bf16.msra.mxu0 %v15398_v38  ;;  %v15453_v38 = vld [vmem:[#allocation320_spill] sm:$0xff] }
 0x4be   :  { %6026 = vmatpush1.bf16.msra.mxu1 %v15399_v41  ;;  %5941 = vmatprep.subr.bf16.mxu0 %v15400_v57  ;;  %v15454_v41 = vld [vmem:[#allocation321_spill] sm:$0xff]  ;;  %v15455_v57 = vld [vmem:[#allocation322_spill] sm:$0xff] }
 0x4bf   :  { %6027 = vmatprep.subr.bf16.mxu1 %v15401_v11  ;;  %v15456_v11 = vld [vmem:[#allocation323_spill] sm:$0xff] }
 0x4c1   :  { %5942 = vmatpush1.bf16.msra.mxu0 %v15402_v50  ;;  %v15457_v50 = vld [vmem:[#allocation324_spill] sm:$0xff] }
 0x4c2   :  { %6028 = vmatpush1.bf16.msra.mxu1 %v15403_v12  ;;  %5943 = vmatprep.subr.bf16.mxu0 %v15404_v31  ;;  %v15458_v12 = vld [vmem:[#allocation325_spill] sm:$0xff]  ;;  %v15459_v31 = vld [vmem:[#allocation326_spill] sm:$0xff] }
 0x4c3   :  { %6029 = vmatprep.subr.bf16.mxu1 %v15405_v51  ;;  %v15460_v51 = vld [vmem:[#allocation327_spill] sm:$0xff] }
 0x4c5   :  { %5944 = vmatpush1.bf16.msra.mxu0 %v15406_v48  ;;  %v15461_v48 = vld [vmem:[#allocation328_spill] sm:$0xff] }
 0x4c6   :  { %6030 = vmatpush1.bf16.msra.mxu1 %v15407_v32  ;;  %5945 = vmatprep.subr.bf16.mxu0 %v15408_v54  ;;  %v15462_v32 = vld [vmem:[#allocation329_spill] sm:$0xff]  ;;  %v15463_v54 = vld [vmem:[#allocation330_spill] sm:$0xff] }
 0x4c7   :  { %6031 = vmatprep.subr.bf16.mxu1 %v15409_v19  ;;  %v15464_v19 = vld [vmem:[#allocation331_spill] sm:$0xff] }
 0x4c9   :  { %5946 = vmatpush1.bf16.msra.mxu0 %v15410_v16  ;;  %v15465_v16 = vld [vmem:[#allocation332_spill] sm:$0xff] }
 0x4ca   :  { %6032 = vmatpush1.bf16.msra.mxu1 %v15411_v45  ;;  %5947 = vmatprep.subr.bf16.mxu0 %v15412_v20  ;;  %v15466_v45 = vld [vmem:[#allocation333_spill] sm:$0xff]  ;;  %v15467_v20 = vld [vmem:[#allocation334_spill] sm:$0xff] }
 0x4cb   :  { %6033 = vmatprep.subr.bf16.mxu1 %v15413_v30  ;;  %v15468_v30 = vld [vmem:[#allocation335_spill] sm:$0xff] }
 0x4cd   :  { %5948 = vmatpush1.bf16.msra.mxu0 %v15414_v3  ;;  %v15469_v3 = vld [vmem:[#allocation336_spill] sm:$0xff] }
 0x4ce   :  { %6034 = vmatpush1.bf16.msra.mxu1 %v15415_v43  ;;  %5949 = vmatprep.subr.bf16.mxu0 %v15416_v44  ;;  %v15470_v43 = vld [vmem:[#allocation337_spill] sm:$0xff]  ;;  %v15471_v44 = vld [vmem:[#allocation338_spill] sm:$0xff] }
 0x4cf   :  { %6035 = vmatprep.subr.bf16.mxu1 %v15417_v55  ;;  %v15472_v55 = vld [vmem:[#allocation339_spill] sm:$0xff] }
 0x4d1   :  { %5950 = vmatpush1.bf16.msra.mxu0 %v15418_v40  ;;  %v15473_v40 = vld [vmem:[#allocation340_spill] sm:$0xff] }
 0x4d2   :  { %6036 = vmatpush1.bf16.msra.mxu1 %v15419_v13  ;;  %5951 = vmatprep.subr.bf16.mxu0 %v15420_v14  ;;  %v15474_v13 = vld [vmem:[#allocation341_spill] sm:$0xff]  ;;  %v15475_v14 = vld [vmem:[#allocation342_spill] sm:$0xff] }
 0x4d3   :  { %6037 = vmatprep.subr.bf16.mxu1 %v15421_v26  ;;  %v15476_v26 = vld [vmem:[#allocation343_spill] sm:$0xff] }
 0x4d5   :  { %5952 = vmatpush1.bf16.msra.mxu0 %v15422_v21  ;;  %v15477_v21 = vld [vmem:[#allocation344_spill] sm:$0xff] }
 0x4d6   :  { %6038 = vmatpush1.bf16.msra.mxu1 %v15423_v29  ;;  %5953 = vmatprep.subr.bf16.mxu0 %v15424_v53  ;;  %v15478_v29 = vld [vmem:[#allocation345_spill] sm:$0xff]  ;;  %v15479_v53 = vld [vmem:[#allocation346_spill] sm:$0xff] }
 0x4d7   :  { %6039 = vmatprep.subr.bf16.mxu1 %v15425_v36  ;;  %v15480_v36 = vld [vmem:[#allocation347_spill] sm:$0xff] }
 0x4d9   :  { %5954 = vmatpush1.bf16.msra.mxu0 %v15426_v7  ;;  %v15481_v7 = vld [vmem:[#allocation348_spill] sm:$0xff] }
 0x4da   :  { %6040 = vmatpush1.bf16.msra.mxu1 %v15427_v61  ;;  %5955 = vmatprep.subr.bf16.mxu0 %v15428_v28  ;;  %v15482_v61 = vld [vmem:[#allocation349_spill] sm:$0xff]  ;;  %v15483_v28 = vld [vmem:[#allocation350_spill] sm:$0xff] }
 0x4db   :  { %6041 = vmatprep.subr.bf16.mxu1 %v15429_v35  ;;  %v15484_v35 = vld [vmem:[#allocation351_spill] sm:$0xff] }
 0x4dd   :  { %5956 = vmatpush1.bf16.msra.mxu0 %v15430_v4  ;;  %v15485_v4 = vld [vmem:[#allocation352_spill] sm:$0xff] }
 0x4de   :  { %6042 = vmatpush1.bf16.msra.mxu1 %v15431_v63  ;;  %5968 = vmatprep.subr.bf16.mxu0 %v15432_v9  ;;  %v15486_v63 = vld [vmem:[#allocation353_spill] sm:$0xff]  ;;  %v15487_v9 = vld [vmem:[#allocation354_spill] sm:$0xff] }
 0x4df   :  { %6054 = vmatprep.subr.bf16.mxu1 %v15433_v24  ;;  %v15488_v24 = vld [vmem:[#allocation355_spill] sm:$0xff] }
 0x4e0   :  { %5958 = vmatmul.mubr.bf16.vlgmr.msra.gmra.mrb[40].mxu0 %v15434_v52 }
 0x4e1   :  { %6044 = vmatmul.mubr.bf16.vlgmr.msra.gmra.mrb[40].mxu1 %v15434_v52  ;;  %5969 = vmatpush1.bf16.msra.mxu0 %v15435_v8  ;;  %v15489_v8 = vld [vmem:[#allocation356_spill] sm:$0xff] }
 0x4e2   :  { %6000 = vmatprep.mubr.bf16.mxu0 %v15436_v39  ;;  %6055 = vmatpush1.bf16.msra.mxu1 %v15437_v0  ;;  %v15490_v0 = vld [vmem:[#allocation357_spill] sm:$0xff] }
 0x4e3   :  { %6086 = vmatprep.mubr.bf16.mxu1 %v15436_v39  ;;  %5970 = vmatprep.subr.bf16.mxu0 %v15438_v10  ;;  %v15491_v10 = vld [vmem:[#allocation358_spill] sm:$0xff] }
 0x4e4   :  { %6056 = vmatprep.subr.bf16.mxu1 %v15439_v18  ;;  %v15492_v18 = vld [vmem:[#allocation359_spill] sm:$0xff] }
 0x4e5   :  { %5971 = vmatpush1.bf16.msra.mxu0 %v15440_v15  ;;  %v15493_v15 = vld [vmem:[#allocation360_spill] sm:$0xff] }
 0x4e6   :  { %6057 = vmatpush1.bf16.msra.mxu1 %v15441_v42  ;;  %5972 = vmatprep.subr.bf16.mxu0 %v15442_v60  ;;  %v15494_v42 = vld [vmem:[#allocation361_spill] sm:$0xff]  ;;  %v15495_v60 = vld [vmem:[#allocation362_spill] sm:$0xff] }
 0x4e7   :  { %6058 = vmatprep.subr.bf16.mxu1 %v15443_v22  ;;  %v15496_v22 = vld [vmem:[#allocation363_spill] sm:$0xff] }
 0x4e9   :  { %5973 = vmatpush1.bf16.msra.mxu0 %v15444_v27  ;;  %v15497_v27 = vld [vmem:[#allocation364_spill] sm:$0xff] }
 0x4ea   :  { %6059 = vmatpush1.bf16.msra.mxu1 %v15445_v37  ;;  %5974 = vmatprep.subr.bf16.mxu0 %v15446_v1  ;;  %v15498_v37 = vld [vmem:[#allocation365_spill] sm:$0xff]  ;;  %v15499_v1 = vld [vmem:[#allocation366_spill] sm:$0xff] }
 0x4eb   :  { %6060 = vmatprep.subr.bf16.mxu1 %v15447_v33  ;;  %v15500_v33 = vld [vmem:[#allocation84_spill] sm:$0xff] }
 0x4ed   :  { %5975 = vmatpush1.bf16.msra.mxu0 %v15448_v62  ;;  %v15501_v62 = vld [vmem:[#allocation367_spill] sm:$0xff] }
 0x4ee   :  { %6061 = vmatpush1.bf16.msra.mxu1 %v15449_v17  ;;  %5976 = vmatprep.subr.bf16.mxu0 %v15450_v46  ;;  %v15502_v17 = vld [vmem:[#allocation368_spill] sm:$0xff]  ;;  %v15503_v46 = vld [vmem:[#allocation369_spill] sm:$0xff] }
 0x4ef   :  { %6062 = vmatprep.subr.bf16.mxu1 %v15451_v47  ;;  %v15504_v47 = vld [vmem:[#allocation370_spill] sm:$0xff] }
 0x4f1   :  { %5977 = vmatpush1.bf16.msra.mxu0 %v15452_v49  ;;  %v15505_v49 = vld [vmem:[#allocation371_spill] sm:$0xff] }
 0x4f2   :  { %6063 = vmatpush1.bf16.msra.mxu1 %v15453_v38  ;;  %5978 = vmatprep.subr.bf16.mxu0 %v15454_v41  ;;  %v15506_v38 = vld [vmem:[#allocation372_spill] sm:$0xff]  ;;  %v15507_v41 = vld [vmem:[#allocation373_spill] sm:$0xff] }
 0x4f3   :  { %6064 = vmatprep.subr.bf16.mxu1 %v15455_v57  ;;  %v15508_v57 = vld [vmem:[#allocation374_spill] sm:$0xff] }
 0x4f5   :  { %5979 = vmatpush1.bf16.msra.mxu0 %v15456_v11  ;;  %v15509_v11 = vld [vmem:[#allocation375_spill] sm:$0xff] }
 0x4f6   :  { %6065 = vmatpush1.bf16.msra.mxu1 %v15457_v50  ;;  %5980 = vmatprep.subr.bf16.mxu0 %v15458_v12  ;;  %v15510_v50 = vld [vmem:[#allocation376_spill] sm:$0xff]  ;;  %v15511_v12 = vld [vmem:[#allocation377_spill] sm:$0xff] }
 0x4f7   :  { %6066 = vmatprep.subr.bf16.mxu1 %v15459_v31  ;;  %v15512_v31 = vld [vmem:[#allocation378_spill] sm:$0xff] }
 0x4f9   :  { %5981 = vmatpush1.bf16.msra.mxu0 %v15460_v51  ;;  %v15514_v51 = vld [vmem:[#allocation380_spill] sm:$0xff] }
 0x4fa   :  { %6067 = vmatpush1.bf16.msra.mxu1 %v15461_v48  ;;  %5982 = vmatprep.subr.bf16.mxu0 %v15462_v32  ;;  %v15515_v48 = vld [vmem:[#allocation381_spill] sm:$0xff]  ;;  %v15516_v32 = vld [vmem:[#allocation382_spill] sm:$0xff] }
 0x4fb   :  { %6068 = vmatprep.subr.bf16.mxu1 %v15463_v54  ;;  %v15517_v54 = vld [vmem:[#allocation383_spill] sm:$0xff] }
 0x4fd   :  { %5983 = vmatpush1.bf16.msra.mxu0 %v15464_v19  ;;  %v15518_v19 = vld [vmem:[#allocation384_spill] sm:$0xff] }
 0x4fe   :  { %6069 = vmatpush1.bf16.msra.mxu1 %v15465_v16  ;;  %5984 = vmatprep.subr.bf16.mxu0 %v15466_v45  ;;  %v15519_v16 = vld [vmem:[#allocation385_spill] sm:$0xff]  ;;  %v15520_v45 = vld [vmem:[#allocation386_spill] sm:$0xff] }
 0x4ff   :  { %6070 = vmatprep.subr.bf16.mxu1 %v15467_v20  ;;  %v15521_v20 = vld [vmem:[#allocation387_spill] sm:$0xff] }
 0x501   :  { %5985 = vmatpush1.bf16.msra.mxu0 %v15468_v30  ;;  %v15522_v30 = vld [vmem:[#allocation388_spill] sm:$0xff] }
 0x502   :  { %6071 = vmatpush1.bf16.msra.mxu1 %v15469_v3  ;;  %5986 = vmatprep.subr.bf16.mxu0 %v15470_v43  ;;  %v15523_v3 = vld [vmem:[#allocation389_spill] sm:$0xff]  ;;  %v15524_v43 = vld [vmem:[#allocation390_spill] sm:$0xff] }
 0x503   :  { %6072 = vmatprep.subr.bf16.mxu1 %v15471_v44  ;;  %v15525_v44 = vld [vmem:[#allocation391_spill] sm:$0xff] }
 0x505   :  { %5987 = vmatpush1.bf16.msra.mxu0 %v15472_v55  ;;  %v15526_v55 = vld [vmem:[#allocation392_spill] sm:$0xff] }
 0x506   :  { %6073 = vmatpush1.bf16.msra.mxu1 %v15473_v40  ;;  %5988 = vmatprep.subr.bf16.mxu0 %v15474_v13  ;;  %v15527_v40 = vld [vmem:[#allocation393_spill] sm:$0xff]  ;;  %v15528_v13 = vld [vmem:[#allocation394_spill] sm:$0xff] }
 0x507   :  { %6074 = vmatprep.subr.bf16.mxu1 %v15475_v14  ;;  %v15529_v14 = vld [vmem:[#allocation395_spill] sm:$0xff] }
 0x509   :  { %5989 = vmatpush1.bf16.msra.mxu0 %v15476_v26  ;;  %v15530_v26 = vld [vmem:[#allocation396_spill] sm:$0xff] }
 0x50a   :  { %6075 = vmatpush1.bf16.msra.mxu1 %v15477_v21  ;;  %5990 = vmatprep.subr.bf16.mxu0 %v15478_v29  ;;  %v15531_v21 = vld [vmem:[#allocation397_spill] sm:$0xff]  ;;  %v15532_v29 = vld [vmem:[#allocation398_spill] sm:$0xff] }
 0x50b   :  { %6076 = vmatprep.subr.bf16.mxu1 %v15479_v53  ;;  %v15533_v53 = vld [vmem:[#allocation399_spill] sm:$0xff] }
 0x50d   :  { %5991 = vmatpush1.bf16.msra.mxu0 %v15480_v36  ;;  %v15534_v36 = vld [vmem:[#allocation400_spill] sm:$0xff] }
 0x50e   :  { %6077 = vmatpush1.bf16.msra.mxu1 %v15481_v7  ;;  %5992 = vmatprep.subr.bf16.mxu0 %v15482_v61  ;;  %v15535_v7 = vld [vmem:[#allocation401_spill] sm:$0xff]  ;;  %v15536_v61 = vld [vmem:[#allocation402_spill] sm:$0xff] }
 0x50f   :  { %6078 = vmatprep.subr.bf16.mxu1 %v15483_v28  ;;  %v15537_v28 = vld [vmem:[#allocation403_spill] sm:$0xff] }
 0x511   :  { %5993 = vmatpush1.bf16.msra.mxu0 %v15484_v35  ;;  %v15538_v35 = vld [vmem:[#allocation404_spill] sm:$0xff] }
 0x512   :  { %6079 = vmatpush1.bf16.msra.mxu1 %v15485_v4  ;;  %5994 = vmatprep.subr.bf16.mxu0 %v15486_v63  ;;  %v15539_v4 = vld [vmem:[#allocation405_spill] sm:$0xff]  ;;  %v15540_v63 = vld [vmem:[#allocation406_spill] sm:$0xff] }
 0x513   :  { %6080 = vmatprep.subr.bf16.mxu1 %v15487_v9  ;;  %v15541_v9 = vld [vmem:[#allocation407_spill] sm:$0xff] }
 0x515   :  { %5995 = vmatpush1.bf16.msra.mxu0 %v15488_v24  ;;  %v15542_v24 = vld [vmem:[#allocation408_spill] sm:$0xff] }
 0x516   :  { %6081 = vmatpush1.bf16.msra.mxu1 %v15489_v8  ;;  %5996 = vmatprep.subr.bf16.mxu0 %v15490_v0  ;;  %v15543_v8 = vld [vmem:[#allocation409_spill] sm:$0xff]  ;;  %v15544_v0 = vld [vmem:[#allocation410_spill] sm:$0xff] }
 0x517   :  { %6082 = vmatprep.subr.bf16.mxu1 %v15491_v10  ;;  %v15545_v10 = vld [vmem:[#allocation411_spill] sm:$0xff] }
 0x519   :  { %5997 = vmatpush1.bf16.msra.mxu0 %v15492_v18  ;;  %v15546_v18 = vld [vmem:[#allocation412_spill] sm:$0xff] }
 0x51a   :  { %6083 = vmatpush1.bf16.msra.mxu1 %v15493_v15  ;;  %5998 = vmatprep.subr.bf16.mxu0 %v15494_v42  ;;  %v15547_v15 = vld [vmem:[#allocation413_spill] sm:$0xff]  ;;  %v15548_v42 = vld [vmem:[#allocation414_spill] sm:$0xff] }
 0x51b   :  { %6084 = vmatprep.subr.bf16.mxu1 %v15495_v60  ;;  %v15549_v60 = vld [vmem:[#allocation415_spill] sm:$0xff] }
 0x51d   :  { %5999 = vmatpush1.bf16.msra.mxu0 %v15496_v22  ;;  %v15550_v22 = vld [vmem:[#allocation416_spill] sm:$0xff] }
 0x51e   :  { %6085 = vmatpush1.bf16.msra.mxu1 %v15497_v27  ;;  %6097 = vmatprep.subr.bf16.mxu0 %v15498_v37  ;;  %v15551_v27 = vld [vmem:[#allocation417_spill] sm:$0xff]  ;;  %v15552_v37 = vld [vmem:[#allocation418_spill] sm:$0xff] }
 0x51f   :  { %6183 = vmatprep.subr.bf16.mxu1 %v15499_v1  ;;  %v15553_v1 = vld [vmem:[#allocation419_spill] sm:$0xff] }
 0x520   :  { %6001 = vmatmul.mubr.bf16.vlgmr.msra.gmra.mrb[40].mxu0 %v15500_v33 }
 0x521   :  { %6087 = vmatmul.mubr.bf16.vlgmr.msra.gmra.mrb[40].mxu1 %v15500_v33  ;;  %6098 = vmatpush1.bf16.msra.mxu0 %v15501_v62  ;;  %v15554_v62 = vld [vmem:[#allocation420_spill] sm:$0xff] }
 0x522   :  { %6129 = vmatprep.mubr.bf16.mxu0 %v15370_v56  ;;  %6184 = vmatpush1.bf16.msra.mxu1 %v15502_v17  ;;  %v15555_v17 = vld [vmem:[#allocation421_spill] sm:$0xff] }
 0x523   :  { %6215 = vmatprep.mubr.bf16.mxu1 %v15370_v56  ;;  %6099 = vmatprep.subr.bf16.mxu0 %v15503_v46  ;;  %v15513_v56 = vld [vmem:[#allocation379_spill] sm:$0xff]  ;;  %v15556_v46 = vld [vmem:[#allocation422_spill] sm:$0xff] }
 0x524   :  { %6185 = vmatprep.subr.bf16.mxu1 %v15504_v47  ;;  %v15557_v47 = vld [vmem:[#allocation423_spill] sm:$0xff] }
 0x525   :  { %6100 = vmatpush1.bf16.msra.mxu0 %v15505_v49  ;;  %v15558_v49 = vld [vmem:[#allocation424_spill] sm:$0xff] }
 0x526   :  { %6186 = vmatpush1.bf16.msra.mxu1 %v15506_v38  ;;  %6101 = vmatprep.subr.bf16.mxu0 %v15507_v41  ;;  %v15559_v38 = vld [vmem:[#allocation425_spill] sm:$0xff]  ;;  %v15560_v41 = vld [vmem:[#allocation426_spill] sm:$0xff] }
 0x527   :  { %6187 = vmatprep.subr.bf16.mxu1 %v15508_v57  ;;  %v15561_v57 = vld [vmem:[#allocation427_spill] sm:$0xff] }
 0x529   :  { %6102 = vmatpush1.bf16.msra.mxu0 %v15509_v11  ;;  %v15562_v11 = vld [vmem:[#allocation428_spill] sm:$0xff] }
 0x52a   :  { %6188 = vmatpush1.bf16.msra.mxu1 %v15510_v50  ;;  %6103 = vmatprep.subr.bf16.mxu0 %v15511_v12  ;;  %v15563_v50 = vld [vmem:[#allocation429_spill] sm:$0xff]  ;;  %v15564_v12 = vld [vmem:[#allocation430_spill] sm:$0xff] }
 0x52b   :  { %6189 = vmatprep.subr.bf16.mxu1 %v15512_v31  ;;  %v15565_v31 = vld [vmem:[#allocation431_spill] sm:$0xff] }
 0x52d   :  { %6104 = vmatpush1.bf16.msra.mxu0 %v15513_v56  ;;  %v15566_v56 = vld [vmem:[#allocation432_spill] sm:$0xff] }
 0x52e   :  { %6190 = vmatpush1.bf16.msra.mxu1 %v15514_v51  ;;  %6105 = vmatprep.subr.bf16.mxu0 %v15515_v48  ;;  %v15567_v51 = vld [vmem:[#allocation433_spill] sm:$0xff]  ;;  %v15568_v48 = vld [vmem:[#allocation434_spill] sm:$0xff] }
 0x52f   :  { %6191 = vmatprep.subr.bf16.mxu1 %v15516_v32  ;;  %v15569_v32 = vld [vmem:[#allocation435_spill] sm:$0xff] }
 0x531   :  { %6106 = vmatpush1.bf16.msra.mxu0 %v15517_v54  ;;  %v15570_v54 = vld [vmem:[#allocation436_spill] sm:$0xff] }
 0x532   :  { %6192 = vmatpush1.bf16.msra.mxu1 %v15518_v19  ;;  %6107 = vmatprep.subr.bf16.mxu0 %v15519_v16  ;;  %v15571_v19 = vld [vmem:[#allocation437_spill] sm:$0xff]  ;;  %v15572_v16 = vld [vmem:[#allocation438_spill] sm:$0xff] }
 0x533   :  { %6193 = vmatprep.subr.bf16.mxu1 %v15520_v45  ;;  %v15574_v45 = vld [vmem:[#allocation440_spill] sm:$0xff] }
 0x535   :  { %6108 = vmatpush1.bf16.msra.mxu0 %v15521_v20  ;;  %v15575_v20 = vld [vmem:[#allocation441_spill] sm:$0xff] }
 0x536   :  { %6194 = vmatpush1.bf16.msra.mxu1 %v15522_v30  ;;  %6109 = vmatprep.subr.bf16.mxu0 %v15523_v3  ;;  %v15576_v30 = vld [vmem:[#allocation442_spill] sm:$0xff]  ;;  %v15578_v3 = vld [vmem:[#allocation444_spill] sm:$0xff] }
 0x537   :  { %6195 = vmatprep.subr.bf16.mxu1 %v15524_v43  ;;  %v15579_v43 = vld [vmem:[#allocation445_spill] sm:$0xff] }
 0x539   :  { %6110 = vmatpush1.bf16.msra.mxu0 %v15525_v44  ;;  %v15580_v44 = vld [vmem:[#allocation446_spill] sm:$0xff] }
 0x53a   :  { %6196 = vmatpush1.bf16.msra.mxu1 %v15526_v55  ;;  %6111 = vmatprep.subr.bf16.mxu0 %v15527_v40  ;;  %v15581_v55 = vld [vmem:[#allocation447_spill] sm:$0xff]  ;;  %v15582_v40 = vld [vmem:[#allocation448_spill] sm:$0xff] }
 0x53b   :  { %6197 = vmatprep.subr.bf16.mxu1 %v15528_v13  ;;  %v15583_v13 = vld [vmem:[#allocation449_spill] sm:$0xff] }
 0x53d   :  { %6112 = vmatpush1.bf16.msra.mxu0 %v15529_v14  ;;  %v15584_v14 = vld [vmem:[#allocation450_spill] sm:$0xff] }
 0x53e   :  { %6198 = vmatpush1.bf16.msra.mxu1 %v15530_v26  ;;  %6113 = vmatprep.subr.bf16.mxu0 %v15531_v21  ;;  %v15585_v26 = vld [vmem:[#allocation451_spill] sm:$0xff]  ;;  %v15586_v21 = vld [vmem:[#allocation452_spill] sm:$0xff] }
 0x53f   :  { %6199 = vmatprep.subr.bf16.mxu1 %v15532_v29  ;;  %v15587_v29 = vld [vmem:[#allocation453_spill] sm:$0xff] }
 0x541   :  { %6114 = vmatpush1.bf16.msra.mxu0 %v15533_v53  ;;  %v15588_v53 = vld [vmem:[#allocation454_spill] sm:$0xff] }
 0x542   :  { %6200 = vmatpush1.bf16.msra.mxu1 %v15534_v36  ;;  %6115 = vmatprep.subr.bf16.mxu0 %v15535_v7  ;;  %v15589_v36 = vld [vmem:[#allocation455_spill] sm:$0xff]  ;;  %v15590_v7 = vld [vmem:[#allocation456_spill] sm:$0xff] }
 0x543   :  { %6201 = vmatprep.subr.bf16.mxu1 %v15536_v61  ;;  %v15591_v61 = vld [vmem:[#allocation457_spill] sm:$0xff] }
 0x545   :  { %6116 = vmatpush1.bf16.msra.mxu0 %v15537_v28  ;;  %v15592_v28 = vld [vmem:[#allocation458_spill] sm:$0xff] }
 0x546   :  { %6202 = vmatpush1.bf16.msra.mxu1 %v15538_v35  ;;  %6117 = vmatprep.subr.bf16.mxu0 %v15539_v4  ;;  %v15593_v35 = vld [vmem:[#allocation459_spill] sm:$0xff]  ;;  %v15594_v4 = vld [vmem:[#allocation460_spill] sm:$0xff] }
 0x547   :  { %6203 = vmatprep.subr.bf16.mxu1 %v15540_v63  ;;  %v15595_v63 = vld [vmem:[#allocation461_spill] sm:$0xff] }
 0x549   :  { %6118 = vmatpush1.bf16.msra.mxu0 %v15541_v9  ;;  %v15596_v9 = vld [vmem:[#allocation462_spill] sm:$0xff] }
 0x54a   :  { %6204 = vmatpush1.bf16.msra.mxu1 %v15542_v24  ;;  %6119 = vmatprep.subr.bf16.mxu0 %v15543_v8  ;;  %v15597_v24 = vld [vmem:[#allocation463_spill] sm:$0xff]  ;;  %v15598_v8 = vld [vmem:[#allocation464_spill] sm:$0xff] }
 0x54b   :  { %6205 = vmatprep.subr.bf16.mxu1 %v15544_v0  ;;  %v15599_v0 = vld [vmem:[#allocation465_spill] sm:$0xff] }
 0x54d   :  { %6120 = vmatpush1.bf16.msra.mxu0 %v15545_v10  ;;  %v15600_v10 = vld [vmem:[#allocation466_spill] sm:$0xff] }
 0x54e   :  { %6206 = vmatpush1.bf16.msra.mxu1 %v15546_v18  ;;  %6121 = vmatprep.subr.bf16.mxu0 %v15547_v15  ;;  %v15601_v18 = vld [vmem:[#allocation467_spill] sm:$0xff]  ;;  %v15602_v15 = vld [vmem:[#allocation468_spill] sm:$0xff] }
 0x54f   :  { %6207 = vmatprep.subr.bf16.mxu1 %v15548_v42  ;;  %v15603_v42 = vld [vmem:[#allocation469_spill] sm:$0xff] }
 0x551   :  { %6122 = vmatpush1.bf16.msra.mxu0 %v15549_v60  ;;  %v15604_v60 = vld [vmem:[#allocation470_spill] sm:$0xff] }
 0x552   :  { %6208 = vmatpush1.bf16.msra.mxu1 %v15550_v22  ;;  %6123 = vmatprep.subr.bf16.mxu0 %v15551_v27  ;;  %v15605_v22 = vld [vmem:[#allocation471_spill] sm:$0xff]  ;;  %v15606_v27 = vld [vmem:[#allocation472_spill] sm:$0xff] }
 0x553   :  { %6209 = vmatprep.subr.bf16.mxu1 %v15552_v37  ;;  %v15607_v37 = vld [vmem:[#allocation473_spill] sm:$0xff] }
 0x555   :  { %6124 = vmatpush1.bf16.msra.mxu0 %v15553_v1  ;;  %v15608_v1 = vld [vmem:[#allocation474_spill] sm:$0xff] }
 0x556   :  { %6210 = vmatpush1.bf16.msra.mxu1 %v15554_v62  ;;  %6125 = vmatprep.subr.bf16.mxu0 %v15555_v17  ;;  %v15609_v62 = vld [vmem:[#allocation475_spill] sm:$0xff]  ;;  %v15610_v17 = vld [vmem:[#allocation476_spill] sm:$0xff] }
 0x557   :  { %6211 = vmatprep.subr.bf16.mxu1 %v15556_v46  ;;  %v15611_v46 = vld [vmem:[#allocation477_spill] sm:$0xff] }
 0x559   :  { %6126 = vmatpush1.bf16.msra.mxu0 %v15557_v47  ;;  %v15612_v47 = vld [vmem:[#allocation478_spill] sm:$0xff] }
 0x55a   :  { %6212 = vmatpush1.bf16.msra.mxu1 %v15558_v49  ;;  %6127 = vmatprep.subr.bf16.mxu0 %v15559_v38  ;;  %v15613_v49 = vld [vmem:[#allocation479_spill] sm:$0xff]  ;;  %v15614_v38 = vld [vmem:[#allocation480_spill] sm:$0xff] }
 0x55b   :  { %6213 = vmatprep.subr.bf16.mxu1 %v15560_v41  ;;  %v15615_v41 = vld [vmem:[#allocation481_spill] sm:$0xff] }
 0x55d   :  { %6128 = vmatpush1.bf16.msra.mxu0 %v15561_v57  ;;  %v15616_v57 = vld [vmem:[#allocation482_spill] sm:$0xff] }
 0x55e   :  { %6214 = vmatpush1.bf16.msra.mxu1 %v15562_v11  ;;  %6140 = vmatprep.subr.bf16.mxu0 %v15563_v50  ;;  %v15617_v11 = vld [vmem:[#allocation483_spill] sm:$0xff]  ;;  %v6270_v50 = vld [vmem:[#allocation7 + $0x1000] sm:$0xff] }
 0x55f   :  { %6226 = vmatprep.subr.bf16.mxu1 %v15564_v12  ;;  %v6274_v12 = vld [vmem:[#allocation7 + $0x1020] sm:$0xff] }
 0x560   :  { %6130 = vmatmul.mubr.bf16.vlgmr.msra.gmra.mrb[44].mxu0 %v15434_v52 }
 0x561   :  { %6216 = vmatmul.mubr.bf16.vlgmr.msra.gmra.mrb[44].mxu1 %v15434_v52  ;;  %6141 = vmatpush1.bf16.msra.mxu0 %v15565_v31  ;;  %v15573_v52 = vld [vmem:[#allocation439_spill] sm:$0xff]  ;;  %v6271_v31 = vld [vmem:[#allocation7 + $0x1008] sm:$0xff] }
 0x562   :  { %6172 = vmatprep.mubr.bf16.mxu0 %v15436_v39  ;;  %6227 = vmatpush1.bf16.msra.mxu1 %v15566_v56  ;;  %v6275_v56 = vld [vmem:[#allocation7 + $0x1028] sm:$0xff] }
 0x563   :  { %6258 = vmatprep.mubr.bf16.mxu1 %v15436_v39  ;;  %6142 = vmatprep.subr.bf16.mxu0 %v15567_v51  ;;  %v15577_v39 = vld [vmem:[#allocation443_spill] sm:$0xff]  ;;  %v15618_v51 = vld [vmem:[#allocation484_spill] sm:$0xff] }
 0x564   :  { %6228 = vmatprep.subr.bf16.mxu1 %v15568_v48  ;;  %v15619_v48 = vld [vmem:[#allocation485_spill] sm:$0xff] }
 0x565   :  { %6143 = vmatpush1.bf16.msra.mxu0 %v15569_v32  ;;  %v15620_v32 = vld [vmem:[#allocation486_spill] sm:$0xff] }
 0x566   :  { %6229 = vmatpush1.bf16.msra.mxu1 %v15570_v54  ;;  %6144 = vmatprep.subr.bf16.mxu0 %v15571_v19  ;;  %v12781_v54 = vcombine.high %v6270_v50, %v6274_v12  ;;  %v15621_v19 = vld [vmem:[#allocation487_spill] sm:$0xff] }
 0x567   :  { %6230 = vmatprep.subr.bf16.mxu1 %v15572_v16  ;;  %v15622_v16 = vld [vmem:[#allocation488_spill] sm:$0xff] }
 0x569   :  { %6145 = vmatpush1.bf16.msra.mxu0 %v15573_v52  ;;  %v12787_v52 = vcombine.low %v6270_v50, %v6274_v12  ;;  %v6326_v12 = vld [vmem:[#allocation7 + $0x11c0] sm:$0xff] }
 0x56a   :  { %6231 = vmatpush1.bf16.msra.mxu1 %v15574_v45  ;;  %6146 = vmatprep.subr.bf16.mxu0 %v15575_v20  ;;  %v6279_v45 = vld [vmem:[#allocation7 + $0x1048] sm:$0xff] }
 0x56b   :  { %6232 = vmatprep.subr.bf16.mxu1 %v15576_v30  ;;  %v6283_v20 = vld [vmem:[#allocation7 + $0x1068] sm:$0xff] }
 0x56c   :  { %v15623_v30 = vld [vmem:[#allocation489_spill] sm:$0xff] }
 0x56d   :  { %6147 = vmatpush1.bf16.msra.mxu0 %v15577_v39  ;;  %v12791_v39 = vcombine.low %v6271_v31, %v6275_v56 }
 0x56e   :  { %6233 = vmatpush1.bf16.msra.mxu1 %v15578_v3  ;;  %6148 = vmatprep.subr.bf16.mxu0 %v15579_v43  ;;  %v6286_v43 = vld [vmem:[#allocation7 + $0x1080] sm:$0xff] }
 0x56f   :  { %6234 = vmatprep.subr.bf16.mxu1 %v15580_v44  ;;  %v6290_v44 = vld [vmem:[#allocation7 + $0x10a0] sm:$0xff] }
 0x571   :  { %6149 = vmatpush1.bf16.msra.mxu0 %v15581_v55  ;;  %v12797_v55 = vcombine.high %v6279_v45, %v6283_v20 }
 0x572   :  { %6235 = vmatpush1.bf16.msra.mxu1 %v15582_v40  ;;  %6150 = vmatprep.subr.bf16.mxu0 %v15583_v13  ;;  %v6287_v40 = vld [vmem:[#allocation7 + $0x1088] sm:$0xff] }
 0x573   :  { %6236 = vmatprep.subr.bf16.mxu1 %v15584_v14  ;;  %v6291_v13 = vld [vmem:[#allocation7 + $0x10a8] sm:$0xff] }
 0x575   :  { %6151 = vmatpush1.bf16.msra.mxu0 %v15585_v26  ;;  %v12805_v26 = vcombine.low %v6279_v45, %v6283_v20  ;;  %v6335_v45 = vld [vmem:[#allocation7 + $0x1208] sm:$0xff] }
 0x576   :  { %6237 = vmatpush1.bf16.msra.mxu1 %v15586_v21  ;;  %6152 = vmatprep.subr.bf16.mxu0 %v15587_v29  ;;  %v12807_v21 = vcombine.high %v6286_v43, %v6290_v44  ;;  %v12811_v29 = vcombine.high %v6287_v40, %v6291_v13  ;;  %v6339_v20 = vld [vmem:[#allocation7 + $0x1228] sm:$0xff] }
 0x577   :  { %6238 = vmatprep.subr.bf16.mxu1 %v15588_v53  ;;  %v6294_v53 = vld [vmem:[#allocation7 + $0x10c0] sm:$0xff] }
 0x579   :  { %6153 = vmatpush1.bf16.msra.mxu0 %v15589_v36  ;;  %v6295_v36 = vld [vmem:[#allocation7 + $0x10c8] sm:$0xff] }
 0x57a   :  { %6239 = vmatpush1.bf16.msra.mxu1 %v15590_v7  ;;  %6154 = vmatprep.subr.bf16.mxu0 %v15591_v61  ;;  %v6299_v7 = vld [vmem:[#allocation7 + $0x10e8] sm:$0xff]  ;;  %v12815_v61 = vcombine.low %v6286_v43, %v6290_v44 }
 0x57b   :  { %6240 = vmatprep.subr.bf16.mxu1 %v15592_v28  ;;  %v12819_v28 = vcombine.low %v6287_v40, %v6291_v13  ;;  %v12884_v40 = vcombine.high %v6335_v45, %v6339_v20  ;;  %v6342_v13 = vld [vmem:[#allocation7 + $0x1240] sm:$0xff] }
 0x57d   :  { %6155 = vmatpush1.bf16.msra.mxu0 %v15593_v35 }
 0x57e   :  { %6241 = vmatpush1.bf16.msra.mxu1 %v15594_v4  ;;  %6156 = vmatprep.subr.bf16.mxu0 %v15595_v63  ;;  %v12824_v4 = vcombine.high %v6295_v36, %v6299_v7  ;;  %v6302_v63 = vld [vmem:[#allocation7 + $0x1100] sm:$0xff] }
 0x57f   :  { %6242 = vmatprep.subr.bf16.mxu1 %v15596_v9  ;;  %v6306_v9 = vld [vmem:[#allocation7 + $0x1120] sm:$0xff] }
 0x581   :  { %6157 = vmatpush1.bf16.msra.mxu0 %v15597_v24  ;;  %v6303_v24 = vld [vmem:[#allocation7 + $0x1108] sm:$0xff] }
 0x582   :  { %6243 = vmatpush1.bf16.msra.mxu1 %v15598_v8  ;;  %6158 = vmatprep.subr.bf16.mxu0 %v15599_v0  ;;  %v6307_v8 = vld [vmem:[#allocation7 + $0x1128] sm:$0xff] }
 0x583   :  { %6244 = vmatprep.subr.bf16.mxu1 %v15600_v10  ;;  %v12831_v10 = vcombine.low %v6295_v36, %v6299_v7  ;;  %v6347_v36 = vld [vmem:[#allocation7 + $0x1268] sm:$0xff] }
 0x585   :  { %6159 = vmatpush1.bf16.msra.mxu0 %v15601_v18  ;;  %v12833_v18 = vcombine.high %v6302_v63, %v6306_v9 }
 0x586   :  { %6245 = vmatpush1.bf16.msra.mxu1 %v15602_v15  ;;  %6160 = vmatprep.subr.bf16.mxu0 %v15603_v42  ;;  %v12836_v15 = vcombine.high %v6303_v24, %v6307_v8  ;;  %v6310_v42 = vld [vmem:[#allocation7 + $0x1140] sm:$0xff] }
 0x587   :  { %6246 = vmatprep.subr.bf16.mxu1 %v15604_v60  ;;  %v6314_v60 = vld [vmem:[#allocation7 + $0x1160] sm:$0xff] }
 0x589   :  { %6161 = vmatpush1.bf16.msra.mxu0 %v15605_v22  ;;  %v6311_v22 = vld [vmem:[#allocation7 + $0x1148] sm:$0xff] }
 0x58a   :  { %6247 = vmatpush1.bf16.msra.mxu1 %v15606_v27  ;;  %6162 = vmatprep.subr.bf16.mxu0 %v15607_v37  ;;  %v6315_v27 = vld [vmem:[#allocation7 + $0x1168] sm:$0xff]  ;;  %v12839_v37 = vcombine.low %v6302_v63, %v6306_v9  ;;  %v12891_v63 = vcombine.low %v6335_v45, %v6339_v20  ;;  %v6366_v20 = vld [vmem:[#allocation7 + $0x1300] sm:$0xff] }
 0x58b   :  { %6248 = vmatprep.subr.bf16.mxu1 %v15608_v1  ;;  %v12843_v1 = vcombine.low %v6303_v24, %v6307_v8  ;;  %v6350_v8 = vld [vmem:[#allocation7 + $0x1280] sm:$0xff] }
 0x58d   :  { %6163 = vmatpush1.bf16.msra.mxu0 %v15609_v62  ;;  %v12845_v62 = vcombine.high %v6310_v42, %v6314_v60 }
 0x58e   :  { %6249 = vmatpush1.bf16.msra.mxu1 %v15610_v17  ;;  %6164 = vmatprep.subr.bf16.mxu0 %v15611_v46  ;;  %v12848_v17 = vcombine.high %v6311_v22, %v6315_v27  ;;  %v6318_v46 = vld [vmem:[#allocation7 + $0x1180] sm:$0xff] }
 0x58f   :  { %6250 = vmatprep.subr.bf16.mxu1 %v15612_v47  ;;  %v6322_v47 = vld [vmem:[#allocation7 + $0x11a0] sm:$0xff] }
 0x591   :  { %6165 = vmatpush1.bf16.msra.mxu0 %v15613_v49  ;;  %v6319_v49 = vld [vmem:[#allocation7 + $0x1188] sm:$0xff] }
 0x592   :  { %6251 = vmatpush1.bf16.msra.mxu1 %v15614_v38  ;;  %6166 = vmatprep.subr.bf16.mxu0 %v15615_v41  ;;  %v6323_v38 = vld [vmem:[#allocation7 + $0x11a8] sm:$0xff]  ;;  %v12851_v41 = vcombine.low %v6310_v42, %v6314_v60  ;;  %v6354_v42 = vld [vmem:[#allocation7 + $0x12a0] sm:$0xff] }
 0x593   :  { %6252 = vmatprep.subr.bf16.mxu1 %v15616_v57  ;;  %v12855_v57 = vcombine.low %v6311_v22, %v6315_v27  ;;  %v12860_v50 = vcombine.high %v6319_v49, %v6323_v38  ;;  %v6351_v60 = vld [vmem:[#allocation7 + $0x1288] sm:$0xff] }
 0x594   :  { %v6355_v22 = vld [vmem:[#allocation7 + $0x12a8] sm:$0xff] }
 0x595   :  { %6167 = vmatpush1.bf16.msra.mxu0 %v12175_v59  ;;  %v12784_v59 = vcombine.high %v6271_v31, %v6275_v56  ;;  %v6330_v31 = vld [vmem:[#allocation7 + $0x11e0] sm:$0xff]  ;;  %v6327_v56 = vld [vmem:[#allocation7 + $0x11c8] sm:$0xff] }
 0x596   :  { %6253 = vmatpush1.bf16.msra.mxu1 %v12179_v34  ;;  %6168 = vmatprep.subr.bf16.mxu0 %v12181_v58  ;;  %v6278_v34 = vld [vmem:[#allocation7 + $0x1040] sm:$0xff] }
 0x597   :  { %6254 = vmatprep.subr.bf16.mxu1 %v15617_v11  ;;  %v6282_v58 = vld [vmem:[#allocation7 + $0x1060] sm:$0xff]  ;;  %v12857_v11 = vcombine.high %v6318_v46, %v6322_v47 }
 0x598   :  { %v12794_v3 = vcombine.high %v6278_v34, %v6282_v58  ;;  %v12801_v14 = vcombine.low %v6278_v34, %v6282_v58  ;;  %v6334_v58 = vld [vmem:[#allocation7 + $0x1200] sm:$0xff] }
 0x599   :  { %6169 = vmatpush1.bf16.msra.mxu0 %v15618_v51  ;;  %v6331_v51 = vld [vmem:[#allocation7 + $0x11e8] sm:$0xff] }
 0x59a   :  { %6255 = vmatpush1.bf16.msra.mxu1 %v15619_v48  ;;  %6170 = vmatprep.subr.bf16.mxu0 %v15620_v32  ;;  %v12863_v48 = vcombine.low %v6318_v46, %v6322_v47  ;;  %v12867_v32 = vcombine.low %v6319_v49, %v6323_v38  ;;  %v12872_v34 = vcombine.high %v6327_v56, %v6331_v51  ;;  %v6358_v38 = vld [vmem:[#allocation7 + $0x12c0] sm:$0xff] }
 0x59b   :  { %6256 = vmatprep.subr.bf16.mxu1 %v15621_v19  ;;  %v12869_v19 = vcombine.high %v6326_v12, %v6330_v31  ;;  %v12879_v43 = vcombine.low %v6327_v56, %v6331_v51  ;;  %v12905_v47 = vcombine.high %v6350_v8, %v6354_v42  ;;  %v12908_v49 = vcombine.high %v6351_v60, %v6355_v22  ;;  %v6363_v56 = vld [vmem:[#allocation7 + $0x12e8] sm:$0xff] }
 0x59c   :  { %v12911_v51 = vcombine.low %v6350_v8, %v6354_v42 }
 0x59d   :  { %6171 = vmatpush1.bf16.msra.mxu0 %v15622_v16  ;;  %v6338_v16 = vld [vmem:[#allocation7 + $0x1220] sm:$0xff]  ;;  %15628 = vst [vmem:[#allocation16_spill] sm:$0xff] %v12905_v47  ;;  %15629 = vst [vmem:[#allocation18_spill] sm:$0xff] %v12908_v49 }
 0x59e   :  { %6257 = vmatpush1.bf16.msra.mxu1 %v15623_v30  ;;  %7806 = vmatprep.subr.bf16.mxu0 %v12781_v54  ;;  %v12875_v30 = vcombine.low %v6326_v12, %v6330_v31  ;;  %v12881_v44 = vcombine.high %v6334_v58, %v6338_v16  ;;  %v12887_v7 = vcombine.low %v6334_v58, %v6338_v16  ;;  %v6362_v12 = vld [vmem:[#allocation7 + $0x12e0] sm:$0xff]  ;;  %v6359_v31 = vld [vmem:[#allocation7 + $0x12c8] sm:$0xff] }
 0x59f   :  { %7892 = vmatprep.subr.bf16.mxu1 %v12784_v59  ;;  %15630 = vst [vmem:[#allocation21_spill] sm:$0xff] %v12911_v51  ;;  %v12915_v58 = vcombine.low %v6351_v60, %v6355_v22  ;;  %v12917_v16 = vcombine.high %v6358_v38, %v6362_v12  ;;  %v12920_v45 = vcombine.high %v6359_v31, %v6363_v56  ;;  %v6374_v22 = vld [vmem:[#allocation7 + $0x1340] sm:$0xff] }
 0x5a0   :  { %6173 = vmatmul.mubr.bf16.vlgmr.msra.gmra.mrb[44].mxu0 %v15500_v33  ;;  %v12927_v8 = vcombine.low %v6359_v31, %v6363_v56 }
 0x5a1   :  { %6259 = vmatmul.mubr.bf16.vlgmr.msra.gmra.mrb[44].mxu1 %v15500_v33  ;;  %7807 = vmatpush1.bf16.msra.mxu0 %v12787_v52  ;;  %v6298_v33 = vld [vmem:[#allocation7 + $0x10e0] sm:$0xff]  ;;  %15631 = vst [vmem:[#allocation19_spill] sm:$0xff] %v12915_v58  ;;  %15632 = vst [vmem:[#allocation20_spill] sm:$0xff] %v12917_v16 }
 0x5a2   :  { %7838 = vmatprep.mubr.bf16.mxu0 %v12221_v23  ;;  %7893 = vmatpush1.bf16.msra.mxu1 %v12791_v39  ;;  %v12821_v35 = vcombine.high %v6294_v53, %v6298_v33  ;;  %v12827_v0 = vcombine.low %v6294_v53, %v6298_v33  ;;  %v6346_v53 = vld [vmem:[#allocation7 + $0x1260] sm:$0xff]  ;;  %v6343_v33 = vld [vmem:[#allocation7 + $0x1248] sm:$0xff]  ;;  %15633 = vst [vmem:[#allocation22_spill] sm:$0xff] %v12920_v45  ;;  %15635 = vst [vmem:[#allocation23_spill] sm:$0xff] %v12927_v8 }
 0x5a3   :  { %7924 = vmatprep.mubr.bf16.mxu1 %v12221_v23  ;;  %7808 = vmatprep.subr.bf16.mxu0 %v12794_v3  ;;  %v12893_v9 = vcombine.high %v6342_v13, %v6346_v53  ;;  %v12896_v24 = vcombine.high %v6343_v33, %v6347_v36  ;;  %v12899_v27 = vcombine.low %v6342_v13, %v6346_v53  ;;  %v6370_v13 = vld [vmem:[#allocation7 + $0x1320] sm:$0xff]  ;;  %v6367_v53 = vld [vmem:[#allocation7 + $0x1308] sm:$0xff] }
 0x5a4   :  { %7894 = vmatprep.subr.bf16.mxu1 %v12797_v55  ;;  %v12903_v46 = vcombine.low %v6343_v33, %v6347_v36  ;;  %v6371_v33 = vld [vmem:[#allocation7 + $0x1328] sm:$0xff]  ;;  %v12923_v36 = vcombine.low %v6358_v38, %v6362_v12  ;;  %v12929_v42 = vcombine.high %v6366_v20, %v6370_v13  ;;  %v12935_v38 = vcombine.low %v6366_v20, %v6370_v13 }
 0x5a5   :  { %7809 = vmatpush1.bf16.msra.mxu0 %v12801_v14  ;;  %15624 = vst [vmem:[#allocation13_spill] sm:$0xff] %v12893_v9  ;;  %15625 = vst [vmem:[#allocation14_spill] sm:$0xff] %v12896_v24  ;;  %v12932_v60 = vcombine.high %v6367_v53, %v6371_v33  ;;  %v12939_v12 = vcombine.low %v6367_v53, %v6371_v33 }
 0x5a6   :  { %7895 = vmatpush1.bf16.msra.mxu1 %v12805_v26  ;;  %7810 = vmatprep.subr.bf16.mxu0 %v12807_v21  ;;  %15626 = vst [vmem:[#allocation17_spill] sm:$0xff] %v12899_v27  ;;  %15627 = vst [vmem:[#allocation15_spill] sm:$0xff] %v12903_v46 }
 0x5a7   :  { %7896 = vmatprep.subr.bf16.mxu1 %v12811_v29  ;;  %15634 = vst [vmem:[#allocation25_spill] sm:$0xff] %v12923_v36  ;;  %15636 = vst [vmem:[#allocation24_spill] sm:$0xff] %v12929_v42 }
 0x5a8   :  { %15637 = vst [vmem:[#allocation26_spill] sm:$0xff] %v12932_v60  ;;  %15638 = vst [vmem:[#allocation29_spill] sm:$0xff] %v12935_v38 }
 0x5a9   :  { %7811 = vmatpush1.bf16.msra.mxu0 %v12815_v61  ;;  %15639 = vst [vmem:[#allocation27_spill] sm:$0xff] %v12939_v12 }
 0x5aa   :  { %7897 = vmatpush1.bf16.msra.mxu1 %v12819_v28  ;;  %7812 = vmatprep.subr.bf16.mxu0 %v12821_v35 }
 0x5ab   :  { %7898 = vmatprep.subr.bf16.mxu1 %v12824_v4 }
 0x5ad   :  { %7813 = vmatpush1.bf16.msra.mxu0 %v12827_v0 }
 0x5ae   :  { %7899 = vmatpush1.bf16.msra.mxu1 %v12831_v10  ;;  %7814 = vmatprep.subr.bf16.mxu0 %v12833_v18 }
 0x5af   :  { %7900 = vmatprep.subr.bf16.mxu1 %v12836_v15 }
 0x5b1   :  { %7815 = vmatpush1.bf16.msra.mxu0 %v12839_v37 }
 0x5b2   :  { %7901 = vmatpush1.bf16.msra.mxu1 %v12843_v1  ;;  %7816 = vmatprep.subr.bf16.mxu0 %v12845_v62 }
 0x5b3   :  { %7902 = vmatprep.subr.bf16.mxu1 %v12848_v17 }
 0x5b5   :  { %7817 = vmatpush1.bf16.msra.mxu0 %v12851_v41 }
 0x5b6   :  { %7903 = vmatpush1.bf16.msra.mxu1 %v12855_v57  ;;  %7818 = vmatprep.subr.bf16.mxu0 %v12857_v11 }
 0x5b7   :  { %7904 = vmatprep.subr.bf16.mxu1 %v12860_v50 }
 0x5b9   :  { %7819 = vmatpush1.bf16.msra.mxu0 %v12863_v48 }
 0x5ba   :  { %7905 = vmatpush1.bf16.msra.mxu1 %v12867_v32  ;;  %7820 = vmatprep.subr.bf16.mxu0 %v12869_v19 }
 0x5bb   :  { %7906 = vmatprep.subr.bf16.mxu1 %v12872_v34 }
 0x5bd   :  { %7821 = vmatpush1.bf16.msra.mxu0 %v12875_v30 }
 0x5be   :  { %7907 = vmatpush1.bf16.msra.mxu1 %v12879_v43  ;;  %7822 = vmatprep.subr.bf16.mxu0 %v12881_v44 }
 0x5bf   :  { %7908 = vmatprep.subr.bf16.mxu1 %v12884_v40 }
 0x5c1   :  { %7823 = vmatpush1.bf16.msra.mxu0 %v12887_v7 }
 0x5c2   :  { %7909 = vmatpush1.bf16.msra.mxu1 %v12891_v63  ;;  %7824 = vmatprep.subr.bf16.mxu0 %v12893_v9 }
 0x5c3   :  { %7910 = vmatprep.subr.bf16.mxu1 %v12896_v24  ;;  %v6524_v24 = vld [vmem:[#allocation7 + $0x17f0] sm:$0xff] }
 0x5c5   :  { %7825 = vmatpush1.bf16.msra.mxu0 %v12899_v27  ;;  %v6520_v27 = vld [vmem:[#allocation7 + $0x17d0] sm:$0xff] }
 0x5c6   :  { %7911 = vmatpush1.bf16.msra.mxu1 %v12903_v46  ;;  %7826 = vmatprep.subr.bf16.mxu0 %v12905_v47  ;;  %v6375_v47 = vld [vmem:[#allocation7 + $0x1348] sm:$0xff] }
 0x5c7   :  { %7912 = vmatprep.subr.bf16.mxu1 %v12908_v49  ;;  %v6378_v49 = vld [vmem:[#allocation7 + $0x1360] sm:$0xff]  ;;  %v6379_v46 = vld [vmem:[#allocation7 + $0x1368] sm:$0xff] }
 0x5c8   :  { %v12941_v31 = vcombine.high %v6374_v22, %v6378_v49  ;;  %v12944_v56 = vcombine.high %v6375_v47, %v6379_v46  ;;  %v12947_v20 = vcombine.low %v6374_v22, %v6378_v49  ;;  %v12951_v13 = vcombine.low %v6375_v47, %v6379_v46 }
 0x5c9   :  { %7827 = vmatpush1.bf16.msra.mxu0 %v12911_v51  ;;  %v6387_v51 = vld [vmem:[#allocation7 + $0x13a8] sm:$0xff] }
 0x5ca   :  { %7913 = vmatpush1.bf16.msra.mxu1 %v12915_v58  ;;  %7828 = vmatprep.subr.bf16.mxu0 %v12917_v16  ;;  %15640 = vst [vmem:[#allocation28_spill] sm:$0xff] %v12941_v31  ;;  %15641 = vst [vmem:[#allocation30_spill] sm:$0xff] %v12944_v56  ;;  %v6386_v16 = vld [vmem:[#allocation7 + $0x13a0] sm:$0xff]  ;;  %v6383_v58 = vld [vmem:[#allocation7 + $0x1388] sm:$0xff] }
 0x5cb   :  { %7914 = vmatprep.subr.bf16.mxu1 %v12920_v45  ;;  %v6382_v45 = vld [vmem:[#allocation7 + $0x1380] sm:$0xff]  ;;  %15642 = vst [vmem:[#allocation33_spill] sm:$0xff] %v12947_v20  ;;  %15643 = vst [vmem:[#allocation31_spill] sm:$0xff] %v12951_v13  ;;  %v12956_v33 = vcombine.high %v6383_v58, %v6387_v51  ;;  %v12963_v46 = vcombine.low %v6383_v58, %v6387_v51 }
 0x5cc   :  { %v12953_v53 = vcombine.high %v6382_v45, %v6386_v16  ;;  %v12959_v49 = vcombine.low %v6382_v45, %v6386_v16 }
 0x5cd   :  { %7829 = vmatpush1.bf16.msra.mxu0 %v12923_v36  ;;  %15645 = vst [vmem:[#allocation34_spill] sm:$0xff] %v12956_v33  ;;  %v6395_v36 = vld [vmem:[#allocation7 + $0x13e8] sm:$0xff]  ;;  %15647 = vst [vmem:[#allocation35_spill] sm:$0xff] %v12963_v46 }
 0x5ce   :  { %7915 = vmatpush1.bf16.msra.mxu1 %v12927_v8  ;;  %7830 = vmatprep.subr.bf16.mxu0 %v12929_v42  ;;  %15644 = vst [vmem:[#allocation32_spill] sm:$0xff] %v12953_v53  ;;  %v6394_v42 = vld [vmem:[#allocation7 + $0x13e0] sm:$0xff]  ;;  %v6391_v8 = vld [vmem:[#allocation7 + $0x13c8] sm:$0xff]  ;;  %15646 = vst [vmem:[#allocation37_spill] sm:$0xff] %v12959_v49 }
 0x5cf   :  { %7916 = vmatprep.subr.bf16.mxu1 %v12932_v60  ;;  %v6390_v60 = vld [vmem:[#allocation7 + $0x13c0] sm:$0xff]  ;;  %v12968_v22 = vcombine.high %v6391_v8, %v6395_v36  ;;  %v12975_v51 = vcombine.low %v6391_v8, %v6395_v36 }
 0x5d0   :  { %v12965_v47 = vcombine.high %v6390_v60, %v6394_v42  ;;  %v12971_v16 = vcombine.low %v6390_v60, %v6394_v42  ;;  %v6407_v42 = vld [vmem:[#allocation7 + $0x1448] sm:$0xff] }
 0x5d1   :  { %7831 = vmatpush1.bf16.msra.mxu0 %v12935_v38  ;;  %15649 = vst [vmem:[#allocation38_spill] sm:$0xff] %v12968_v22  ;;  %v6403_v38 = vld [vmem:[#allocation7 + $0x1428] sm:$0xff]  ;;  %15651 = vst [vmem:[#allocation39_spill] sm:$0xff] %v12975_v51 }
 0x5d2   :  { %7917 = vmatpush1.bf16.msra.mxu1 %v12939_v12  ;;  %7832 = vmatprep.subr.bf16.mxu0 %v12941_v31  ;;  %15648 = vst [vmem:[#allocation36_spill] sm:$0xff] %v12965_v47  ;;  %v6402_v31 = vld [vmem:[#allocation7 + $0x1420] sm:$0xff]  ;;  %v6399_v12 = vld [vmem:[#allocation7 + $0x1408] sm:$0xff]  ;;  %15650 = vst [vmem:[#allocation41_spill] sm:$0xff] %v12971_v16 }
 0x5d3   :  { %7918 = vmatprep.subr.bf16.mxu1 %v12944_v56  ;;  %v6398_v56 = vld [vmem:[#allocation7 + $0x1400] sm:$0xff]  ;;  %v12980_v45 = vcombine.high %v6399_v12, %v6403_v38  ;;  %v6411_v60 = vld [vmem:[#allocation7 + $0x1468] sm:$0xff]  ;;  %v12987_v36 = vcombine.low %v6399_v12, %v6403_v38 }
 0x5d4   :  { %v12977_v58 = vcombine.high %v6398_v56, %v6402_v31  ;;  %v13001_v38 = vcombine.low %v6407_v42, %v6411_v60 }
 0x5d5   :  { %7833 = vmatpush1.bf16.msra.mxu0 %v12947_v20  ;;  %15653 = vst [vmem:[#allocation42_spill] sm:$0xff] %v12980_v45  ;;  %15655 = vst [vmem:[#allocation43_spill] sm:$0xff] %v12987_v36  ;;  %v6435_v20 = vld [vmem:[#allocation7 + $0x1528] sm:$0xff] }
 0x5d6   :  { %7919 = vmatpush1.bf16.msra.mxu1 %v12951_v13  ;;  %7834 = vmatprep.subr.bf16.mxu0 %v12953_v53  ;;  %15652 = vst [vmem:[#allocation40_spill] sm:$0xff] %v12977_v58  ;;  %v6410_v53 = vld [vmem:[#allocation7 + $0x1460] sm:$0xff]  ;;  %v12983_v13 = vcombine.low %v6398_v56, %v6402_v31  ;;  %v6415_v31 = vld [vmem:[#allocation7 + $0x1488] sm:$0xff]  ;;  %15659 = vst [vmem:[#allocation47_spill] sm:$0xff] %v13001_v38 }
 0x5d7   :  { %7920 = vmatprep.subr.bf16.mxu1 %v12956_v33  ;;  %v6406_v33 = vld [vmem:[#allocation7 + $0x1440] sm:$0xff]  ;;  %v6419_v56 = vld [vmem:[#allocation7 + $0x14a8] sm:$0xff] }
 0x5d8   :  { %15654 = vst [vmem:[#allocation45_spill] sm:$0xff] %v12983_v13  ;;  %v12990_v8 = vcombine.high %v6406_v33, %v6410_v53 }
 0x5d9   :  { %7835 = vmatpush1.bf16.msra.mxu0 %v12959_v49  ;;  %v6431_v49 = vld [vmem:[#allocation7 + $0x1508] sm:$0xff] }
 0x5da   :  { %7921 = vmatpush1.bf16.msra.mxu1 %v12963_v46  ;;  %7836 = vmatprep.subr.bf16.mxu0 %v12965_v47  ;;  %15656 = vst [vmem:[#allocation44_spill] sm:$0xff] %v12990_v8  ;;  %v6418_v47 = vld [vmem:[#allocation7 + $0x14a0] sm:$0xff]  ;;  %v12993_v46 = vcombine.high %v6407_v42, %v6411_v60  ;;  %v13015_v42 = vcombine.low %v6415_v31, %v6419_v56 }
 0x5db   :  { %7922 = vmatprep.subr.bf16.mxu1 %v12968_v22  ;;  %v6414_v22 = vld [vmem:[#allocation7 + $0x1480] sm:$0xff] }
 0x5dc   :  { %15657 = vst [vmem:[#allocation46_spill] sm:$0xff] %v12993_v46  ;;  %v13003_v12 = vcombine.high %v6414_v22, %v6418_v47  ;;  %15663 = vst [vmem:[#allocation51_spill] sm:$0xff] %v13015_v42 }
 0x5dd   :  { %7837 = vmatpush1.bf16.msra.mxu0 %v12971_v16  ;;  %v6426_v16 = vld [vmem:[#allocation7 + $0x14e0] sm:$0xff] }
 0x5de   :  { %7923 = vmatpush1.bf16.msra.mxu1 %v12975_v51  ;;  %7849 = vmatprep.subr.bf16.mxu0 %v12977_v58  ;;  %v12997_v51 = vcombine.low %v6406_v33, %v6410_v53  ;;  %15660 = vst [vmem:[#allocation48_spill] sm:$0xff] %v13003_v12  ;;  %v6422_v58 = vld [vmem:[#allocation7 + $0x14c0] sm:$0xff]  ;;  %v6423_v53 = vld [vmem:[#allocation7 + $0x14c8] sm:$0xff] }
 0x5df   :  { %7935 = vmatprep.subr.bf16.mxu1 %v12980_v45  ;;  %v13007_v45 = vcombine.high %v6415_v31, %v6419_v56  ;;  %v6427_v33 = vld [vmem:[#allocation7 + $0x14e8] sm:$0xff]  ;;  %v13017_v60 = vcombine.high %v6422_v58, %v6426_v16  ;;  %v13032_v56 = vcombine.high %v6431_v49, %v6435_v20 }
 0x5e0   :  { %7839 = vmatmul.mubr.bf16.vlgmr.msra.gmra.mrb[32].mxu0 %v12294_v6  ;;  %15658 = vst [vmem:[#allocation49_spill] sm:$0xff] %v12997_v51 }
 0x5e1   :  { %7925 = vmatmul.mubr.bf16.vlgmr.msra.gmra.mrb[32].mxu1 %v12294_v6  ;;  %7850 = vmatpush1.bf16.msra.mxu0 %v12983_v13  ;;  %15661 = vst [vmem:[#allocation50_spill] sm:$0xff] %v13007_v45  ;;  %v13011_v13 = vcombine.low %v6414_v22, %v6418_v47  ;;  %15664 = vst [vmem:[#allocation52_spill] sm:$0xff] %v13017_v60  ;;  %v13023_v47 = vcombine.low %v6422_v58, %v6426_v16 }
 0x5e2   :  { %7881 = vmatprep.mubr.bf16.mxu0 %v12305_v5  ;;  %7936 = vmatpush1.bf16.msra.mxu1 %v12987_v36  ;;  %v6430_v36 = vld [vmem:[#allocation7 + $0x1500] sm:$0xff]  ;;  %v13027_v22 = vcombine.low %v6423_v53, %v6427_v33  ;;  %15669 = vst [vmem:[#allocation58_spill] sm:$0xff] %v13032_v56  ;;  %v13039_v58 = vcombine.low %v6431_v49, %v6435_v20 }
 0x5e3   :  { %7967 = vmatprep.mubr.bf16.mxu1 %v12305_v5  ;;  %7851 = vmatprep.subr.bf16.mxu0 %v12990_v8  ;;  %15662 = vst [vmem:[#allocation53_spill] sm:$0xff] %v13011_v13  ;;  %v13020_v8 = vcombine.high %v6423_v53, %v6427_v33  ;;  %15666 = vst [vmem:[#allocation57_spill] sm:$0xff] %v13023_v47  ;;  %v15867_v2 = vld [vmem:[#allocation46_spill] sm:$0xff] }
 0x5e4   :  { %7937 = vmatprep.subr.bf16.mxu1 %v12993_v46  ;;  %v6434_v46 = vld [vmem:[#allocation7 + $0x1520] sm:$0xff]  ;;  %15667 = vst [vmem:[#allocation55_spill] sm:$0xff] %v13027_v22  ;;  %15671 = vst [vmem:[#allocation59_spill] sm:$0xff] %v13039_v58 }
 0x5e5   :  { %7852 = vmatpush1.bf16.msra.mxu0 %v12997_v51  ;;  %15665 = vst [vmem:[#allocation54_spill] sm:$0xff] %v13020_v8  ;;  %v13029_v31 = vcombine.high %v6430_v36, %v6434_v46  ;;  %v6443_v51 = vld [vmem:[#allocation7 + $0x1568] sm:$0xff]  ;;  %v13035_v16 = vcombine.low %v6430_v36, %v6434_v46 }
 0x5e6   :  { %7938 = vmatpush1.bf16.msra.mxu1 %v13001_v38  ;;  %7853 = vmatprep.subr.bf16.mxu0 %v13003_v12  ;;  %v6442_v12 = vld [vmem:[#allocation7 + $0x1560] sm:$0xff]  ;;  %v6439_v38 = vld [vmem:[#allocation7 + $0x1548] sm:$0xff] }
 0x5e7   :  { %7939 = vmatprep.subr.bf16.mxu1 %v13007_v45  ;;  %15668 = vst [vmem:[#allocation56_spill] sm:$0xff] %v13029_v31  ;;  %v6438_v45 = vld [vmem:[#allocation7 + $0x1540] sm:$0xff]  ;;  %15670 = vst [vmem:[#allocation61_spill] sm:$0xff] %v13035_v16  ;;  %v13044_v33 = vcombine.high %v6439_v38, %v6443_v51  ;;  %v13051_v20 = vcombine.low %v6439_v38, %v6443_v51 }
 0x5e8   :  { %v13041_v53 = vcombine.high %v6438_v45, %v6442_v12  ;;  %v13047_v46 = vcombine.low %v6438_v45, %v6442_v12 }
 0x5e9   :  { %7854 = vmatpush1.bf16.msra.mxu0 %v13011_v13  ;;  %15673 = vst [vmem:[#allocation62_spill] sm:$0xff] %v13044_v33  ;;  %v6451_v13 = vld [vmem:[#allocation7 + $0x15a8] sm:$0xff]  ;;  %15675 = vst [vmem:[#allocation63_spill] sm:$0xff] %v13051_v20 }
 0x5ea   :  { %7940 = vmatpush1.bf16.msra.mxu1 %v13015_v42  ;;  %7855 = vmatprep.subr.bf16.mxu0 %v13017_v60  ;;  %15672 = vst [vmem:[#allocation60_spill] sm:$0xff] %v13041_v53  ;;  %v6450_v60 = vld [vmem:[#allocation7 + $0x15a0] sm:$0xff]  ;;  %v6447_v42 = vld [vmem:[#allocation7 + $0x1588] sm:$0xff]  ;;  %15674 = vst [vmem:[#allocation65_spill] sm:$0xff] %v13047_v46 }
 0x5eb   :  { %7941 = vmatprep.subr.bf16.mxu1 %v13020_v8  ;;  %v6446_v8 = vld [vmem:[#allocation7 + $0x1580] sm:$0xff]  ;;  %v13056_v36 = vcombine.high %v6447_v42, %v6451_v13  ;;  %v13063_v51 = vcombine.low %v6447_v42, %v6451_v13 }
 0x5ec   :  { %v13053_v49 = vcombine.high %v6446_v8, %v6450_v60  ;;  %v13059_v45 = vcombine.low %v6446_v8, %v6450_v60 }
 0x5ed   :  { %7856 = vmatpush1.bf16.msra.mxu0 %v13023_v47  ;;  %15677 = vst [vmem:[#allocation66_spill] sm:$0xff] %v13056_v36  ;;  %v6459_v47 = vld [vmem:[#allocation7 + $0x15e8] sm:$0xff]  ;;  %15679 = vst [vmem:[#allocation67_spill] sm:$0xff] %v13063_v51 }
 0x5ee   :  { %7942 = vmatpush1.bf16.msra.mxu1 %v13027_v22  ;;  %7857 = vmatprep.subr.bf16.mxu0 %v13029_v31  ;;  %15676 = vst [vmem:[#allocation64_spill] sm:$0xff] %v13053_v49  ;;  %v6458_v31 = vld [vmem:[#allocation7 + $0x15e0] sm:$0xff]  ;;  %v6455_v22 = vld [vmem:[#allocation7 + $0x15c8] sm:$0xff]  ;;  %15678 = vst [vmem:[#allocation69_spill] sm:$0xff] %v13059_v45 }
 0x5ef   :  { %7943 = vmatprep.subr.bf16.mxu1 %v13032_v56  ;;  %v6454_v56 = vld [vmem:[#allocation7 + $0x15c0] sm:$0xff]  ;;  %v13068_v12 = vcombine.high %v6455_v22, %v6459_v47  ;;  %v13075_v13 = vcombine.low %v6455_v22, %v6459_v47 }
 0x5f0   :  { %v13065_v38 = vcombine.high %v6454_v56, %v6458_v31  ;;  %v13071_v8 = vcombine.low %v6454_v56, %v6458_v31 }
 0x5f1   :  { %7858 = vmatpush1.bf16.msra.mxu0 %v13035_v16  ;;  %15681 = vst [vmem:[#allocation70_spill] sm:$0xff] %v13068_v12  ;;  %v6467_v16 = vld [vmem:[#allocation7 + $0x1628] sm:$0xff]  ;;  %15683 = vst [vmem:[#allocation71_spill] sm:$0xff] %v13075_v13 }
 0x5f2   :  { %7944 = vmatpush1.bf16.msra.mxu1 %v13039_v58  ;;  %7859 = vmatprep.subr.bf16.mxu0 %v13041_v53  ;;  %15680 = vst [vmem:[#allocation68_spill] sm:$0xff] %v13065_v38  ;;  %v6466_v53 = vld [vmem:[#allocation7 + $0x1620] sm:$0xff]  ;;  %v6463_v58 = vld [vmem:[#allocation7 + $0x1608] sm:$0xff]  ;;  %15682 = vst [vmem:[#allocation73_spill] sm:$0xff] %v13071_v8 }
 0x5f3   :  { %7945 = vmatprep.subr.bf16.mxu1 %v13044_v33  ;;  %v6462_v33 = vld [vmem:[#allocation7 + $0x1600] sm:$0xff]  ;;  %v13080_v60 = vcombine.high %v6463_v58, %v6467_v16  ;;  %v13087_v47 = vcombine.low %v6463_v58, %v6467_v16 }
 0x5f4   :  { %v13077_v42 = vcombine.high %v6462_v33, %v6466_v53  ;;  %v13083_v31 = vcombine.low %v6462_v33, %v6466_v53 }
 0x5f5   :  { %7860 = vmatpush1.bf16.msra.mxu0 %v13047_v46  ;;  %15685 = vst [vmem:[#allocation74_spill] sm:$0xff] %v13080_v60  ;;  %v6475_v46 = vld [vmem:[#allocation7 + $0x1668] sm:$0xff]  ;;  %15687 = vst [vmem:[#allocation75_spill] sm:$0xff] %v13087_v47 }
 0x5f6   :  { %7946 = vmatpush1.bf16.msra.mxu1 %v13051_v20  ;;  %7861 = vmatprep.subr.bf16.mxu0 %v13053_v49  ;;  %15684 = vst [vmem:[#allocation72_spill] sm:$0xff] %v13077_v42  ;;  %v6474_v49 = vld [vmem:[#allocation7 + $0x1660] sm:$0xff]  ;;  %v6471_v20 = vld [vmem:[#allocation7 + $0x1648] sm:$0xff]  ;;  %15686 = vst [vmem:[#allocation77_spill] sm:$0xff] %v13083_v31 }
 0x5f7   :  { %7947 = vmatprep.subr.bf16.mxu1 %v13056_v36  ;;  %v6470_v36 = vld [vmem:[#allocation7 + $0x1640] sm:$0xff]  ;;  %v13092_v56 = vcombine.high %v6471_v20, %v6475_v46  ;;  %v13099_v16 = vcombine.low %v6471_v20, %v6475_v46 }
 0x5f8   :  { %v13089_v22 = vcombine.high %v6470_v36, %v6474_v49  ;;  %v13095_v53 = vcombine.low %v6470_v36, %v6474_v49 }
 0x5f9   :  { %7862 = vmatpush1.bf16.msra.mxu0 %v13059_v45  ;;  %15689 = vst [vmem:[#allocation78_spill] sm:$0xff] %v13092_v56  ;;  %v6483_v45 = vld [vmem:[#allocation7 + $0x16a8] sm:$0xff]  ;;  %15691 = vst [vmem:[#allocation85_spill] sm:$0xff] %v13099_v16 }
 0x5fa   :  { %7948 = vmatpush1.bf16.msra.mxu1 %v13063_v51  ;;  %7863 = vmatprep.subr.bf16.mxu0 %v13065_v38  ;;  %15688 = vst [vmem:[#allocation76_spill] sm:$0xff] %v13089_v22  ;;  %v6482_v38 = vld [vmem:[#allocation7 + $0x16a0] sm:$0xff]  ;;  %v6479_v51 = vld [vmem:[#allocation7 + $0x1688] sm:$0xff]  ;;  %15690 = vst [vmem:[#allocation79_spill] sm:$0xff] %v13095_v53 }
 0x5fb   :  { %7949 = vmatprep.subr.bf16.mxu1 %v13068_v12  ;;  %v6478_v12 = vld [vmem:[#allocation7 + $0x1680] sm:$0xff]  ;;  %v13104_v33 = vcombine.high %v6479_v51, %v6483_v45  ;;  %v13111_v46 = vcombine.low %v6479_v51, %v6483_v45 }
 0x5fc   :  { %v13101_v58 = vcombine.high %v6478_v12, %v6482_v38  ;;  %v13107_v49 = vcombine.low %v6478_v12, %v6482_v38 }
 0x5fd   :  { %7864 = vmatpush1.bf16.msra.mxu0 %v13071_v8  ;;  %15693 = vst [vmem:[#allocation87_spill] sm:$0xff] %v13104_v33  ;;  %v6491_v8 = vld [vmem:[#allocation7 + $0x16e8] sm:$0xff]  ;;  %15695 = vst [vmem:[#allocation89_spill] sm:$0xff] %v13111_v46 }
 0x5fe   :  { %7950 = vmatpush1.bf16.msra.mxu1 %v13075_v13  ;;  %7865 = vmatprep.subr.bf16.mxu0 %v13077_v42  ;;  %15692 = vst [vmem:[#allocation86_spill] sm:$0xff] %v13101_v58  ;;  %v6490_v42 = vld [vmem:[#allocation7 + $0x16e0] sm:$0xff]  ;;  %v6487_v13 = vld [vmem:[#allocation7 + $0x16c8] sm:$0xff]  ;;  %15694 = vst [vmem:[#allocation88_spill] sm:$0xff] %v13107_v49 }
 0x5ff   :  { %7951 = vmatprep.subr.bf16.mxu1 %v13080_v60  ;;  %v6486_v60 = vld [vmem:[#allocation7 + $0x16c0] sm:$0xff]  ;;  %v13116_v36 = vcombine.high %v6487_v13, %v6491_v8  ;;  %v13123_v45 = vcombine.low %v6487_v13, %v6491_v8 }
 0x600   :  { %v13113_v20 = vcombine.high %v6486_v60, %v6490_v42  ;;  %v13119_v38 = vcombine.low %v6486_v60, %v6490_v42 }
 0x601   :  { %7866 = vmatpush1.bf16.msra.mxu0 %v13083_v31  ;;  %15697 = vst [vmem:[#allocation91_spill] sm:$0xff] %v13116_v36  ;;  %v6499_v31 = vld [vmem:[#allocation7 + $0x1728] sm:$0xff]  ;;  %15699 = vst [vmem:[#allocation93_spill] sm:$0xff] %v13123_v45 }
 0x602   :  { %7952 = vmatpush1.bf16.msra.mxu1 %v13087_v47  ;;  %7867 = vmatprep.subr.bf16.mxu0 %v13089_v22  ;;  %15696 = vst [vmem:[#allocation90_spill] sm:$0xff] %v13113_v20  ;;  %v6498_v22 = vld [vmem:[#allocation7 + $0x1720] sm:$0xff]  ;;  %v6495_v47 = vld [vmem:[#allocation7 + $0x1708] sm:$0xff]  ;;  %15698 = vst [vmem:[#allocation92_spill] sm:$0xff] %v13119_v38 }
 0x603   :  { %7953 = vmatprep.subr.bf16.mxu1 %v13092_v56  ;;  %v6494_v56 = vld [vmem:[#allocation7 + $0x1700] sm:$0xff]  ;;  %v13128_v12 = vcombine.high %v6495_v47, %v6499_v31  ;;  %v13135_v8 = vcombine.low %v6495_v47, %v6499_v31 }
 0x604   :  { %v13125_v51 = vcombine.high %v6494_v56, %v6498_v22  ;;  %v13131_v42 = vcombine.low %v6494_v56, %v6498_v22 }
 0x605   :  { %7868 = vmatpush1.bf16.msra.mxu0 %v13095_v53  ;;  %15701 = vst [vmem:[#allocation95_spill] sm:$0xff] %v13128_v12  ;;  %v6507_v53 = vld [vmem:[#allocation7 + $0x1768] sm:$0xff]  ;;  %15703 = vst [vmem:[#allocation97_spill] sm:$0xff] %v13135_v8 }
 0x606   :  { %7954 = vmatpush1.bf16.msra.mxu1 %v13099_v16  ;;  %7869 = vmatprep.subr.bf16.mxu0 %v13101_v58  ;;  %15700 = vst [vmem:[#allocation94_spill] sm:$0xff] %v13125_v51  ;;  %v6506_v58 = vld [vmem:[#allocation7 + $0x1760] sm:$0xff]  ;;  %v6503_v16 = vld [vmem:[#allocation7 + $0x1748] sm:$0xff]  ;;  %15702 = vst [vmem:[#allocation96_spill] sm:$0xff] %v13131_v42 }
 0x607   :  { %7955 = vmatprep.subr.bf16.mxu1 %v13104_v33  ;;  %v6502_v33 = vld [vmem:[#allocation7 + $0x1740] sm:$0xff]  ;;  %v13140_v60 = vcombine.high %v6503_v16, %v6507_v53  ;;  %v13147_v31 = vcombine.low %v6503_v16, %v6507_v53 }
 0x608   :  { %v13137_v13 = vcombine.high %v6502_v33, %v6506_v58  ;;  %v13143_v22 = vcombine.low %v6502_v33, %v6506_v58 }
 0x609   :  { %7870 = vmatpush1.bf16.msra.mxu0 %v13107_v49  ;;  %15705 = vst [vmem:[#allocation99_spill] sm:$0xff] %v13140_v60  ;;  %v6515_v49 = vld [vmem:[#allocation7 + $0x17a8] sm:$0xff]  ;;  %15707 = vst [vmem:[#allocation101_spill] sm:$0xff] %v13147_v31 }
 0x60a   :  { %7956 = vmatpush1.bf16.msra.mxu1 %v13111_v46  ;;  %7871 = vmatprep.subr.bf16.mxu0 %v13113_v20  ;;  %15704 = vst [vmem:[#allocation98_spill] sm:$0xff] %v13137_v13  ;;  %v6514_v20 = vld [vmem:[#allocation7 + $0x17a0] sm:$0xff]  ;;  %v6511_v46 = vld [vmem:[#allocation7 + $0x1788] sm:$0xff]  ;;  %15706 = vst [vmem:[#allocation100_spill] sm:$0xff] %v13143_v22 }
 0x60b   :  { %7957 = vmatprep.subr.bf16.mxu1 %v13116_v36  ;;  %v6510_v36 = vld [vmem:[#allocation7 + $0x1780] sm:$0xff]  ;;  %v13152_v56 = vcombine.high %v6511_v46, %v6515_v49  ;;  %v13159_v53 = vcombine.low %v6511_v46, %v6515_v49 }
 0x60c   :  { %v13149_v47 = vcombine.high %v6510_v36, %v6514_v20  ;;  %v13155_v58 = vcombine.low %v6510_v36, %v6514_v20 }
 0x60d   :  { %7872 = vmatpush1.bf16.msra.mxu0 %v13119_v38  ;;  %15709 = vst [vmem:[#allocation103_spill] sm:$0xff] %v13152_v56  ;;  %v6523_v38 = vld [vmem:[#allocation7 + $0x17e8] sm:$0xff]  ;;  %15711 = vst [vmem:[#allocation105_spill] sm:$0xff] %v13159_v53 }
 0x60e   :  { %7958 = vmatpush1.bf16.msra.mxu1 %v13123_v45  ;;  %7873 = vmatprep.subr.bf16.mxu0 %v13125_v51  ;;  %15708 = vst [vmem:[#allocation102_spill] sm:$0xff] %v13149_v47  ;;  %v6522_v51 = vld [vmem:[#allocation7 + $0x17e0] sm:$0xff]  ;;  %v6519_v45 = vld [vmem:[#allocation7 + $0x17c8] sm:$0xff]  ;;  %15710 = vst [vmem:[#allocation104_spill] sm:$0xff] %v13155_v58 }
 0x60f   :  { %7959 = vmatprep.subr.bf16.mxu1 %v13128_v12  ;;  %v6518_v12 = vld [vmem:[#allocation7 + $0x17c0] sm:$0xff]  ;;  %v13164_v33 = vcombine.high %v6519_v45, %v6523_v38  ;;  %v13171_v49 = vcombine.low %v6519_v45, %v6523_v38 }
 0x610   :  { %v13161_v16 = vcombine.high %v6518_v12, %v6522_v51  ;;  %v13167_v20 = vcombine.low %v6518_v12, %v6522_v51  ;;  %v6281_v51 = vld [vmem:[#allocation7 + $0x1058] sm:$0xff] }
 0x611   :  { %7874 = vmatpush1.bf16.msra.mxu0 %v13131_v42  ;;  %15713 = vst [vmem:[#allocation107_spill] sm:$0xff] %v13164_v33  ;;  %v6277_v42 = vld [vmem:[#allocation7 + $0x1038] sm:$0xff]  ;;  %15715 = vst [vmem:[#allocation109_spill] sm:$0xff] %v13171_v49 }
 0x612   :  { %7960 = vmatpush1.bf16.msra.mxu1 %v13135_v8  ;;  %7875 = vmatprep.subr.bf16.mxu0 %v13137_v13  ;;  %15712 = vst [vmem:[#allocation106_spill] sm:$0xff] %v13161_v16  ;;  %v6276_v13 = vld [vmem:[#allocation7 + $0x1030] sm:$0xff]  ;;  %v6273_v8 = vld [vmem:[#allocation7 + $0x1018] sm:$0xff]  ;;  %15714 = vst [vmem:[#allocation108_spill] sm:$0xff] %v13167_v20 }
 0x613   :  { %7961 = vmatprep.subr.bf16.mxu1 %v13140_v60  ;;  %v6272_v60 = vld [vmem:[#allocation7 + $0x1010] sm:$0xff]  ;;  %v13176_v36 = vcombine.high %v6273_v8, %v6277_v42  ;;  %v6285_v12 = vld [vmem:[#allocation7 + $0x1078] sm:$0xff]  ;;  %v13183_v38 = vcombine.low %v6273_v8, %v6277_v42 }
 0x614   :  { %v13173_v46 = vcombine.high %v6272_v60, %v6276_v13  ;;  %v13197_v42 = vcombine.low %v6281_v51, %v6285_v12 }
 0x615   :  { %7876 = vmatpush1.bf16.msra.mxu0 %v13143_v22  ;;  %15717 = vst [vmem:[#allocation111_spill] sm:$0xff] %v13176_v36  ;;  %15719 = vst [vmem:[#allocation113_spill] sm:$0xff] %v13183_v38 }
 0x616   :  { %7962 = vmatpush1.bf16.msra.mxu1 %v13147_v31  ;;  %7877 = vmatprep.subr.bf16.mxu0 %v13149_v47  ;;  %15716 = vst [vmem:[#allocation110_spill] sm:$0xff] %v13173_v46  ;;  %v6284_v47 = vld [vmem:[#allocation7 + $0x1070] sm:$0xff]  ;;  %v13179_v31 = vcombine.low %v6272_v60, %v6276_v13  ;;  %v6289_v13 = vld [vmem:[#allocation7 + $0x1098] sm:$0xff]  ;;  %15723 = vst [vmem:[#allocation117_spill] sm:$0xff] %v13197_v42 }
 0x617   :  { %7963 = vmatprep.subr.bf16.mxu1 %v13152_v56  ;;  %v6280_v56 = vld [vmem:[#allocation7 + $0x1050] sm:$0xff]  ;;  %v6293_v60 = vld [vmem:[#allocation7 + $0x10b8] sm:$0xff] }
 0x618   :  { %15718 = vst [vmem:[#allocation112_spill] sm:$0xff] %v13179_v31  ;;  %v13186_v45 = vcombine.high %v6280_v56, %v6284_v47 }
 0x619   :  { %7878 = vmatpush1.bf16.msra.mxu0 %v13155_v58  ;;  %v6309_v58 = vld [vmem:[#allocation7 + $0x1138] sm:$0xff] }
 0x61a   :  { %7964 = vmatpush1.bf16.msra.mxu1 %v13159_v53  ;;  %7879 = vmatprep.subr.bf16.mxu0 %v13161_v16  ;;  %15720 = vst [vmem:[#allocation114_spill] sm:$0xff] %v13186_v45  ;;  %v6292_v16 = vld [vmem:[#allocation7 + $0x10b0] sm:$0xff]  ;;  %v13189_v53 = vcombine.high %v6281_v51, %v6285_v12  ;;  %v13211_v51 = vcombine.low %v6289_v13, %v6293_v60 }
 0x61b   :  { %7965 = vmatprep.subr.bf16.mxu1 %v13164_v33  ;;  %v6288_v33 = vld [vmem:[#allocation7 + $0x1090] sm:$0xff] }
 0x61c   :  { %15721 = vst [vmem:[#allocation115_spill] sm:$0xff] %v13189_v53  ;;  %v13199_v8 = vcombine.high %v6288_v33, %v6292_v16  ;;  %15727 = vst [vmem:[#allocation121_spill] sm:$0xff] %v13211_v51 }
 0x61d   :  { %7880 = vmatpush1.bf16.msra.mxu0 %v13167_v20  ;;  %v6300_v20 = vld [vmem:[#allocation7 + $0x10f0] sm:$0xff] }
 0x61e   :  { %7966 = vmatpush1.bf16.msra.mxu1 %v13171_v49  ;;  %7978 = vmatprep.subr.bf16.mxu0 %v13173_v46  ;;  %v13193_v49 = vcombine.low %v6280_v56, %v6284_v47  ;;  %15724 = vst [vmem:[#allocation118_spill] sm:$0xff] %v13199_v8  ;;  %v6296_v46 = vld [vmem:[#allocation7 + $0x10d0] sm:$0xff]  ;;  %v6297_v47 = vld [vmem:[#allocation7 + $0x10d8] sm:$0xff] }
 0x61f   :  { %8064 = vmatprep.subr.bf16.mxu1 %v13176_v36  ;;  %v13203_v36 = vcombine.high %v6289_v13, %v6293_v60  ;;  %v6301_v56 = vld [vmem:[#allocation7 + $0x10f8] sm:$0xff] }
 0x620   :  { %7882 = vmatmul.mubr.bf16.vlgmr.msra.gmra.mrb[32].mxu0 %v12374_v25  ;;  %15722 = vst [vmem:[#allocation116_spill] sm:$0xff] %v13193_v49  ;;  %v13216_v12 = vcombine.high %v6297_v47, %v6301_v56 }
 0x621   :  { %7968 = vmatmul.mubr.bf16.vlgmr.msra.gmra.mrb[32].mxu1 %v12374_v25  ;;  %7979 = vmatpush1.bf16.msra.mxu0 %v13179_v31  ;;  %15725 = vst [vmem:[#allocation119_spill] sm:$0xff] %v13203_v36  ;;  %v13207_v31 = vcombine.low %v6288_v33, %v6292_v16  ;;  %v13219_v16 = vcombine.low %v6296_v46, %v6300_v20 }
 0x622   :  { %8010 = vmatprep.mubr.bf16.mxu0 %v12221_v23  ;;  %8065 = vmatpush1.bf16.msra.mxu1 %v13183_v38  ;;  %15729 = vst [vmem:[#allocation123_spill] sm:$0xff] %v13216_v12  ;;  %v6305_v38 = vld [vmem:[#allocation7 + $0x1118] sm:$0xff]  ;;  %v13223_v33 = vcombine.low %v6297_v47, %v6301_v56 }
 0x623   :  { %8096 = vmatprep.mubr.bf16.mxu1 %v12221_v23  ;;  %7980 = vmatprep.subr.bf16.mxu0 %v13186_v45  ;;  %15726 = vst [vmem:[#allocation120_spill] sm:$0xff] %v13207_v31  ;;  %v13213_v23 = vcombine.high %v6296_v46, %v6300_v20  ;;  %v6304_v45 = vld [vmem:[#allocation7 + $0x1110] sm:$0xff]  ;;  %15730 = vst [vmem:[#allocation124_spill] sm:$0xff] %v13219_v16  ;;  %v13228_v60 = vcombine.high %v6305_v38, %v6309_v58 }
 0x624   :  { %8066 = vmatprep.subr.bf16.mxu1 %v13189_v53  ;;  %v6308_v53 = vld [vmem:[#allocation7 + $0x1130] sm:$0xff]  ;;  %15731 = vst [vmem:[#allocation125_spill] sm:$0xff] %v13223_v33  ;;  %v13235_v46 = vcombine.low %v6305_v38, %v6309_v58 }
 0x625   :  { %7981 = vmatpush1.bf16.msra.mxu0 %v13193_v49  ;;  %15728 = vst [vmem:[#allocation122_spill] sm:$0xff] %v13213_v23  ;;  %v13225_v13 = vcombine.high %v6304_v45, %v6308_v53  ;;  %15733 = vst [vmem:[#allocation127_spill] sm:$0xff] %v13228_v60  ;;  %v6317_v49 = vld [vmem:[#allocation7 + $0x1178] sm:$0xff]  ;;  %v13231_v20 = vcombine.low %v6304_v45, %v6308_v53 }
 0x626   :  { %8067 = vmatpush1.bf16.msra.mxu1 %v13197_v42  ;;  %7982 = vmatprep.subr.bf16.mxu0 %v13199_v8  ;;  %v6316_v8 = vld [vmem:[#allocation7 + $0x1170] sm:$0xff]  ;;  %v6313_v42 = vld [vmem:[#allocation7 + $0x1158] sm:$0xff]  ;;  %15735 = vst [vmem:[#allocation129_spill] sm:$0xff] %v13235_v46 }
 0x627   :  { %8068 = vmatprep.subr.bf16.mxu1 %v13203_v36  ;;  %15732 = vst [vmem:[#allocation126_spill] sm:$0xff] %v13225_v13  ;;  %v6312_v36 = vld [vmem:[#allocation7 + $0x1150] sm:$0xff]  ;;  %15734 = vst [vmem:[#allocation128_spill] sm:$0xff] %v13231_v20  ;;  %v13240_v56 = vcombine.high %v6313_v42, %v6317_v49  ;;  %v13247_v58 = vcombine.low %v6313_v42, %v6317_v49 }
 0x628   :  { %v13237_v47 = vcombine.high %v6312_v36, %v6316_v8  ;;  %v13243_v53 = vcombine.low %v6312_v36, %v6316_v8 }
 0x629   :  { %7983 = vmatpush1.bf16.msra.mxu0 %v13207_v31  ;;  %15737 = vst [vmem:[#allocation131_spill] sm:$0xff] %v13240_v56  ;;  %v6325_v31 = vld [vmem:[#allocation7 + $0x11b8] sm:$0xff]  ;;  %15739 = vst [vmem:[#allocation133_spill] sm:$0xff] %v13247_v58 }
 0x62a   :  { %8069 = vmatpush1.bf16.msra.mxu1 %v13211_v51  ;;  %7984 = vmatprep.subr.bf16.mxu0 %v13213_v23  ;;  %15736 = vst [vmem:[#allocation130_spill] sm:$0xff] %v13237_v47  ;;  %v6324_v23 = vld [vmem:[#allocation7 + $0x11b0] sm:$0xff]  ;;  %v6321_v51 = vld [vmem:[#allocation7 + $0x1198] sm:$0xff]  ;;  %15738 = vst [vmem:[#allocation132_spill] sm:$0xff] %v13243_v53 }
 0x62b   :  { %8070 = vmatprep.subr.bf16.mxu1 %v13216_v12  ;;  %v6320_v12 = vld [vmem:[#allocation7 + $0x1190] sm:$0xff]  ;;  %v13252_v45 = vcombine.high %v6321_v51, %v6325_v31  ;;  %v13259_v49 = vcombine.low %v6321_v51, %v6325_v31 }
 0x62c   :  { %v13249_v38 = vcombine.high %v6320_v12, %v6324_v23  ;;  %v13255_v36 = vcombine.low %v6320_v12, %v6324_v23 }
 0x62d   :  { %7985 = vmatpush1.bf16.msra.mxu0 %v13219_v16  ;;  %15741 = vst [vmem:[#allocation135_spill] sm:$0xff] %v13252_v45  ;;  %v6333_v16 = vld [vmem:[#allocation7 + $0x11f8] sm:$0xff]  ;;  %15743 = vst [vmem:[#allocation137_spill] sm:$0xff] %v13259_v49 }
 0x62e   :  { %8071 = vmatpush1.bf16.msra.mxu1 %v13223_v33  ;;  %7986 = vmatprep.subr.bf16.mxu0 %v13225_v13  ;;  %15740 = vst [vmem:[#allocation134_spill] sm:$0xff] %v13249_v38  ;;  %v6332_v13 = vld [vmem:[#allocation7 + $0x11f0] sm:$0xff]  ;;  %v6329_v33 = vld [vmem:[#allocation7 + $0x11d8] sm:$0xff]  ;;  %15742 = vst [vmem:[#allocation136_spill] sm:$0xff] %v13255_v36 }
 0x62f   :  { %8072 = vmatprep.subr.bf16.mxu1 %v13228_v60  ;;  %v6328_v60 = vld [vmem:[#allocation7 + $0x11d0] sm:$0xff]  ;;  %v13264_v8 = vcombine.high %v6329_v33, %v6333_v16  ;;  %v13271_v31 = vcombine.low %v6329_v33, %v6333_v16 }
 0x630   :  { %v13261_v42 = vcombine.high %v6328_v60, %v6332_v13  ;;  %v13267_v23 = vcombine.low %v6328_v60, %v6332_v13 }
 0x631   :  { %7987 = vmatpush1.bf16.msra.mxu0 %v13231_v20  ;;  %15745 = vst [vmem:[#allocation139_spill] sm:$0xff] %v13264_v8  ;;  %v6341_v20 = vld [vmem:[#allocation7 + $0x1238] sm:$0xff]  ;;  %15747 = vst [vmem:[#allocation141_spill] sm:$0xff] %v13271_v31 }
 0x632   :  { %8073 = vmatpush1.bf16.msra.mxu1 %v13235_v46  ;;  %7988 = vmatprep.subr.bf16.mxu0 %v13237_v47  ;;  %15744 = vst [vmem:[#allocation138_spill] sm:$0xff] %v13261_v42  ;;  %v6340_v47 = vld [vmem:[#allocation7 + $0x1230] sm:$0xff]  ;;  %v6337_v46 = vld [vmem:[#allocation7 + $0x1218] sm:$0xff]  ;;  %15746 = vst [vmem:[#allocation140_spill] sm:$0xff] %v13267_v23 }
 0x633   :  { %8074 = vmatprep.subr.bf16.mxu1 %v13240_v56  ;;  %v6336_v56 = vld [vmem:[#allocation7 + $0x1210] sm:$0xff]  ;;  %v13276_v12 = vcombine.high %v6337_v46, %v6341_v20  ;;  %v13283_v16 = vcombine.low %v6337_v46, %v6341_v20 }
 0x634   :  { %v13273_v51 = vcombine.high %v6336_v56, %v6340_v47  ;;  %v13279_v13 = vcombine.low %v6336_v56, %v6340_v47 }
 0x635   :  { %7989 = vmatpush1.bf16.msra.mxu0 %v13243_v53  ;;  %15749 = vst [vmem:[#allocation143_spill] sm:$0xff] %v13276_v12  ;;  %v6349_v53 = vld [vmem:[#allocation7 + $0x1278] sm:$0xff]  ;;  %15751 = vst [vmem:[#allocation145_spill] sm:$0xff] %v13283_v16 }
 0x636   :  { %8075 = vmatpush1.bf16.msra.mxu1 %v13247_v58  ;;  %7990 = vmatprep.subr.bf16.mxu0 %v13249_v38  ;;  %15748 = vst [vmem:[#allocation142_spill] sm:$0xff] %v13273_v51  ;;  %v6348_v38 = vld [vmem:[#allocation7 + $0x1270] sm:$0xff]  ;;  %v6345_v58 = vld [vmem:[#allocation7 + $0x1258] sm:$0xff]  ;;  %15750 = vst [vmem:[#allocation144_spill] sm:$0xff] %v13279_v13 }
 0x637   :  { %8076 = vmatprep.subr.bf16.mxu1 %v13252_v45  ;;  %v6344_v45 = vld [vmem:[#allocation7 + $0x1250] sm:$0xff]  ;;  %v13288_v60 = vcombine.high %v6345_v58, %v6349_v53  ;;  %v13295_v20 = vcombine.low %v6345_v58, %v6349_v53 }
 0x638   :  { %v13285_v33 = vcombine.high %v6344_v45, %v6348_v38  ;;  %v13291_v47 = vcombine.low %v6344_v45, %v6348_v38 }
 0x639   :  { %7991 = vmatpush1.bf16.msra.mxu0 %v13255_v36  ;;  %15753 = vst [vmem:[#allocation147_spill] sm:$0xff] %v13288_v60  ;;  %v6357_v36 = vld [vmem:[#allocation7 + $0x12b8] sm:$0xff]  ;;  %15755 = vst [vmem:[#allocation149_spill] sm:$0xff] %v13295_v20 }
 0x63a   :  { %8077 = vmatpush1.bf16.msra.mxu1 %v13259_v49  ;;  %7992 = vmatprep.subr.bf16.mxu0 %v13261_v42  ;;  %15752 = vst [vmem:[#allocation146_spill] sm:$0xff] %v13285_v33  ;;  %v6356_v42 = vld [vmem:[#allocation7 + $0x12b0] sm:$0xff]  ;;  %v6353_v49 = vld [vmem:[#allocation7 + $0x1298] sm:$0xff]  ;;  %15754 = vst [vmem:[#allocation148_spill] sm:$0xff] %v13291_v47 }
 0x63b   :  { %8078 = vmatprep.subr.bf16.mxu1 %v13264_v8  ;;  %v6352_v8 = vld [vmem:[#allocation7 + $0x1290] sm:$0xff]  ;;  %v13300_v56 = vcombine.high %v6353_v49, %v6357_v36  ;;  %v13307_v53 = vcombine.low %v6353_v49, %v6357_v36 }
 0x63c   :  { %v13297_v46 = vcombine.high %v6352_v8, %v6356_v42  ;;  %v13303_v38 = vcombine.low %v6352_v8, %v6356_v42 }
 0x63d   :  { %7993 = vmatpush1.bf16.msra.mxu0 %v13267_v23  ;;  %15757 = vst [vmem:[#allocation151_spill] sm:$0xff] %v13300_v56  ;;  %v6365_v23 = vld [vmem:[#allocation7 + $0x12f8] sm:$0xff]  ;;  %15759 = vst [vmem:[#allocation153_spill] sm:$0xff] %v13307_v53 }
 0x63e   :  { %8079 = vmatpush1.bf16.msra.mxu1 %v13271_v31  ;;  %7994 = vmatprep.subr.bf16.mxu0 %v13273_v51  ;;  %15756 = vst [vmem:[#allocation150_spill] sm:$0xff] %v13297_v46  ;;  %v6364_v51 = vld [vmem:[#allocation7 + $0x12f0] sm:$0xff]  ;;  %v6361_v31 = vld [vmem:[#allocation7 + $0x12d8] sm:$0xff]  ;;  %15758 = vst [vmem:[#allocation152_spill] sm:$0xff] %v13303_v38 }
 0x63f   :  { %8080 = vmatprep.subr.bf16.mxu1 %v13276_v12  ;;  %v6360_v12 = vld [vmem:[#allocation7 + $0x12d0] sm:$0xff]  ;;  %v13312_v45 = vcombine.high %v6361_v31, %v6365_v23  ;;  %v13319_v36 = vcombine.low %v6361_v31, %v6365_v23 }
 0x640   :  { %v13309_v58 = vcombine.high %v6360_v12, %v6364_v51  ;;  %v13315_v42 = vcombine.low %v6360_v12, %v6364_v51 }
 0x641   :  { %7995 = vmatpush1.bf16.msra.mxu0 %v13279_v13  ;;  %15761 = vst [vmem:[#allocation155_spill] sm:$0xff] %v13312_v45  ;;  %v6373_v13 = vld [vmem:[#allocation7 + $0x1338] sm:$0xff]  ;;  %15763 = vst [vmem:[#allocation157_spill] sm:$0xff] %v13319_v36 }
 0x642   :  { %8081 = vmatpush1.bf16.msra.mxu1 %v13283_v16  ;;  %7996 = vmatprep.subr.bf16.mxu0 %v13285_v33  ;;  %15760 = vst [vmem:[#allocation154_spill] sm:$0xff] %v13309_v58  ;;  %v6372_v33 = vld [vmem:[#allocation7 + $0x1330] sm:$0xff]  ;;  %v6369_v16 = vld [vmem:[#allocation7 + $0x1318] sm:$0xff]  ;;  %15762 = vst [vmem:[#allocation156_spill] sm:$0xff] %v13315_v42 }
 0x643   :  { %8082 = vmatprep.subr.bf16.mxu1 %v13288_v60  ;;  %v6368_v60 = vld [vmem:[#allocation7 + $0x1310] sm:$0xff]  ;;  %v13324_v8 = vcombine.high %v6369_v16, %v6373_v13  ;;  %v13331_v23 = vcombine.low %v6369_v16, %v6373_v13 }
 0x644   :  { %v13321_v49 = vcombine.high %v6368_v60, %v6372_v33  ;;  %v13327_v51 = vcombine.low %v6368_v60, %v6372_v33 }
 0x645   :  { %7997 = vmatpush1.bf16.msra.mxu0 %v13291_v47  ;;  %15765 = vst [vmem:[#allocation159_spill] sm:$0xff] %v13324_v8  ;;  %v6381_v47 = vld [vmem:[#allocation7 + $0x1378] sm:$0xff]  ;;  %15767 = vst [vmem:[#allocation161_spill] sm:$0xff] %v13331_v23 }
 0x646   :  { %8083 = vmatpush1.bf16.msra.mxu1 %v13295_v20  ;;  %7998 = vmatprep.subr.bf16.mxu0 %v13297_v46  ;;  %15764 = vst [vmem:[#allocation158_spill] sm:$0xff] %v13321_v49  ;;  %v6380_v46 = vld [vmem:[#allocation7 + $0x1370] sm:$0xff]  ;;  %v6377_v20 = vld [vmem:[#allocation7 + $0x1358] sm:$0xff]  ;;  %15766 = vst [vmem:[#allocation160_spill] sm:$0xff] %v13327_v51 }
 0x647   :  { %8084 = vmatprep.subr.bf16.mxu1 %v13300_v56  ;;  %v6376_v56 = vld [vmem:[#allocation7 + $0x1350] sm:$0xff]  ;;  %v13336_v12 = vcombine.high %v6377_v20, %v6381_v47  ;;  %v13343_v13 = vcombine.low %v6377_v20, %v6381_v47 }
 0x648   :  { %v13333_v31 = vcombine.high %v6376_v56, %v6380_v46  ;;  %v13339_v33 = vcombine.low %v6376_v56, %v6380_v46 }
 0x649   :  { %7999 = vmatpush1.bf16.msra.mxu0 %v13303_v38  ;;  %15769 = vst [vmem:[#allocation163_spill] sm:$0xff] %v13336_v12  ;;  %v6389_v38 = vld [vmem:[#allocation7 + $0x13b8] sm:$0xff]  ;;  %15771 = vst [vmem:[#allocation165_spill] sm:$0xff] %v13343_v13 }
 0x64a   :  { %8085 = vmatpush1.bf16.msra.mxu1 %v13307_v53  ;;  %8000 = vmatprep.subr.bf16.mxu0 %v13309_v58  ;;  %15768 = vst [vmem:[#allocation162_spill] sm:$0xff] %v13333_v31  ;;  %v6388_v58 = vld [vmem:[#allocation7 + $0x13b0] sm:$0xff]  ;;  %v6385_v53 = vld [vmem:[#allocation7 + $0x1398] sm:$0xff]  ;;  %15770 = vst [vmem:[#allocation164_spill] sm:$0xff] %v13339_v33 }
 0x64b   :  { %8086 = vmatprep.subr.bf16.mxu1 %v13312_v45  ;;  %v6384_v45 = vld [vmem:[#allocation7 + $0x1390] sm:$0xff]  ;;  %v13348_v60 = vcombine.high %v6385_v53, %v6389_v38  ;;  %v13355_v47 = vcombine.low %v6385_v53, %v6389_v38 }
 0x64c   :  { %v13345_v16 = vcombine.high %v6384_v45, %v6388_v58  ;;  %v13351_v46 = vcombine.low %v6384_v45, %v6388_v58 }
 0x64d   :  { %8001 = vmatpush1.bf16.msra.mxu0 %v13315_v42  ;;  %15773 = vst [vmem:[#allocation167_spill] sm:$0xff] %v13348_v60  ;;  %v6397_v42 = vld [vmem:[#allocation7 + $0x13f8] sm:$0xff]  ;;  %15775 = vst [vmem:[#allocation169_spill] sm:$0xff] %v13355_v47 }
 0x64e   :  { %8087 = vmatpush1.bf16.msra.mxu1 %v13319_v36  ;;  %8002 = vmatprep.subr.bf16.mxu0 %v13321_v49  ;;  %15772 = vst [vmem:[#allocation166_spill] sm:$0xff] %v13345_v16  ;;  %v6396_v49 = vld [vmem:[#allocation7 + $0x13f0] sm:$0xff]  ;;  %v6393_v36 = vld [vmem:[#allocation7 + $0x13d8] sm:$0xff]  ;;  %15774 = vst [vmem:[#allocation168_spill] sm:$0xff] %v13351_v46 }
 0x64f   :  { %8088 = vmatprep.subr.bf16.mxu1 %v13324_v8  ;;  %v6392_v8 = vld [vmem:[#allocation7 + $0x13d0] sm:$0xff]  ;;  %v13360_v56 = vcombine.high %v6393_v36, %v6397_v42  ;;  %v13367_v38 = vcombine.low %v6393_v36, %v6397_v42 }
 0x650   :  { %v13357_v20 = vcombine.high %v6392_v8, %v6396_v49  ;;  %v13363_v58 = vcombine.low %v6392_v8, %v6396_v49  ;;  %v6409_v49 = vld [vmem:[#allocation7 + $0x1458] sm:$0xff] }
 0x651   :  { %8003 = vmatpush1.bf16.msra.mxu0 %v13327_v51  ;;  %15777 = vst [vmem:[#allocation171_spill] sm:$0xff] %v13360_v56  ;;  %v6405_v51 = vld [vmem:[#allocation7 + $0x1438] sm:$0xff]  ;;  %15779 = vst [vmem:[#allocation173_spill] sm:$0xff] %v13367_v38 }
 0x652   :  { %8089 = vmatpush1.bf16.msra.mxu1 %v13331_v23  ;;  %8004 = vmatprep.subr.bf16.mxu0 %v13333_v31  ;;  %15776 = vst [vmem:[#allocation170_spill] sm:$0xff] %v13357_v20  ;;  %v6404_v31 = vld [vmem:[#allocation7 + $0x1430] sm:$0xff]  ;;  %v6401_v23 = vld [vmem:[#allocation7 + $0x1418] sm:$0xff]  ;;  %15778 = vst [vmem:[#allocation172_spill] sm:$0xff] %v13363_v58 }
 0x653   :  { %8090 = vmatprep.subr.bf16.mxu1 %v13336_v12  ;;  %v6400_v12 = vld [vmem:[#allocation7 + $0x1410] sm:$0xff]  ;;  %v13372_v45 = vcombine.high %v6401_v23, %v6405_v51  ;;  %v6413_v8 = vld [vmem:[#allocation7 + $0x1478] sm:$0xff]  ;;  %v13379_v42 = vcombine.low %v6401_v23, %v6405_v51 }
 0x654   :  { %v13369_v53 = vcombine.high %v6400_v12, %v6404_v31  ;;  %v13393_v51 = vcombine.low %v6409_v49, %v6413_v8 }
 0x655   :  { %8005 = vmatpush1.bf16.msra.mxu0 %v13339_v33  ;;  %15781 = vst [vmem:[#allocation175_spill] sm:$0xff] %v13372_v45  ;;  %15783 = vst [vmem:[#allocation177_spill] sm:$0xff] %v13379_v42  ;;  %v6516_v33 = vld [vmem:[#allocation7 + $0x17b0] sm:$0xff] }
 0x656   :  { %8091 = vmatpush1.bf16.msra.mxu1 %v13343_v13  ;;  %8006 = vmatprep.subr.bf16.mxu0 %v13345_v16  ;;  %15780 = vst [vmem:[#allocation174_spill] sm:$0xff] %v13369_v53  ;;  %v6412_v16 = vld [vmem:[#allocation7 + $0x1470] sm:$0xff]  ;;  %v13375_v13 = vcombine.low %v6400_v12, %v6404_v31  ;;  %v6417_v31 = vld [vmem:[#allocation7 + $0x1498] sm:$0xff]  ;;  %15787 = vst [vmem:[#allocation181_spill] sm:$0xff] %v13393_v51 }
 0x657   :  { %8092 = vmatprep.subr.bf16.mxu1 %v13348_v60  ;;  %v6408_v60 = vld [vmem:[#allocation7 + $0x1450] sm:$0xff]  ;;  %v6421_v12 = vld [vmem:[#allocation7 + $0x14b8] sm:$0xff] }
 0x658   :  { %15782 = vst [vmem:[#allocation176_spill] sm:$0xff] %v13375_v13  ;;  %v13382_v36 = vcombine.high %v6408_v60, %v6412_v16 }
 0x659   :  { %8007 = vmatpush1.bf16.msra.mxu0 %v13351_v46  ;;  %v6509_v46 = vld [vmem:[#allocation7 + $0x1778] sm:$0xff] }
 0x65a   :  { %8093 = vmatpush1.bf16.msra.mxu1 %v13355_v47  ;;  %8008 = vmatprep.subr.bf16.mxu0 %v13357_v20  ;;  %15784 = vst [vmem:[#allocation178_spill] sm:$0xff] %v13382_v36  ;;  %v6420_v20 = vld [vmem:[#allocation7 + $0x14b0] sm:$0xff]  ;;  %v13385_v47 = vcombine.high %v6409_v49, %v6413_v8  ;;  %v13407_v49 = vcombine.low %v6417_v31, %v6421_v12 }
 0x65b   :  { %8094 = vmatprep.subr.bf16.mxu1 %v13360_v56  ;;  %v6416_v56 = vld [vmem:[#allocation7 + $0x1490] sm:$0xff] }
 0x65c   :  { %15785 = vst [vmem:[#allocation179_spill] sm:$0xff] %v13385_v47  ;;  %v13395_v23 = vcombine.high %v6416_v56, %v6420_v20  ;;  %15791 = vst [vmem:[#allocation185_spill] sm:$0xff] %v13407_v49 }
 0x65d   :  { %8009 = vmatpush1.bf16.msra.mxu0 %v13363_v58  ;;  %v6437_v58 = vld [vmem:[#allocation7 + $0x1538] sm:$0xff] }
 0x65e   :  { %8095 = vmatpush1.bf16.msra.mxu1 %v13367_v38  ;;  %8021 = vmatprep.subr.bf16.mxu0 %v13369_v53  ;;  %v13389_v38 = vcombine.low %v6408_v60, %v6412_v16  ;;  %15788 = vst [vmem:[#allocation182_spill] sm:$0xff] %v13395_v23  ;;  %v6424_v53 = vld [vmem:[#allocation7 + $0x14d0] sm:$0xff]  ;;  %v6425_v16 = vld [vmem:[#allocation7 + $0x14d8] sm:$0xff] }
 0x65f   :  { %8107 = vmatprep.subr.bf16.mxu1 %v13372_v45  ;;  %v13399_v45 = vcombine.high %v6417_v31, %v6421_v12  ;;  %v6429_v60 = vld [vmem:[#allocation7 + $0x14f8] sm:$0xff] }
 0x660   :  { %8011 = vmatmul.mubr.bf16.vlgmr.msra.gmra.mrb[36].mxu0 %v12294_v6  ;;  %15786 = vst [vmem:[#allocation180_spill] sm:$0xff] %v13389_v38  ;;  %v13412_v8 = vcombine.high %v6425_v16, %v6429_v60 }
 0x661   :  { %8097 = vmatmul.mubr.bf16.vlgmr.msra.gmra.mrb[36].mxu1 %v12294_v6  ;;  %8022 = vmatpush1.bf16.msra.mxu0 %v13375_v13  ;;  %15789 = vst [vmem:[#allocation183_spill] sm:$0xff] %v13399_v45  ;;  %v6428_v6 = vld [vmem:[#allocation7 + $0x14f0] sm:$0xff]  ;;  %v13403_v13 = vcombine.low %v6416_v56, %v6420_v20  ;;  %v13419_v56 = vcombine.low %v6425_v16, %v6429_v60 }
 0x662   :  { %8053 = vmatprep.mubr.bf16.mxu0 %v12305_v5  ;;  %8108 = vmatpush1.bf16.msra.mxu1 %v13379_v42  ;;  %15793 = vst [vmem:[#allocation187_spill] sm:$0xff] %v13412_v8  ;;  %v6433_v42 = vld [vmem:[#allocation7 + $0x1518] sm:$0xff]  ;;  %v13415_v20 = vcombine.low %v6424_v53, %v6428_v6 }
 0x663   :  { %8139 = vmatprep.mubr.bf16.mxu1 %v12305_v5  ;;  %8023 = vmatprep.subr.bf16.mxu0 %v13382_v36  ;;  %15790 = vst [vmem:[#allocation184_spill] sm:$0xff] %v13403_v13  ;;  %v13409_v5 = vcombine.high %v6424_v53, %v6428_v6  ;;  %v6432_v36 = vld [vmem:[#allocation7 + $0x1510] sm:$0xff]  ;;  %15795 = vst [vmem:[#allocation189_spill] sm:$0xff] %v13419_v56  ;;  %v13424_v12 = vcombine.high %v6433_v42, %v6437_v58 }
 0x664   :  { %8109 = vmatprep.subr.bf16.mxu1 %v13385_v47  ;;  %v6436_v47 = vld [vmem:[#allocation7 + $0x1530] sm:$0xff]  ;;  %15794 = vst [vmem:[#allocation188_spill] sm:$0xff] %v13415_v20  ;;  %v13431_v6 = vcombine.low %v6433_v42, %v6437_v58 }
 0x665   :  { %8024 = vmatpush1.bf16.msra.mxu0 %v13389_v38  ;;  %15792 = vst [vmem:[#allocation186_spill] sm:$0xff] %v13409_v5  ;;  %v13421_v31 = vcombine.high %v6432_v36, %v6436_v47  ;;  %15797 = vst [vmem:[#allocation191_spill] sm:$0xff] %v13424_v12  ;;  %v6445_v38 = vld [vmem:[#allocation7 + $0x1578] sm:$0xff]  ;;  %v13427_v53 = vcombine.low %v6432_v36, %v6436_v47 }
 0x666   :  { %8110 = vmatpush1.bf16.msra.mxu1 %v13393_v51  ;;  %8025 = vmatprep.subr.bf16.mxu0 %v13395_v23  ;;  %v6444_v23 = vld [vmem:[#allocation7 + $0x1570] sm:$0xff]  ;;  %v6441_v51 = vld [vmem:[#allocation7 + $0x1558] sm:$0xff]  ;;  %15799 = vst [vmem:[#allocation193_spill] sm:$0xff] %v13431_v6 }
 0x667   :  { %8111 = vmatprep.subr.bf16.mxu1 %v13399_v45  ;;  %15796 = vst [vmem:[#allocation190_spill] sm:$0xff] %v13421_v31  ;;  %v6440_v45 = vld [vmem:[#allocation7 + $0x1550] sm:$0xff]  ;;  %15798 = vst [vmem:[#allocation192_spill] sm:$0xff] %v13427_v53  ;;  %v13436_v60 = vcombine.high %v6441_v51, %v6445_v38  ;;  %v13443_v58 = vcombine.low %v6441_v51, %v6445_v38 }
 0x668   :  { %v13433_v16 = vcombine.high %v6440_v45, %v6444_v23  ;;  %v13439_v47 = vcombine.low %v6440_v45, %v6444_v23 }
 0x669   :  { %8026 = vmatpush1.bf16.msra.mxu0 %v13403_v13  ;;  %15801 = vst [vmem:[#allocation195_spill] sm:$0xff] %v13436_v60  ;;  %v6453_v13 = vld [vmem:[#allocation7 + $0x15b8] sm:$0xff]  ;;  %15803 = vst [vmem:[#allocation197_spill] sm:$0xff] %v13443_v58 }
 0x66a   :  { %8112 = vmatpush1.bf16.msra.mxu1 %v13407_v49  ;;  %8027 = vmatprep.subr.bf16.mxu0 %v13409_v5  ;;  %15800 = vst [vmem:[#allocation194_spill] sm:$0xff] %v13433_v16  ;;  %v6452_v5 = vld [vmem:[#allocation7 + $0x15b0] sm:$0xff]  ;;  %v6449_v49 = vld [vmem:[#allocation7 + $0x1598] sm:$0xff]  ;;  %15802 = vst [vmem:[#allocation196_spill] sm:$0xff] %v13439_v47 }
 0x66b   :  { %8113 = vmatprep.subr.bf16.mxu1 %v13412_v8  ;;  %v6448_v8 = vld [vmem:[#allocation7 + $0x1590] sm:$0xff]  ;;  %v13448_v36 = vcombine.high %v6449_v49, %v6453_v13  ;;  %v13455_v38 = vcombine.low %v6449_v49, %v6453_v13 }
 0x66c   :  { %v13445_v42 = vcombine.high %v6448_v8, %v6452_v5  ;;  %v13451_v45 = vcombine.low %v6448_v8, %v6452_v5 }
 0x66d   :  { %8028 = vmatpush1.bf16.msra.mxu0 %v13415_v20  ;;  %15805 = vst [vmem:[#allocation199_spill] sm:$0xff] %v13448_v36  ;;  %v6461_v20 = vld [vmem:[#allocation7 + $0x15f8] sm:$0xff]  ;;  %15807 = vst [vmem:[#allocation201_spill] sm:$0xff] %v13455_v38 }
 0x66e   :  { %8114 = vmatpush1.bf16.msra.mxu1 %v13419_v56  ;;  %8029 = vmatprep.subr.bf16.mxu0 %v13421_v31  ;;  %15804 = vst [vmem:[#allocation198_spill] sm:$0xff] %v13445_v42  ;;  %v6460_v31 = vld [vmem:[#allocation7 + $0x15f0] sm:$0xff]  ;;  %v6457_v56 = vld [vmem:[#allocation7 + $0x15d8] sm:$0xff]  ;;  %15806 = vst [vmem:[#allocation200_spill] sm:$0xff] %v13451_v45 }
 0x66f   :  { %8115 = vmatprep.subr.bf16.mxu1 %v13424_v12  ;;  %v6456_v12 = vld [vmem:[#allocation7 + $0x15d0] sm:$0xff]  ;;  %v13460_v23 = vcombine.high %v6457_v56, %v6461_v20  ;;  %v13467_v13 = vcombine.low %v6457_v56, %v6461_v20 }
 0x670   :  { %v13457_v51 = vcombine.high %v6456_v12, %v6460_v31  ;;  %v13463_v5 = vcombine.low %v6456_v12, %v6460_v31 }
 0x671   :  { %8030 = vmatpush1.bf16.msra.mxu0 %v13427_v53  ;;  %15809 = vst [vmem:[#allocation203_spill] sm:$0xff] %v13460_v23  ;;  %v6469_v53 = vld [vmem:[#allocation7 + $0x1638] sm:$0xff]  ;;  %15811 = vst [vmem:[#allocation205_spill] sm:$0xff] %v13467_v13 }
 0x672   :  { %8116 = vmatpush1.bf16.msra.mxu1 %v13431_v6  ;;  %8031 = vmatprep.subr.bf16.mxu0 %v13433_v16  ;;  %15808 = vst [vmem:[#allocation202_spill] sm:$0xff] %v13457_v51  ;;  %v6468_v16 = vld [vmem:[#allocation7 + $0x1630] sm:$0xff]  ;;  %v6465_v6 = vld [vmem:[#allocation7 + $0x1618] sm:$0xff]  ;;  %15810 = vst [vmem:[#allocation204_spill] sm:$0xff] %v13463_v5 }
 0x673   :  { %8117 = vmatprep.subr.bf16.mxu1 %v13436_v60  ;;  %v6464_v60 = vld [vmem:[#allocation7 + $0x1610] sm:$0xff]  ;;  %v13472_v8 = vcombine.high %v6465_v6, %v6469_v53  ;;  %v13479_v20 = vcombine.low %v6465_v6, %v6469_v53 }
 0x674   :  { %v13469_v49 = vcombine.high %v6464_v60, %v6468_v16  ;;  %v13475_v31 = vcombine.low %v6464_v60, %v6468_v16 }
 0x675   :  { %8032 = vmatpush1.bf16.msra.mxu0 %v13439_v47  ;;  %15813 = vst [vmem:[#allocation207_spill] sm:$0xff] %v13472_v8  ;;  %v6477_v47 = vld [vmem:[#allocation7 + $0x1678] sm:$0xff]  ;;  %15815 = vst [vmem:[#allocation209_spill] sm:$0xff] %v13479_v20 }
 0x676   :  { %8118 = vmatpush1.bf16.msra.mxu1 %v13443_v58  ;;  %8033 = vmatprep.subr.bf16.mxu0 %v13445_v42  ;;  %15812 = vst [vmem:[#allocation206_spill] sm:$0xff] %v13469_v49  ;;  %v6476_v42 = vld [vmem:[#allocation7 + $0x1670] sm:$0xff]  ;;  %v6473_v58 = vld [vmem:[#allocation7 + $0x1658] sm:$0xff]  ;;  %15814 = vst [vmem:[#allocation208_spill] sm:$0xff] %v13475_v31 }
 0x677   :  { %8119 = vmatprep.subr.bf16.mxu1 %v13448_v36  ;;  %v6472_v36 = vld [vmem:[#allocation7 + $0x1650] sm:$0xff]  ;;  %v13484_v12 = vcombine.high %v6473_v58, %v6477_v47  ;;  %v13491_v53 = vcombine.low %v6473_v58, %v6477_v47 }
 0x678   :  { %v13481_v56 = vcombine.high %v6472_v36, %v6476_v42  ;;  %v13487_v16 = vcombine.low %v6472_v36, %v6476_v42 }
 0x679   :  { %8034 = vmatpush1.bf16.msra.mxu0 %v13451_v45  ;;  %15817 = vst [vmem:[#allocation211_spill] sm:$0xff] %v13484_v12  ;;  %v6485_v45 = vld [vmem:[#allocation7 + $0x16b8] sm:$0xff]  ;;  %15819 = vst [vmem:[#allocation213_spill] sm:$0xff] %v13491_v53 }
 0x67a   :  { %8120 = vmatpush1.bf16.msra.mxu1 %v13455_v38  ;;  %8035 = vmatprep.subr.bf16.mxu0 %v13457_v51  ;;  %15816 = vst [vmem:[#allocation210_spill] sm:$0xff] %v13481_v56  ;;  %v6484_v51 = vld [vmem:[#allocation7 + $0x16b0] sm:$0xff]  ;;  %v6481_v38 = vld [vmem:[#allocation7 + $0x1698] sm:$0xff]  ;;  %15818 = vst [vmem:[#allocation212_spill] sm:$0xff] %v13487_v16 }
 0x67b   :  { %8121 = vmatprep.subr.bf16.mxu1 %v13460_v23  ;;  %v6480_v23 = vld [vmem:[#allocation7 + $0x1690] sm:$0xff]  ;;  %v13496_v60 = vcombine.high %v6481_v38, %v6485_v45  ;;  %v13503_v47 = vcombine.low %v6481_v38, %v6485_v45 }
 0x67c   :  { %v13493_v6 = vcombine.high %v6480_v23, %v6484_v51  ;;  %v13499_v42 = vcombine.low %v6480_v23, %v6484_v51  ;;  %v8170_v23 = vld [vmem:[#allocation2 + $0x60] sm:$0xff] }
 0x67d   :  { %8036 = vmatpush1.bf16.msra.mxu0 %v13463_v5  ;;  %15821 = vst [vmem:[#allocation215_spill] sm:$0xff] %v13496_v60  ;;  %v6493_v5 = vld [vmem:[#allocation7 + $0x16f8] sm:$0xff]  ;;  %15823 = vst [vmem:[#allocation217_spill] sm:$0xff] %v13503_v47 }
 0x67e   :  { %8122 = vmatpush1.bf16.msra.mxu1 %v13467_v13  ;;  %8037 = vmatprep.subr.bf16.mxu0 %v13469_v49  ;;  %15820 = vst [vmem:[#allocation214_spill] sm:$0xff] %v13493_v6  ;;  %v6492_v49 = vld [vmem:[#allocation7 + $0x16f0] sm:$0xff]  ;;  %v6489_v13 = vld [vmem:[#allocation7 + $0x16d8] sm:$0xff]  ;;  %15822 = vst [vmem:[#allocation216_spill] sm:$0xff] %v13499_v42 }
 0x67f   :  { %8123 = vmatprep.subr.bf16.mxu1 %v13472_v8  ;;  %v6488_v8 = vld [vmem:[#allocation7 + $0x16d0] sm:$0xff]  ;;  %v13508_v36 = vcombine.high %v6489_v13, %v6493_v5  ;;  %v13515_v45 = vcombine.low %v6489_v13, %v6493_v5 }
 0x680   :  { %v13505_v58 = vcombine.high %v6488_v8, %v6492_v49  ;;  %v13511_v51 = vcombine.low %v6488_v8, %v6492_v49  ;;  %v8203_v8 = vshrl.u32 %v8170_v23, 16 }
 0x681   :  { %8038 = vmatpush1.bf16.msra.mxu0 %v13475_v31  ;;  %15825 = vst [vmem:[#allocation219_spill] sm:$0xff] %v13508_v36  ;;  %v6501_v31 = vld [vmem:[#allocation7 + $0x1738] sm:$0xff]  ;;  %15827 = vst [vmem:[#allocation221_spill] sm:$0xff] %v13515_v45 }
 0x682   :  { %8124 = vmatpush1.bf16.msra.mxu1 %v13479_v20  ;;  %8039 = vmatprep.subr.bf16.mxu0 %v13481_v56  ;;  %15824 = vst [vmem:[#allocation218_spill] sm:$0xff] %v13505_v58  ;;  %v6500_v56 = vld [vmem:[#allocation7 + $0x1730] sm:$0xff]  ;;  %v6497_v20 = vld [vmem:[#allocation7 + $0x1718] sm:$0xff]  ;;  %15826 = vst [vmem:[#allocation220_spill] sm:$0xff] %v13511_v51 }
 0x683   :  { %8125 = vmatprep.subr.bf16.mxu1 %v13484_v12  ;;  %v6496_v12 = vld [vmem:[#allocation7 + $0x1710] sm:$0xff]  ;;  %v13527_v5 = vcombine.low %v6497_v20, %v6501_v31 }
 0x684   :  { %v13517_v38 = vcombine.high %v6496_v12, %v6500_v56  ;;  %v13523_v49 = vcombine.low %v6496_v12, %v6500_v56  ;;  %v6513_v56 = vld [vmem:[#allocation7 + $0x1798] sm:$0xff] }
 0x685   :  { %8040 = vmatpush1.bf16.msra.mxu0 %v13487_v16  ;;  %v6505_v16 = vld [vmem:[#allocation7 + $0x1758] sm:$0xff]  ;;  %15831 = vst [vmem:[#allocation225_spill] sm:$0xff] %v13527_v5 }
 0x686   :  { %8126 = vmatpush1.bf16.msra.mxu1 %v13491_v53  ;;  %8041 = vmatprep.subr.bf16.mxu0 %v13493_v6  ;;  %15828 = vst [vmem:[#allocation222_spill] sm:$0xff] %v13517_v38  ;;  %v6504_v6 = vld [vmem:[#allocation7 + $0x1750] sm:$0xff]  ;;  %15830 = vst [vmem:[#allocation224_spill] sm:$0xff] %v13523_v49  ;;  %v6517_v12 = vld [vmem:[#allocation7 + $0x17b8] sm:$0xff] }
 0x687   :  { %8127 = vmatprep.subr.bf16.mxu1 %v13496_v60  ;;  %v13520_v60 = vcombine.high %v6497_v20, %v6501_v31  ;;  %v6508_v53 = vld [vmem:[#allocation7 + $0x1770] sm:$0xff]  ;;  %v13539_v31 = vcombine.low %v6505_v16, %v6509_v46 }
 0x688   :  { %v13529_v13 = vcombine.high %v6504_v6, %v6508_v53 }
 0x689   :  { %8042 = vmatpush1.bf16.msra.mxu0 %v13499_v42  ;;  %15829 = vst [vmem:[#allocation223_spill] sm:$0xff] %v13520_v60  ;;  %v8166_v42 = vld [vmem:[#allocation2 + $0x20] sm:$0xff] }
 0x68a   :  { %8128 = vmatpush1.bf16.msra.mxu1 %v13503_v47  ;;  %8043 = vmatprep.subr.bf16.mxu0 %v13505_v58  ;;  %v8206_v58 = vshll.u32 %v8170_v23, 16  ;;  %15832 = vst [vmem:[#allocation226_spill] sm:$0xff] %v13529_v13  ;;  %v6512_v47 = vld [vmem:[#allocation7 + $0x1790] sm:$0xff]  ;;  %v8175_v22 = vshrl.u32 %v8166_v42, 16  ;;  %v13535_v23 = vcombine.low %v6504_v6, %v6508_v53  ;;  %v6521_v6 = vld [vmem:[#allocation7 + $0x17d8] sm:$0xff] }
 0x68b   :  { %8129 = vmatprep.subr.bf16.mxu1 %v13508_v36  ;;  %v13532_v36 = vcombine.high %v6505_v16, %v6509_v46  ;;  %v13541_v20 = vcombine.high %v6512_v47, %v6516_v33 }
 0x68d   :  { %8044 = vmatpush1.bf16.msra.mxu0 %v13511_v51  ;;  %15833 = vst [vmem:[#allocation227_spill] sm:$0xff] %v13532_v36  ;;  %v8178_v51 = vshll.u32 %v8166_v42, 16  ;;  %v13544_v42 = vcombine.high %v6513_v56, %v6517_v12 }
 0x68e   :  { %8130 = vmatpush1.bf16.msra.mxu1 %v13515_v45  ;;  %8045 = vmatprep.subr.bf16.mxu0 %v13517_v38  ;;  %v8205_v45 = vrot.slane %v8203_v8, 4  ;;  %v8208_v38 = vrot.slane %v8206_v58, 5  ;;  %v6525_v8 = vld [vmem:[#allocation7 + $0x17f8] sm:$0xff]  ;;  %v8168_v58 = vld [vmem:[#allocation2 + $0x30] sm:$0x11] }
 0x68f   :  { %8131 = vmatprep.subr.bf16.mxu1 %v13520_v60  ;;  %v8172_v60 = vld [vmem:[#allocation2 + $0x70] sm:$0x11]  ;;  %v8180_v53 = vrot.slane %v8178_v51, 5  ;;  %v8184_v9 = vshll.u32 %v8168_v58, 16  ;;  %v15858_v58 = vld [vmem:[#allocation36_spill] sm:$0xff] }
 0x690   :  { %v8209_v46 = vor.u32 %v8208_v38, %v8205_v45  ;;  %v8212_v16 = vshll.u32 %v8172_v60, 16  ;;  %v13563_v45 = vcombine.low %v6521_v6, %v6525_v8 }
 0x691   :  { %8046 = vmatpush1.bf16.msra.mxu0 %v13523_v49  ;;  %v8177_v49 = vrot.slane %v8175_v22, 4  ;;  %v13556_v22 = vcombine.high %v6521_v6, %v6525_v8  ;;  %v15857_v8 = vld [vmem:[#allocation35_spill] sm:$0xff] }
 0x692   :  { %8132 = vmatpush1.bf16.msra.mxu1 %v13527_v5  ;;  %8047 = vmatprep.subr.bf16.mxu0 %v13529_v13  ;;  %v13547_v5 = vcombine.low %v6512_v47, %v6516_v33  ;;  %v13553_v13 = vcombine.high %v6520_v27, %v6524_v24  ;;  %v13559_v33 = vcombine.low %v6520_v27, %v6524_v24  ;;  %v8210_v47 = vrot.slane %v8209_v46, 4  ;;  %v15859_v46 = vld [vmem:[#allocation38_spill] sm:$0xff] }
 0x693   :  { %8133 = vmatprep.subr.bf16.mxu1 %v13532_v36  ;;  %v13551_v36 = vcombine.low %v6513_v56, %v6517_v12  ;;  %v8181_v51 = vor.u32 %v8180_v53, %v8177_v49  ;;  %v8214_v60 = vrot.slane %v8212_v16, 5  ;;  %v8186_v56 = vrot.slane %v8184_v9, 5  ;;  %v15856_v12 = vld [vmem:[#allocation37_spill] sm:$0xff] }
 0x695   :  { %8048 = vmatpush1.bf16.msra.mxu0 %v13535_v23  ;;  %v8182_v38 = vrot.slane %v8181_v51, 4  ;;  %v13569_v49 = vsel %vm10186_vm3, %v8210_v47, %v8214_v60  ;;  %v15860_v47 = vld [vmem:[#allocation41_spill] sm:$0xff] }
 0x696   :  { %8134 = vmatpush1.bf16.msra.mxu1 %v13539_v31  ;;  %8049 = vmatprep.subr.bf16.mxu0 %v13541_v20 }
 0x697   :  { %8135 = vmatprep.subr.bf16.mxu1 %v13544_v42  ;;  %v13576_v24 = vsel %vm10186_vm3, %v8182_v38, %v8186_v56  ;;  %v15861_v38 = vld [vmem:[#allocation39_spill] sm:$0xff] }
 0x698   :  { %v13581_v9 = vcombine.high %v13576_v24, %v13569_v49  ;;  %v13654_v56 = vcombine.low %v13576_v24, %v13569_v49  ;;  %v15865_v49 = vld [vmem:[#allocation43_spill] sm:$0xff]  ;;  %v15866_v24 = vld [vmem:[#allocation44_spill] sm:$0xff] }
 0x699   :  { %8050 = vmatpush1.bf16.msra.mxu0 %v13547_v5 }
 0x69a   :  { %8136 = vmatpush1.bf16.msra.mxu1 %v13551_v36  ;;  %8051 = vmatprep.subr.bf16.mxu0 %v13553_v13 }
 0x69b   :  { %8137 = vmatprep.subr.bf16.mxu1 %v13556_v22 }
 0x69d   :  { %8052 = vmatpush1.bf16.msra.mxu0 %v13559_v33 }
 0x69e   :  { %8138 = vmatpush1.bf16.msra.mxu1 %v13563_v45  ;;  %8246 = vmatprep.subr.bf16.mxu0 %v12781_v54  ;;  %v15835_v54 = vld [vmem:[#allocation14_spill] sm:$0xff] }
 0x69f   :  { %8332 = vmatprep.subr.bf16.mxu1 %v12784_v59  ;;  %v15836_v59 = vld [vmem:[#allocation17_spill] sm:$0xff] }
 0x6a0   :  { %8054 = vmatmul.mubr.bf16.vlgmr.msra.gmra.mrb[36].mxu0 %v12374_v25 }
 0x6a1   :  { %8140 = vmatmul.mubr.bf16.vlgmr.msra.gmra.mrb[36].mxu1 %v12374_v25  ;;  %8247 = vmatpush1.bf16.msra.mxu0 %v12787_v52  ;;  %v15834_v25 = vld [vmem:[#allocation13_spill] sm:$0xff]  ;;  %v15837_v52 = vld [vmem:[#allocation15_spill] sm:$0xff] }
 0x6a2   :  { %8278 = vmatprep.mubr.bf16.mxu0 %v13581_v9  ;;  %8333 = vmatpush1.bf16.msra.mxu1 %v12791_v39  ;;  %v15838_v39 = vld [vmem:[#allocation16_spill] sm:$0xff] }
 0x6a3   :  { %8364 = vmatprep.mubr.bf16.mxu1 %v13581_v9  ;;  %8248 = vmatprep.subr.bf16.mxu0 %v12794_v3  ;;  %v15839_v3 = vld [vmem:[#allocation18_spill] sm:$0xff] }
 0x6a4   :  { %8334 = vmatprep.subr.bf16.mxu1 %v12797_v55  ;;  %v15840_v55 = vld [vmem:[#allocation21_spill] sm:$0xff] }
 0x6a5   :  { %8249 = vmatpush1.bf16.msra.mxu0 %v12801_v14  ;;  %v15841_v14 = vld [vmem:[#allocation19_spill] sm:$0xff] }
 0x6a6   :  { %8335 = vmatpush1.bf16.msra.mxu1 %v12805_v26  ;;  %8250 = vmatprep.subr.bf16.mxu0 %v12807_v21  ;;  %v15842_v26 = vld [vmem:[#allocation20_spill] sm:$0xff]  ;;  %v8171_v21 = vld [vmem:[#allocation2 + $0x68] sm:$0xff] }
 0x6a7   :  { %8336 = vmatprep.subr.bf16.mxu1 %v12811_v29  ;;  %v15843_v29 = vld [vmem:[#allocation22_spill] sm:$0xff] }
 0x6a9   :  { %8251 = vmatpush1.bf16.msra.mxu0 %v12815_v61  ;;  %v8167_v61 = vld [vmem:[#allocation2 + $0x28] sm:$0xff] }
 0x6aa   :  { %8337 = vmatpush1.bf16.msra.mxu1 %v12819_v28  ;;  %8252 = vmatprep.subr.bf16.mxu0 %v12821_v35  ;;  %v15844_v28 = vld [vmem:[#allocation25_spill] sm:$0xff]  ;;  %v8217_v35 = vshrl.u32 %v8171_v21, 16 }
 0x6ab   :  { %8338 = vmatprep.subr.bf16.mxu1 %v12824_v4  ;;  %v8220_v4 = vshll.u32 %v8171_v21, 16  ;;  %v15872_v21 = vld [vmem:[#allocation53_spill] sm:$0xff] }
 0x6ad   :  { %8253 = vmatpush1.bf16.msra.mxu0 %v12827_v0  ;;  %v15845_v0 = vld [vmem:[#allocation23_spill] sm:$0xff] }
 0x6ae   :  { %8339 = vmatpush1.bf16.msra.mxu1 %v12831_v10  ;;  %8254 = vmatprep.subr.bf16.mxu0 %v12833_v18  ;;  %v15846_v10 = vld [vmem:[#allocation24_spill] sm:$0xff]  ;;  %v15847_v18 = vld [vmem:[#allocation26_spill] sm:$0xff] }
 0x6af   :  { %8340 = vmatprep.subr.bf16.mxu1 %v12836_v15  ;;  %v8189_v15 = vshrl.u32 %v8167_v61, 16 }
 0x6b1   :  { %8255 = vmatpush1.bf16.msra.mxu0 %v12839_v37  ;;  %v8192_v37 = vshll.u32 %v8167_v61, 16  ;;  %v15874_v61 = vld [vmem:[#allocation52_spill] sm:$0xff] }
 0x6b2   :  { %8341 = vmatpush1.bf16.msra.mxu1 %v12843_v1  ;;  %8256 = vmatprep.subr.bf16.mxu0 %v12845_v62  ;;  %v15848_v1 = vld [vmem:[#allocation29_spill] sm:$0xff]  ;;  %v8219_v62 = vrot.slane %v8217_v35, 4 }
 0x6b3   :  { %8342 = vmatprep.subr.bf16.mxu1 %v12848_v17  ;;  %v8222_v17 = vrot.slane %v8220_v4, 5  ;;  %v15876_v35 = vld [vmem:[#allocation57_spill] sm:$0xff]  ;;  %v15877_v4 = vld [vmem:[#allocation55_spill] sm:$0xff] }
 0x6b5   :  { %8257 = vmatpush1.bf16.msra.mxu0 %v12851_v41  ;;  %v15849_v41 = vld [vmem:[#allocation27_spill] sm:$0xff] }
 0x6b6   :  { %8343 = vmatpush1.bf16.msra.mxu1 %v12855_v57  ;;  %8258 = vmatprep.subr.bf16.mxu0 %v12857_v11  ;;  %v15850_v57 = vld [vmem:[#allocation28_spill] sm:$0xff]  ;;  %v8173_v11 = vld [vmem:[#allocation2 + $0x78] sm:$0x11] }
 0x6b7   :  { %8344 = vmatprep.subr.bf16.mxu1 %v12860_v50  ;;  %v15851_v50 = vld [vmem:[#allocation30_spill] sm:$0xff] }
 0x6b9   :  { %8259 = vmatpush1.bf16.msra.mxu0 %v12863_v48  ;;  %v8191_v48 = vrot.slane %v8189_v15, 4  ;;  %v15881_v15 = vld [vmem:[#allocation59_spill] sm:$0xff] }
 0x6ba   :  { %8345 = vmatpush1.bf16.msra.mxu1 %v12867_v32  ;;  %8260 = vmatprep.subr.bf16.mxu0 %v12869_v19  ;;  %v8194_v32 = vrot.slane %v8192_v37, 5  ;;  %v8169_v19 = vld [vmem:[#allocation2 + $0x38] sm:$0x11]  ;;  %v15882_v37 = vld [vmem:[#allocation60_spill] sm:$0xff] }
 0x6bb   :  { %8346 = vmatprep.subr.bf16.mxu1 %v12872_v34  ;;  %v15852_v34 = vld [vmem:[#allocation33_spill] sm:$0xff]  ;;  %v8198_v27 = vshll.u32 %v8169_v19, 16 }
 0x6bd   :  { %8261 = vmatpush1.bf16.msra.mxu0 %v12875_v30  ;;  %v8223_v30 = vor.u32 %v8222_v17, %v8219_v62  ;;  %v8200_v51 = vrot.slane %v8198_v27, 5  ;;  %v15883_v62 = vld [vmem:[#allocation62_spill] sm:$0xff]  ;;  %v15892_v27 = vld [vmem:[#allocation73_spill] sm:$0xff] }
 0x6be   :  { %8347 = vmatpush1.bf16.msra.mxu1 %v12879_v43  ;;  %8262 = vmatprep.subr.bf16.mxu0 %v12881_v44  ;;  %v8226_v43 = vshll.u32 %v8173_v11, 16  ;;  %v15853_v44 = vld [vmem:[#allocation31_spill] sm:$0xff] }
 0x6bf   :  { %8348 = vmatprep.subr.bf16.mxu1 %v12884_v40  ;;  %v15854_v40 = vld [vmem:[#allocation32_spill] sm:$0xff]  ;;  %v8224_v53 = vrot.slane %v8223_v30, 4 }
 0x6c0   :  { %v8228_v6 = vrot.slane %v8226_v43, 5  ;;  %v15887_v43 = vld [vmem:[#allocation66_spill] sm:$0xff] }
 0x6c1   :  { %8263 = vmatpush1.bf16.msra.mxu0 %v12887_v7  ;;  %v15855_v7 = vld [vmem:[#allocation34_spill] sm:$0xff] }
 0x6c2   :  { %8349 = vmatpush1.bf16.msra.mxu1 %v12891_v63  ;;  %8264 = vmatprep.subr.bf16.mxu0 %v15834_v25  ;;  %v8195_v63 = vor.u32 %v8194_v32, %v8191_v48  ;;  %v13649_v60 = vsel %vm10186_vm3, %v8224_v53, %v8228_v6  ;;  %v15862_v25 = vld [vmem:[#allocation40_spill] sm:$0xff]  ;;  %v15885_v32 = vld [vmem:[#allocation63_spill] sm:$0xff]  ;;  %v15895_v6 = vld [vmem:[#allocation74_spill] sm:$0xff] }
 0x6c3   :  { %8350 = vmatprep.subr.bf16.mxu1 %v15835_v54  ;;  %v15863_v54 = vld [vmem:[#allocation42_spill] sm:$0xff]  ;;  %v15894_v53 = vld [vmem:[#allocation72_spill] sm:$0xff] }
 0x6c4   :  { %v8196_v16 = vrot.slane %v8195_v63, 4  ;;  %v15891_v63 = vld [vmem:[#allocation70_spill] sm:$0xff] }
 0x6c5   :  { %8265 = vmatpush1.bf16.msra.mxu0 %v15836_v59 }
 0x6c6   :  { %8351 = vmatpush1.bf16.msra.mxu1 %v15837_v52  ;;  %8266 = vmatprep.subr.bf16.mxu0 %v15838_v39  ;;  %v13660_v59 = vsel %vm10186_vm3, %v8196_v16, %v8200_v51  ;;  %v15864_v39 = vld [vmem:[#allocation45_spill] sm:$0xff]  ;;  %v15899_v16 = vld [vmem:[#allocation78_spill] sm:$0xff]  ;;  %v15900_v51 = vld [vmem:[#allocation79_spill] sm:$0xff] }
 0x6c7   :  { %8352 = vmatprep.subr.bf16.mxu1 %v15839_v3  ;;  %v13665_v52 = vcombine.high %v13660_v59, %v13649_v60  ;;  %v15868_v3 = vld [vmem:[#allocation49_spill] sm:$0xff] }
 0x6c9   :  { %8267 = vmatpush1.bf16.msra.mxu0 %v15840_v55  ;;  %v15869_v55 = vld [vmem:[#allocation47_spill] sm:$0xff] }
 0x6ca   :  { %8353 = vmatpush1.bf16.msra.mxu1 %v15841_v14  ;;  %8268 = vmatprep.subr.bf16.mxu0 %v15842_v26  ;;  %v15870_v14 = vld [vmem:[#allocation48_spill] sm:$0xff]  ;;  %v15871_v26 = vld [vmem:[#allocation50_spill] sm:$0xff] }
 0x6cb   :  { %8354 = vmatprep.subr.bf16.mxu1 %v15843_v29  ;;  %v15873_v29 = vld [vmem:[#allocation51_spill] sm:$0xff] }
 0x6cd   :  { %8269 = vmatpush1.bf16.msra.mxu0 %v15844_v28  ;;  %v15875_v28 = vld [vmem:[#allocation54_spill] sm:$0xff] }
 0x6ce   :  { %8355 = vmatpush1.bf16.msra.mxu1 %v15845_v0  ;;  %8270 = vmatprep.subr.bf16.mxu0 %v15846_v10  ;;  %v15878_v0 = vld [vmem:[#allocation56_spill] sm:$0xff]  ;;  %v15879_v10 = vld [vmem:[#allocation58_spill] sm:$0xff] }
 0x6cf   :  { %8356 = vmatprep.subr.bf16.mxu1 %v15847_v18  ;;  %v15880_v18 = vld [vmem:[#allocation61_spill] sm:$0xff] }
 0x6d1   :  { %8271 = vmatpush1.bf16.msra.mxu0 %v15848_v1 }
 0x6d2   :  { %8357 = vmatpush1.bf16.msra.mxu1 %v15849_v41  ;;  %8272 = vmatprep.subr.bf16.mxu0 %v15850_v57 }
 0x6d3   :  { %8358 = vmatprep.subr.bf16.mxu1 %v15851_v50  ;;  %v15884_v50 = vld [vmem:[#allocation65_spill] sm:$0xff] }
 0x6d5   :  { %8273 = vmatpush1.bf16.msra.mxu0 %v15852_v34  ;;  %v15886_v34 = vld [vmem:[#allocation64_spill] sm:$0xff] }
 0x6d6   :  { %8359 = vmatpush1.bf16.msra.mxu1 %v15853_v44  ;;  %8274 = vmatprep.subr.bf16.mxu0 %v15854_v40  ;;  %v15888_v44 = vld [vmem:[#allocation69_spill] sm:$0xff]  ;;  %v15889_v40 = vld [vmem:[#allocation67_spill] sm:$0xff] }
 0x6d7   :  { %8360 = vmatprep.subr.bf16.mxu1 %v15855_v7  ;;  %v15890_v7 = vld [vmem:[#allocation68_spill] sm:$0xff] }
 0x6d9   :  { %8275 = vmatpush1.bf16.msra.mxu0 %v15856_v12  ;;  %v15893_v12 = vld [vmem:[#allocation71_spill] sm:$0xff] }
 0x6da   :  { %8361 = vmatpush1.bf16.msra.mxu1 %v15857_v8  ;;  %8276 = vmatprep.subr.bf16.mxu0 %v15858_v58  ;;  %v15896_v8 = vld [vmem:[#allocation77_spill] sm:$0xff]  ;;  %v15897_v58 = vld [vmem:[#allocation75_spill] sm:$0xff] }
 0x6db   :  { %8362 = vmatprep.subr.bf16.mxu1 %v15859_v46  ;;  %v15898_v46 = vld [vmem:[#allocation76_spill] sm:$0xff] }
 0x6dd   :  { %8277 = vmatpush1.bf16.msra.mxu0 %v15860_v47  ;;  %v15901_v47 = vld [vmem:[#allocation85_spill] sm:$0xff] }
 0x6de   :  { %8363 = vmatpush1.bf16.msra.mxu1 %v15861_v38  ;;  %8289 = vmatprep.subr.bf16.mxu0 %v15862_v25  ;;  %v15902_v38 = vld [vmem:[#allocation86_spill] sm:$0xff]  ;;  %v15903_v25 = vld [vmem:[#allocation87_spill] sm:$0xff] }
 0x6df   :  { %8375 = vmatprep.subr.bf16.mxu1 %v15863_v54  ;;  %v15904_v54 = vld [vmem:[#allocation88_spill] sm:$0xff] }
 0x6e0   :  { %8279 = vmatmul.mubr.bf16.vlgmr.msra.gmra.mrb[40].mxu0 %v13654_v56 }
 0x6e1   :  { %8365 = vmatmul.mubr.bf16.vlgmr.msra.gmra.mrb[40].mxu1 %v13654_v56  ;;  %8290 = vmatpush1.bf16.msra.mxu0 %v15864_v39  ;;  %v15905_v39 = vld [vmem:[#allocation89_spill] sm:$0xff] }
 0x6e2   :  { %8321 = vmatprep.mubr.bf16.mxu0 %v13665_v52  ;;  %8376 = vmatpush1.bf16.msra.mxu1 %v15865_v49  ;;  %v15906_v49 = vld [vmem:[#allocation90_spill] sm:$0xff] }
 0x6e3   :  { %8407 = vmatprep.mubr.bf16.mxu1 %v13665_v52  ;;  %8291 = vmatprep.subr.bf16.mxu0 %v15866_v24  ;;  %v15907_v24 = vld [vmem:[#allocation91_spill] sm:$0xff] }
 0x6e4   :  { %8377 = vmatprep.subr.bf16.mxu1 %v15867_v2  ;;  %v15908_v2 = vld [vmem:[#allocation92_spill] sm:$0xff] }
 0x6e5   :  { %8292 = vmatpush1.bf16.msra.mxu0 %v15868_v3  ;;  %v15909_v3 = vld [vmem:[#allocation93_spill] sm:$0xff] }
 0x6e6   :  { %8378 = vmatpush1.bf16.msra.mxu1 %v15869_v55  ;;  %8293 = vmatprep.subr.bf16.mxu0 %v15870_v14  ;;  %v15910_v55 = vld [vmem:[#allocation94_spill] sm:$0xff]  ;;  %v15911_v14 = vld [vmem:[#allocation95_spill] sm:$0xff] }
 0x6e7   :  { %8379 = vmatprep.subr.bf16.mxu1 %v15871_v26  ;;  %v15912_v26 = vld [vmem:[#allocation96_spill] sm:$0xff] }
 0x6e9   :  { %8294 = vmatpush1.bf16.msra.mxu0 %v15872_v21  ;;  %v15913_v21 = vld [vmem:[#allocation97_spill] sm:$0xff] }
 0x6ea   :  { %8380 = vmatpush1.bf16.msra.mxu1 %v15873_v29  ;;  %8295 = vmatprep.subr.bf16.mxu0 %v15874_v61  ;;  %v15914_v29 = vld [vmem:[#allocation98_spill] sm:$0xff]  ;;  %v15915_v61 = vld [vmem:[#allocation99_spill] sm:$0xff] }
 0x6eb   :  { %8381 = vmatprep.subr.bf16.mxu1 %v15875_v28  ;;  %v15916_v28 = vld [vmem:[#allocation100_spill] sm:$0xff] }
 0x6ed   :  { %8296 = vmatpush1.bf16.msra.mxu0 %v15876_v35  ;;  %v15917_v35 = vld [vmem:[#allocation101_spill] sm:$0xff] }
 0x6ee   :  { %8382 = vmatpush1.bf16.msra.mxu1 %v15877_v4  ;;  %8297 = vmatprep.subr.bf16.mxu0 %v15878_v0  ;;  %v15918_v4 = vld [vmem:[#allocation102_spill] sm:$0xff]  ;;  %v15919_v0 = vld [vmem:[#allocation103_spill] sm:$0xff] }
 0x6ef   :  { %8383 = vmatprep.subr.bf16.mxu1 %v15879_v10  ;;  %v15920_v10 = vld [vmem:[#allocation104_spill] sm:$0xff] }
 0x6f1   :  { %8298 = vmatpush1.bf16.msra.mxu0 %v15880_v18  ;;  %v15921_v18 = vld [vmem:[#allocation105_spill] sm:$0xff] }
 0x6f2   :  { %8384 = vmatpush1.bf16.msra.mxu1 %v15881_v15  ;;  %8299 = vmatprep.subr.bf16.mxu0 %v15882_v37  ;;  %v15922_v15 = vld [vmem:[#allocation106_spill] sm:$0xff]  ;;  %v15923_v37 = vld [vmem:[#allocation107_spill] sm:$0xff] }
 0x6f3   :  { %v13689_v1 = vpop.f32.mrb[32].mxu0  ;;  %8385 = vmatprep.subr.bf16.mxu1 %v15883_v62  ;;  %v15924_v62 = vld [vmem:[#allocation108_spill] sm:$0xff] }
 0x6f4   :  { %v13692_v17 = vpop.f32.mrb[32].mxu1  ;;  %v13694_v41 = vpop.f32.mrb[33].mxu0 }
 0x6f5   :  { %v13696_v57 = vpop.f32.mrb[33].mxu1  ;;  %v13698_v11 = vpop.f32.mrb[34].mxu0  ;;  %8300 = vmatpush1.bf16.msra.mxu0 %v15884_v50  ;;  %v15925_v50 = vld [vmem:[#allocation109_spill] sm:$0xff] }
 0x6f6   :  { %v13701_v48 = vpop.f32.mrb[34].mxu1  ;;  %8386 = vmatpush1.bf16.msra.mxu1 %v15885_v32  ;;  %v13704_v19 = vpop.f32.mrb[35].mxu0  ;;  %8301 = vmatprep.subr.bf16.mxu0 %v15886_v34  ;;  %v13750_v32 = vcombine.low %v13660_v59, %v13649_v60  ;;  %v15926_v34 = vld [vmem:[#allocation110_spill] sm:$0xff]  ;;  %v15931_v60 = vld [vmem:[#allocation115_spill] sm:$0xff]  ;;  %v15932_v59 = vld [vmem:[#allocation116_spill] sm:$0xff] }
 0x6f7   :  { %v13707_v30 = vpop.f32.mrb[35].mxu1  ;;  %8387 = vmatprep.subr.bf16.mxu1 %v15887_v43  ;;  %v15927_v43 = vld [vmem:[#allocation111_spill] sm:$0xff] }
 0x6f9   :  { %8302 = vmatpush1.bf16.msra.mxu0 %v15888_v44  ;;  %v15928_v44 = vld [vmem:[#allocation112_spill] sm:$0xff] }
 0x6fa   :  { %8388 = vmatpush1.bf16.msra.mxu1 %v15889_v40  ;;  %8303 = vmatprep.subr.bf16.mxu0 %v15890_v7  ;;  %v15929_v40 = vld [vmem:[#allocation113_spill] sm:$0xff]  ;;  %v15930_v7 = vld [vmem:[#allocation114_spill] sm:$0xff] }
 0x6fb   :  { %8389 = vmatprep.subr.bf16.mxu1 %v15891_v63  ;;  %v15933_v63 = vld [vmem:[#allocation117_spill] sm:$0xff] }
 0x6fd   :  { %8304 = vmatpush1.bf16.msra.mxu0 %v15892_v27  ;;  %v15934_v27 = vld [vmem:[#allocation118_spill] sm:$0xff] }
 0x6fe   :  { %8390 = vmatpush1.bf16.msra.mxu1 %v15893_v12  ;;  %8305 = vmatprep.subr.bf16.mxu0 %v15894_v53  ;;  %v15935_v12 = vld [vmem:[#allocation119_spill] sm:$0xff]  ;;  %v15936_v53 = vld [vmem:[#allocation120_spill] sm:$0xff] }
 0x6ff   :  { %8391 = vmatprep.subr.bf16.mxu1 %v15895_v6  ;;  %v15937_v6 = vld [vmem:[#allocation121_spill] sm:$0xff] }
 0x701   :  { %8306 = vmatpush1.bf16.msra.mxu0 %v15896_v8  ;;  %v15938_v8 = vld [vmem:[#allocation122_spill] sm:$0xff] }
 0x702   :  { %8392 = vmatpush1.bf16.msra.mxu1 %v15897_v58  ;;  %8307 = vmatprep.subr.bf16.mxu0 %v15898_v46  ;;  %v15939_v58 = vld [vmem:[#allocation123_spill] sm:$0xff]  ;;  %v15941_v46 = vld [vmem:[#allocation125_spill] sm:$0xff] }
 0x703   :  { %8393 = vmatprep.subr.bf16.mxu1 %v15899_v16  ;;  %v15942_v16 = vld [vmem:[#allocation126_spill] sm:$0xff] }
 0x705   :  { %8308 = vmatpush1.bf16.msra.mxu0 %v15900_v51  ;;  %v15943_v51 = vld [vmem:[#allocation127_spill] sm:$0xff] }
 0x706   :  { %8394 = vmatpush1.bf16.msra.mxu1 %v15901_v47  ;;  %8309 = vmatprep.subr.bf16.mxu0 %v15902_v38  ;;  %v15944_v47 = vld [vmem:[#allocation128_spill] sm:$0xff]  ;;  %v15945_v38 = vld [vmem:[#allocation129_spill] sm:$0xff] }
 0x707   :  { %8395 = vmatprep.subr.bf16.mxu1 %v15903_v25  ;;  %v15946_v25 = vld [vmem:[#allocation130_spill] sm:$0xff] }
 0x709   :  { %8310 = vmatpush1.bf16.msra.mxu0 %v15904_v54  ;;  %v15947_v54 = vld [vmem:[#allocation131_spill] sm:$0xff] }
 0x70a   :  { %8396 = vmatpush1.bf16.msra.mxu1 %v15905_v39  ;;  %8311 = vmatprep.subr.bf16.mxu0 %v15906_v49  ;;  %v15948_v39 = vld [vmem:[#allocation132_spill] sm:$0xff]  ;;  %v15949_v49 = vld [vmem:[#allocation133_spill] sm:$0xff] }
 0x70b   :  { %8397 = vmatprep.subr.bf16.mxu1 %v15907_v24  ;;  %v15950_v24 = vld [vmem:[#allocation134_spill] sm:$0xff] }
 0x70d   :  { %8312 = vmatpush1.bf16.msra.mxu0 %v15908_v2  ;;  %v15951_v2 = vld [vmem:[#allocation135_spill] sm:$0xff] }
 0x70e   :  { %8398 = vmatpush1.bf16.msra.mxu1 %v15909_v3  ;;  %8313 = vmatprep.subr.bf16.mxu0 %v15910_v55  ;;  %v15952_v3 = vld [vmem:[#allocation136_spill] sm:$0xff]  ;;  %v15953_v55 = vld [vmem:[#allocation137_spill] sm:$0xff] }
 0x70f   :  { %8399 = vmatprep.subr.bf16.mxu1 %v15911_v14  ;;  %v15954_v14 = vld [vmem:[#allocation138_spill] sm:$0xff] }
 0x711   :  { %8314 = vmatpush1.bf16.msra.mxu0 %v15912_v26  ;;  %v15955_v26 = vld [vmem:[#allocation139_spill] sm:$0xff] }
 0x712   :  { %8400 = vmatpush1.bf16.msra.mxu1 %v15913_v21  ;;  %8315 = vmatprep.subr.bf16.mxu0 %v15914_v29  ;;  %v15956_v21 = vld [vmem:[#allocation140_spill] sm:$0xff]  ;;  %v15957_v29 = vld [vmem:[#allocation141_spill] sm:$0xff] }
 0x713   :  { %8401 = vmatprep.subr.bf16.mxu1 %v15915_v61  ;;  %v15958_v61 = vld [vmem:[#allocation142_spill] sm:$0xff] }
 0x715   :  { %8316 = vmatpush1.bf16.msra.mxu0 %v15916_v28  ;;  %v15959_v28 = vld [vmem:[#allocation143_spill] sm:$0xff] }
 0x716   :  { %8402 = vmatpush1.bf16.msra.mxu1 %v15917_v35  ;;  %8317 = vmatprep.subr.bf16.mxu0 %v15918_v4  ;;  %v15960_v35 = vld [vmem:[#allocation144_spill] sm:$0xff]  ;;  %v15961_v4 = vld [vmem:[#allocation145_spill] sm:$0xff] }
 0x717   :  { %8403 = vmatprep.subr.bf16.mxu1 %v15919_v0  ;;  %v15962_v0 = vld [vmem:[#allocation146_spill] sm:$0xff] }
 0x719   :  { %8318 = vmatpush1.bf16.msra.mxu0 %v15920_v10  ;;  %v15963_v10 = vld [vmem:[#allocation147_spill] sm:$0xff] }
 0x71a   :  { %8404 = vmatpush1.bf16.msra.mxu1 %v15921_v18  ;;  %8319 = vmatprep.subr.bf16.mxu0 %v15922_v15  ;;  %v15964_v18 = vld [vmem:[#allocation148_spill] sm:$0xff]  ;;  %v15965_v15 = vld [vmem:[#allocation149_spill] sm:$0xff] }
 0x71b   :  { %8405 = vmatprep.subr.bf16.mxu1 %v15923_v37  ;;  %v15966_v37 = vld [vmem:[#allocation150_spill] sm:$0xff] }
 0x71d   :  { %8320 = vmatpush1.bf16.msra.mxu0 %v15924_v62  ;;  %v15967_v62 = vld [vmem:[#allocation151_spill] sm:$0xff] }
 0x71e   :  { %8406 = vmatpush1.bf16.msra.mxu1 %v15925_v50  ;;  %8418 = vmatprep.subr.bf16.mxu0 %v15926_v34  ;;  %v15968_v50 = vld [vmem:[#allocation152_spill] sm:$0xff]  ;;  %v15969_v34 = vld [vmem:[#allocation153_spill] sm:$0xff] }
 0x71f   :  { %8504 = vmatprep.subr.bf16.mxu1 %v15927_v43  ;;  %v15970_v43 = vld [vmem:[#allocation154_spill] sm:$0xff] }
 0x720   :  { %8322 = vmatmul.mubr.bf16.vlgmr.msra.gmra.mrb[40].mxu0 %v13750_v32 }
 0x721   :  { %8408 = vmatmul.mubr.bf16.vlgmr.msra.gmra.mrb[40].mxu1 %v13750_v32  ;;  %8419 = vmatpush1.bf16.msra.mxu0 %v15928_v44  ;;  %v15971_v44 = vld [vmem:[#allocation155_spill] sm:$0xff] }
 0x722   :  { %8450 = vmatprep.mubr.bf16.mxu0 %v13581_v9  ;;  %8505 = vmatpush1.bf16.msra.mxu1 %v15929_v40  ;;  %v15972_v40 = vld [vmem:[#allocation156_spill] sm:$0xff] }
 0x723   :  { %8536 = vmatprep.mubr.bf16.mxu1 %v13581_v9  ;;  %8420 = vmatprep.subr.bf16.mxu0 %v15930_v7  ;;  %v15940_v9 = vld [vmem:[#allocation124_spill] sm:$0xff]  ;;  %v15973_v7 = vld [vmem:[#allocation157_spill] sm:$0xff] }
 0x724   :  { %8506 = vmatprep.subr.bf16.mxu1 %v15931_v60  ;;  %v15974_v60 = vld [vmem:[#allocation158_spill] sm:$0xff] }
 0x725   :  { %8421 = vmatpush1.bf16.msra.mxu0 %v15932_v59  ;;  %v15975_v59 = vld [vmem:[#allocation159_spill] sm:$0xff] }
 0x726   :  { %8507 = vmatpush1.bf16.msra.mxu1 %v15933_v63  ;;  %8422 = vmatprep.subr.bf16.mxu0 %v15934_v27  ;;  %v15976_v63 = vld [vmem:[#allocation160_spill] sm:$0xff]  ;;  %v15977_v27 = vld [vmem:[#allocation161_spill] sm:$0xff] }
 0x727   :  { %8508 = vmatprep.subr.bf16.mxu1 %v15935_v12  ;;  %v15978_v12 = vld [vmem:[#allocation162_spill] sm:$0xff] }
 0x729   :  { %8423 = vmatpush1.bf16.msra.mxu0 %v15936_v53  ;;  %v15979_v53 = vld [vmem:[#allocation163_spill] sm:$0xff] }
 0x72a   :  { %8509 = vmatpush1.bf16.msra.mxu1 %v15937_v6  ;;  %8424 = vmatprep.subr.bf16.mxu0 %v15938_v8  ;;  %v15980_v6 = vld [vmem:[#allocation164_spill] sm:$0xff]  ;;  %v15981_v8 = vld [vmem:[#allocation165_spill] sm:$0xff] }
 0x72b   :  { %8510 = vmatprep.subr.bf16.mxu1 %v15939_v58  ;;  %v15982_v58 = vld [vmem:[#allocation166_spill] sm:$0xff] }
 0x72d   :  { %8425 = vmatpush1.bf16.msra.mxu0 %v15940_v9  ;;  %v15983_v9 = vld [vmem:[#allocation167_spill] sm:$0xff] }
 0x72e   :  { %8511 = vmatpush1.bf16.msra.mxu1 %v15941_v46  ;;  %8426 = vmatprep.subr.bf16.mxu0 %v15942_v16  ;;  %v15984_v46 = vld [vmem:[#allocation168_spill] sm:$0xff]  ;;  %v15985_v16 = vld [vmem:[#allocation169_spill] sm:$0xff] }
 0x72f   :  { %8512 = vmatprep.subr.bf16.mxu1 %v15943_v51  ;;  %v15986_v51 = vld [vmem:[#allocation170_spill] sm:$0xff] }
 0x731   :  { %8427 = vmatpush1.bf16.msra.mxu0 %v15944_v47  ;;  %v15987_v47 = vld [vmem:[#allocation171_spill] sm:$0xff] }
 0x732   :  { %8513 = vmatpush1.bf16.msra.mxu1 %v15945_v38  ;;  %8428 = vmatprep.subr.bf16.mxu0 %v15946_v25  ;;  %v15988_v38 = vld [vmem:[#allocation172_spill] sm:$0xff]  ;;  %v15989_v25 = vld [vmem:[#allocation173_spill] sm:$0xff] }
 0x733   :  { %8514 = vmatprep.subr.bf16.mxu1 %v15947_v54  ;;  %v15990_v54 = vld [vmem:[#allocation174_spill] sm:$0xff] }
 0x735   :  { %8429 = vmatpush1.bf16.msra.mxu0 %v15948_v39  ;;  %v15991_v39 = vld [vmem:[#allocation175_spill] sm:$0xff] }
 0x736   :  { %8515 = vmatpush1.bf16.msra.mxu1 %v15949_v49  ;;  %8430 = vmatprep.subr.bf16.mxu0 %v15950_v24  ;;  %v15992_v49 = vld [vmem:[#allocation176_spill] sm:$0xff]  ;;  %v15993_v24 = vld [vmem:[#allocation177_spill] sm:$0xff] }
 0x737   :  { %8516 = vmatprep.subr.bf16.mxu1 %v15951_v2  ;;  %v15994_v2 = vld [vmem:[#allocation178_spill] sm:$0xff] }
 0x739   :  { %8431 = vmatpush1.bf16.msra.mxu0 %v15952_v3  ;;  %v15995_v3 = vld [vmem:[#allocation179_spill] sm:$0xff] }
 0x73a   :  { %8517 = vmatpush1.bf16.msra.mxu1 %v15953_v55  ;;  %8432 = vmatprep.subr.bf16.mxu0 %v15954_v14  ;;  %v15996_v55 = vld [vmem:[#allocation180_spill] sm:$0xff]  ;;  %v15997_v14 = vld [vmem:[#allocation181_spill] sm:$0xff] }
 0x73b   :  { %8518 = vmatprep.subr.bf16.mxu1 %v15955_v26  ;;  %v15998_v26 = vld [vmem:[#allocation182_spill] sm:$0xff] }
 0x73d   :  { %8433 = vmatpush1.bf16.msra.mxu0 %v15956_v21  ;;  %v15999_v21 = vld [vmem:[#allocation183_spill] sm:$0xff] }
 0x73e   :  { %8519 = vmatpush1.bf16.msra.mxu1 %v15957_v29  ;;  %8434 = vmatprep.subr.bf16.mxu0 %v15958_v61  ;;  %v16001_v29 = vld [vmem:[#allocation185_spill] sm:$0xff]  ;;  %v16002_v61 = vld [vmem:[#allocation186_spill] sm:$0xff] }
 0x73f   :  { %8520 = vmatprep.subr.bf16.mxu1 %v15959_v28  ;;  %v16003_v28 = vld [vmem:[#allocation187_spill] sm:$0xff] }
 0x741   :  { %8435 = vmatpush1.bf16.msra.mxu0 %v15960_v35  ;;  %v16005_v35 = vld [vmem:[#allocation189_spill] sm:$0xff] }
 0x742   :  { %8521 = vmatpush1.bf16.msra.mxu1 %v15961_v4  ;;  %8436 = vmatprep.subr.bf16.mxu0 %v15962_v0  ;;  %v16006_v4 = vld [vmem:[#allocation190_spill] sm:$0xff]  ;;  %v16007_v0 = vld [vmem:[#allocation191_spill] sm:$0xff] }
 0x743   :  { %8522 = vmatprep.subr.bf16.mxu1 %v15963_v10  ;;  %v16008_v10 = vld [vmem:[#allocation192_spill] sm:$0xff] }
 0x745   :  { %8437 = vmatpush1.bf16.msra.mxu0 %v15964_v18  ;;  %v16009_v18 = vld [vmem:[#allocation193_spill] sm:$0xff] }
 0x746   :  { %8523 = vmatpush1.bf16.msra.mxu1 %v15965_v15  ;;  %8438 = vmatprep.subr.bf16.mxu0 %v15966_v37  ;;  %v16010_v15 = vld [vmem:[#allocation194_spill] sm:$0xff] }
 0x747   :  { %8524 = vmatprep.subr.bf16.mxu1 %v15967_v62  ;;  %v16011_v62 = vld [vmem:[#allocation195_spill] sm:$0xff] }
 0x749   :  { %8439 = vmatpush1.bf16.msra.mxu0 %v15968_v50 }
 0x74a   :  { %8525 = vmatpush1.bf16.msra.mxu1 %v15969_v34  ;;  %8440 = vmatprep.subr.bf16.mxu0 %v15970_v43 }
 0x74b   :  { %8526 = vmatprep.subr.bf16.mxu1 %v15971_v44 }
 0x74d   :  { %8441 = vmatpush1.bf16.msra.mxu0 %v15972_v40  ;;  %v16012_v40 = vld [vmem:[#allocation196_spill] sm:$0xff] }
 0x74e   :  { %8527 = vmatpush1.bf16.msra.mxu1 %v15973_v7  ;;  %8442 = vmatprep.subr.bf16.mxu0 %v15974_v60  ;;  %v16013_v60 = vld [vmem:[#allocation197_spill] sm:$0xff] }
 0x74f   :  { %8528 = vmatprep.subr.bf16.mxu1 %v15975_v59 }
 0x751   :  { %8443 = vmatpush1.bf16.msra.mxu0 %v15976_v63  ;;  %v16014_v63 = vld [vmem:[#allocation198_spill] sm:$0xff] }
 0x752   :  { %8529 = vmatpush1.bf16.msra.mxu1 %v15977_v27  ;;  %8444 = vmatprep.subr.bf16.mxu0 %v15978_v12  ;;  %v16015_v12 = vld [vmem:[#allocation199_spill] sm:$0xff] }
 0x753   :  { %8530 = vmatprep.subr.bf16.mxu1 %v15979_v53  ;;  %v16016_v53 = vld [vmem:[#allocation200_spill] sm:$0xff] }
 0x755   :  { %8445 = vmatpush1.bf16.msra.mxu0 %v15980_v6  ;;  %v16017_v6 = vld [vmem:[#allocation201_spill] sm:$0xff] }
 0x756   :  { %8531 = vmatpush1.bf16.msra.mxu1 %v15981_v8  ;;  %8446 = vmatprep.subr.bf16.mxu0 %v15982_v58  ;;  %v16018_v8 = vld [vmem:[#allocation202_spill] sm:$0xff]  ;;  %v16019_v58 = vld [vmem:[#allocation203_spill] sm:$0xff] }
 0x757   :  { %8532 = vmatprep.subr.bf16.mxu1 %v15983_v9  ;;  %v16020_v9 = vld [vmem:[#allocation204_spill] sm:$0xff] }
 0x759   :  { %8447 = vmatpush1.bf16.msra.mxu0 %v15984_v46  ;;  %v16021_v46 = vld [vmem:[#allocation205_spill] sm:$0xff] }
 0x75a   :  { %8533 = vmatpush1.bf16.msra.mxu1 %v15985_v16  ;;  %8448 = vmatprep.subr.bf16.mxu0 %v15986_v51  ;;  %v16022_v16 = vld [vmem:[#allocation206_spill] sm:$0xff]  ;;  %v16023_v51 = vld [vmem:[#allocation207_spill] sm:$0xff] }
 0x75b   :  { %8534 = vmatprep.subr.bf16.mxu1 %v15987_v47  ;;  %v16024_v47 = vld [vmem:[#allocation208_spill] sm:$0xff] }
 0x75d   :  { %8449 = vmatpush1.bf16.msra.mxu0 %v15988_v38  ;;  %v16025_v38 = vld [vmem:[#allocation209_spill] sm:$0xff] }
 0x75e   :  { %8535 = vmatpush1.bf16.msra.mxu1 %v15989_v25  ;;  %8461 = vmatprep.subr.bf16.mxu0 %v15990_v54  ;;  %v16026_v25 = vld [vmem:[#allocation210_spill] sm:$0xff]  ;;  %v16027_v54 = vld [vmem:[#allocation211_spill] sm:$0xff] }
 0x75f   :  { %8547 = vmatprep.subr.bf16.mxu1 %v15991_v39  ;;  %v16028_v39 = vld [vmem:[#allocation212_spill] sm:$0xff] }
 0x760   :  { %8451 = vmatmul.mubr.bf16.vlgmr.msra.gmra.mrb[44].mxu0 %v13654_v56 }
 0x761   :  { %8537 = vmatmul.mubr.bf16.vlgmr.msra.gmra.mrb[44].mxu1 %v13654_v56  ;;  %8462 = vmatpush1.bf16.msra.mxu0 %v15992_v49  ;;  %v16000_v56 = vld [vmem:[#allocation184_spill] sm:$0xff]  ;;  %v16029_v49 = vld [vmem:[#allocation213_spill] sm:$0xff] }
 0x762   :  { %8493 = vmatprep.mubr.bf16.mxu0 %v13665_v52  ;;  %8548 = vmatpush1.bf16.msra.mxu1 %v15993_v24  ;;  %v16030_v24 = vld [vmem:[#allocation214_spill] sm:$0xff] }
 0x763   :  { %8579 = vmatprep.mubr.bf16.mxu1 %v13665_v52  ;;  %8463 = vmatprep.subr.bf16.mxu0 %v15994_v2  ;;  %v16004_v52 = vld [vmem:[#allocation188_spill] sm:$0xff]  ;;  %v16031_v2 = vld [vmem:[#allocation215_spill] sm:$0xff] }
 0x764   :  { %8549 = vmatprep.subr.bf16.mxu1 %v15995_v3  ;;  %v16032_v3 = vld [vmem:[#allocation216_spill] sm:$0xff] }
 0x765   :  { %8464 = vmatpush1.bf16.msra.mxu0 %v15996_v55  ;;  %v16033_v55 = vld [vmem:[#allocation217_spill] sm:$0xff] }
 0x766   :  { %8550 = vmatpush1.bf16.msra.mxu1 %v15997_v14  ;;  %8465 = vmatprep.subr.bf16.mxu0 %v15998_v26  ;;  %v16034_v14 = vld [vmem:[#allocation218_spill] sm:$0xff]  ;;  %v16035_v26 = vld [vmem:[#allocation219_spill] sm:$0xff] }
 0x767   :  { %8551 = vmatprep.subr.bf16.mxu1 %v15999_v21  ;;  %v16036_v21 = vld [vmem:[#allocation220_spill] sm:$0xff] }
 0x769   :  { %8466 = vmatpush1.bf16.msra.mxu0 %v16000_v56  ;;  %v16037_v56 = vld [vmem:[#allocation221_spill] sm:$0xff] }
 0x76a   :  { %8552 = vmatpush1.bf16.msra.mxu1 %v16001_v29  ;;  %8467 = vmatprep.subr.bf16.mxu0 %v16002_v61  ;;  %v16038_v29 = vld [vmem:[#allocation222_spill] sm:$0xff]  ;;  %v16039_v61 = vld [vmem:[#allocation223_spill] sm:$0xff] }
 0x76b   :  { %8553 = vmatprep.subr.bf16.mxu1 %v16003_v28  ;;  %v16040_v28 = vld [vmem:[#allocation224_spill] sm:$0xff] }
 0x76d   :  { %8468 = vmatpush1.bf16.msra.mxu0 %v16004_v52  ;;  %v16041_v52 = vld [vmem:[#allocation225_spill] sm:$0xff] }
 0x76e   :  { %8554 = vmatpush1.bf16.msra.mxu1 %v16005_v35  ;;  %8469 = vmatprep.subr.bf16.mxu0 %v16006_v4  ;;  %v16042_v35 = vld [vmem:[#allocation226_spill] sm:$0xff]  ;;  %v16043_v4 = vld [vmem:[#allocation227_spill] sm:$0xff] }
 0x76f   :  { %8555 = vmatprep.subr.bf16.mxu1 %v16007_v0 }
 0x771   :  { %8470 = vmatpush1.bf16.msra.mxu0 %v16008_v10 }
 0x772   :  { %8556 = vmatpush1.bf16.msra.mxu1 %v16009_v18  ;;  %8471 = vmatprep.subr.bf16.mxu0 %v16010_v15 }
 0x773   :  { %v13845_v37 = vpop.f32.mrb[36].mxu0  ;;  %8557 = vmatprep.subr.bf16.mxu1 %v16011_v62  ;;  %v8630_v62 = vld [vmem:[#allocation8] sm:$0xf] }
 0x774   :  { %v13848_v50 = vpop.f32.mrb[36].mxu1  ;;  %v13850_v34 = vpop.f32.mrb[37].mxu0 }
 0x775   :  { %v13852_v43 = vpop.f32.mrb[37].mxu1  ;;  %v13854_v44 = vpop.f32.mrb[38].mxu0  ;;  %8472 = vmatpush1.bf16.msra.mxu0 %v16012_v40 }
 0x776   :  { %v13857_v7 = vpop.f32.mrb[38].mxu1  ;;  %8558 = vmatpush1.bf16.msra.mxu1 %v16013_v60  ;;  %v13860_v59 = vpop.f32.mrb[39].mxu0  ;;  %8473 = vmatprep.subr.bf16.mxu0 %v16014_v63 }
 0x777   :  { %v13863_v27 = vpop.f32.mrb[39].mxu1  ;;  %8559 = vmatprep.subr.bf16.mxu1 %v16015_v12 }
 0x779   :  { %8474 = vmatpush1.bf16.msra.mxu0 %v16016_v53 }
 0x77a   :  { %8560 = vmatpush1.bf16.msra.mxu1 %v16017_v6  ;;  %8475 = vmatprep.subr.bf16.mxu0 %v16018_v8 }
 0x77b   :  { %8561 = vmatprep.subr.bf16.mxu1 %v16019_v58 }
 0x77d   :  { %8476 = vmatpush1.bf16.msra.mxu0 %v16020_v9 }
 0x77e   :  { %8562 = vmatpush1.bf16.msra.mxu1 %v16021_v46  ;;  %8477 = vmatprep.subr.bf16.mxu0 %v16022_v16 }
 0x77f   :  { %8563 = vmatprep.subr.bf16.mxu1 %v16023_v51 }
 0x781   :  { %8478 = vmatpush1.bf16.msra.mxu0 %v16024_v47 }
 0x782   :  { %8564 = vmatpush1.bf16.msra.mxu1 %v16025_v38  ;;  %8479 = vmatprep.subr.bf16.mxu0 %v16026_v25 }
 0x783   :  { %8565 = vmatprep.subr.bf16.mxu1 %v16027_v54 }
 0x785   :  { %8480 = vmatpush1.bf16.msra.mxu0 %v16028_v39 }
 0x786   :  { %8566 = vmatpush1.bf16.msra.mxu1 %v16029_v49  ;;  %8481 = vmatprep.subr.bf16.mxu0 %v16030_v24 }
 0x787   :  { %8567 = vmatprep.subr.bf16.mxu1 %v16031_v2 }
 0x789   :  { %8482 = vmatpush1.bf16.msra.mxu0 %v16032_v3 }
 0x78a   :  { %8568 = vmatpush1.bf16.msra.mxu1 %v16033_v55  ;;  %8483 = vmatprep.subr.bf16.mxu0 %v16034_v14 }
 0x78b   :  { %8569 = vmatprep.subr.bf16.mxu1 %v16035_v26 }
 0x78d   :  { %8484 = vmatpush1.bf16.msra.mxu0 %v16036_v21 }
 0x78e   :  { %8570 = vmatpush1.bf16.msra.mxu1 %v16037_v56  ;;  %8485 = vmatprep.subr.bf16.mxu0 %v16038_v29 }
 0x78f   :  { %8571 = vmatprep.subr.bf16.mxu1 %v16039_v61 }
 0x791   :  { %8486 = vmatpush1.bf16.msra.mxu0 %v16040_v28 }
 0x792   :  { %8572 = vmatpush1.bf16.msra.mxu1 %v16041_v52  ;;  %8487 = vmatprep.subr.bf16.mxu0 %v16042_v35 }
 0x793   :  { %8573 = vmatprep.subr.bf16.mxu1 %v16043_v4 }
 0x795   :  { %8488 = vmatpush1.bf16.msra.mxu0 %v13535_v23 }
 0x796   :  { %8574 = vmatpush1.bf16.msra.mxu1 %v13539_v31  ;;  %8489 = vmatprep.subr.bf16.mxu0 %v13541_v20 }
 0x797   :  { %8575 = vmatprep.subr.bf16.mxu1 %v13544_v42 }
 0x799   :  { %8490 = vmatpush1.bf16.msra.mxu0 %v13547_v5 }
 0x79a   :  { %8576 = vmatpush1.bf16.msra.mxu1 %v13551_v36  ;;  %8491 = vmatprep.subr.bf16.mxu0 %v13553_v13 }
 0x79b   :  { %8577 = vmatprep.subr.bf16.mxu1 %v13556_v22 }
 0x79d   :  { %8492 = vmatpush1.bf16.msra.mxu0 %v13559_v33 }
 0x79e   :  { %8578 = vmatpush1.bf16.msra.mxu1 %v13563_v45 }
 0x7a0   :  { %8494 = vmatmul.mubr.bf16.vlgmr.msra.gmra.mrb[44].mxu0 %v13750_v32 }
 0x7a1   :  { %8580 = vmatmul.mubr.bf16.vlgmr.msra.gmra.mrb[44].mxu1 %v13750_v32 }
 0x7f3   :  { %v8323_v23 = vpop.f32.mrb[40].mxu0 }
 0x7f4   :  { %v8606_v31 = vmax.f32 %v13689_v1, %v8323_v23  ;;  %v8409_v20 = vpop.f32.mrb[40].mxu1  ;;  %v8325_v42 = vpop.f32.mrb[41].mxu0 }
 0x7f5   :  { %v8608_v5 = vmax.f32 %v13692_v17, %v8409_v20  ;;  %v8607_v36 = vmax.f32 %v13694_v41, %v8325_v42  ;;  %v8411_v13 = vpop.f32.mrb[41].mxu1  ;;  %v8327_v0 = vpop.f32.mrb[42].mxu0  ;;  %v16044_v41 = vld [vmem:[#allocation80_spill] sm:$0xff] }
 0x7f6   :  { %v8609_v22 = vmax.f32 %v13696_v57, %v8411_v13  ;;  %v8614_v33 = vmax.f32 %v13698_v11, %v8327_v0  ;;  %v8413_v45 = vpop.f32.mrb[42].mxu1  ;;  %v8329_v10 = vpop.f32.mrb[43].mxu0  ;;  %v16045_v60 = vsub.s32 0, %v16044_v41  ;;  %v16046_v53 = vsub.s32 2, %v16044_v41 }
 0x7f7   :  { %v8616_v18 = vmax.f32 %v13701_v48, %v8413_v45  ;;  %v8615_v32 = vmax.f32 %v13704_v19, %v8329_v10  ;;  %v8415_v15 = vpop.f32.mrb[43].mxu1  ;;  %v16047_v19 = vsub.s32 1, %v16044_v41  ;;  %v16048_v46 = vsub.s32 3, %v16044_v41 }
 0x7f8   :  { %v8617_v1 = vmax.f32 %v13707_v30, %v8415_v15  ;;  %v8635_v63 = vrot.slane %v8630_v62, %v16045_v60  ;;  %v8643_v6 = vrot.slane %v8630_v62, %v16046_v53 }
 0x7f9   :  { %v8639_v8 = vrot.slane %v8630_v62, %v16047_v19  ;;  %v8647_v16 = vrot.slane %v8630_v62, %v16048_v46 }
 0x873   :  { %v8495_v40 = vpop.f32.mrb[44].mxu0 }
 0x874   :  { %v8610_v17 = vmax.f32 %v13845_v37, %v8495_v40  ;;  %v8581_v12 = vpop.f32.mrb[44].mxu1  ;;  %v8497_v57 = vpop.f32.mrb[45].mxu0 }
 0x875   :  { %v8612_v11 = vmax.f32 %v13848_v50, %v8581_v12  ;;  %v8611_v48 = vmax.f32 %v13850_v34, %v8497_v57  ;;  %v8583_v30 = vpop.f32.mrb[45].mxu1  ;;  %v8499_v58 = vpop.f32.mrb[46].mxu0 }
 0x876   :  { %v8622_v9 = vmax.f32 %v8606_v31, %v8610_v17  ;;  %v8613_v37 = vmax.f32 %v13852_v43, %v8583_v30  ;;  %v8618_v51 = vmax.f32 %v13854_v44, %v8499_v58  ;;  %v8585_v47 = vpop.f32.mrb[46].mxu1  ;;  %v8501_v50 = vpop.f32.mrb[47].mxu0 }
 0x877   :  { %v8624_v38 = vmax.f32 %v8608_v5, %v8612_v11  ;;  %v8623_v25 = vmax.f32 %v8607_v36, %v8611_v48  ;;  %v8620_v54 = vmax.f32 %v13857_v7, %v8585_v47  ;;  %v8619_v34 = vmax.f32 %v13860_v59, %v8501_v50  ;;  %v8587_v39 = vpop.f32.mrb[47].mxu1 }
 0x878   :  { %v8652_v49 = vadd.f32 %v8635_v63, %v8622_v9  ;;  %v8625_v24 = vmax.f32 %v8609_v22, %v8613_v37  ;;  %v8626_v2 = vmax.f32 %v8614_v33, %v8618_v51  ;;  %v8621_v3 = vmax.f32 %v13863_v27, %v8587_v39 }
 0x879   :  { %v8654_v43 = vadd.f32 %v8643_v6, %v8624_v38  ;;  %v8653_v55 = vadd.f32 %v8639_v8, %v8623_v25  ;;  %v8628_v14 = vmax.f32 %v8616_v18, %v8620_v54  ;;  %v8627_v26 = vmax.f32 %v8615_v32, %v8619_v34 }
 0x87a   :  { %v8660_v21 = vmax.f32 %v8652_v49, 0.0  ;;  %v8655_v44 = vadd.f32 %v8647_v16, %v8625_v24  ;;  %v8656_v56 = vadd.f32 %v8635_v63, %v8626_v2  ;;  %v8629_v29 = vmax.f32 %v8617_v1, %v8621_v3 }
 0x87b   :  { %v8662_v61 = vmax.f32 %v8654_v43, 0.0  ;;  %v8661_v28 = vmax.f32 %v8653_v55, 0.0  ;;  %v8658_v52 = vadd.f32 %v8643_v6, %v8628_v14  ;;  %v8657_v7 = vadd.f32 %v8639_v8, %v8627_v26 }
 0x87c   :  { %v8663_v35 = vmax.f32 %v8655_v44, 0.0  ;;  %v8664_v59 = vmax.f32 %v8656_v56, 0.0  ;;  %v8659_v4 = vadd.f32 %v8647_v16, %v8629_v29 }
 0x87d   :  { %v9627_v23 = vpack.c.bf16 %v8661_v28, %v8660_v21  ;;  %v8666_v31 = vmax.f32 %v8658_v52, 0.0  ;;  %v8665_v20 = vmax.f32 %v8657_v7, 0.0 }
 0x87e   :  { %v9628_v42 = vpack.c.bf16 %v8663_v35, %v8662_v61  ;;  %v8667_v27 = vmax.f32 %v8659_v4, 0.0 }
 0x87f   :  { %8700 = vst [vmem:[%s13947_s5] sm:$0xff] %v9627_v23  ;;  %v9629_v5 = vpack.c.bf16 %v8665_v20, %v8664_v59 }
 0x880   :  { %8701 = vst [vmem:[%s13947_s5 + $0x8] sm:$0xff] %v9628_v42  ;;  %v9630_v36 = vpack.c.bf16 %v8667_v27, %v8666_v31 }
 0x881   :  { %8702 = vst [vmem:[%s13947_s5 + $0x10] sm:$0xff] %v9629_v5 }
 0x882   :  { %8703 = vst [vmem:[%s13947_s5 + $0x18] sm:$0xff] %v9630_v36 }
 0x883   :  { %8708 = vsyncpa [#allocation4], 1 }
 0x884   :  { %8709 = vsyncpa [#allocation6], 1 }
 0x885   :  { %8710 = vsyncpa [#allocation9], 1 }

</bundles_post_ra>
